<compile_context>
chip_gen: v6e
topology: v6e:2x2x1
jax: 0.10.0
libtpu: 0.0.40
codegen_flags: <defaults>
</compile_context>

<pallas_src>
import functools

import jax
import jax.numpy as jnp
from jax.experimental import pallas as pl
from jax.experimental.pallas import tpu as pltpu


def _round_up(n, m):
    return ((n + m - 1) // m) * m


def down_kernel(x_ref, w1_ref, s1_ref, t1_ref, w2_ref, s2_ref, t2_ref,
                o_ref, buf_ref, col_ref, *, H, W, Wf):
    """Fused (conv3x3 -> BN -> ReLU) x2 -> maxpool(2) for ONE sample.

    x_ref  : [Nin, Cin]        flat zero-padded input  (row = i*Wf + j of the padded image)
    w1_ref : [9*Cin, Cout]     conv1 weights, taps stacked along K ((ky,kx,cin)-major)
    s1_ref : [1, Cout]         folded BN1 scale   (gamma / sqrt(var+eps))
    t1_ref : [1, Cout]         folded BN1 shift   (beta + (bias-mean)*scale)
    w2_ref : [9*Cout, Cout]    conv2 weights, taps stacked along K
    s2_ref, t2_ref             folded BN2 scale / shift
    o_ref  : [Cout, Hh*Wh]     pooled output, channel-major (lane-dense, NCHW order)
    buf_ref: VMEM [N1p, Cout]  f32 staging scratch (conv2 padded image, then pool buffer)
    col_ref: VMEM [Nr, 9*max(Cin,Cout)]  im2col slab (compute dtype)
    """
    Cin = x_ref.shape[1]
    Cout = o_ref.shape[0]
    Hh, Wh = H // 2, W // 2
    Nr = H * Wf                       # conv rows computed per sample (junk cols included)
    M0 = Wf + 8                       # sublane-aligned offset of the staged conv1 image
    N1p = buf_ref.shape[0]
    f32 = jnp.float32

    # --- zero only the padding border of the staging scratch (every step) ----------
    buf_ref[0:M0, :] = jnp.zeros((M0, Cout), f32)
    buf_ref[M0 + Nr:N1p, :] = jnp.zeros((N1p - M0 - Nr, Cout), f32)

    # --- conv1: im2col slab in VMEM (taps stacked along K) + one fat MXU matmul ----
    for t in range(9):                                    # static 9-tap unroll
        ky, kx = t // 3, t % 3
        off = ky * Wf + kx                                # contiguous flat tap slice
        col_ref[:, t * Cin:(t + 1) * Cin] = (
            x_ref[off:off + Nr, :].astype(col_ref.dtype))
    acc1 = jnp.dot(col_ref[:, :9 * Cin], w1_ref[...],
                   preferred_element_type=f32)            # [Nr, Cout]
    y1 = jnp.maximum(acc1 * s1_ref[...] + t1_ref[...], 0.0)

    # Junk columns (w >= W of each flat image row) land exactly on conv2's padding
    # positions when staged below, so force them to zero.
    col_idx = jax.lax.broadcasted_iota(jnp.int32, (Nr, 1), 0) % Wf
    y1 = jnp.where(col_idx < W, y1, 0.0)

    # Stage conv1 output as conv2's padded image (sublane-aligned contiguous store).
    buf_ref[M0:M0 + Nr, :] = y1

    # --- conv2: same im2col trick, K = 9*Cout ---------------------------------------
    for t in range(9):
        ky, kx = t // 3, t % 3
        off = (M0 - Wf - 1) + ky * Wf + kx
        col_ref[:, t * Cout:(t + 1) * Cout] = (
            buf_ref[off:off + Nr, :].astype(col_ref.dtype))
    acc2 = jnp.dot(col_ref[:, :9 * Cout], w2_ref[...],
                   preferred_element_type=f32)            # [Nr, Cout]
    y2 = jnp.maximum(acc2 * s2_ref[...] + t2_ref[...], 0.0)

    # --- 2x2 / stride-2 max pool -----------------------------------------------------
    def shift_rows(v, k):           # result[r] = v[r + k]; wrapped tail rows are unused
        return jnp.concatenate([v[k:], v[:k]], axis=0)

    hmax = jnp.maximum(y2, shift_rows(y2, 1))             # pair (w, w+1)
    z = jnp.maximum(hmax, shift_rows(hmax, Wf))           # pair (h, h+1)
    # z[h*Wf + w] = max of the 2x2 window anchored at (h, w)

    buf_ref[0:Nr, :] = z                                  # reuse staging scratch
    rows = []
    for ho in range(Hh):                                  # stride-2 extraction over w
        start = 2 * ho * Wf
        rows.append(buf_ref[pl.ds(start, Wh, stride=2), :])
    pooled = jnp.concatenate(rows, axis=0)                # [Hh*Wh, Cout]

    # Channel-major store: lane dim = Hh*Wh (dense) and already NCHW order.
    o_ref[...] = jnp.transpose(pooled).astype(o_ref.dtype)


def down_forward(x, params, *, eps=1e-5, compute_dtype=jnp.float32):
    """x: [B, Cin, H, W] (NCHW).  Returns [B, Cout, H//2, W//2]."""
    (w1, b1, g1, be1, m1, v1, w2, b2, g2, be2, m2, v2) = params
    B, Cin, H, W = x.shape
    Cout = w1.shape[0]
    assert H % 2 == 0 and W % 2 == 0, "MaxPool2d(2) kernel assumes even H, W"
    Hh, Wh = H // 2, W // 2

    Wf = _round_up(W + 2, 8)          # flat image-row width (1 left + >=1 right zero col)
    Nr = H * Wf                       # conv rows computed per sample
    Nin = (H + 2) * Wf + 8            # flat padded-input rows (+8 keeps the last taps in-bounds)
    N1p = Nr + 2 * Wf + 16            # staging scratch rows (multiple of 8)

    # Layout glue (cheap XLA): NCHW -> NHWC, pad to the flat [row, channel] layout.
    x_nhwc = jnp.transpose(x, (0, 2, 3, 1))
    x_pad = jnp.pad(x_nhwc, ((0, 0), (1, 1), (1, Wf - W - 1), (0, 0)))
    x_flat = x_pad.reshape(B, (H + 2) * Wf, Cin)
    x_flat = jnp.pad(x_flat, ((0, 0), (0, Nin - (H + 2) * Wf), (0, 0)))
    x_flat = x_flat.astype(compute_dtype)

    # PyTorch conv weights [Cout, C, 3, 3] -> [(ky,kx,c), Cout] (matches im2col order).
    w1_k = jnp.transpose(w1, (2, 3, 1, 0)).reshape(9 * Cin, Cout).astype(compute_dtype)
    w2_k = jnp.transpose(w2, (2, 3, 1, 0)).reshape(9 * Cout, Cout).astype(compute_dtype)

    # Fold conv bias + eval-mode BatchNorm into per-channel scale/shift (f32 epilogue).
    inv1 = g1 / jnp.sqrt(v1 + eps)
    inv2 = g2 / jnp.sqrt(v2 + eps)
    s1 = inv1.reshape(1, Cout).astype(jnp.float32)
    t1 = (be1 + (b1 - m1) * inv1).reshape(1, Cout).astype(jnp.float32)
    s2 = inv2.reshape(1, Cout).astype(jnp.float32)
    t2 = (be2 + (b2 - m2) * inv2).reshape(1, Cout).astype(jnp.float32)

    kernel = functools.partial(down_kernel, H=H, W=W, Wf=Wf)

    out = pl.pallas_call(
        kernel,
        out_shape=jax.ShapeDtypeStruct((B, Cout, Hh * Wh), x.dtype),
        grid=(B,),
        in_specs=[
            pl.BlockSpec((None, Nin, Cin), lambda b: (b, 0, 0)),     # per-sample input
            pl.BlockSpec((9 * Cin, Cout), lambda b: (0, 0)),         # VMEM-resident weights
            pl.BlockSpec((1, Cout), lambda b: (0, 0)),
            pl.BlockSpec((1, Cout), lambda b: (0, 0)),
            pl.BlockSpec((9 * Cout, Cout), lambda b: (0, 0)),
            pl.BlockSpec((1, Cout), lambda b: (0, 0)),
            pl.BlockSpec((1, Cout), lambda b: (0, 0)),
        ],
        out_specs=pl.BlockSpec((None, Cout, Hh * Wh), lambda b: (b, 0, 0)),
        scratch_shapes=[
            pltpu.VMEM((N1p, Cout), jnp.float32),                    # staging / pool scratch
            pltpu.VMEM((Nr, 9 * max(Cin, Cout)), compute_dtype),     # im2col slab
        ],
        compiler_params=pltpu.CompilerParams(
            dimension_semantics=("parallel",),      # batch -> both TensorCores on v7x
            # VMEM use here is ~150 KiB + tiny blocks; the default scoped limit is ample.
        ),
    )(x_flat, w1_k, s1, t1, w2_k, s2, t2)

    # [B, Cout, Hh*Wh] is already NCHW order -- just reshape.
    return out.reshape(B, Cout, Hh, Wh)


def reference_down(x, w1, b1, g1, be1, m1, v1, w2, b2, g2, be2, m2, v2, eps=1e-5):
    """Plain-XLA reference: conv -> bias -> BN(eval) -> ReLU, twice, then 2x2 maxpool."""
    def conv_bn_relu(h, w, b, g, be, m, v):
        y = jax.lax.conv_general_dilated(
            h, w, window_strides=(1, 1), padding=((1, 1), (1, 1)),
            dimension_numbers=("NCHW", "OIHW", "NCHW"),
            precision=jax.lax.Precision.HIGHEST)
        y = y + b[None, :, None, None]
        y = (y - m[None, :, None, None]) * (g / jnp.sqrt(v + eps))[None, :, None, None] \
            + be[None, :, None, None]
        return jnp.maximum(y, 0.0)

    y = conv_bn_relu(x, w1, b1, g1, be1, m1, v1)
    y = conv_bn_relu(y, w2, b2, g2, be2, m2, v2)
    return jax.lax.reduce_window(y, -jnp.inf, jax.lax.max,
                                 (1, 1, 2, 2), (1, 1, 2, 2), "VALID")


if __name__ == "__main__":
    # Small shapes: batch=2, in_channels=4, out_channels=8, spatial 16x16.
    B, C_IN, C_OUT, H, W = 2, 4, 8, 16, 16

    key = jax.random.PRNGKey(0)
    ks = jax.random.split(key, 13)

    x = jax.random.normal(ks[0], (B, C_IN, H, W), jnp.float32)

    w1 = 0.25 * jax.random.normal(ks[1], (C_OUT, C_IN, 3, 3), jnp.float32)
    b1 = 0.10 * jax.random.normal(ks[2], (C_OUT,), jnp.float32)
    g1 = 1.0 + 0.1 * jax.random.normal(ks[3], (C_OUT,), jnp.float32)
    be1 = 0.10 * jax.random.normal(ks[4], (C_OUT,), jnp.float32)
    m1 = 0.10 * jax.random.normal(ks[5], (C_OUT,), jnp.float32)
    v1 = jax.random.uniform(ks[6], (C_OUT,), jnp.float32, 0.5, 1.5)

    w2 = 0.25 * jax.random.normal(ks[7], (C_OUT, C_OUT, 3, 3), jnp.float32)
    b2 = 0.10 * jax.random.normal(ks[8], (C_OUT,), jnp.float32)
    g2 = 1.0 + 0.1 * jax.random.normal(ks[9], (C_OUT,), jnp.float32)
    be2 = 0.10 * jax.random.normal(ks[10], (C_OUT,), jnp.float32)
    m2 = 0.10 * jax.random.normal(ks[11], (C_OUT,), jnp.float32)
    v2 = jax.random.uniform(ks[12], (C_OUT,), jnp.float32, 0.5, 1.5)

    params = (w1, b1, g1, be1, m1, v1, w2, b2, g2, be2, m2, v2)

    out = jax.jit(down_forward)(x, params)
    out = jax.block_until_ready(out)

    ref = reference_down(x, *params)
    assert out.shape == (B, C_OUT, H // 2, W // 2), out.shape
    # Tolerance allows for the MXU's multi-pass f32 matmul rounding; layout or
    # tap-offset bugs would produce O(0.1..1) errors and still be caught.
    assert jnp.allclose(out, ref, atol=1e-2, rtol=1e-2), \
        f"mismatch vs reference: max abs err {jnp.max(jnp.abs(out - ref))}"

    print("KERNEL_OK")
</pallas_src>

<mosaic_0001>
module attributes {stable_mosaic.version = 11 : i64} {
  func.func @down_kernel(%arg0: i32, %arg1: memref<1x440x4xf32, #tpu.memory_space<vmem>>, %arg2: memref<36x8xf32, #tpu.memory_space<vmem>>, %arg3: memref<1x8xf32, #tpu.memory_space<vmem>>, %arg4: memref<1x8xf32, #tpu.memory_space<vmem>>, %arg5: memref<72x8xf32, #tpu.memory_space<vmem>>, %arg6: memref<1x8xf32, #tpu.memory_space<vmem>>, %arg7: memref<1x8xf32, #tpu.memory_space<vmem>>, %arg8: memref<1x8x64xf32, #tpu.memory_space<vmem>>, %arg9: memref<448x8xf32, #tpu.memory_space<vmem>>, %arg10: memref<384x72xf32, #tpu.memory_space<vmem>>) attributes {dimension_semantics = [#tpu.dimension_semantics<parallel>], iteration_bounds = array<i64: 2>, scalar_prefetch = 0 : i64, scratch_operands = 2 : i64, tpu.core_type = #tpu.core_type<tc>, window_params = [{transform_indices = @transform_0, window_bounds = array<i64: 1, 440, 4>}, {pipeline_mode = #tpu.pipeline_mode<synchronous>, transform_indices = @transform_1, window_bounds = array<i64: 36, 8>}, {pipeline_mode = #tpu.pipeline_mode<synchronous>, transform_indices = @transform_2, window_bounds = array<i64: 1, 8>}, {pipeline_mode = #tpu.pipeline_mode<synchronous>, transform_indices = @transform_3, window_bounds = array<i64: 1, 8>}, {pipeline_mode = #tpu.pipeline_mode<synchronous>, transform_indices = @transform_4, window_bounds = array<i64: 72, 8>}, {pipeline_mode = #tpu.pipeline_mode<synchronous>, transform_indices = @transform_5, window_bounds = array<i64: 1, 8>}, {pipeline_mode = #tpu.pipeline_mode<synchronous>, transform_indices = @transform_6, window_bounds = array<i64: 1, 8>}, {transform_indices = @transform_7, window_bounds = array<i64: 1, 8, 64>}]} {
    %cst = arith.constant 0.000000e+00 : f32
    %0 = vector.broadcast %cst : f32 to vector<32x8xf32>
    %c0 = arith.constant 0 : index
    %c0_0 = arith.constant 0 : index
    %1 = vector.load %arg9[%c0, %c0_0] : memref<448x8xf32, #tpu.memory_space<vmem>>, vector<32x8xf32>
    tpu.vector_store %arg9[%c0, %c0_0], %0 {strides = array<i32>} : memref<448x8xf32, #tpu.memory_space<vmem>>, vector<32x8xf32>,
    %cst_1 = arith.constant 0.000000e+00 : f32
    %2 = vector.broadcast %cst_1 : f32 to vector<32x8xf32>
    %c416 = arith.constant 416 : index
    %c0_2 = arith.constant 0 : index
    %3 = vector.load %arg9[%c416, %c0_2] : memref<448x8xf32, #tpu.memory_space<vmem>>, vector<32x8xf32>
    tpu.vector_store %arg9[%c416, %c0_2], %2 {strides = array<i32>} : memref<448x8xf32, #tpu.memory_space<vmem>>, vector<32x8xf32>,
    %c0_3 = arith.constant 0 : index
    %c0_4 = arith.constant 0 : index
    %c0_5 = arith.constant 0 : index
    %4 = vector.load %arg1[%c0_3, %c0_4, %c0_5] : memref<1x440x4xf32, #tpu.memory_space<vmem>>, vector<1x384x4xf32>
    %5 = vector.shape_cast %4 : vector<1x384x4xf32> to vector<384x4xf32>
    %c0_6 = arith.constant 0 : index
    %c0_7 = arith.constant 0 : index
    %6 = vector.load %arg10[%c0_6, %c0_7] : memref<384x72xf32, #tpu.memory_space<vmem>>, vector<384x4xf32>
    tpu.vector_store %arg10[%c0_6, %c0_7], %5 {strides = array<i32>} : memref<384x72xf32, #tpu.memory_space<vmem>>, vector<384x4xf32>,
    %c0_8 = arith.constant 0 : index
    %c1 = arith.constant 1 : index
    %c0_9 = arith.constant 0 : index
    %7 = vector.load %arg1[%c0_8, %c1, %c0_9] : memref<1x440x4xf32, #tpu.memory_space<vmem>>, vector<1x384x4xf32>
    %8 = vector.shape_cast %7 : vector<1x384x4xf32> to vector<384x4xf32>
    %c0_10 = arith.constant 0 : index
    %c4 = arith.constant 4 : index
    %9 = vector.load %arg10[%c0_10, %c4] : memref<384x72xf32, #tpu.memory_space<vmem>>, vector<384x4xf32>
    tpu.vector_store %arg10[%c0_10, %c4], %8 {strides = array<i32>} : memref<384x72xf32, #tpu.memory_space<vmem>>, vector<384x4xf32>,
    %c0_11 = arith.constant 0 : index
    %c2 = arith.constant 2 : index
    %c0_12 = arith.constant 0 : index
    %10 = vector.load %arg1[%c0_11, %c2, %c0_12] : memref<1x440x4xf32, #tpu.memory_space<vmem>>, vector<1x384x4xf32>
    %11 = vector.shape_cast %10 : vector<1x384x4xf32> to vector<384x4xf32>
    %c0_13 = arith.constant 0 : index
    %c8 = arith.constant 8 : index
    %12 = vector.load %arg10[%c0_13, %c8] : memref<384x72xf32, #tpu.memory_space<vmem>>, vector<384x4xf32>
    tpu.vector_store %arg10[%c0_13, %c8], %11 {strides = array<i32>} : memref<384x72xf32, #tpu.memory_space<vmem>>, vector<384x4xf32>,
    %c0_14 = arith.constant 0 : index
    %c24 = arith.constant 24 : index
    %c0_15 = arith.constant 0 : index
    %13 = vector.load %arg1[%c0_14, %c24, %c0_15] : memref<1x440x4xf32, #tpu.memory_space<vmem>>, vector<1x384x4xf32>
    %14 = vector.shape_cast %13 : vector<1x384x4xf32> to vector<384x4xf32>
    %c0_16 = arith.constant 0 : index
    %c12 = arith.constant 12 : index
    %15 = vector.load %arg10[%c0_16, %c12] : memref<384x72xf32, #tpu.memory_space<vmem>>, vector<384x4xf32>
    tpu.vector_store %arg10[%c0_16, %c12], %14 {strides = array<i32>} : memref<384x72xf32, #tpu.memory_space<vmem>>, vector<384x4xf32>,
    %c0_17 = arith.constant 0 : index
    %c25 = arith.constant 25 : index
    %c0_18 = arith.constant 0 : index
    %16 = vector.load %arg1[%c0_17, %c25, %c0_18] : memref<1x440x4xf32, #tpu.memory_space<vmem>>, vector<1x384x4xf32>
    %17 = vector.shape_cast %16 : vector<1x384x4xf32> to vector<384x4xf32>
    %c0_19 = arith.constant 0 : index
    %c16 = arith.constant 16 : index
    %18 = vector.load %arg10[%c0_19, %c16] : memref<384x72xf32, #tpu.memory_space<vmem>>, vector<384x4xf32>
    tpu.vector_store %arg10[%c0_19, %c16], %17 {strides = array<i32>} : memref<384x72xf32, #tpu.memory_space<vmem>>, vector<384x4xf32>,
    %c0_20 = arith.constant 0 : index
    %c26 = arith.constant 26 : index
    %c0_21 = arith.constant 0 : index
    %19 = vector.load %arg1[%c0_20, %c26, %c0_21] : memref<1x440x4xf32, #tpu.memory_space<vmem>>, vector<1x384x4xf32>
    %20 = vector.shape_cast %19 : vector<1x384x4xf32> to vector<384x4xf32>
    %c0_22 = arith.constant 0 : index
    %c20 = arith.constant 20 : index
    %21 = vector.load %arg10[%c0_22, %c20] : memref<384x72xf32, #tpu.memory_space<vmem>>, vector<384x4xf32>
    tpu.vector_store %arg10[%c0_22, %c20], %20 {strides = array<i32>} : memref<384x72xf32, #tpu.memory_space<vmem>>, vector<384x4xf32>,
    %c0_23 = arith.constant 0 : index
    %c48 = arith.constant 48 : index
    %c0_24 = arith.constant 0 : index
    %22 = vector.load %arg1[%c0_23, %c48, %c0_24] : memref<1x440x4xf32, #tpu.memory_space<vmem>>, vector<1x384x4xf32>
    %23 = vector.shape_cast %22 : vector<1x384x4xf32> to vector<384x4xf32>
    %c0_25 = arith.constant 0 : index
    %c24_26 = arith.constant 24 : index
    %24 = vector.load %arg10[%c0_25, %c24_26] : memref<384x72xf32, #tpu.memory_space<vmem>>, vector<384x4xf32>
    tpu.vector_store %arg10[%c0_25, %c24_26], %23 {strides = array<i32>} : memref<384x72xf32, #tpu.memory_space<vmem>>, vector<384x4xf32>,
    %c0_27 = arith.constant 0 : index
    %c49 = arith.constant 49 : index
    %c0_28 = arith.constant 0 : index
    %25 = vector.load %arg1[%c0_27, %c49, %c0_28] : memref<1x440x4xf32, #tpu.memory_space<vmem>>, vector<1x384x4xf32>
    %26 = vector.shape_cast %25 : vector<1x384x4xf32> to vector<384x4xf32>
    %c0_29 = arith.constant 0 : index
    %c28 = arith.constant 28 : index
    %27 = vector.load %arg10[%c0_29, %c28] : memref<384x72xf32, #tpu.memory_space<vmem>>, vector<384x4xf32>
    tpu.vector_store %arg10[%c0_29, %c28], %26 {strides = array<i32>} : memref<384x72xf32, #tpu.memory_space<vmem>>, vector<384x4xf32>,
    %c0_30 = arith.constant 0 : index
    %c50 = arith.constant 50 : index
    %c0_31 = arith.constant 0 : index
    %28 = vector.load %arg1[%c0_30, %c50, %c0_31] : memref<1x440x4xf32, #tpu.memory_space<vmem>>, vector<1x384x4xf32>
    %29 = vector.shape_cast %28 : vector<1x384x4xf32> to vector<384x4xf32>
    %c0_32 = arith.constant 0 : index
    %c32 = arith.constant 32 : index
    %30 = vector.load %arg10[%c0_32, %c32] : memref<384x72xf32, #tpu.memory_space<vmem>>, vector<384x4xf32>
    tpu.vector_store %arg10[%c0_32, %c32], %29 {strides = array<i32>} : memref<384x72xf32, #tpu.memory_space<vmem>>, vector<384x4xf32>,
    %c0_33 = arith.constant 0 : index
    %c0_34 = arith.constant 0 : index
    %31 = vector.load %arg10[%c0_33, %c0_34] : memref<384x72xf32, #tpu.memory_space<vmem>>, vector<384x36xf32>
    %c0_35 = arith.constant 0 : index
    %c0_36 = arith.constant 0 : index
    %32 = vector.load %arg2[%c0_35, %c0_36] : memref<36x8xf32, #tpu.memory_space<vmem>>, vector<36x8xf32>
    %cst_37 = arith.constant dense<0.000000e+00> : vector<384x8xf32>
    %33 = tpu.matmul %31, %32, %cst_37 {dimension_numbers = #tpu.dot_dimension_numbers<[1], [0], [0], [1], [0, 0, 1, 1], [], []>} : vector<384x36xf32>, vector<36x8xf32>, vector<384x8xf32> -> vector<384x8xf32>
    %c0_38 = arith.constant 0 : index
    %c0_39 = arith.constant 0 : index
    %34 = vector.load %arg3[%c0_38, %c0_39] : memref<1x8xf32, #tpu.memory_space<vmem>>, vector<1x8xf32>
    %35 = vector.broadcast %34 : vector<1x8xf32> to vector<384x8xf32>
    %36 = arith.mulf %33, %35 : vector<384x8xf32>
    %c0_40 = arith.constant 0 : index
    %c0_41 = arith.constant 0 : index
    %37 = vector.load %arg4[%c0_40, %c0_41] : memref<1x8xf32, #tpu.memory_space<vmem>>, vector<1x8xf32>
    %38 = vector.broadcast %37 : vector<1x8xf32> to vector<384x8xf32>
    %39 = arith.addf %36, %38 : vector<384x8xf32>
    %cst_42 = arith.constant 0.000000e+00 : f32
    %40 = vector.broadcast %cst_42 : f32 to vector<384x8xf32>
    %41 = arith.maximumf %39, %40 : vector<384x8xf32>
    %42 = tpu.iota {dimensions = array<i32: 0>} : vector<384x1xi32>
    %c24_i32 = arith.constant 24 : i32
    %c0_i32 = arith.constant 0 : i32
    %43 = arith.cmpi eq, %c24_i32, %c0_i32 : i32
    %c1_i32 = arith.constant 1 : i32
    %44 = arith.select %43, %c1_i32, %c24_i32 : i32
    %45 = vector.broadcast %44 : i32 to vector<384x1xi32>
    %46 = arith.remsi %42, %45 : vector<384x1xi32>
    %c0_i32_43 = arith.constant 0 : i32
    %47 = vector.broadcast %c0_i32_43 : i32 to vector<384x1xi32>
    %48 = arith.cmpi ne, %46, %47 : vector<384x1xi32>
    %c0_i32_44 = arith.constant 0 : i32
    %49 = vector.broadcast %c0_i32_44 : i32 to vector<384x1xi32>
    %50 = arith.cmpi slt, %46, %49 : vector<384x1xi32>
    %c0_i32_45 = arith.constant 0 : i32
    %51 = arith.cmpi slt, %44, %c0_i32_45 : i32
    %52 = vector.broadcast %51 : i1 to vector<384x1xi1>
    %53 = vector.broadcast %52 : vector<384x1xi1> to vector<384x1xi1>
    %54 = arith.xori %50, %53 : vector<384x1xi1>
    %55 = arith.andi %54, %48 : vector<384x1xi1>
    %56 = vector.broadcast %44 : i32 to vector<384x1xi32>
    %57 = arith.addi %46, %56 : vector<384x1xi32>
    %58 = arith.select %55, %57, %46 : vector<384x1xi1>, vector<384x1xi32>
    %c16_i32 = arith.constant 16 : i32
    %59 = vector.broadcast %c16_i32 : i32 to vector<384x1xi32>
    %60 = arith.cmpi slt, %58, %59 : vector<384x1xi32>
    %cst_46 = arith.constant 0.000000e+00 : f32
    %61 = vector.shape_cast %60 : vector<384x1xi1> to vector<384x1xi1>
    %62 = vector.broadcast %61 : vector<384x1xi1> to vector<384x8xi1>
    %63 = vector.broadcast %cst_46 : f32 to vector<384x8xf32>
    %64 = arith.select %62, %41, %63 : vector<384x8xi1>, vector<384x8xf32>
    %c32_47 = arith.constant 32 : index
    %c0_48 = arith.constant 0 : index
    %65 = vector.load %arg9[%c32_47, %c0_48] : memref<448x8xf32, #tpu.memory_space<vmem>>, vector<384x8xf32>
    tpu.vector_store %arg9[%c32_47, %c0_48], %64 {strides = array<i32>} : memref<448x8xf32, #tpu.memory_space<vmem>>, vector<384x8xf32>,
    %c7 = arith.constant 7 : index
    %c0_49 = arith.constant 0 : index
    %66 = vector.load %arg9[%c7, %c0_49] : memref<448x8xf32, #tpu.memory_space<vmem>>, vector<384x8xf32>
    %c0_50 = arith.constant 0 : index
    %c0_51 = arith.constant 0 : index
    %67 = vector.load %arg10[%c0_50, %c0_51] : memref<384x72xf32, #tpu.memory_space<vmem>>, vector<384x8xf32>
    tpu.vector_store %arg10[%c0_50, %c0_51], %66 {strides = array<i32>} : memref<384x72xf32, #tpu.memory_space<vmem>>, vector<384x8xf32>,
    %c8_52 = arith.constant 8 : index
    %c0_53 = arith.constant 0 : index
    %68 = vector.load %arg9[%c8_52, %c0_53] : memref<448x8xf32, #tpu.memory_space<vmem>>, vector<384x8xf32>
    %c0_54 = arith.constant 0 : index
    %c8_55 = arith.constant 8 : index
    %69 = vector.load %arg10[%c0_54, %c8_55] : memref<384x72xf32, #tpu.memory_space<vmem>>, vector<384x8xf32>
    tpu.vector_store %arg10[%c0_54, %c8_55], %68 {strides = array<i32>} : memref<384x72xf32, #tpu.memory_space<vmem>>, vector<384x8xf32>,
    %c9 = arith.constant 9 : index
    %c0_56 = arith.constant 0 : index
    %70 = vector.load %arg9[%c9, %c0_56] : memref<448x8xf32, #tpu.memory_space<vmem>>, vector<384x8xf32>
    %c0_57 = arith.constant 0 : index
    %c16_58 = arith.constant 16 : index
    %71 = vector.load %arg10[%c0_57, %c16_58] : memref<384x72xf32, #tpu.memory_space<vmem>>, vector<384x8xf32>
    tpu.vector_store %arg10[%c0_57, %c16_58], %70 {strides = array<i32>} : memref<384x72xf32, #tpu.memory_space<vmem>>, vector<384x8xf32>,
    %c31 = arith.constant 31 : index
    %c0_59 = arith.constant 0 : index
    %72 = vector.load %arg9[%c31, %c0_59] : memref<448x8xf32, #tpu.memory_space<vmem>>, vector<384x8xf32>
    %c0_60 = arith.constant 0 : index
    %c24_61 = arith.constant 24 : index
    %73 = vector.load %arg10[%c0_60, %c24_61] : memref<384x72xf32, #tpu.memory_space<vmem>>, vector<384x8xf32>
    tpu.vector_store %arg10[%c0_60, %c24_61], %72 {strides = array<i32>} : memref<384x72xf32, #tpu.memory_space<vmem>>, vector<384x8xf32>,
    %c32_62 = arith.constant 32 : index
    %c0_63 = arith.constant 0 : index
    %74 = vector.load %arg9[%c32_62, %c0_63] : memref<448x8xf32, #tpu.memory_space<vmem>>, vector<384x8xf32>
    %c0_64 = arith.constant 0 : index
    %c32_65 = arith.constant 32 : index
    %75 = vector.load %arg10[%c0_64, %c32_65] : memref<384x72xf32, #tpu.memory_space<vmem>>, vector<384x8xf32>
    tpu.vector_store %arg10[%c0_64, %c32_65], %74 {strides = array<i32>} : memref<384x72xf32, #tpu.memory_space<vmem>>, vector<384x8xf32>,
    %c33 = arith.constant 33 : index
    %c0_66 = arith.constant 0 : index
    %76 = vector.load %arg9[%c33, %c0_66] : memref<448x8xf32, #tpu.memory_space<vmem>>, vector<384x8xf32>
    %c0_67 = arith.constant 0 : index
    %c40 = arith.constant 40 : index
    %77 = vector.load %arg10[%c0_67, %c40] : memref<384x72xf32, #tpu.memory_space<vmem>>, vector<384x8xf32>
    tpu.vector_store %arg10[%c0_67, %c40], %76 {strides = array<i32>} : memref<384x72xf32, #tpu.memory_space<vmem>>, vector<384x8xf32>,
    %c55 = arith.constant 55 : index
    %c0_68 = arith.constant 0 : index
    %78 = vector.load %arg9[%c55, %c0_68] : memref<448x8xf32, #tpu.memory_space<vmem>>, vector<384x8xf32>
    %c0_69 = arith.constant 0 : index
    %c48_70 = arith.constant 48 : index
    %79 = vector.load %arg10[%c0_69, %c48_70] : memref<384x72xf32, #tpu.memory_space<vmem>>, vector<384x8xf32>
    tpu.vector_store %arg10[%c0_69, %c48_70], %78 {strides = array<i32>} : memref<384x72xf32, #tpu.memory_space<vmem>>, vector<384x8xf32>,
    %c56 = arith.constant 56 : index
    %c0_71 = arith.constant 0 : index
    %80 = vector.load %arg9[%c56, %c0_71] : memref<448x8xf32, #tpu.memory_space<vmem>>, vector<384x8xf32>
    %c0_72 = arith.constant 0 : index
    %c56_73 = arith.constant 56 : index
    %81 = vector.load %arg10[%c0_72, %c56_73] : memref<384x72xf32, #tpu.memory_space<vmem>>, vector<384x8xf32>
    tpu.vector_store %arg10[%c0_72, %c56_73], %80 {strides = array<i32>} : memref<384x72xf32, #tpu.memory_space<vmem>>, vector<384x8xf32>,
    %c57 = arith.constant 57 : index
    %c0_74 = arith.constant 0 : index
    %82 = vector.load %arg9[%c57, %c0_74] : memref<448x8xf32, #tpu.memory_space<vmem>>, vector<384x8xf32>
    %c0_75 = arith.constant 0 : index
    %c64 = arith.constant 64 : index
    %83 = vector.load %arg10[%c0_75, %c64] : memref<384x72xf32, #tpu.memory_space<vmem>>, vector<384x8xf32>
    tpu.vector_store %arg10[%c0_75, %c64], %82 {strides = array<i32>} : memref<384x72xf32, #tpu.memory_space<vmem>>, vector<384x8xf32>,
    %c0_76 = arith.constant 0 : index
    %c0_77 = arith.constant 0 : index
    %84 = vector.load %arg10[%c0_76, %c0_77] : memref<384x72xf32, #tpu.memory_space<vmem>>, vector<384x72xf32>
    %c0_78 = arith.constant 0 : index
    %c0_79 = arith.constant 0 : index
    %85 = vector.load %arg5[%c0_78, %c0_79] : memref<72x8xf32, #tpu.memory_space<vmem>>, vector<72x8xf32>
    %cst_80 = arith.constant dense<0.000000e+00> : vector<384x8xf32>
    %86 = tpu.matmul %84, %85, %cst_80 {dimension_numbers = #tpu.dot_dimension_numbers<[1], [0], [0], [1], [0, 0, 1, 1], [], []>} : vector<384x72xf32>, vector<72x8xf32>, vector<384x8xf32> -> vector<384x8xf32>
    %c0_81 = arith.constant 0 : index
    %c0_82 = arith.constant 0 : index
    %87 = vector.load %arg6[%c0_81, %c0_82] : memref<1x8xf32, #tpu.memory_space<vmem>>, vector<1x8xf32>
    %88 = vector.broadcast %87 : vector<1x8xf32> to vector<384x8xf32>
    %89 = arith.mulf %86, %88 : vector<384x8xf32>
    %c0_83 = arith.constant 0 : index
    %c0_84 = arith.constant 0 : index
    %90 = vector.load %arg7[%c0_83, %c0_84] : memref<1x8xf32, #tpu.memory_space<vmem>>, vector<1x8xf32>
    %91 = vector.broadcast %90 : vector<1x8xf32> to vector<384x8xf32>
    %92 = arith.addf %89, %91 : vector<384x8xf32>
    %cst_85 = arith.constant 0.000000e+00 : f32
    %93 = vector.broadcast %cst_85 : f32 to vector<384x8xf32>
    %94 = arith.maximumf %92, %93 : vector<384x8xf32>
    %95 = vector.extract_strided_slice %94 {offsets = [1, 0], sizes = [383, 8], strides = [1, 1]} : vector<384x8xf32> to vector<383x8xf32>
    %96 = vector.extract_strided_slice %94 {offsets = [0, 0], sizes = [1, 8], strides = [1, 1]} : vector<384x8xf32> to vector<1x8xf32>
    %97 = tpu.concatenate %95, %96 in 0 : vector<383x8xf32>, vector<1x8xf32> -> vector<384x8xf32>
    %98 = arith.maximumf %94, %97 : vector<384x8xf32>
    %99 = vector.extract_strided_slice %98 {offsets = [24, 0], sizes = [360, 8], strides = [1, 1]} : vector<384x8xf32> to vector<360x8xf32>
    %100 = vector.extract_strided_slice %98 {offsets = [0, 0], sizes = [24, 8], strides = [1, 1]} : vector<384x8xf32> to vector<24x8xf32>
    %101 = tpu.concatenate %99, %100 in 0 : vector<360x8xf32>, vector<24x8xf32> -> vector<384x8xf32>
    %102 = arith.maximumf %98, %101 : vector<384x8xf32>
    %c0_86 = arith.constant 0 : index
    %c0_87 = arith.constant 0 : index
    %103 = vector.load %arg9[%c0_86, %c0_87] : memref<448x8xf32, #tpu.memory_space<vmem>>, vector<384x8xf32>
    tpu.vector_store %arg9[%c0_86, %c0_87], %102 {strides = array<i32>} : memref<448x8xf32, #tpu.memory_space<vmem>>, vector<384x8xf32>,
    %c0_88 = arith.constant 0 : index
    %c0_89 = arith.constant 0 : index
    %104 = tpu.strided_load %arg9[%c0_88, %c0_89] {strides = array<i32: 2, 1>} : memref<448x8xf32, #tpu.memory_space<vmem>>, vector<8x8xf32>
    %c48_90 = arith.constant 48 : index
    %c0_91 = arith.constant 0 : index
    %105 = tpu.strided_load %arg9[%c48_90, %c0_91] {strides = array<i32: 2, 1>} : memref<448x8xf32, #tpu.memory_space<vmem>>, vector<8x8xf32>
    %c96 = arith.constant 96 : index
    %c0_92 = arith.constant 0 : index
    %106 = tpu.strided_load %arg9[%c96, %c0_92] {strides = array<i32: 2, 1>} : memref<448x8xf32, #tpu.memory_space<vmem>>, vector<8x8xf32>
    %c144 = arith.constant 144 : index
    %c0_93 = arith.constant 0 : index
    %107 = tpu.strided_load %arg9[%c144, %c0_93] {strides = array<i32: 2, 1>} : memref<448x8xf32, #tpu.memory_space<vmem>>, vector<8x8xf32>
    %c192 = arith.constant 192 : index
    %c0_94 = arith.constant 0 : index
    %108 = tpu.strided_load %arg9[%c192, %c0_94] {strides = array<i32: 2, 1>} : memref<448x8xf32, #tpu.memory_space<vmem>>, vector<8x8xf32>
    %c240 = arith.constant 240 : index
    %c0_95 = arith.constant 0 : index
    %109 = tpu.strided_load %arg9[%c240, %c0_95] {strides = array<i32: 2, 1>} : memref<448x8xf32, #tpu.memory_space<vmem>>, vector<8x8xf32>
    %c288 = arith.constant 288 : index
    %c0_96 = arith.constant 0 : index
    %110 = tpu.strided_load %arg9[%c288, %c0_96] {strides = array<i32: 2, 1>} : memref<448x8xf32, #tpu.memory_space<vmem>>, vector<8x8xf32>
    %c336 = arith.constant 336 : index
    %c0_97 = arith.constant 0 : index
    %111 = tpu.strided_load %arg9[%c336, %c0_97] {strides = array<i32: 2, 1>} : memref<448x8xf32, #tpu.memory_space<vmem>>, vector<8x8xf32>
    %112 = tpu.concatenate %104, %105, %106, %107, %108, %109, %110, %111 in 0 : vector<8x8xf32>, vector<8x8xf32>, vector<8x8xf32>, vector<8x8xf32>, vector<8x8xf32>, vector<8x8xf32>, vector<8x8xf32>, vector<8x8xf32> -> vector<64x8xf32>
    %113 = tpu.transpose %112, [1, 0] : vector<64x8xf32> -> vector<8x64xf32>
    %c0_98 = arith.constant 0 : index
    %c0_99 = arith.constant 0 : index
    %c0_100 = arith.constant 0 : index
    %114 = vector.load %arg8[%c0_98, %c0_99, %c0_100] : memref<1x8x64xf32, #tpu.memory_space<vmem>>, vector<1x8x64xf32>
    %115 = vector.shape_cast %114 : vector<1x8x64xf32> to vector<8x64xf32>
    %116 = vector.shape_cast %113 : vector<8x64xf32> to vector<1x8x64xf32>
    tpu.vector_store %arg8[%c0_98, %c0_99, %c0_100], %116 {strides = array<i32>} : memref<1x8x64xf32, #tpu.memory_space<vmem>>, vector<1x8x64xf32>,
    return
  }
  func.func @transform_0(%arg0: i32) -> (i32, i32, i32) {
    %c0_i32 = arith.constant 0 : i32
    %c0_i32_0 = arith.constant 0 : i32
    %c0_i32_1 = arith.constant 0 : i32
    return %arg0, %c0_i32, %c0_i32_0 : i32, i32, i32
  }
  func.func @transform_1(%arg0: i32) -> (i32, i32) {
    %c0_i32 = arith.constant 0 : i32
    %c0_i32_0 = arith.constant 0 : i32
    %c0_i32_1 = arith.constant 0 : i32
    return %c0_i32, %c0_i32_0 : i32, i32
  }
  func.func @transform_2(%arg0: i32) -> (i32, i32) {
    %c0_i32 = arith.constant 0 : i32
    %c0_i32_0 = arith.constant 0 : i32
    %c0_i32_1 = arith.constant 0 : i32
    return %c0_i32, %c0_i32_0 : i32, i32
  }
  func.func @transform_3(%arg0: i32) -> (i32, i32) {
    %c0_i32 = arith.constant 0 : i32
    %c0_i32_0 = arith.constant 0 : i32
    %c0_i32_1 = arith.constant 0 : i32
    return %c0_i32, %c0_i32_0 : i32, i32
  }
  func.func @transform_4(%arg0: i32) -> (i32, i32) {
    %c0_i32 = arith.constant 0 : i32
    %c0_i32_0 = arith.constant 0 : i32
    %c0_i32_1 = arith.constant 0 : i32
    return %c0_i32, %c0_i32_0 : i32, i32
  }
  func.func @transform_5(%arg0: i32) -> (i32, i32) {
    %c0_i32 = arith.constant 0 : i32
    %c0_i32_0 = arith.constant 0 : i32
    %c0_i32_1 = arith.constant 0 : i32
    return %c0_i32, %c0_i32_0 : i32, i32
  }
  func.func @transform_6(%arg0: i32) -> (i32, i32) {
    %c0_i32 = arith.constant 0 : i32
    %c0_i32_0 = arith.constant 0 : i32
    %c0_i32_1 = arith.constant 0 : i32
    return %c0_i32, %c0_i32_0 : i32, i32
  }
  func.func @transform_7(%arg0: i32) -> (i32, i32, i32) {
    %c0_i32 = arith.constant 0 : i32
    %c0_i32_0 = arith.constant 0 : i32
    %c0_i32_1 = arith.constant 0 : i32
    return %arg0, %c0_i32, %c0_i32_0 : i32, i32, i32
  }
}

</mosaic_0001>

<bundles_post_ra>
// kernel: down_forward.1
= control target key start
LH: loop header
LB: loop body
LE: loop exit
PB: predicated region body
PF: predicated region fallthrough
CT: control target
= control target key end

     0   :  { %s8523_s24 = smov 0   ;;  %s13402_s0 = inlined_call_operand.vmem [shape: f32[2,440,4], index: 0, kind: input, shape index: {}]   ;;  %s13403_s1 = inlined_call_operand.vmem [shape: f32[36,8], index: 1, kind: input, shape index: {}]   ;;  %s13404_s2 = inlined_call_operand.vmem [shape: f32[1,8], index: 2, kind: input, shape index: {}]   ;;  %s13405_s3 = inlined_call_operand.vmem [shape: f32[1,8], index: 3, kind: input, shape index: {}]   ;;  %s13406_s4 = inlined_call_operand.vmem [shape: f32[72,8], index: 4, kind: input, shape index: {}]   ;;  %s13407_s5 = inlined_call_operand.vmem [shape: f32[1,8], index: 5, kind: input, shape index: {}]   ;;  %s13408_s6 = inlined_call_operand.vmem [shape: f32[1,8], index: 6, kind: input, shape index: {}]   ;;  %s13409_s7 = inlined_call_operand.vmem [shape: f32[2,8,64], index: 7, kind: output, shape index: {}]  }
   0x1 LB: > { %s7930_s25 = sadd.s32 4294967295, %s8468_s24   ;;  %p7934_p0 = scmp.ge.s32.totalorder %s8468_s24, 1  ;;  %s8468_s24 = sphi %s8523_s24, %s17_s24  }
   0x2   : > { %p237_p1 = scmp.lt.s32.totalorder %s8468_s24, 3 }
   0x4   : > { %p238_p2 = pnand %p7934_p0, %p237_p1 }
   0x6   : > { %241 = sbr.rel (%p238_p2) target bundleno = 2251 (0x8cb), region = 48 }
   0xb   : > { %p268_p3 = scmp.lt.s32.totalorder %s7930_s25, 1  ;;  %s8470_s30 = smov 4   ;;  %vm334_vm0 = vcmask 31744   ;;  %vm623_vm1 = vcmask 64544   ;;  %vm912_vm2 = vcmask 97344   ;;  %vm1201_vm3 = vcmask 130144  }
   0xc   : > { %s8471_s8 = smov 8   ;;  %s8472_s9 = smov 12   ;;  %vm1490_vm4 = vcmask 162944   ;;  %vm1779_vm5 = vcmask 195744   ;;  %vm2068_vm6 = vcmask 228544   ;;  %vm2893_vm7 = vcmask 1043456  }
   0xd   : > { %s14116_s25 = smov (!%p268_p3, %s7930_s25), 1  ;;  %s8473_s10 = smov 16   ;;  %vm2357_vm8 = vcmask 261344   ;;  %vm2646_vm9 = vcmask 294144   ;;  %vm2748_vm10 = vcmask 293888   ;;  %vm13410_vm11 = vcmask 64512  }
   0xe   : > { %s8340_s26 = smul.u32 440, %s14116_s25  ;;  %s8474_s11 = smov 20  }
   0xf   : > { %s8475_s12 = smov 24   ;;  %s8476_s13 = smov 28  }
  0x10   : > { %s8537_s29 = scalar_lea.vmem %s13402_s0, %s8340_s26  ;;  %s8477_s26 = smov 32  }
  0x11   : > { %v383_v0 = vld [vmem:[%s8537_s29 + $0x1] sm:$0xff]  ;;  %v385_v1 = vld [vmem:[%s8537_s29 + $0x11] sm:$0xff]  ;;  %v384_v2 = vld [vmem:[%s8537_s29 + $0x9] sm:$0xff]  ;;  %s8479_s16 = smov 40   ;;  %s8480_s27 = smov 48  }
  0x12   : > { %479 = vrot.lane.b32.xlu0 %v383_v0, %s8470_s30  ;;  %483 = vrot.lane.b32.xlu1 %v385_v1, %s8470_s30  ;;  %v386_v3 = vld [vmem:[%s8537_s29 + $0x19] sm:$0xff]  ;;  %v387_v4 = vld [vmem:[%s8537_s29 + $0x21] sm:$0xff]  ;;  %s7936_s21 = sshll.u32 %s14116_s25, 3 }
  0x13   : > { %v388_v5 = vld [vmem:[%s8537_s29 + $0x29] sm:$0xff]  ;;  %v389_v6 = vld [vmem:[%s8537_s29 + $0x31] sm:$0xff]  ;;  %v390_v7 = vld [vmem:[%s8537_s29 + $0x39] sm:$0xff] }
  0x14   : > { %v391_v8 = vld [vmem:[%s8537_s29 + $0x41] sm:$0xff]  ;;  %v392_v9 = vld [vmem:[%s8537_s29 + $0x49] sm:$0xff]  ;;  %v393_v10 = vld [vmem:[%s8537_s29 + $0x51] sm:$0xff] }
  0x15   : > { %v394_v11 = vld [vmem:[%s8537_s29 + $0x59] sm:$0xff]  ;;  %v288_v13 = vld [vmem:[%s8537_s29 + $0x10] sm:$0xff]  ;;  %v395_v14 = vld [vmem:[%s8537_s29 + $0x61] sm:$0xff] }
  0x16   : > { %481 = vrot.lane.b32.xlu0 %v384_v2, %s8470_s30  ;;  %485 = vrot.lane.b32.xlu1 %v386_v3, %s8470_s30  ;;  %v286_v12 = vld [vmem:[%s8537_s29] sm:$0xff]  ;;  %v396_v15 = vld [vmem:[%s8537_s29 + $0x69] sm:$0xff]  ;;  %337 = vst.msk [vmem:[#allocation3 + $0x10] sm:$0xff] %vm334_vm0, %v288_v13 }
  0x17   : > { %335 = vst.msk [vmem:[#allocation3] sm:$0xff] %vm334_vm0, %v286_v12  ;;  %v287_v16 = vld [vmem:[%s8537_s29 + $0x8] sm:$0xff]  ;;  %v8572_v17 = vld [vmem:[%s8537_s29 + $0x18] sm:$0xff]  ;;  %v8577_v18 = vld [vmem:[%s8537_s29 + $0x20] sm:$0xff] }
  0x18   : > { %336 = vst.msk [vmem:[#allocation3 + $0x8] sm:$0xff] %vm334_vm0, %v287_v16  ;;  %338 = vst.msk [vmem:[#allocation3 + $0x18] sm:$0xff] %vm334_vm0, %v8572_v17  ;;  %v8580_v19 = vld [vmem:[%s8537_s29 + $0x28] sm:$0xff]  ;;  %v8589_v20 = vld [vmem:[%s8537_s29 + $0x30] sm:$0xff] }
  0x19   : > { %339 = vst.msk [vmem:[#allocation3 + $0x20] sm:$0xff] %vm334_vm0, %v8577_v18  ;;  %340 = vst.msk [vmem:[#allocation3 + $0x28] sm:$0xff] %vm334_vm0, %v8580_v19  ;;  %v397_v21 = vld [vmem:[%s8537_s29 + $0x71] sm:$0xff]  ;;  %v398_v22 = vld [vmem:[%s8537_s29 + $0x79] sm:$0xff] }
  0x1a   : > { %487 = vrot.lane.b32.xlu0 %v387_v4, %s8470_s30  ;;  %489 = vrot.lane.b32.xlu1 %v388_v5, %s8470_s30  ;;  %341 = vst.msk [vmem:[#allocation3 + $0x30] sm:$0xff] %vm334_vm0, %v8589_v20  ;;  %v8596_v23 = vld [vmem:[%s8537_s29 + $0x38] sm:$0xff]  ;;  %v8601_v24 = vld [vmem:[%s8537_s29 + $0x40] sm:$0xff] }
  0x1b   : > { %342 = vst.msk [vmem:[#allocation3 + $0x38] sm:$0xff] %vm334_vm0, %v8596_v23  ;;  %v8604_v25 = vld [vmem:[%s8537_s29 + $0x48] sm:$0xff]  ;;  %343 = vst.msk [vmem:[#allocation3 + $0x40] sm:$0xff] %vm334_vm0, %v8601_v24  ;;  %v8611_v26 = vld [vmem:[%s8537_s29 + $0x50] sm:$0xff] }
  0x1c   : > { %344 = vst.msk [vmem:[#allocation3 + $0x48] sm:$0xff] %vm334_vm0, %v8604_v25  ;;  %v8614_v27 = vld [vmem:[%s8537_s29 + $0x58] sm:$0xff]  ;;  %v399_v28 = vld [vmem:[%s8537_s29 + $0x81] sm:$0xff]  ;;  %345 = vst.msk [vmem:[#allocation3 + $0x50] sm:$0xff] %vm334_vm0, %v8611_v26 }
  0x1d   : > { %346 = vst.msk [vmem:[#allocation3 + $0x58] sm:$0xff] %vm334_vm0, %v8614_v27  ;;  %v400_v29 = vld [vmem:[%s8537_s29 + $0x89] sm:$0xff]  ;;  %v8625_v30 = vld [vmem:[%s8537_s29 + $0x60] sm:$0xff]  ;;  %v8638_v33 = vld [vmem:[%s8537_s29 + $0x78] sm:$0xff] }
  0x1e   : > { %491 = vrot.lane.b32.xlu0 %v389_v6, %s8470_s30  ;;  %493 = vrot.lane.b32.xlu1 %v390_v7, %s8470_s30  ;;  %v8628_v31 = vld [vmem:[%s8537_s29 + $0x68] sm:$0xff]  ;;  %347 = vst.msk [vmem:[#allocation3 + $0x60] sm:$0xff] %vm334_vm0, %v8625_v30  ;;  %v8635_v32 = vld [vmem:[%s8537_s29 + $0x70] sm:$0xff]  ;;  %350 = vst.msk [vmem:[#allocation3 + $0x78] sm:$0xff] %vm334_vm0, %v8638_v33 }
  0x1f   : > { %348 = vst.msk [vmem:[#allocation3 + $0x68] sm:$0xff] %vm334_vm0, %v8628_v31  ;;  %349 = vst.msk [vmem:[#allocation3 + $0x70] sm:$0xff] %vm334_vm0, %v8635_v32  ;;  %v8645_v34 = vld [vmem:[%s8537_s29 + $0x80] sm:$0xff]  ;;  %v401_v35 = vld [vmem:[%s8537_s29 + $0x91] sm:$0xff] }
  0x20   : > { %351 = vst.msk [vmem:[#allocation3 + $0x80] sm:$0xff] %vm334_vm0, %v8645_v34  ;;  %v8653_v36 = vld [vmem:[%s8537_s29 + $0x88] sm:$0xff]  ;;  %v402_v37 = vld [vmem:[%s8537_s29 + $0x99] sm:$0xff]  ;;  %v8659_v38 = vld [vmem:[%s8537_s29 + $0x90] sm:$0xff] }
  0x21   : > { %352 = vst.msk [vmem:[#allocation3 + $0x88] sm:$0xff] %vm334_vm0, %v8653_v36  ;;  %v8662_v39 = vld [vmem:[%s8537_s29 + $0x98] sm:$0xff]  ;;  %353 = vst.msk [vmem:[#allocation3 + $0x90] sm:$0xff] %vm334_vm0, %v8659_v38  ;;  %v8669_v40 = vld [vmem:[%s8537_s29 + $0xa0] sm:$0xff] }
  0x22   : > { %495 = vrot.lane.b32.xlu0 %v391_v8, %s8470_s30  ;;  %497 = vrot.lane.b32.xlu1 %v392_v9, %s8470_s30  ;;  %354 = vst.msk [vmem:[#allocation3 + $0x98] sm:$0xff] %vm334_vm0, %v8662_v39  ;;  %355 = vst.msk [vmem:[#allocation3 + $0xa0] sm:$0xff] %vm334_vm0, %v8669_v40  ;;  %v8674_v41 = vld [vmem:[%s8537_s29 + $0xa8] sm:$0xff]  ;;  %v8681_v42 = vld [vmem:[%s8537_s29 + $0xb0] sm:$0xff] }
  0x23   : > { %356 = vst.msk [vmem:[#allocation3 + $0xa8] sm:$0xff] %vm334_vm0, %v8674_v41  ;;  %v8684_v43 = vld [vmem:[%s8537_s29 + $0xb8] sm:$0xff]  ;;  %v403_v44 = vld [vmem:[%s8537_s29 + $0xa1] sm:$0xff]  ;;  %v404_v45 = vld [vmem:[%s8537_s29 + $0xa9] sm:$0xff] }
  0x24   : > { %357 = vst.msk [vmem:[#allocation3 + $0xb0] sm:$0xff] %vm334_vm0, %v8681_v42  ;;  %358 = vst.msk [vmem:[#allocation3 + $0xb8] sm:$0xff] %vm334_vm0, %v8684_v43  ;;  %v8693_v46 = vld [vmem:[%s8537_s29 + $0xc0] sm:$0xff]  ;;  %v8698_v47 = vld [vmem:[%s8537_s29 + $0xc8] sm:$0xff] }
  0x25   : > { %359 = vst.msk [vmem:[#allocation3 + $0xc0] sm:$0xff] %vm334_vm0, %v8693_v46  ;;  %360 = vst.msk [vmem:[#allocation3 + $0xc8] sm:$0xff] %vm334_vm0, %v8698_v47  ;;  %v8703_v48 = vld [vmem:[%s8537_s29 + $0xd0] sm:$0xff]  ;;  %v8706_v49 = vld [vmem:[%s8537_s29 + $0xd8] sm:$0xff] }
  0x26   : > { %499 = vrot.lane.b32.xlu0 %v393_v10, %s8470_s30  ;;  %501 = vrot.lane.b32.xlu1 %v394_v11, %s8470_s30  ;;  %361 = vst.msk [vmem:[#allocation3 + $0xd0] sm:$0xff] %vm334_vm0, %v8703_v48  ;;  %362 = vst.msk [vmem:[#allocation3 + $0xd8] sm:$0xff] %vm334_vm0, %v8706_v49  ;;  %v405_v50 = vld [vmem:[%s8537_s29 + $0xb1] sm:$0xff]  ;;  %v406_v51 = vld [vmem:[%s8537_s29 + $0xb9] sm:$0xff] }
  0x27   : > { %v8717_v52 = vld [vmem:[%s8537_s29 + $0xe0] sm:$0xff]  ;;  %v8722_v53 = vld [vmem:[%s8537_s29 + $0xe8] sm:$0xff]  ;;  %v8731_v56 = vld [vmem:[%s8537_s29 + $0xf0] sm:$0xff] }
  0x28   : > { %363 = vst.msk [vmem:[#allocation3 + $0xe0] sm:$0xff] %vm334_vm0, %v8717_v52  ;;  %364 = vst.msk [vmem:[#allocation3 + $0xe8] sm:$0xff] %vm334_vm0, %v8722_v53  ;;  %v407_v54 = vld [vmem:[%s8537_s29 + $0xc1] sm:$0xff]  ;;  %v408_v55 = vld [vmem:[%s8537_s29 + $0xc9] sm:$0xff] }
  0x29   : > { %365 = vst.msk [vmem:[#allocation3 + $0xf0] sm:$0xff] %vm334_vm0, %v8731_v56  ;;  %v8736_v57 = vld [vmem:[%s8537_s29 + $0xf8] sm:$0xff]  ;;  %v8745_v60 = vld [vmem:[%s8537_s29 + $0x100] sm:$0xff]  ;;  %v8750_v61 = vld [vmem:[%s8537_s29 + $0x108] sm:$0xff] }
  0x2a   : > { %503 = vrot.lane.b32.xlu0 %v395_v14, %s8470_s30  ;;  %505 = vrot.lane.b32.xlu1 %v396_v15, %s8470_s30  ;;  %366 = vst.msk [vmem:[#allocation3 + $0xf8] sm:$0xff] %vm334_vm0, %v8736_v57  ;;  %v409_v58 = vld [vmem:[%s8537_s29 + $0xd1] sm:$0xff]  ;;  %v410_v59 = vld [vmem:[%s8537_s29 + $0xd9] sm:$0xff]  ;;  %367 = vst.msk [vmem:[#allocation3 + $0x100] sm:$0xff] %vm334_vm0, %v8745_v60 }
  0x2b   : > { %368 = vst.msk [vmem:[#allocation3 + $0x108] sm:$0xff] %vm334_vm0, %v8750_v61  ;;  %v411_v62 = vld [vmem:[%s8537_s29 + $0xe1] sm:$0xff]  ;;  %v412_v63 = vld [vmem:[%s8537_s29 + $0xe9] sm:$0xff]  ;;  %v8764_v1 = vld [vmem:[%s8537_s29 + $0x118] sm:$0xff] }
  0x2c   : > { %v8759_v0 = vld [vmem:[%s8537_s29 + $0x110] sm:$0xff]  ;;  %370 = vst.msk [vmem:[#allocation3 + $0x118] sm:$0xff] %vm334_vm0, %v8764_v1  ;;  %v414_v3 = vld [vmem:[%s8537_s29 + $0xf9] sm:$0xff]  ;;  %v8778_v5 = vld [vmem:[%s8537_s29 + $0x128] sm:$0xff] }
  0x2d   : > { %369 = vst.msk [vmem:[#allocation3 + $0x110] sm:$0xff] %vm334_vm0, %v8759_v0  ;;  %v413_v2 = vld [vmem:[%s8537_s29 + $0xf1] sm:$0xff]  ;;  %v8773_v4 = vld [vmem:[%s8537_s29 + $0x120] sm:$0xff]  ;;  %372 = vst.msk [vmem:[#allocation3 + $0x128] sm:$0xff] %vm334_vm0, %v8778_v5 }
  0x2e   : > { %507 = vrot.lane.b32.xlu0 %v397_v21, %s8470_s30  ;;  %509 = vrot.lane.b32.xlu1 %v398_v22, %s8470_s30  ;;  %371 = vst.msk [vmem:[#allocation3 + $0x120] sm:$0xff] %vm334_vm0, %v8773_v4  ;;  %v415_v6 = vld [vmem:[%s8537_s29 + $0x101] sm:$0xff]  ;;  %v416_v7 = vld [vmem:[%s8537_s29 + $0x109] sm:$0xff] }
  0x2f   : > { %v8787_v8 = vld [vmem:[%s8537_s29 + $0x130] sm:$0xff]  ;;  %v8792_v9 = vld [vmem:[%s8537_s29 + $0x138] sm:$0xff]  ;;  %v8801_v12 = vld [vmem:[%s8537_s29 + $0x140] sm:$0xff] }
  0x30   : > { %373 = vst.msk [vmem:[#allocation3 + $0x130] sm:$0xff] %vm334_vm0, %v8787_v8  ;;  %374 = vst.msk [vmem:[#allocation3 + $0x138] sm:$0xff] %vm334_vm0, %v8792_v9  ;;  %v417_v10 = vld [vmem:[%s8537_s29 + $0x111] sm:$0xff]  ;;  %v418_v11 = vld [vmem:[%s8537_s29 + $0x119] sm:$0xff] }
  0x31   : > { %375 = vst.msk [vmem:[#allocation3 + $0x140] sm:$0xff] %vm334_vm0, %v8801_v12  ;;  %v8806_v13 = vld [vmem:[%s8537_s29 + $0x148] sm:$0xff]  ;;  %v8815_v16 = vld [vmem:[%s8537_s29 + $0x150] sm:$0xff]  ;;  %v8820_v21 = vld [vmem:[%s8537_s29 + $0x158] sm:$0xff] }
  0x32   : > { %511 = vrot.lane.b32.xlu0 %v399_v28, %s8470_s30  ;;  %513 = vrot.lane.b32.xlu1 %v400_v29, %s8470_s30  ;;  %376 = vst.msk [vmem:[#allocation3 + $0x148] sm:$0xff] %vm334_vm0, %v8806_v13  ;;  %v419_v14 = vld [vmem:[%s8537_s29 + $0x121] sm:$0xff]  ;;  %v420_v15 = vld [vmem:[%s8537_s29 + $0x129] sm:$0xff]  ;;  %377 = vst.msk [vmem:[#allocation3 + $0x150] sm:$0xff] %vm334_vm0, %v8815_v16 }
  0x33   : > { %378 = vst.msk [vmem:[#allocation3 + $0x158] sm:$0xff] %vm334_vm0, %v8820_v21  ;;  %v421_v22 = vld [vmem:[%s8537_s29 + $0x131] sm:$0xff]  ;;  %v422_v28 = vld [vmem:[%s8537_s29 + $0x139] sm:$0xff] }
  0x34   : > { %v8829_v29 = vld [vmem:[%s8537_s29 + $0x160] sm:$0xff] }
  0x35   : > { %379 = vst.msk [vmem:[#allocation3 + $0x160] sm:$0xff] %vm334_vm0, %v8829_v29 }
  0x36   : > { %515 = vrot.lane.b32.xlu0 %v401_v35, %s8470_s30  ;;  %517 = vrot.lane.b32.xlu1 %v402_v37, %s8470_s30  ;;  %v8834_v35 = vld [vmem:[%s8537_s29 + $0x168] sm:$0xff] }
  0x37   : > { %380 = vst.msk [vmem:[#allocation3 + $0x168] sm:$0xff] %vm334_vm0, %v8834_v35  ;;  %v423_v37 = vld [vmem:[%s8537_s29 + $0x141] sm:$0xff] }
  0x3a   : > { %519 = vrot.lane.b32.xlu0 %v403_v44, %s8470_s30  ;;  %521 = vrot.lane.b32.xlu1 %v404_v45, %s8470_s30  ;;  %v424_v44 = vld [vmem:[%s8537_s29 + $0x149] sm:$0xff] }
  0x3b   : > { %v8843_v45 = vld [vmem:[%s8537_s29 + $0x170] sm:$0xff] }
  0x3c   : > { %381 = vst.msk [vmem:[#allocation3 + $0x170] sm:$0xff] %vm334_vm0, %v8843_v45 }
  0x3e   : > { %523 = vrot.lane.b32.xlu0 %v405_v50, %s8470_s30  ;;  %525 = vrot.lane.b32.xlu1 %v406_v51, %s8470_s30  ;;  %v8848_v50 = vld [vmem:[%s8537_s29 + $0x178] sm:$0xff] }
  0x3f   : > { %382 = vst.msk [vmem:[#allocation3 + $0x178] sm:$0xff] %vm334_vm0, %v8848_v50  ;;  %v425_v51 = vld [vmem:[%s8537_s29 + $0x151] sm:$0xff] }
  0x42   : > { %527 = vrot.lane.b32.xlu0 %v407_v54, %s8470_s30  ;;  %529 = vrot.lane.b32.xlu1 %v408_v55, %s8470_s30  ;;  %v426_v54 = vld [vmem:[%s8537_s29 + $0x159] sm:$0xff]  ;;  %v427_v55 = vld [vmem:[%s8537_s29 + $0x161] sm:$0xff] }
  0x46   : > { %531 = vrot.lane.b32.xlu0 %v409_v58, %s8470_s30  ;;  %533 = vrot.lane.b32.xlu1 %v410_v59, %s8470_s30  ;;  %v428_v58 = vld [vmem:[%s8537_s29 + $0x169] sm:$0xff]  ;;  %v429_v59 = vld [vmem:[%s8537_s29 + $0x171] sm:$0xff] }
  0x4a   : > { %535 = vrot.lane.b32.xlu0 %v411_v62, %s8470_s30  ;;  %537 = vrot.lane.b32.xlu1 %v412_v63, %s8470_s30  ;;  %v430_v62 = vld [vmem:[%s8537_s29 + $0x179] sm:$0xff]  ;;  %v672_v63 = vld [vmem:[%s8537_s29 + $0x2] sm:$0xff] }
  0x4e   : > { %539 = vrot.lane.b32.xlu0 %v413_v2, %s8470_s30  ;;  %541 = vrot.lane.b32.xlu1 %v414_v3, %s8470_s30  ;;  %v673_v2 = vld [vmem:[%s8537_s29 + $0xa] sm:$0xff]  ;;  %v674_v3 = vld [vmem:[%s8537_s29 + $0x12] sm:$0xff] }
  0x52   : > { %543 = vrot.lane.b32.xlu0 %v415_v6, %s8470_s30  ;;  %545 = vrot.lane.b32.xlu1 %v416_v7, %s8470_s30  ;;  %v675_v6 = vld [vmem:[%s8537_s29 + $0x1a] sm:$0xff]  ;;  %v676_v7 = vld [vmem:[%s8537_s29 + $0x22] sm:$0xff] }
  0x56   : > { %547 = vrot.lane.b32.xlu0 %v417_v10, %s8470_s30  ;;  %549 = vrot.lane.b32.xlu1 %v418_v11, %s8470_s30  ;;  %v677_v10 = vld [vmem:[%s8537_s29 + $0x2a] sm:$0xff]  ;;  %v678_v11 = vld [vmem:[%s8537_s29 + $0x32] sm:$0xff] }
  0x5a   : > { %551 = vrot.lane.b32.xlu0 %v419_v14, %s8470_s30  ;;  %553 = vrot.lane.b32.xlu1 %v420_v15, %s8470_s30  ;;  %v679_v14 = vld [vmem:[%s8537_s29 + $0x3a] sm:$0xff]  ;;  %v680_v15 = vld [vmem:[%s8537_s29 + $0x42] sm:$0xff] }
  0x5e   : > { %555 = vrot.lane.b32.xlu0 %v421_v22, %s8470_s30  ;;  %557 = vrot.lane.b32.xlu1 %v422_v28, %s8470_s30  ;;  %v681_v22 = vld [vmem:[%s8537_s29 + $0x4a] sm:$0xff]  ;;  %v682_v28 = vld [vmem:[%s8537_s29 + $0x52] sm:$0xff] }
  0x62   : > { %559 = vrot.lane.b32.xlu0 %v423_v37, %s8470_s30  ;;  %561 = vrot.lane.b32.xlu1 %v424_v44, %s8470_s30  ;;  %v683_v37 = vld [vmem:[%s8537_s29 + $0x5a] sm:$0xff] }
  0x66   : > { %563 = vrot.lane.b32.xlu0 %v425_v51, %s8470_s30  ;;  %565 = vrot.lane.b32.xlu1 %v426_v54, %s8470_s30  ;;  %v684_v54 = vld [vmem:[%s8537_s29 + $0x62] sm:$0xff] }
  0x6a   : > { %567 = vrot.lane.b32.xlu0 %v427_v55, %s8470_s30  ;;  %569 = vrot.lane.b32.xlu1 %v428_v58, %s8470_s30  ;;  %v685_v55 = vld [vmem:[%s8537_s29 + $0x6a] sm:$0xff] }
  0x6e   : > { %571 = vrot.lane.b32.xlu0 %v429_v59, %s8470_s30  ;;  %573 = vrot.lane.b32.xlu1 %v430_v62, %s8470_s30  ;;  %v686_v62 = vld [vmem:[%s8537_s29 + $0x72] sm:$0xff] }
  0x72   : > { %768 = vrot.lane.b32.xlu0 %v672_v63, %s8471_s8  ;;  %770 = vrot.lane.b32.xlu1 %v673_v2, %s8471_s8  ;;  %v687_v63 = vld [vmem:[%s8537_s29 + $0x7a] sm:$0xff] }
  0x76   : > { %772 = vrot.lane.b32.xlu0 %v674_v3, %s8471_s8  ;;  %774 = vrot.lane.b32.xlu1 %v675_v6, %s8471_s8  ;;  %v688_v6 = vld [vmem:[%s8537_s29 + $0x82] sm:$0xff] }
  0x7a   : > { %776 = vrot.lane.b32.xlu0 %v676_v7, %s8471_s8  ;;  %778 = vrot.lane.b32.xlu1 %v677_v10, %s8471_s8  ;;  %v689_v7 = vld [vmem:[%s8537_s29 + $0x8a] sm:$0xff] }
  0x7e   : > { %780 = vrot.lane.b32.xlu0 %v678_v11, %s8471_s8  ;;  %782 = vrot.lane.b32.xlu1 %v679_v14, %s8471_s8  ;;  %v690_v14 = vld [vmem:[%s8537_s29 + $0x92] sm:$0xff] }
  0x82   : > { %784 = vrot.lane.b32.xlu0 %v680_v15, %s8471_s8  ;;  %786 = vrot.lane.b32.xlu1 %v681_v22, %s8471_s8  ;;  %v691_v15 = vld [vmem:[%s8537_s29 + $0x9a] sm:$0xff] }
  0x84   : > { %v480_v44 = vpop.permute.xlu0 %479  ;;  %v484_v51 = vpop.permute.xlu1 %483 }
  0x85   : > { %624 = vst.msk [vmem:[#allocation3] sm:$0xff] %vm623_vm1, %v480_v44  ;;  %626 = vst.msk [vmem:[#allocation3 + $0x10] sm:$0xff] %vm623_vm1, %v484_v51  ;;  %v693_v44 = vld [vmem:[%s8537_s29 + $0xaa] sm:$0xff] }
  0x86   : > { %788 = vrot.lane.b32.xlu0 %v682_v28, %s8471_s8  ;;  %790 = vrot.lane.b32.xlu1 %v683_v37, %s8471_s8  ;;  %v692_v37 = vld [vmem:[%s8537_s29 + $0xa2] sm:$0xff] }
  0x88   : > { %v482_v58 = vpop.permute.xlu0 %481  ;;  %v486_v59 = vpop.permute.xlu1 %485 }
  0x89   : > { %625 = vst.msk [vmem:[#allocation3 + $0x8] sm:$0xff] %vm623_vm1, %v482_v58  ;;  %627 = vst.msk [vmem:[#allocation3 + $0x18] sm:$0xff] %vm623_vm1, %v486_v59  ;;  %v695_v58 = vld [vmem:[%s8537_s29 + $0xba] sm:$0xff] }
  0x8a   : > { %792 = vrot.lane.b32.xlu0 %v684_v54, %s8471_s8  ;;  %794 = vrot.lane.b32.xlu1 %v685_v55, %s8471_s8  ;;  %v694_v55 = vld [vmem:[%s8537_s29 + $0xb2] sm:$0xff] }
  0x8c   : > { %v488_v2 = vpop.permute.xlu0 %487  ;;  %v490_v3 = vpop.permute.xlu1 %489 }
  0x8d   : > { %628 = vst.msk [vmem:[#allocation3 + $0x20] sm:$0xff] %vm623_vm1, %v488_v2  ;;  %629 = vst.msk [vmem:[#allocation3 + $0x28] sm:$0xff] %vm623_vm1, %v490_v3  ;;  %v697_v2 = vld [vmem:[%s8537_s29 + $0xca] sm:$0xff] }
  0x8e   : > { %796 = vrot.lane.b32.xlu0 %v686_v62, %s8471_s8  ;;  %798 = vrot.lane.b32.xlu1 %v687_v63, %s8471_s8  ;;  %v696_v63 = vld [vmem:[%s8537_s29 + $0xc2] sm:$0xff] }
  0x90   : > { %v492_v10 = vpop.permute.xlu0 %491  ;;  %v494_v11 = vpop.permute.xlu1 %493 }
  0x91   : > { %630 = vst.msk [vmem:[#allocation3 + $0x30] sm:$0xff] %vm623_vm1, %v492_v10  ;;  %631 = vst.msk [vmem:[#allocation3 + $0x38] sm:$0xff] %vm623_vm1, %v494_v11  ;;  %v699_v10 = vld [vmem:[%s8537_s29 + $0xda] sm:$0xff] }
  0x92   : > { %800 = vrot.lane.b32.xlu0 %v688_v6, %s8471_s8  ;;  %802 = vrot.lane.b32.xlu1 %v689_v7, %s8471_s8  ;;  %v698_v7 = vld [vmem:[%s8537_s29 + $0xd2] sm:$0xff] }
  0x94   : > { %v496_v22 = vpop.permute.xlu0 %495  ;;  %v498_v28 = vpop.permute.xlu1 %497 }
  0x95   : > { %632 = vst.msk [vmem:[#allocation3 + $0x40] sm:$0xff] %vm623_vm1, %v496_v22  ;;  %633 = vst.msk [vmem:[#allocation3 + $0x48] sm:$0xff] %vm623_vm1, %v498_v28  ;;  %v701_v22 = vld [vmem:[%s8537_s29 + $0xea] sm:$0xff] }
  0x96   : > { %804 = vrot.lane.b32.xlu0 %v690_v14, %s8471_s8  ;;  %806 = vrot.lane.b32.xlu1 %v691_v15, %s8471_s8  ;;  %v700_v15 = vld [vmem:[%s8537_s29 + $0xe2] sm:$0xff] }
  0x98   : > { %v500_v51 = vpop.permute.xlu0 %499  ;;  %v502_v54 = vpop.permute.xlu1 %501 }
  0x99   : > { %634 = vst.msk [vmem:[#allocation3 + $0x50] sm:$0xff] %vm623_vm1, %v500_v51  ;;  %635 = vst.msk [vmem:[#allocation3 + $0x58] sm:$0xff] %vm623_vm1, %v502_v54  ;;  %v703_v51 = vld [vmem:[%s8537_s29 + $0xfa] sm:$0xff] }
  0x9a   : > { %808 = vrot.lane.b32.xlu0 %v692_v37, %s8471_s8  ;;  %810 = vrot.lane.b32.xlu1 %v693_v44, %s8471_s8  ;;  %v702_v44 = vld [vmem:[%s8537_s29 + $0xf2] sm:$0xff] }
  0x9c   : > { %v504_v59 = vpop.permute.xlu0 %503  ;;  %v506_v62 = vpop.permute.xlu1 %505 }
  0x9d   : > { %636 = vst.msk [vmem:[#allocation3 + $0x60] sm:$0xff] %vm623_vm1, %v504_v59  ;;  %637 = vst.msk [vmem:[#allocation3 + $0x68] sm:$0xff] %vm623_vm1, %v506_v62  ;;  %v705_v59 = vld [vmem:[%s8537_s29 + $0x10a] sm:$0xff] }
  0x9e   : > { %812 = vrot.lane.b32.xlu0 %v694_v55, %s8471_s8  ;;  %814 = vrot.lane.b32.xlu1 %v695_v58, %s8471_s8  ;;  %v704_v58 = vld [vmem:[%s8537_s29 + $0x102] sm:$0xff] }
  0xa0   : > { %v508_v3 = vpop.permute.xlu0 %507  ;;  %v510_v6 = vpop.permute.xlu1 %509 }
  0xa1   : > { %638 = vst.msk [vmem:[#allocation3 + $0x70] sm:$0xff] %vm623_vm1, %v508_v3  ;;  %639 = vst.msk [vmem:[#allocation3 + $0x78] sm:$0xff] %vm623_vm1, %v510_v6  ;;  %v707_v3 = vld [vmem:[%s8537_s29 + $0x11a] sm:$0xff] }
  0xa2   : > { %816 = vrot.lane.b32.xlu0 %v696_v63, %s8471_s8  ;;  %818 = vrot.lane.b32.xlu1 %v697_v2, %s8471_s8  ;;  %v706_v2 = vld [vmem:[%s8537_s29 + $0x112] sm:$0xff] }
  0xa4   : > { %v512_v11 = vpop.permute.xlu0 %511  ;;  %v514_v14 = vpop.permute.xlu1 %513 }
  0xa5   : > { %640 = vst.msk [vmem:[#allocation3 + $0x80] sm:$0xff] %vm623_vm1, %v512_v11  ;;  %641 = vst.msk [vmem:[#allocation3 + $0x88] sm:$0xff] %vm623_vm1, %v514_v14  ;;  %v709_v11 = vld [vmem:[%s8537_s29 + $0x12a] sm:$0xff] }
  0xa6   : > { %820 = vrot.lane.b32.xlu0 %v698_v7, %s8471_s8  ;;  %822 = vrot.lane.b32.xlu1 %v699_v10, %s8471_s8  ;;  %v708_v10 = vld [vmem:[%s8537_s29 + $0x122] sm:$0xff] }
  0xa8   : > { %v516_v28 = vpop.permute.xlu0 %515  ;;  %v518_v37 = vpop.permute.xlu1 %517 }
  0xa9   : > { %642 = vst.msk [vmem:[#allocation3 + $0x90] sm:$0xff] %vm623_vm1, %v516_v28  ;;  %643 = vst.msk [vmem:[#allocation3 + $0x98] sm:$0xff] %vm623_vm1, %v518_v37  ;;  %v711_v28 = vld [vmem:[%s8537_s29 + $0x13a] sm:$0xff] }
  0xaa   : > { %824 = vrot.lane.b32.xlu0 %v700_v15, %s8471_s8  ;;  %826 = vrot.lane.b32.xlu1 %v701_v22, %s8471_s8  ;;  %v710_v22 = vld [vmem:[%s8537_s29 + $0x132] sm:$0xff] }
  0xac   : > { %v520_v54 = vpop.permute.xlu0 %519  ;;  %v522_v55 = vpop.permute.xlu1 %521 }
  0xad   : > { %644 = vst.msk [vmem:[#allocation3 + $0xa0] sm:$0xff] %vm623_vm1, %v520_v54  ;;  %645 = vst.msk [vmem:[#allocation3 + $0xa8] sm:$0xff] %vm623_vm1, %v522_v55  ;;  %v713_v54 = vld [vmem:[%s8537_s29 + $0x14a] sm:$0xff] }
  0xae   : > { %828 = vrot.lane.b32.xlu0 %v702_v44, %s8471_s8  ;;  %830 = vrot.lane.b32.xlu1 %v703_v51, %s8471_s8  ;;  %v712_v51 = vld [vmem:[%s8537_s29 + $0x142] sm:$0xff] }
  0xb0   : > { %v524_v62 = vpop.permute.xlu0 %523  ;;  %v526_v63 = vpop.permute.xlu1 %525 }
  0xb1   : > { %646 = vst.msk [vmem:[#allocation3 + $0xb0] sm:$0xff] %vm623_vm1, %v524_v62  ;;  %647 = vst.msk [vmem:[#allocation3 + $0xb8] sm:$0xff] %vm623_vm1, %v526_v63  ;;  %v715_v62 = vld [vmem:[%s8537_s29 + $0x15a] sm:$0xff] }
  0xb2   : > { %832 = vrot.lane.b32.xlu0 %v704_v58, %s8471_s8  ;;  %834 = vrot.lane.b32.xlu1 %v705_v59, %s8471_s8  ;;  %v714_v59 = vld [vmem:[%s8537_s29 + $0x152] sm:$0xff] }
  0xb4   : > { %v528_v6 = vpop.permute.xlu0 %527  ;;  %v530_v7 = vpop.permute.xlu1 %529 }
  0xb5   : > { %648 = vst.msk [vmem:[#allocation3 + $0xc0] sm:$0xff] %vm623_vm1, %v528_v6  ;;  %649 = vst.msk [vmem:[#allocation3 + $0xc8] sm:$0xff] %vm623_vm1, %v530_v7  ;;  %v717_v6 = vld [vmem:[%s8537_s29 + $0x16a] sm:$0xff] }
  0xb6   : > { %836 = vrot.lane.b32.xlu0 %v706_v2, %s8471_s8  ;;  %838 = vrot.lane.b32.xlu1 %v707_v3, %s8471_s8  ;;  %v716_v3 = vld [vmem:[%s8537_s29 + $0x162] sm:$0xff] }
  0xb8   : > { %v532_v14 = vpop.permute.xlu0 %531  ;;  %v534_v15 = vpop.permute.xlu1 %533 }
  0xb9   : > { %650 = vst.msk [vmem:[#allocation3 + $0xd0] sm:$0xff] %vm623_vm1, %v532_v14  ;;  %651 = vst.msk [vmem:[#allocation3 + $0xd8] sm:$0xff] %vm623_vm1, %v534_v15  ;;  %v719_v14 = vld [vmem:[%s8537_s29 + $0x17a] sm:$0xff] }
  0xba   : > { %840 = vrot.lane.b32.xlu0 %v708_v10, %s8471_s8  ;;  %842 = vrot.lane.b32.xlu1 %v709_v11, %s8471_s8  ;;  %v718_v11 = vld [vmem:[%s8537_s29 + $0x172] sm:$0xff] }
  0xbc   : > { %v536_v37 = vpop.permute.xlu0 %535  ;;  %v538_v44 = vpop.permute.xlu1 %537 }
  0xbd   : > { %652 = vst.msk [vmem:[#allocation3 + $0xe0] sm:$0xff] %vm623_vm1, %v536_v37  ;;  %653 = vst.msk [vmem:[#allocation3 + $0xe8] sm:$0xff] %vm623_vm1, %v538_v44 }
  0xbe   : > { %844 = vrot.lane.b32.xlu0 %v710_v22, %s8471_s8  ;;  %846 = vrot.lane.b32.xlu1 %v711_v28, %s8471_s8 }
  0xc0   : > { %v540_v55 = vpop.permute.xlu0 %539  ;;  %v542_v58 = vpop.permute.xlu1 %541 }
  0xc1   : > { %654 = vst.msk [vmem:[#allocation3 + $0xf0] sm:$0xff] %vm623_vm1, %v540_v55  ;;  %655 = vst.msk [vmem:[#allocation3 + $0xf8] sm:$0xff] %vm623_vm1, %v542_v58  ;;  %v1008_v58 = vld [vmem:[%s8537_s29 + $0x190] sm:$0xff] }
  0xc2   : > { %848 = vrot.lane.b32.xlu0 %v712_v51, %s8471_s8  ;;  %850 = vrot.lane.b32.xlu1 %v713_v54, %s8471_s8 }
  0xc4   : > { %v544_v63 = vpop.permute.xlu0 %543  ;;  %v546_v2 = vpop.permute.xlu1 %545 }
  0xc5   : > { %656 = vst.msk [vmem:[#allocation3 + $0x100] sm:$0xff] %vm623_vm1, %v544_v63  ;;  %657 = vst.msk [vmem:[#allocation3 + $0x108] sm:$0xff] %vm623_vm1, %v546_v2  ;;  %v1252_v2 = vld [vmem:[%s8537_s29 + $0x29] sm:$0xff] }
  0xc6   : > { %852 = vrot.lane.b32.xlu0 %v714_v59, %s8471_s8  ;;  %854 = vrot.lane.b32.xlu1 %v715_v62, %s8471_s8  ;;  %v1250_v59 = vld [vmem:[%s8537_s29 + $0x19] sm:$0xff]  ;;  %v1251_v62 = vld [vmem:[%s8537_s29 + $0x21] sm:$0xff] }
  0xc8   : > { %v548_v7 = vpop.permute.xlu0 %547  ;;  %v550_v10 = vpop.permute.xlu1 %549 }
  0xc9   : > { %658 = vst.msk [vmem:[#allocation3 + $0x110] sm:$0xff] %vm623_vm1, %v548_v7  ;;  %659 = vst.msk [vmem:[#allocation3 + $0x118] sm:$0xff] %vm623_vm1, %v550_v10  ;;  %v1254_v10 = vld [vmem:[%s8537_s29 + $0x39] sm:$0xff] }
  0xca   : > { %856 = vrot.lane.b32.xlu0 %v716_v3, %s8471_s8  ;;  %858 = vrot.lane.b32.xlu1 %v717_v6, %s8471_s8  ;;  %v1253_v3 = vld [vmem:[%s8537_s29 + $0x31] sm:$0xff] }
  0xcc   : > { %v552_v15 = vpop.permute.xlu0 %551  ;;  %v554_v22 = vpop.permute.xlu1 %553 }
  0xcd   : > { %660 = vst.msk [vmem:[#allocation3 + $0x120] sm:$0xff] %vm623_vm1, %v552_v15  ;;  %661 = vst.msk [vmem:[#allocation3 + $0x128] sm:$0xff] %vm623_vm1, %v554_v22  ;;  %v1256_v22 = vld [vmem:[%s8537_s29 + $0x49] sm:$0xff] }
  0xce   : > { %860 = vrot.lane.b32.xlu0 %v718_v11, %s8471_s8  ;;  %862 = vrot.lane.b32.xlu1 %v719_v14, %s8471_s8  ;;  %v1255_v11 = vld [vmem:[%s8537_s29 + $0x41] sm:$0xff] }
  0xd0   : > { %v556_v28 = vpop.permute.xlu0 %555  ;;  %v558_v37 = vpop.permute.xlu1 %557 }
  0xd1   : > { %662 = vst.msk [vmem:[#allocation3 + $0x130] sm:$0xff] %vm623_vm1, %v556_v28  ;;  %663 = vst.msk [vmem:[#allocation3 + $0x138] sm:$0xff] %vm623_vm1, %v558_v37  ;;  %v1257_v28 = vld [vmem:[%s8537_s29 + $0x51] sm:$0xff] }
  0xd2   : > { %1057 = vrot.lane.b32.xlu0 %v8572_v17, %s8472_s9  ;;  %1059 = vrot.lane.b32.xlu1 %v8577_v18, %s8472_s9 }
  0xd4   : > { %v560_v44 = vpop.permute.xlu0 %559  ;;  %v562_v51 = vpop.permute.xlu1 %561 }
  0xd5   : > { %664 = vst.msk [vmem:[#allocation3 + $0x140] sm:$0xff] %vm623_vm1, %v560_v44  ;;  %665 = vst.msk [vmem:[#allocation3 + $0x148] sm:$0xff] %vm623_vm1, %v562_v51  ;;  %v1258_v51 = vld [vmem:[%s8537_s29 + $0x59] sm:$0xff] }
  0xd6   : > { %1061 = vrot.lane.b32.xlu0 %v8580_v19, %s8472_s9  ;;  %1063 = vrot.lane.b32.xlu1 %v8589_v20, %s8472_s9 }
  0xd8   : > { %v564_v54 = vpop.permute.xlu0 %563  ;;  %v566_v55 = vpop.permute.xlu1 %565 }
  0xd9   : > { %666 = vst.msk [vmem:[#allocation3 + $0x150] sm:$0xff] %vm623_vm1, %v564_v54  ;;  %667 = vst.msk [vmem:[#allocation3 + $0x158] sm:$0xff] %vm623_vm1, %v566_v55  ;;  %v1259_v54 = vld [vmem:[%s8537_s29 + $0x61] sm:$0xff] }
  0xda   : > { %1065 = vrot.lane.b32.xlu0 %v8596_v23, %s8472_s9  ;;  %1067 = vrot.lane.b32.xlu1 %v8601_v24, %s8472_s9 }
  0xdc   : > { %v568_v17 = vpop.permute.xlu0 %567  ;;  %v570_v18 = vpop.permute.xlu1 %569 }
  0xdd   : > { %668 = vst.msk [vmem:[#allocation3 + $0x160] sm:$0xff] %vm623_vm1, %v568_v17  ;;  %669 = vst.msk [vmem:[#allocation3 + $0x168] sm:$0xff] %vm623_vm1, %v570_v18  ;;  %v1260_v18 = vld [vmem:[%s8537_s29 + $0x69] sm:$0xff] }
  0xde   : > { %1069 = vrot.lane.b32.xlu0 %v8604_v25, %s8472_s9  ;;  %1071 = vrot.lane.b32.xlu1 %v8611_v26, %s8472_s9 }
  0xe0   : > { %v572_v19 = vpop.permute.xlu0 %571  ;;  %v574_v20 = vpop.permute.xlu1 %573 }
  0xe1   : > { %670 = vst.msk [vmem:[#allocation3 + $0x170] sm:$0xff] %vm623_vm1, %v572_v19  ;;  %671 = vst.msk [vmem:[#allocation3 + $0x178] sm:$0xff] %vm623_vm1, %v574_v20  ;;  %v1261_v19 = vld [vmem:[%s8537_s29 + $0x71] sm:$0xff] }
  0xe2   : > { %1073 = vrot.lane.b32.xlu0 %v8614_v27, %s8472_s9  ;;  %1075 = vrot.lane.b32.xlu1 %v8625_v30, %s8472_s9 }
  0xe4   : > { %v769_v23 = vpop.permute.xlu0 %768  ;;  %v771_v24 = vpop.permute.xlu1 %770 }
  0xe5   : > { %913 = vst.msk [vmem:[#allocation3] sm:$0xff] %vm912_vm2, %v769_v23  ;;  %914 = vst.msk [vmem:[#allocation3 + $0x8] sm:$0xff] %vm912_vm2, %v771_v24  ;;  %v1262_v24 = vld [vmem:[%s8537_s29 + $0x79] sm:$0xff] }
  0xe6   : > { %1077 = vrot.lane.b32.xlu0 %v8628_v31, %s8472_s9  ;;  %1079 = vrot.lane.b32.xlu1 %v8635_v32, %s8472_s9 }
  0xe8   : > { %v773_v25 = vpop.permute.xlu0 %772  ;;  %v775_v26 = vpop.permute.xlu1 %774 }
  0xe9   : > { %915 = vst.msk [vmem:[#allocation3 + $0x10] sm:$0xff] %vm912_vm2, %v773_v25  ;;  %916 = vst.msk [vmem:[#allocation3 + $0x18] sm:$0xff] %vm912_vm2, %v775_v26  ;;  %v1263_v25 = vld [vmem:[%s8537_s29 + $0x81] sm:$0xff] }
  0xea   : > { %1081 = vrot.lane.b32.xlu0 %v8638_v33, %s8472_s9  ;;  %1083 = vrot.lane.b32.xlu1 %v8645_v34, %s8472_s9 }
  0xec   : > { %v777_v27 = vpop.permute.xlu0 %776  ;;  %v779_v30 = vpop.permute.xlu1 %778 }
  0xed   : > { %917 = vst.msk [vmem:[#allocation3 + $0x20] sm:$0xff] %vm912_vm2, %v777_v27  ;;  %918 = vst.msk [vmem:[#allocation3 + $0x28] sm:$0xff] %vm912_vm2, %v779_v30  ;;  %v1264_v30 = vld [vmem:[%s8537_s29 + $0x89] sm:$0xff] }
  0xee   : > { %1085 = vrot.lane.b32.xlu0 %v8653_v36, %s8472_s9  ;;  %1087 = vrot.lane.b32.xlu1 %v8659_v38, %s8472_s9 }
  0xf0   : > { %v781_v31 = vpop.permute.xlu0 %780  ;;  %v783_v32 = vpop.permute.xlu1 %782 }
  0xf1   : > { %919 = vst.msk [vmem:[#allocation3 + $0x30] sm:$0xff] %vm912_vm2, %v781_v31  ;;  %920 = vst.msk [vmem:[#allocation3 + $0x38] sm:$0xff] %vm912_vm2, %v783_v32  ;;  %v1265_v31 = vld [vmem:[%s8537_s29 + $0x91] sm:$0xff] }
  0xf2   : > { %1089 = vrot.lane.b32.xlu0 %v8662_v39, %s8472_s9  ;;  %1091 = vrot.lane.b32.xlu1 %v8669_v40, %s8472_s9 }
  0xf4   : > { %v785_v33 = vpop.permute.xlu0 %784  ;;  %v787_v34 = vpop.permute.xlu1 %786 }
  0xf5   : > { %921 = vst.msk [vmem:[#allocation3 + $0x40] sm:$0xff] %vm912_vm2, %v785_v33  ;;  %922 = vst.msk [vmem:[#allocation3 + $0x48] sm:$0xff] %vm912_vm2, %v787_v34  ;;  %v1266_v34 = vld [vmem:[%s8537_s29 + $0x99] sm:$0xff] }
  0xf6   : > { %1093 = vrot.lane.b32.xlu0 %v8674_v41, %s8472_s9  ;;  %1095 = vrot.lane.b32.xlu1 %v8681_v42, %s8472_s9 }
  0xf8   : > { %v789_v36 = vpop.permute.xlu0 %788  ;;  %v791_v38 = vpop.permute.xlu1 %790 }
  0xf9   : > { %923 = vst.msk [vmem:[#allocation3 + $0x50] sm:$0xff] %vm912_vm2, %v789_v36  ;;  %924 = vst.msk [vmem:[#allocation3 + $0x58] sm:$0xff] %vm912_vm2, %v791_v38  ;;  %v1267_v36 = vld [vmem:[%s8537_s29 + $0xa1] sm:$0xff] }
  0xfa   : > { %1097 = vrot.lane.b32.xlu0 %v8684_v43, %s8472_s9  ;;  %1099 = vrot.lane.b32.xlu1 %v8693_v46, %s8472_s9 }
  0xfc   : > { %v793_v39 = vpop.permute.xlu0 %792  ;;  %v795_v40 = vpop.permute.xlu1 %794 }
  0xfd   : > { %925 = vst.msk [vmem:[#allocation3 + $0x60] sm:$0xff] %vm912_vm2, %v793_v39  ;;  %926 = vst.msk [vmem:[#allocation3 + $0x68] sm:$0xff] %vm912_vm2, %v795_v40  ;;  %v1268_v40 = vld [vmem:[%s8537_s29 + $0xa9] sm:$0xff] }
  0xfe   : > { %1101 = vrot.lane.b32.xlu0 %v8698_v47, %s8472_s9  ;;  %1103 = vrot.lane.b32.xlu1 %v8703_v48, %s8472_s9 }
 0x100   : > { %v797_v41 = vpop.permute.xlu0 %796  ;;  %v799_v42 = vpop.permute.xlu1 %798 }
 0x101   : > { %927 = vst.msk [vmem:[#allocation3 + $0x70] sm:$0xff] %vm912_vm2, %v797_v41  ;;  %928 = vst.msk [vmem:[#allocation3 + $0x78] sm:$0xff] %vm912_vm2, %v799_v42  ;;  %v1269_v41 = vld [vmem:[%s8537_s29 + $0xb1] sm:$0xff] }
 0x102   : > { %1105 = vrot.lane.b32.xlu0 %v8706_v49, %s8472_s9  ;;  %1107 = vrot.lane.b32.xlu1 %v8717_v52, %s8472_s9 }
 0x104   : > { %v801_v43 = vpop.permute.xlu0 %800  ;;  %v803_v46 = vpop.permute.xlu1 %802 }
 0x105   : > { %929 = vst.msk [vmem:[#allocation3 + $0x80] sm:$0xff] %vm912_vm2, %v801_v43  ;;  %930 = vst.msk [vmem:[#allocation3 + $0x88] sm:$0xff] %vm912_vm2, %v803_v46  ;;  %v1270_v46 = vld [vmem:[%s8537_s29 + $0xb9] sm:$0xff] }
 0x106   : > { %1109 = vrot.lane.b32.xlu0 %v8722_v53, %s8472_s9  ;;  %1111 = vrot.lane.b32.xlu1 %v8731_v56, %s8472_s9 }
 0x108   : > { %v805_v47 = vpop.permute.xlu0 %804  ;;  %v807_v48 = vpop.permute.xlu1 %806 }
 0x109   : > { %931 = vst.msk [vmem:[#allocation3 + $0x90] sm:$0xff] %vm912_vm2, %v805_v47  ;;  %932 = vst.msk [vmem:[#allocation3 + $0x98] sm:$0xff] %vm912_vm2, %v807_v48  ;;  %v1271_v47 = vld [vmem:[%s8537_s29 + $0xc1] sm:$0xff] }
 0x10a   : > { %1113 = vrot.lane.b32.xlu0 %v8736_v57, %s8472_s9  ;;  %1115 = vrot.lane.b32.xlu1 %v8745_v60, %s8472_s9 }
 0x10c   : > { %v809_v49 = vpop.permute.xlu0 %808  ;;  %v811_v52 = vpop.permute.xlu1 %810 }
 0x10d   : > { %933 = vst.msk [vmem:[#allocation3 + $0xa0] sm:$0xff] %vm912_vm2, %v809_v49  ;;  %934 = vst.msk [vmem:[#allocation3 + $0xa8] sm:$0xff] %vm912_vm2, %v811_v52  ;;  %v1272_v52 = vld [vmem:[%s8537_s29 + $0xc9] sm:$0xff] }
 0x10e   : > { %1117 = vrot.lane.b32.xlu0 %v8750_v61, %s8472_s9  ;;  %1119 = vrot.lane.b32.xlu1 %v8759_v0, %s8472_s9 }
 0x110   : > { %v813_v53 = vpop.permute.xlu0 %812  ;;  %v815_v56 = vpop.permute.xlu1 %814 }
 0x111   : > { %935 = vst.msk [vmem:[#allocation3 + $0xb0] sm:$0xff] %vm912_vm2, %v813_v53  ;;  %936 = vst.msk [vmem:[#allocation3 + $0xb8] sm:$0xff] %vm912_vm2, %v815_v56  ;;  %v1273_v53 = vld [vmem:[%s8537_s29 + $0xd1] sm:$0xff] }
 0x112   : > { %1121 = vrot.lane.b32.xlu0 %v8764_v1, %s8472_s9  ;;  %1123 = vrot.lane.b32.xlu1 %v8773_v4, %s8472_s9 }
 0x114   : > { %v817_v57 = vpop.permute.xlu0 %816  ;;  %v819_v60 = vpop.permute.xlu1 %818 }
 0x115   : > { %937 = vst.msk [vmem:[#allocation3 + $0xc0] sm:$0xff] %vm912_vm2, %v817_v57  ;;  %938 = vst.msk [vmem:[#allocation3 + $0xc8] sm:$0xff] %vm912_vm2, %v819_v60  ;;  %v1274_v60 = vld [vmem:[%s8537_s29 + $0xd9] sm:$0xff] }
 0x116   : > { %1125 = vrot.lane.b32.xlu0 %v8778_v5, %s8472_s9  ;;  %1127 = vrot.lane.b32.xlu1 %v8787_v8, %s8472_s9 }
 0x118   : > { %v821_v61 = vpop.permute.xlu0 %820  ;;  %v823_v0 = vpop.permute.xlu1 %822 }
 0x119   : > { %939 = vst.msk [vmem:[#allocation3 + $0xd0] sm:$0xff] %vm912_vm2, %v821_v61  ;;  %940 = vst.msk [vmem:[#allocation3 + $0xd8] sm:$0xff] %vm912_vm2, %v823_v0  ;;  %v1275_v61 = vld [vmem:[%s8537_s29 + $0xe1] sm:$0xff] }
 0x11a   : > { %1129 = vrot.lane.b32.xlu0 %v8792_v9, %s8472_s9  ;;  %1131 = vrot.lane.b32.xlu1 %v8801_v12, %s8472_s9 }
 0x11c   : > { %v825_v1 = vpop.permute.xlu0 %824  ;;  %v827_v4 = vpop.permute.xlu1 %826 }
 0x11d   : > { %941 = vst.msk [vmem:[#allocation3 + $0xe0] sm:$0xff] %vm912_vm2, %v825_v1  ;;  %942 = vst.msk [vmem:[#allocation3 + $0xe8] sm:$0xff] %vm912_vm2, %v827_v4  ;;  %v1276_v4 = vld [vmem:[%s8537_s29 + $0xe9] sm:$0xff] }
 0x11e   : > { %1133 = vrot.lane.b32.xlu0 %v8806_v13, %s8472_s9  ;;  %1135 = vrot.lane.b32.xlu1 %v8815_v16, %s8472_s9  ;;  %v1006_v13 = vld [vmem:[%s8537_s29 + $0x180] sm:$0xff] }
 0x120   : > { %v829_v5 = vpop.permute.xlu0 %828  ;;  %v831_v8 = vpop.permute.xlu1 %830 }
 0x121   : > { %943 = vst.msk [vmem:[#allocation3 + $0xf0] sm:$0xff] %vm912_vm2, %v829_v5  ;;  %944 = vst.msk [vmem:[#allocation3 + $0xf8] sm:$0xff] %vm912_vm2, %v831_v8  ;;  %v1277_v5 = vld [vmem:[%s8537_s29 + $0xf1] sm:$0xff] }
 0x122   : > { %1137 = vrot.lane.b32.xlu0 %v8820_v21, %s8472_s9  ;;  %1139 = vrot.lane.b32.xlu1 %v8829_v29, %s8472_s9  ;;  %v1007_v29 = vld [vmem:[%s8537_s29 + $0x188] sm:$0xff] }
 0x124   : > { %v833_v9 = vpop.permute.xlu0 %832  ;;  %v835_v12 = vpop.permute.xlu1 %834 }
 0x125   : > { %945 = vst.msk [vmem:[#allocation3 + $0x100] sm:$0xff] %vm912_vm2, %v833_v9  ;;  %946 = vst.msk [vmem:[#allocation3 + $0x108] sm:$0xff] %vm912_vm2, %v835_v12  ;;  %v1278_v12 = vld [vmem:[%s8537_s29 + $0xf9] sm:$0xff] }
 0x126   : > { %1141 = vrot.lane.b32.xlu0 %v8834_v35, %s8472_s9  ;;  %1143 = vrot.lane.b32.xlu1 %v8843_v45, %s8472_s9 }
 0x128   : > { %v837_v16 = vpop.permute.xlu0 %836  ;;  %v839_v21 = vpop.permute.xlu1 %838 }
 0x129   : > { %947 = vst.msk [vmem:[#allocation3 + $0x110] sm:$0xff] %vm912_vm2, %v837_v16  ;;  %948 = vst.msk [vmem:[#allocation3 + $0x118] sm:$0xff] %vm912_vm2, %v839_v21 }
 0x12a   : > { %1145 = vrot.lane.b32.xlu0 %v8848_v50, %s8472_s9  ;;  %1147 = vrot.lane.b32.xlu1 %v1006_v13, %s8472_s9  ;;  %v1279_v13 = vld [vmem:[%s8537_s29 + $0x101] sm:$0xff] }
 0x12c   : > { %v841_v35 = vpop.permute.xlu0 %840  ;;  %v843_v45 = vpop.permute.xlu1 %842 }
 0x12d   : > { %949 = vst.msk [vmem:[#allocation3 + $0x120] sm:$0xff] %vm912_vm2, %v841_v35  ;;  %950 = vst.msk [vmem:[#allocation3 + $0x128] sm:$0xff] %vm912_vm2, %v843_v45 }
 0x12e   : > { %1149 = vrot.lane.b32.xlu0 %v1007_v29, %s8472_s9  ;;  %1151 = vrot.lane.b32.xlu1 %v1008_v58, %s8472_s9  ;;  %v1280_v29 = vld [vmem:[%s8537_s29 + $0x109] sm:$0xff]  ;;  %v1281_v58 = vld [vmem:[%s8537_s29 + $0x111] sm:$0xff] }
 0x130   : > { %v845_v50 = vpop.permute.xlu0 %844  ;;  %v847_v63 = vpop.permute.xlu1 %846 }
 0x131   : > { %951 = vst.msk [vmem:[#allocation3 + $0x130] sm:$0xff] %vm912_vm2, %v845_v50  ;;  %952 = vst.msk [vmem:[#allocation3 + $0x138] sm:$0xff] %vm912_vm2, %v847_v63 }
 0x132   : > { %1346 = vrot.lane.b32.xlu0 %v1250_v59, %s8473_s10  ;;  %1348 = vrot.lane.b32.xlu1 %v1251_v62, %s8473_s10  ;;  %v1282_v59 = vld [vmem:[%s8537_s29 + $0x119] sm:$0xff]  ;;  %v1283_v62 = vld [vmem:[%s8537_s29 + $0x121] sm:$0xff] }
 0x134   : > { %v849_v6 = vpop.permute.xlu0 %848  ;;  %v851_v7 = vpop.permute.xlu1 %850 }
 0x135   : > { %953 = vst.msk [vmem:[#allocation3 + $0x140] sm:$0xff] %vm912_vm2, %v849_v6  ;;  %954 = vst.msk [vmem:[#allocation3 + $0x148] sm:$0xff] %vm912_vm2, %v851_v7 }
 0x136   : > { %1350 = vrot.lane.b32.xlu0 %v1252_v2, %s8473_s10  ;;  %1352 = vrot.lane.b32.xlu1 %v1253_v3, %s8473_s10  ;;  %v1284_v2 = vld [vmem:[%s8537_s29 + $0x129] sm:$0xff]  ;;  %v1285_v3 = vld [vmem:[%s8537_s29 + $0x131] sm:$0xff] }
 0x138   : > { %v853_v14 = vpop.permute.xlu0 %852  ;;  %v855_v15 = vpop.permute.xlu1 %854 }
 0x139   : > { %955 = vst.msk [vmem:[#allocation3 + $0x150] sm:$0xff] %vm912_vm2, %v853_v14  ;;  %956 = vst.msk [vmem:[#allocation3 + $0x158] sm:$0xff] %vm912_vm2, %v855_v15 }
 0x13a   : > { %1354 = vrot.lane.b32.xlu0 %v1254_v10, %s8473_s10  ;;  %1356 = vrot.lane.b32.xlu1 %v1255_v11, %s8473_s10  ;;  %v1286_v10 = vld [vmem:[%s8537_s29 + $0x139] sm:$0xff]  ;;  %v1287_v11 = vld [vmem:[%s8537_s29 + $0x141] sm:$0xff] }
 0x13c   : > { %v857_v37 = vpop.permute.xlu0 %856  ;;  %v859_v44 = vpop.permute.xlu1 %858 }
 0x13d   : > { %957 = vst.msk [vmem:[#allocation3 + $0x160] sm:$0xff] %vm912_vm2, %v857_v37  ;;  %958 = vst.msk [vmem:[#allocation3 + $0x168] sm:$0xff] %vm912_vm2, %v859_v44 }
 0x13e   : > { %1358 = vrot.lane.b32.xlu0 %v1256_v22, %s8473_s10  ;;  %1360 = vrot.lane.b32.xlu1 %v1257_v28, %s8473_s10  ;;  %v1288_v22 = vld [vmem:[%s8537_s29 + $0x149] sm:$0xff]  ;;  %v1289_v28 = vld [vmem:[%s8537_s29 + $0x151] sm:$0xff] }
 0x140   : > { %v861_v55 = vpop.permute.xlu0 %860  ;;  %v863_v17 = vpop.permute.xlu1 %862 }
 0x141   : > { %959 = vst.msk [vmem:[#allocation3 + $0x170] sm:$0xff] %vm912_vm2, %v861_v55  ;;  %960 = vst.msk [vmem:[#allocation3 + $0x178] sm:$0xff] %vm912_vm2, %v863_v17 }
 0x142   : > { %1362 = vrot.lane.b32.xlu0 %v1258_v51, %s8473_s10  ;;  %1364 = vrot.lane.b32.xlu1 %v1259_v54, %s8473_s10  ;;  %v1290_v51 = vld [vmem:[%s8537_s29 + $0x159] sm:$0xff]  ;;  %v1291_v54 = vld [vmem:[%s8537_s29 + $0x161] sm:$0xff] }
 0x144   : > { %v1058_v20 = vpop.permute.xlu0 %1057  ;;  %v1060_v23 = vpop.permute.xlu1 %1059 }
 0x145   : > { %1202 = vst.msk [vmem:[#allocation3] sm:$0xff] %vm1201_vm3, %v1058_v20  ;;  %1203 = vst.msk [vmem:[#allocation3 + $0x8] sm:$0xff] %vm1201_vm3, %v1060_v23 }
 0x146   : > { %1366 = vrot.lane.b32.xlu0 %v1260_v18, %s8473_s10  ;;  %1368 = vrot.lane.b32.xlu1 %v1261_v19, %s8473_s10  ;;  %v1292_v18 = vld [vmem:[%s8537_s29 + $0x169] sm:$0xff]  ;;  %v1293_v19 = vld [vmem:[%s8537_s29 + $0x171] sm:$0xff] }
 0x148   : > { %v1062_v26 = vpop.permute.xlu0 %1061  ;;  %v1064_v27 = vpop.permute.xlu1 %1063 }
 0x149   : > { %1204 = vst.msk [vmem:[#allocation3 + $0x10] sm:$0xff] %vm1201_vm3, %v1062_v26  ;;  %1205 = vst.msk [vmem:[#allocation3 + $0x18] sm:$0xff] %vm1201_vm3, %v1064_v27 }
 0x14a   : > { %1370 = vrot.lane.b32.xlu0 %v1262_v24, %s8473_s10  ;;  %1372 = vrot.lane.b32.xlu1 %v1263_v25, %s8473_s10  ;;  %v1294_v24 = vld [vmem:[%s8537_s29 + $0x179] sm:$0xff]  ;;  %v1295_v25 = vld [vmem:[%s8537_s29 + $0x181] sm:$0xff] }
 0x14c   : > { %v1066_v32 = vpop.permute.xlu0 %1065  ;;  %v1068_v33 = vpop.permute.xlu1 %1067 }
 0x14d   : > { %1206 = vst.msk [vmem:[#allocation3 + $0x20] sm:$0xff] %vm1201_vm3, %v1066_v32  ;;  %1207 = vst.msk [vmem:[#allocation3 + $0x28] sm:$0xff] %vm1201_vm3, %v1068_v33 }
 0x14e   : > { %1374 = vrot.lane.b32.xlu0 %v1264_v30, %s8473_s10  ;;  %1376 = vrot.lane.b32.xlu1 %v1265_v31, %s8473_s10  ;;  %v1296_v30 = vld [vmem:[%s8537_s29 + $0x189] sm:$0xff]  ;;  %v1297_v31 = vld [vmem:[%s8537_s29 + $0x191] sm:$0xff] }
 0x150   : > { %v1070_v38 = vpop.permute.xlu0 %1069  ;;  %v1072_v39 = vpop.permute.xlu1 %1071 }
 0x151   : > { %1208 = vst.msk [vmem:[#allocation3 + $0x30] sm:$0xff] %vm1201_vm3, %v1070_v38  ;;  %1209 = vst.msk [vmem:[#allocation3 + $0x38] sm:$0xff] %vm1201_vm3, %v1072_v39 }
 0x152   : > { %1378 = vrot.lane.b32.xlu0 %v1266_v34, %s8473_s10  ;;  %1380 = vrot.lane.b32.xlu1 %v1267_v36, %s8473_s10  ;;  %v1539_v34 = vld [vmem:[%s8537_s29 + $0x1a] sm:$0xff]  ;;  %v1540_v36 = vld [vmem:[%s8537_s29 + $0x22] sm:$0xff] }
 0x154   : > { %v1074_v42 = vpop.permute.xlu0 %1073  ;;  %v1076_v43 = vpop.permute.xlu1 %1075 }
 0x155   : > { %1210 = vst.msk [vmem:[#allocation3 + $0x40] sm:$0xff] %vm1201_vm3, %v1074_v42  ;;  %1211 = vst.msk [vmem:[#allocation3 + $0x48] sm:$0xff] %vm1201_vm3, %v1076_v43 }
 0x156   : > { %1382 = vrot.lane.b32.xlu0 %v1268_v40, %s8473_s10  ;;  %1384 = vrot.lane.b32.xlu1 %v1269_v41, %s8473_s10  ;;  %v1541_v40 = vld [vmem:[%s8537_s29 + $0x2a] sm:$0xff]  ;;  %v1542_v41 = vld [vmem:[%s8537_s29 + $0x32] sm:$0xff] }
 0x158   : > { %v1078_v48 = vpop.permute.xlu0 %1077  ;;  %v1080_v49 = vpop.permute.xlu1 %1079 }
 0x159   : > { %1212 = vst.msk [vmem:[#allocation3 + $0x50] sm:$0xff] %vm1201_vm3, %v1078_v48  ;;  %1213 = vst.msk [vmem:[#allocation3 + $0x58] sm:$0xff] %vm1201_vm3, %v1080_v49 }
 0x15a   : > { %1386 = vrot.lane.b32.xlu0 %v1270_v46, %s8473_s10  ;;  %1388 = vrot.lane.b32.xlu1 %v1271_v47, %s8473_s10  ;;  %v1543_v46 = vld [vmem:[%s8537_s29 + $0x3a] sm:$0xff]  ;;  %v1544_v47 = vld [vmem:[%s8537_s29 + $0x42] sm:$0xff] }
 0x15c   : > { %v1082_v56 = vpop.permute.xlu0 %1081  ;;  %v1084_v57 = vpop.permute.xlu1 %1083 }
 0x15d   : > { %1214 = vst.msk [vmem:[#allocation3 + $0x60] sm:$0xff] %vm1201_vm3, %v1082_v56  ;;  %1215 = vst.msk [vmem:[#allocation3 + $0x68] sm:$0xff] %vm1201_vm3, %v1084_v57 }
 0x15e   : > { %1390 = vrot.lane.b32.xlu0 %v1272_v52, %s8473_s10  ;;  %1392 = vrot.lane.b32.xlu1 %v1273_v53, %s8473_s10  ;;  %v1545_v52 = vld [vmem:[%s8537_s29 + $0x4a] sm:$0xff]  ;;  %v1546_v53 = vld [vmem:[%s8537_s29 + $0x52] sm:$0xff] }
 0x160   : > { %v1086_v0 = vpop.permute.xlu0 %1085  ;;  %v1088_v1 = vpop.permute.xlu1 %1087 }
 0x161   : > { %1216 = vst.msk [vmem:[#allocation3 + $0x70] sm:$0xff] %vm1201_vm3, %v1086_v0  ;;  %1217 = vst.msk [vmem:[#allocation3 + $0x78] sm:$0xff] %vm1201_vm3, %v1088_v1 }
 0x162   : > { %1394 = vrot.lane.b32.xlu0 %v1274_v60, %s8473_s10  ;;  %1396 = vrot.lane.b32.xlu1 %v1275_v61, %s8473_s10  ;;  %v1547_v60 = vld [vmem:[%s8537_s29 + $0x5a] sm:$0xff]  ;;  %v1548_v61 = vld [vmem:[%s8537_s29 + $0x62] sm:$0xff] }
 0x164   : > { %v1090_v8 = vpop.permute.xlu0 %1089  ;;  %v1092_v9 = vpop.permute.xlu1 %1091 }
 0x165   : > { %1218 = vst.msk [vmem:[#allocation3 + $0x80] sm:$0xff] %vm1201_vm3, %v1090_v8  ;;  %1219 = vst.msk [vmem:[#allocation3 + $0x88] sm:$0xff] %vm1201_vm3, %v1092_v9 }
 0x166   : > { %1398 = vrot.lane.b32.xlu0 %v1276_v4, %s8473_s10  ;;  %1400 = vrot.lane.b32.xlu1 %v1277_v5, %s8473_s10  ;;  %v1549_v4 = vld [vmem:[%s8537_s29 + $0x6a] sm:$0xff]  ;;  %v1550_v5 = vld [vmem:[%s8537_s29 + $0x72] sm:$0xff] }
 0x168   : > { %v1094_v16 = vpop.permute.xlu0 %1093  ;;  %v1096_v21 = vpop.permute.xlu1 %1095 }
 0x169   : > { %1220 = vst.msk [vmem:[#allocation3 + $0x90] sm:$0xff] %vm1201_vm3, %v1094_v16  ;;  %1221 = vst.msk [vmem:[#allocation3 + $0x98] sm:$0xff] %vm1201_vm3, %v1096_v21 }
 0x16a   : > { %1402 = vrot.lane.b32.xlu0 %v1278_v12, %s8473_s10  ;;  %1404 = vrot.lane.b32.xlu1 %v1279_v13, %s8473_s10  ;;  %v1551_v12 = vld [vmem:[%s8537_s29 + $0x7a] sm:$0xff]  ;;  %v1552_v13 = vld [vmem:[%s8537_s29 + $0x82] sm:$0xff] }
 0x16c   : > { %v1098_v35 = vpop.permute.xlu0 %1097  ;;  %v1100_v45 = vpop.permute.xlu1 %1099 }
 0x16d   : > { %1222 = vst.msk [vmem:[#allocation3 + $0xa0] sm:$0xff] %vm1201_vm3, %v1098_v35  ;;  %1223 = vst.msk [vmem:[#allocation3 + $0xa8] sm:$0xff] %vm1201_vm3, %v1100_v45 }
 0x16e   : > { %1406 = vrot.lane.b32.xlu0 %v1280_v29, %s8473_s10  ;;  %1408 = vrot.lane.b32.xlu1 %v1281_v58, %s8473_s10  ;;  %v1553_v29 = vld [vmem:[%s8537_s29 + $0x8a] sm:$0xff]  ;;  %v1554_v58 = vld [vmem:[%s8537_s29 + $0x92] sm:$0xff] }
 0x170   : > { %v1102_v50 = vpop.permute.xlu0 %1101  ;;  %v1104_v63 = vpop.permute.xlu1 %1103 }
 0x171   : > { %1224 = vst.msk [vmem:[#allocation3 + $0xb0] sm:$0xff] %vm1201_vm3, %v1102_v50  ;;  %1225 = vst.msk [vmem:[#allocation3 + $0xb8] sm:$0xff] %vm1201_vm3, %v1104_v63 }
 0x172   : > { %1410 = vrot.lane.b32.xlu0 %v1282_v59, %s8473_s10  ;;  %1412 = vrot.lane.b32.xlu1 %v1283_v62, %s8473_s10  ;;  %v1555_v59 = vld [vmem:[%s8537_s29 + $0x9a] sm:$0xff]  ;;  %v1556_v62 = vld [vmem:[%s8537_s29 + $0xa2] sm:$0xff] }
 0x174   : > { %v1106_v6 = vpop.permute.xlu0 %1105  ;;  %v1108_v7 = vpop.permute.xlu1 %1107 }
 0x175   : > { %1226 = vst.msk [vmem:[#allocation3 + $0xc0] sm:$0xff] %vm1201_vm3, %v1106_v6  ;;  %1227 = vst.msk [vmem:[#allocation3 + $0xc8] sm:$0xff] %vm1201_vm3, %v1108_v7 }
 0x176   : > { %1414 = vrot.lane.b32.xlu0 %v1284_v2, %s8473_s10  ;;  %1416 = vrot.lane.b32.xlu1 %v1285_v3, %s8473_s10  ;;  %v1557_v2 = vld [vmem:[%s8537_s29 + $0xaa] sm:$0xff]  ;;  %v1558_v3 = vld [vmem:[%s8537_s29 + $0xb2] sm:$0xff] }
 0x178   : > { %v1110_v14 = vpop.permute.xlu0 %1109  ;;  %v1112_v15 = vpop.permute.xlu1 %1111 }
 0x179   : > { %1228 = vst.msk [vmem:[#allocation3 + $0xd0] sm:$0xff] %vm1201_vm3, %v1110_v14  ;;  %1229 = vst.msk [vmem:[#allocation3 + $0xd8] sm:$0xff] %vm1201_vm3, %v1112_v15 }
 0x17a   : > { %1418 = vrot.lane.b32.xlu0 %v1286_v10, %s8473_s10  ;;  %1420 = vrot.lane.b32.xlu1 %v1287_v11, %s8473_s10  ;;  %v1559_v10 = vld [vmem:[%s8537_s29 + $0xba] sm:$0xff]  ;;  %v1560_v11 = vld [vmem:[%s8537_s29 + $0xc2] sm:$0xff] }
 0x17c   : > { %v1114_v37 = vpop.permute.xlu0 %1113  ;;  %v1116_v44 = vpop.permute.xlu1 %1115 }
 0x17d   : > { %1230 = vst.msk [vmem:[#allocation3 + $0xe0] sm:$0xff] %vm1201_vm3, %v1114_v37  ;;  %1231 = vst.msk [vmem:[#allocation3 + $0xe8] sm:$0xff] %vm1201_vm3, %v1116_v44 }
 0x17e   : > { %1422 = vrot.lane.b32.xlu0 %v1288_v22, %s8473_s10  ;;  %1424 = vrot.lane.b32.xlu1 %v1289_v28, %s8473_s10  ;;  %v1561_v22 = vld [vmem:[%s8537_s29 + $0xca] sm:$0xff]  ;;  %v1562_v28 = vld [vmem:[%s8537_s29 + $0xd2] sm:$0xff] }
 0x180   : > { %v1118_v55 = vpop.permute.xlu0 %1117  ;;  %v1120_v17 = vpop.permute.xlu1 %1119 }
 0x181   : > { %1232 = vst.msk [vmem:[#allocation3 + $0xf0] sm:$0xff] %vm1201_vm3, %v1118_v55  ;;  %1233 = vst.msk [vmem:[#allocation3 + $0xf8] sm:$0xff] %vm1201_vm3, %v1120_v17 }
 0x182   : > { %1426 = vrot.lane.b32.xlu0 %v1290_v51, %s8473_s10  ;;  %1428 = vrot.lane.b32.xlu1 %v1291_v54, %s8473_s10  ;;  %v1563_v51 = vld [vmem:[%s8537_s29 + $0xda] sm:$0xff]  ;;  %v1564_v54 = vld [vmem:[%s8537_s29 + $0xe2] sm:$0xff] }
 0x184   : > { %v1122_v20 = vpop.permute.xlu0 %1121  ;;  %v1124_v23 = vpop.permute.xlu1 %1123 }
 0x185   : > { %1234 = vst.msk [vmem:[#allocation3 + $0x100] sm:$0xff] %vm1201_vm3, %v1122_v20  ;;  %1235 = vst.msk [vmem:[#allocation3 + $0x108] sm:$0xff] %vm1201_vm3, %v1124_v23 }
 0x186   : > { %1430 = vrot.lane.b32.xlu0 %v1292_v18, %s8473_s10  ;;  %1432 = vrot.lane.b32.xlu1 %v1293_v19, %s8473_s10  ;;  %v1565_v18 = vld [vmem:[%s8537_s29 + $0xea] sm:$0xff]  ;;  %v1566_v19 = vld [vmem:[%s8537_s29 + $0xf2] sm:$0xff] }
 0x188   : > { %v1126_v26 = vpop.permute.xlu0 %1125  ;;  %v1128_v27 = vpop.permute.xlu1 %1127 }
 0x189   : > { %1236 = vst.msk [vmem:[#allocation3 + $0x110] sm:$0xff] %vm1201_vm3, %v1126_v26  ;;  %1237 = vst.msk [vmem:[#allocation3 + $0x118] sm:$0xff] %vm1201_vm3, %v1128_v27 }
 0x18a   : > { %1434 = vrot.lane.b32.xlu0 %v1294_v24, %s8473_s10  ;;  %1436 = vrot.lane.b32.xlu1 %v1295_v25, %s8473_s10  ;;  %v1567_v24 = vld [vmem:[%s8537_s29 + $0xfa] sm:$0xff]  ;;  %v1568_v25 = vld [vmem:[%s8537_s29 + $0x102] sm:$0xff] }
 0x18c   : > { %v1130_v32 = vpop.permute.xlu0 %1129  ;;  %v1132_v33 = vpop.permute.xlu1 %1131 }
 0x18d   : > { %1238 = vst.msk [vmem:[#allocation3 + $0x120] sm:$0xff] %vm1201_vm3, %v1130_v32  ;;  %1239 = vst.msk [vmem:[#allocation3 + $0x128] sm:$0xff] %vm1201_vm3, %v1132_v33 }
 0x18e   : > { %1438 = vrot.lane.b32.xlu0 %v1296_v30, %s8473_s10  ;;  %1440 = vrot.lane.b32.xlu1 %v1297_v31, %s8473_s10  ;;  %v1569_v30 = vld [vmem:[%s8537_s29 + $0x10a] sm:$0xff]  ;;  %v1570_v31 = vld [vmem:[%s8537_s29 + $0x112] sm:$0xff] }
 0x190   : > { %v1134_v38 = vpop.permute.xlu0 %1133  ;;  %v1136_v39 = vpop.permute.xlu1 %1135 }
 0x191   : > { %1240 = vst.msk [vmem:[#allocation3 + $0x130] sm:$0xff] %vm1201_vm3, %v1134_v38  ;;  %1241 = vst.msk [vmem:[#allocation3 + $0x138] sm:$0xff] %vm1201_vm3, %v1136_v39 }
 0x192   : > { %1635 = vrot.lane.b32.xlu0 %v1539_v34, %s8474_s11  ;;  %1637 = vrot.lane.b32.xlu1 %v1540_v36, %s8474_s11  ;;  %v1571_v34 = vld [vmem:[%s8537_s29 + $0x11a] sm:$0xff]  ;;  %v1572_v36 = vld [vmem:[%s8537_s29 + $0x122] sm:$0xff] }
 0x194   : > { %v1138_v42 = vpop.permute.xlu0 %1137  ;;  %v1140_v43 = vpop.permute.xlu1 %1139 }
 0x195   : > { %1242 = vst.msk [vmem:[#allocation3 + $0x140] sm:$0xff] %vm1201_vm3, %v1138_v42  ;;  %1243 = vst.msk [vmem:[#allocation3 + $0x148] sm:$0xff] %vm1201_vm3, %v1140_v43 }
 0x196   : > { %1639 = vrot.lane.b32.xlu0 %v1541_v40, %s8474_s11  ;;  %1641 = vrot.lane.b32.xlu1 %v1542_v41, %s8474_s11  ;;  %v1573_v40 = vld [vmem:[%s8537_s29 + $0x12a] sm:$0xff]  ;;  %v1574_v41 = vld [vmem:[%s8537_s29 + $0x132] sm:$0xff] }
 0x198   : > { %v1142_v48 = vpop.permute.xlu0 %1141  ;;  %v1144_v49 = vpop.permute.xlu1 %1143 }
 0x199   : > { %1244 = vst.msk [vmem:[#allocation3 + $0x150] sm:$0xff] %vm1201_vm3, %v1142_v48  ;;  %1245 = vst.msk [vmem:[#allocation3 + $0x158] sm:$0xff] %vm1201_vm3, %v1144_v49 }
 0x19a   : > { %1643 = vrot.lane.b32.xlu0 %v1543_v46, %s8474_s11  ;;  %1645 = vrot.lane.b32.xlu1 %v1544_v47, %s8474_s11  ;;  %v1575_v46 = vld [vmem:[%s8537_s29 + $0x13a] sm:$0xff]  ;;  %v1576_v47 = vld [vmem:[%s8537_s29 + $0x142] sm:$0xff] }
 0x19c   : > { %v1146_v56 = vpop.permute.xlu0 %1145  ;;  %v1148_v57 = vpop.permute.xlu1 %1147 }
 0x19d   : > { %1246 = vst.msk [vmem:[#allocation3 + $0x160] sm:$0xff] %vm1201_vm3, %v1146_v56  ;;  %1247 = vst.msk [vmem:[#allocation3 + $0x168] sm:$0xff] %vm1201_vm3, %v1148_v57 }
 0x19e   : > { %1647 = vrot.lane.b32.xlu0 %v1545_v52, %s8474_s11  ;;  %1649 = vrot.lane.b32.xlu1 %v1546_v53, %s8474_s11  ;;  %v1577_v52 = vld [vmem:[%s8537_s29 + $0x14a] sm:$0xff]  ;;  %v1578_v53 = vld [vmem:[%s8537_s29 + $0x152] sm:$0xff] }
 0x1a0   : > { %v1150_v0 = vpop.permute.xlu0 %1149  ;;  %v1152_v1 = vpop.permute.xlu1 %1151 }
 0x1a1   : > { %1248 = vst.msk [vmem:[#allocation3 + $0x170] sm:$0xff] %vm1201_vm3, %v1150_v0  ;;  %1249 = vst.msk [vmem:[#allocation3 + $0x178] sm:$0xff] %vm1201_vm3, %v1152_v1 }
 0x1a2   : > { %1651 = vrot.lane.b32.xlu0 %v1547_v60, %s8474_s11  ;;  %1653 = vrot.lane.b32.xlu1 %v1548_v61, %s8474_s11  ;;  %v1579_v60 = vld [vmem:[%s8537_s29 + $0x15a] sm:$0xff]  ;;  %v1580_v61 = vld [vmem:[%s8537_s29 + $0x162] sm:$0xff] }
 0x1a4   : > { %v1347_v8 = vpop.permute.xlu0 %1346  ;;  %v1349_v9 = vpop.permute.xlu1 %1348 }
 0x1a5   : > { %1491 = vst.msk [vmem:[#allocation3] sm:$0xff] %vm1490_vm4, %v1347_v8  ;;  %1492 = vst.msk [vmem:[#allocation3 + $0x8] sm:$0xff] %vm1490_vm4, %v1349_v9 }
 0x1a6   : > { %1655 = vrot.lane.b32.xlu0 %v1549_v4, %s8474_s11  ;;  %1657 = vrot.lane.b32.xlu1 %v1550_v5, %s8474_s11  ;;  %v1581_v4 = vld [vmem:[%s8537_s29 + $0x16a] sm:$0xff]  ;;  %v1582_v5 = vld [vmem:[%s8537_s29 + $0x172] sm:$0xff] }
 0x1a8   : > { %v1351_v16 = vpop.permute.xlu0 %1350  ;;  %v1353_v21 = vpop.permute.xlu1 %1352 }
 0x1a9   : > { %1493 = vst.msk [vmem:[#allocation3 + $0x10] sm:$0xff] %vm1490_vm4, %v1351_v16  ;;  %1494 = vst.msk [vmem:[#allocation3 + $0x18] sm:$0xff] %vm1490_vm4, %v1353_v21 }
 0x1aa   : > { %1659 = vrot.lane.b32.xlu0 %v1551_v12, %s8474_s11  ;;  %1661 = vrot.lane.b32.xlu1 %v1552_v13, %s8474_s11  ;;  %v1583_v12 = vld [vmem:[%s8537_s29 + $0x17a] sm:$0xff]  ;;  %v1584_v13 = vld [vmem:[%s8537_s29 + $0x182] sm:$0xff] }
 0x1ac   : > { %v1355_v35 = vpop.permute.xlu0 %1354  ;;  %v1357_v45 = vpop.permute.xlu1 %1356 }
 0x1ad   : > { %1495 = vst.msk [vmem:[#allocation3 + $0x20] sm:$0xff] %vm1490_vm4, %v1355_v35  ;;  %1496 = vst.msk [vmem:[#allocation3 + $0x28] sm:$0xff] %vm1490_vm4, %v1357_v45 }
 0x1ae   : > { %1663 = vrot.lane.b32.xlu0 %v1553_v29, %s8474_s11  ;;  %1665 = vrot.lane.b32.xlu1 %v1554_v58, %s8474_s11  ;;  %v1585_v29 = vld [vmem:[%s8537_s29 + $0x18a] sm:$0xff]  ;;  %v1586_v58 = vld [vmem:[%s8537_s29 + $0x192] sm:$0xff] }
 0x1b0   : > { %v1359_v50 = vpop.permute.xlu0 %1358  ;;  %v1361_v63 = vpop.permute.xlu1 %1360 }
 0x1b1   : > { %1497 = vst.msk [vmem:[#allocation3 + $0x30] sm:$0xff] %vm1490_vm4, %v1359_v50  ;;  %1498 = vst.msk [vmem:[#allocation3 + $0x38] sm:$0xff] %vm1490_vm4, %v1361_v63 }
 0x1b2   : > { %1667 = vrot.lane.b32.xlu0 %v1555_v59, %s8474_s11  ;;  %1669 = vrot.lane.b32.xlu1 %v1556_v62, %s8474_s11  ;;  %v1828_v59 = vld [vmem:[%s8537_s29 + $0x30] sm:$0xff]  ;;  %v1829_v62 = vld [vmem:[%s8537_s29 + $0x38] sm:$0xff] }
 0x1b4   : > { %v1363_v6 = vpop.permute.xlu0 %1362  ;;  %v1365_v7 = vpop.permute.xlu1 %1364 }
 0x1b5   : > { %1499 = vst.msk [vmem:[#allocation3 + $0x40] sm:$0xff] %vm1490_vm4, %v1363_v6  ;;  %1500 = vst.msk [vmem:[#allocation3 + $0x48] sm:$0xff] %vm1490_vm4, %v1365_v7 }
 0x1b6   : > { %1671 = vrot.lane.b32.xlu0 %v1557_v2, %s8474_s11  ;;  %1673 = vrot.lane.b32.xlu1 %v1558_v3, %s8474_s11  ;;  %v1830_v2 = vld [vmem:[%s8537_s29 + $0x40] sm:$0xff]  ;;  %v1831_v3 = vld [vmem:[%s8537_s29 + $0x48] sm:$0xff] }
 0x1b8   : > { %v1367_v14 = vpop.permute.xlu0 %1366  ;;  %v1369_v15 = vpop.permute.xlu1 %1368 }
 0x1b9   : > { %1501 = vst.msk [vmem:[#allocation3 + $0x50] sm:$0xff] %vm1490_vm4, %v1367_v14  ;;  %1502 = vst.msk [vmem:[#allocation3 + $0x58] sm:$0xff] %vm1490_vm4, %v1369_v15 }
 0x1ba   : > { %1675 = vrot.lane.b32.xlu0 %v1559_v10, %s8474_s11  ;;  %1677 = vrot.lane.b32.xlu1 %v1560_v11, %s8474_s11  ;;  %v1832_v10 = vld [vmem:[%s8537_s29 + $0x50] sm:$0xff]  ;;  %v1833_v11 = vld [vmem:[%s8537_s29 + $0x58] sm:$0xff] }
 0x1bc   : > { %v1371_v37 = vpop.permute.xlu0 %1370  ;;  %v1373_v44 = vpop.permute.xlu1 %1372 }
 0x1bd   : > { %1503 = vst.msk [vmem:[#allocation3 + $0x60] sm:$0xff] %vm1490_vm4, %v1371_v37  ;;  %1504 = vst.msk [vmem:[#allocation3 + $0x68] sm:$0xff] %vm1490_vm4, %v1373_v44 }
 0x1be   : > { %1679 = vrot.lane.b32.xlu0 %v1561_v22, %s8474_s11  ;;  %1681 = vrot.lane.b32.xlu1 %v1562_v28, %s8474_s11  ;;  %v1834_v22 = vld [vmem:[%s8537_s29 + $0x60] sm:$0xff]  ;;  %v1835_v28 = vld [vmem:[%s8537_s29 + $0x68] sm:$0xff] }
 0x1c0   : > { %v1375_v55 = vpop.permute.xlu0 %1374  ;;  %v1377_v17 = vpop.permute.xlu1 %1376 }
 0x1c1   : > { %1505 = vst.msk [vmem:[#allocation3 + $0x70] sm:$0xff] %vm1490_vm4, %v1375_v55  ;;  %1506 = vst.msk [vmem:[#allocation3 + $0x78] sm:$0xff] %vm1490_vm4, %v1377_v17 }
 0x1c2   : > { %1683 = vrot.lane.b32.xlu0 %v1563_v51, %s8474_s11  ;;  %1685 = vrot.lane.b32.xlu1 %v1564_v54, %s8474_s11  ;;  %v1836_v51 = vld [vmem:[%s8537_s29 + $0x70] sm:$0xff]  ;;  %v1837_v54 = vld [vmem:[%s8537_s29 + $0x78] sm:$0xff] }
 0x1c4   : > { %v1379_v20 = vpop.permute.xlu0 %1378  ;;  %v1381_v23 = vpop.permute.xlu1 %1380 }
 0x1c5   : > { %1507 = vst.msk [vmem:[#allocation3 + $0x80] sm:$0xff] %vm1490_vm4, %v1379_v20  ;;  %1508 = vst.msk [vmem:[#allocation3 + $0x88] sm:$0xff] %vm1490_vm4, %v1381_v23 }
 0x1c6   : > { %1687 = vrot.lane.b32.xlu0 %v1565_v18, %s8474_s11  ;;  %1689 = vrot.lane.b32.xlu1 %v1566_v19, %s8474_s11  ;;  %v1838_v18 = vld [vmem:[%s8537_s29 + $0x80] sm:$0xff]  ;;  %v1839_v19 = vld [vmem:[%s8537_s29 + $0x88] sm:$0xff] }
 0x1c8   : > { %v1383_v26 = vpop.permute.xlu0 %1382  ;;  %v1385_v27 = vpop.permute.xlu1 %1384 }
 0x1c9   : > { %1509 = vst.msk [vmem:[#allocation3 + $0x90] sm:$0xff] %vm1490_vm4, %v1383_v26  ;;  %1510 = vst.msk [vmem:[#allocation3 + $0x98] sm:$0xff] %vm1490_vm4, %v1385_v27 }
 0x1ca   : > { %1691 = vrot.lane.b32.xlu0 %v1567_v24, %s8474_s11  ;;  %1693 = vrot.lane.b32.xlu1 %v1568_v25, %s8474_s11  ;;  %v1840_v24 = vld [vmem:[%s8537_s29 + $0x90] sm:$0xff]  ;;  %v1841_v25 = vld [vmem:[%s8537_s29 + $0x98] sm:$0xff] }
 0x1cc   : > { %v1387_v32 = vpop.permute.xlu0 %1386  ;;  %v1389_v33 = vpop.permute.xlu1 %1388 }
 0x1cd   : > { %1511 = vst.msk [vmem:[#allocation3 + $0xa0] sm:$0xff] %vm1490_vm4, %v1387_v32  ;;  %1512 = vst.msk [vmem:[#allocation3 + $0xa8] sm:$0xff] %vm1490_vm4, %v1389_v33 }
 0x1ce   : > { %1695 = vrot.lane.b32.xlu0 %v1569_v30, %s8474_s11  ;;  %1697 = vrot.lane.b32.xlu1 %v1570_v31, %s8474_s11  ;;  %v1842_v30 = vld [vmem:[%s8537_s29 + $0xa0] sm:$0xff]  ;;  %v1843_v31 = vld [vmem:[%s8537_s29 + $0xa8] sm:$0xff] }
 0x1d0   : > { %v1391_v38 = vpop.permute.xlu0 %1390  ;;  %v1393_v39 = vpop.permute.xlu1 %1392 }
 0x1d1   : > { %1513 = vst.msk [vmem:[#allocation3 + $0xb0] sm:$0xff] %vm1490_vm4, %v1391_v38  ;;  %1514 = vst.msk [vmem:[#allocation3 + $0xb8] sm:$0xff] %vm1490_vm4, %v1393_v39 }
 0x1d2   : > { %1699 = vrot.lane.b32.xlu0 %v1571_v34, %s8474_s11  ;;  %1701 = vrot.lane.b32.xlu1 %v1572_v36, %s8474_s11  ;;  %v1844_v34 = vld [vmem:[%s8537_s29 + $0xb0] sm:$0xff]  ;;  %v1845_v36 = vld [vmem:[%s8537_s29 + $0xb8] sm:$0xff] }
 0x1d4   : > { %v1395_v42 = vpop.permute.xlu0 %1394  ;;  %v1397_v43 = vpop.permute.xlu1 %1396 }
 0x1d5   : > { %1515 = vst.msk [vmem:[#allocation3 + $0xc0] sm:$0xff] %vm1490_vm4, %v1395_v42  ;;  %1516 = vst.msk [vmem:[#allocation3 + $0xc8] sm:$0xff] %vm1490_vm4, %v1397_v43 }
 0x1d6   : > { %1703 = vrot.lane.b32.xlu0 %v1573_v40, %s8474_s11  ;;  %1705 = vrot.lane.b32.xlu1 %v1574_v41, %s8474_s11  ;;  %v1846_v40 = vld [vmem:[%s8537_s29 + $0xc0] sm:$0xff]  ;;  %v1847_v41 = vld [vmem:[%s8537_s29 + $0xc8] sm:$0xff] }
 0x1d8   : > { %v1399_v48 = vpop.permute.xlu0 %1398  ;;  %v1401_v49 = vpop.permute.xlu1 %1400 }
 0x1d9   : > { %1517 = vst.msk [vmem:[#allocation3 + $0xd0] sm:$0xff] %vm1490_vm4, %v1399_v48  ;;  %1518 = vst.msk [vmem:[#allocation3 + $0xd8] sm:$0xff] %vm1490_vm4, %v1401_v49 }
 0x1da   : > { %1707 = vrot.lane.b32.xlu0 %v1575_v46, %s8474_s11  ;;  %1709 = vrot.lane.b32.xlu1 %v1576_v47, %s8474_s11  ;;  %v1848_v46 = vld [vmem:[%s8537_s29 + $0xd0] sm:$0xff]  ;;  %v1849_v47 = vld [vmem:[%s8537_s29 + $0xd8] sm:$0xff] }
 0x1dc   : > { %v1403_v56 = vpop.permute.xlu0 %1402  ;;  %v1405_v57 = vpop.permute.xlu1 %1404 }
 0x1dd   : > { %1519 = vst.msk [vmem:[#allocation3 + $0xe0] sm:$0xff] %vm1490_vm4, %v1403_v56  ;;  %1520 = vst.msk [vmem:[#allocation3 + $0xe8] sm:$0xff] %vm1490_vm4, %v1405_v57 }
 0x1de   : > { %1711 = vrot.lane.b32.xlu0 %v1577_v52, %s8474_s11  ;;  %1713 = vrot.lane.b32.xlu1 %v1578_v53, %s8474_s11  ;;  %v1850_v52 = vld [vmem:[%s8537_s29 + $0xe0] sm:$0xff]  ;;  %v1851_v53 = vld [vmem:[%s8537_s29 + $0xe8] sm:$0xff] }
 0x1e0   : > { %v1407_v0 = vpop.permute.xlu0 %1406  ;;  %v1409_v1 = vpop.permute.xlu1 %1408 }
 0x1e1   : > { %1521 = vst.msk [vmem:[#allocation3 + $0xf0] sm:$0xff] %vm1490_vm4, %v1407_v0  ;;  %1522 = vst.msk [vmem:[#allocation3 + $0xf8] sm:$0xff] %vm1490_vm4, %v1409_v1 }
 0x1e2   : > { %1715 = vrot.lane.b32.xlu0 %v1579_v60, %s8474_s11  ;;  %1717 = vrot.lane.b32.xlu1 %v1580_v61, %s8474_s11  ;;  %v1852_v60 = vld [vmem:[%s8537_s29 + $0xf0] sm:$0xff]  ;;  %v1853_v61 = vld [vmem:[%s8537_s29 + $0xf8] sm:$0xff] }
 0x1e4   : > { %v1411_v8 = vpop.permute.xlu0 %1410  ;;  %v1413_v9 = vpop.permute.xlu1 %1412 }
 0x1e5   : > { %1523 = vst.msk [vmem:[#allocation3 + $0x100] sm:$0xff] %vm1490_vm4, %v1411_v8  ;;  %1524 = vst.msk [vmem:[#allocation3 + $0x108] sm:$0xff] %vm1490_vm4, %v1413_v9 }
 0x1e6   : > { %1719 = vrot.lane.b32.xlu0 %v1581_v4, %s8474_s11  ;;  %1721 = vrot.lane.b32.xlu1 %v1582_v5, %s8474_s11  ;;  %v1854_v4 = vld [vmem:[%s8537_s29 + $0x100] sm:$0xff]  ;;  %v1855_v5 = vld [vmem:[%s8537_s29 + $0x108] sm:$0xff] }
 0x1e8   : > { %v1415_v16 = vpop.permute.xlu0 %1414  ;;  %v1417_v21 = vpop.permute.xlu1 %1416 }
 0x1e9   : > { %1525 = vst.msk [vmem:[#allocation3 + $0x110] sm:$0xff] %vm1490_vm4, %v1415_v16  ;;  %1526 = vst.msk [vmem:[#allocation3 + $0x118] sm:$0xff] %vm1490_vm4, %v1417_v21 }
 0x1ea   : > { %1723 = vrot.lane.b32.xlu0 %v1583_v12, %s8474_s11  ;;  %1725 = vrot.lane.b32.xlu1 %v1584_v13, %s8474_s11  ;;  %v1856_v12 = vld [vmem:[%s8537_s29 + $0x110] sm:$0xff]  ;;  %v1857_v13 = vld [vmem:[%s8537_s29 + $0x118] sm:$0xff] }
 0x1ec   : > { %v1419_v35 = vpop.permute.xlu0 %1418  ;;  %v1421_v45 = vpop.permute.xlu1 %1420 }
 0x1ed   : > { %1527 = vst.msk [vmem:[#allocation3 + $0x120] sm:$0xff] %vm1490_vm4, %v1419_v35  ;;  %1528 = vst.msk [vmem:[#allocation3 + $0x128] sm:$0xff] %vm1490_vm4, %v1421_v45 }
 0x1ee   : > { %1727 = vrot.lane.b32.xlu0 %v1585_v29, %s8474_s11  ;;  %1729 = vrot.lane.b32.xlu1 %v1586_v58, %s8474_s11  ;;  %v1858_v29 = vld [vmem:[%s8537_s29 + $0x120] sm:$0xff]  ;;  %v1859_v58 = vld [vmem:[%s8537_s29 + $0x128] sm:$0xff]  ;;  %s8481_s11 = smov 56  }
 0x1f0   : > { %v1423_v50 = vpop.permute.xlu0 %1422  ;;  %v1425_v63 = vpop.permute.xlu1 %1424 }
 0x1f1   : > { %1529 = vst.msk [vmem:[#allocation3 + $0x130] sm:$0xff] %vm1490_vm4, %v1423_v50  ;;  %1530 = vst.msk [vmem:[#allocation3 + $0x138] sm:$0xff] %vm1490_vm4, %v1425_v63 }
 0x1f2   : > { %1924 = vrot.lane.b32.xlu0 %v1828_v59, %s8475_s12  ;;  %1926 = vrot.lane.b32.xlu1 %v1829_v62, %s8475_s12  ;;  %v1860_v59 = vld [vmem:[%s8537_s29 + $0x130] sm:$0xff]  ;;  %v1861_v62 = vld [vmem:[%s8537_s29 + $0x138] sm:$0xff] }
 0x1f4   : > { %v1427_v6 = vpop.permute.xlu0 %1426  ;;  %v1429_v7 = vpop.permute.xlu1 %1428 }
 0x1f5   : > { %1531 = vst.msk [vmem:[#allocation3 + $0x140] sm:$0xff] %vm1490_vm4, %v1427_v6  ;;  %1532 = vst.msk [vmem:[#allocation3 + $0x148] sm:$0xff] %vm1490_vm4, %v1429_v7 }
 0x1f6   : > { %1928 = vrot.lane.b32.xlu0 %v1830_v2, %s8475_s12  ;;  %1930 = vrot.lane.b32.xlu1 %v1831_v3, %s8475_s12  ;;  %v1862_v2 = vld [vmem:[%s8537_s29 + $0x140] sm:$0xff]  ;;  %v1863_v3 = vld [vmem:[%s8537_s29 + $0x148] sm:$0xff] }
 0x1f8   : > { %v1431_v14 = vpop.permute.xlu0 %1430  ;;  %v1433_v15 = vpop.permute.xlu1 %1432 }
 0x1f9   : > { %1533 = vst.msk [vmem:[#allocation3 + $0x150] sm:$0xff] %vm1490_vm4, %v1431_v14  ;;  %1534 = vst.msk [vmem:[#allocation3 + $0x158] sm:$0xff] %vm1490_vm4, %v1433_v15 }
 0x1fa   : > { %1932 = vrot.lane.b32.xlu0 %v1832_v10, %s8475_s12  ;;  %1934 = vrot.lane.b32.xlu1 %v1833_v11, %s8475_s12  ;;  %v1864_v10 = vld [vmem:[%s8537_s29 + $0x150] sm:$0xff]  ;;  %v1865_v11 = vld [vmem:[%s8537_s29 + $0x158] sm:$0xff] }
 0x1fc   : > { %v1435_v37 = vpop.permute.xlu0 %1434  ;;  %v1437_v44 = vpop.permute.xlu1 %1436 }
 0x1fd   : > { %1535 = vst.msk [vmem:[#allocation3 + $0x160] sm:$0xff] %vm1490_vm4, %v1435_v37  ;;  %1536 = vst.msk [vmem:[#allocation3 + $0x168] sm:$0xff] %vm1490_vm4, %v1437_v44 }
 0x1fe   : > { %1936 = vrot.lane.b32.xlu0 %v1834_v22, %s8475_s12  ;;  %1938 = vrot.lane.b32.xlu1 %v1835_v28, %s8475_s12  ;;  %v1866_v22 = vld [vmem:[%s8537_s29 + $0x160] sm:$0xff]  ;;  %v1867_v28 = vld [vmem:[%s8537_s29 + $0x168] sm:$0xff] }
 0x200   : > { %v1439_v55 = vpop.permute.xlu0 %1438  ;;  %v1441_v17 = vpop.permute.xlu1 %1440 }
 0x201   : > { %1537 = vst.msk [vmem:[#allocation3 + $0x170] sm:$0xff] %vm1490_vm4, %v1439_v55  ;;  %1538 = vst.msk [vmem:[#allocation3 + $0x178] sm:$0xff] %vm1490_vm4, %v1441_v17 }
 0x202   : > { %1940 = vrot.lane.b32.xlu0 %v1836_v51, %s8475_s12  ;;  %1942 = vrot.lane.b32.xlu1 %v1837_v54, %s8475_s12  ;;  %v1868_v51 = vld [vmem:[%s8537_s29 + $0x170] sm:$0xff]  ;;  %v1869_v54 = vld [vmem:[%s8537_s29 + $0x178] sm:$0xff] }
 0x204   : > { %v1636_v20 = vpop.permute.xlu0 %1635  ;;  %v1638_v23 = vpop.permute.xlu1 %1637 }
 0x205   : > { %1780 = vst.msk [vmem:[#allocation3] sm:$0xff] %vm1779_vm5, %v1636_v20  ;;  %1781 = vst.msk [vmem:[#allocation3 + $0x8] sm:$0xff] %vm1779_vm5, %v1638_v23 }
 0x206   : > { %1944 = vrot.lane.b32.xlu0 %v1838_v18, %s8475_s12  ;;  %1946 = vrot.lane.b32.xlu1 %v1839_v19, %s8475_s12  ;;  %v1870_v18 = vld [vmem:[%s8537_s29 + $0x180] sm:$0xff]  ;;  %v1871_v19 = vld [vmem:[%s8537_s29 + $0x188] sm:$0xff] }
 0x208   : > { %v1640_v26 = vpop.permute.xlu0 %1639  ;;  %v1642_v27 = vpop.permute.xlu1 %1641 }
 0x209   : > { %1782 = vst.msk [vmem:[#allocation3 + $0x10] sm:$0xff] %vm1779_vm5, %v1640_v26  ;;  %1783 = vst.msk [vmem:[#allocation3 + $0x18] sm:$0xff] %vm1779_vm5, %v1642_v27 }
 0x20a   : > { %1948 = vrot.lane.b32.xlu0 %v1840_v24, %s8475_s12  ;;  %1950 = vrot.lane.b32.xlu1 %v1841_v25, %s8475_s12  ;;  %v1872_v24 = vld [vmem:[%s8537_s29 + $0x190] sm:$0xff]  ;;  %v1873_v25 = vld [vmem:[%s8537_s29 + $0x198] sm:$0xff] }
 0x20c   : > { %v1644_v32 = vpop.permute.xlu0 %1643  ;;  %v1646_v33 = vpop.permute.xlu1 %1645 }
 0x20d   : > { %1784 = vst.msk [vmem:[#allocation3 + $0x20] sm:$0xff] %vm1779_vm5, %v1644_v32  ;;  %1785 = vst.msk [vmem:[#allocation3 + $0x28] sm:$0xff] %vm1779_vm5, %v1646_v33 }
 0x20e   : > { %1952 = vrot.lane.b32.xlu0 %v1842_v30, %s8475_s12  ;;  %1954 = vrot.lane.b32.xlu1 %v1843_v31, %s8475_s12  ;;  %v1874_v30 = vld [vmem:[%s8537_s29 + $0x1a0] sm:$0xff]  ;;  %v1875_v31 = vld [vmem:[%s8537_s29 + $0x1a8] sm:$0xff] }
 0x210   : > { %v1648_v38 = vpop.permute.xlu0 %1647  ;;  %v1650_v39 = vpop.permute.xlu1 %1649 }
 0x211   : > { %1786 = vst.msk [vmem:[#allocation3 + $0x30] sm:$0xff] %vm1779_vm5, %v1648_v38  ;;  %1787 = vst.msk [vmem:[#allocation3 + $0x38] sm:$0xff] %vm1779_vm5, %v1650_v39 }
 0x212   : > { %1956 = vrot.lane.b32.xlu0 %v1844_v34, %s8475_s12  ;;  %1958 = vrot.lane.b32.xlu1 %v1845_v36, %s8475_s12  ;;  %v2117_v34 = vld [vmem:[%s8537_s29 + $0x31] sm:$0xff]  ;;  %v2118_v36 = vld [vmem:[%s8537_s29 + $0x39] sm:$0xff] }
 0x214   : > { %v1652_v42 = vpop.permute.xlu0 %1651  ;;  %v1654_v43 = vpop.permute.xlu1 %1653 }
 0x215   : > { %1788 = vst.msk [vmem:[#allocation3 + $0x40] sm:$0xff] %vm1779_vm5, %v1652_v42  ;;  %1789 = vst.msk [vmem:[#allocation3 + $0x48] sm:$0xff] %vm1779_vm5, %v1654_v43 }
 0x216   : > { %1960 = vrot.lane.b32.xlu0 %v1846_v40, %s8475_s12  ;;  %1962 = vrot.lane.b32.xlu1 %v1847_v41, %s8475_s12  ;;  %v2119_v40 = vld [vmem:[%s8537_s29 + $0x41] sm:$0xff]  ;;  %v2120_v41 = vld [vmem:[%s8537_s29 + $0x49] sm:$0xff] }
 0x218   : > { %v1656_v48 = vpop.permute.xlu0 %1655  ;;  %v1658_v49 = vpop.permute.xlu1 %1657 }
 0x219   : > { %1790 = vst.msk [vmem:[#allocation3 + $0x50] sm:$0xff] %vm1779_vm5, %v1656_v48  ;;  %1791 = vst.msk [vmem:[#allocation3 + $0x58] sm:$0xff] %vm1779_vm5, %v1658_v49 }
 0x21a   : > { %1964 = vrot.lane.b32.xlu0 %v1848_v46, %s8475_s12  ;;  %1966 = vrot.lane.b32.xlu1 %v1849_v47, %s8475_s12  ;;  %v2121_v46 = vld [vmem:[%s8537_s29 + $0x51] sm:$0xff]  ;;  %v2122_v47 = vld [vmem:[%s8537_s29 + $0x59] sm:$0xff] }
 0x21c   : > { %v1660_v56 = vpop.permute.xlu0 %1659  ;;  %v1662_v57 = vpop.permute.xlu1 %1661 }
 0x21d   : > { %1792 = vst.msk [vmem:[#allocation3 + $0x60] sm:$0xff] %vm1779_vm5, %v1660_v56  ;;  %1793 = vst.msk [vmem:[#allocation3 + $0x68] sm:$0xff] %vm1779_vm5, %v1662_v57 }
 0x21e   : > { %1968 = vrot.lane.b32.xlu0 %v1850_v52, %s8475_s12  ;;  %1970 = vrot.lane.b32.xlu1 %v1851_v53, %s8475_s12  ;;  %v2123_v52 = vld [vmem:[%s8537_s29 + $0x61] sm:$0xff]  ;;  %v2124_v53 = vld [vmem:[%s8537_s29 + $0x69] sm:$0xff] }
 0x220   : > { %v1664_v0 = vpop.permute.xlu0 %1663  ;;  %v1666_v1 = vpop.permute.xlu1 %1665 }
 0x221   : > { %1794 = vst.msk [vmem:[#allocation3 + $0x70] sm:$0xff] %vm1779_vm5, %v1664_v0  ;;  %1795 = vst.msk [vmem:[#allocation3 + $0x78] sm:$0xff] %vm1779_vm5, %v1666_v1 }
 0x222   : > { %1972 = vrot.lane.b32.xlu0 %v1852_v60, %s8475_s12  ;;  %1974 = vrot.lane.b32.xlu1 %v1853_v61, %s8475_s12  ;;  %v2125_v60 = vld [vmem:[%s8537_s29 + $0x71] sm:$0xff]  ;;  %v2126_v61 = vld [vmem:[%s8537_s29 + $0x79] sm:$0xff] }
 0x224   : > { %v1668_v8 = vpop.permute.xlu0 %1667  ;;  %v1670_v9 = vpop.permute.xlu1 %1669 }
 0x225   : > { %1796 = vst.msk [vmem:[#allocation3 + $0x80] sm:$0xff] %vm1779_vm5, %v1668_v8  ;;  %1797 = vst.msk [vmem:[#allocation3 + $0x88] sm:$0xff] %vm1779_vm5, %v1670_v9 }
 0x226   : > { %1976 = vrot.lane.b32.xlu0 %v1854_v4, %s8475_s12  ;;  %1978 = vrot.lane.b32.xlu1 %v1855_v5, %s8475_s12  ;;  %v2127_v4 = vld [vmem:[%s8537_s29 + $0x81] sm:$0xff]  ;;  %v2128_v5 = vld [vmem:[%s8537_s29 + $0x89] sm:$0xff] }
 0x228   : > { %v1672_v16 = vpop.permute.xlu0 %1671  ;;  %v1674_v21 = vpop.permute.xlu1 %1673 }
 0x229   : > { %1798 = vst.msk [vmem:[#allocation3 + $0x90] sm:$0xff] %vm1779_vm5, %v1672_v16  ;;  %1799 = vst.msk [vmem:[#allocation3 + $0x98] sm:$0xff] %vm1779_vm5, %v1674_v21 }
 0x22a   : > { %1980 = vrot.lane.b32.xlu0 %v1856_v12, %s8475_s12  ;;  %1982 = vrot.lane.b32.xlu1 %v1857_v13, %s8475_s12  ;;  %v2129_v12 = vld [vmem:[%s8537_s29 + $0x91] sm:$0xff]  ;;  %v2130_v13 = vld [vmem:[%s8537_s29 + $0x99] sm:$0xff] }
 0x22c   : > { %v1676_v35 = vpop.permute.xlu0 %1675  ;;  %v1678_v45 = vpop.permute.xlu1 %1677 }
 0x22d   : > { %1800 = vst.msk [vmem:[#allocation3 + $0xa0] sm:$0xff] %vm1779_vm5, %v1676_v35  ;;  %1801 = vst.msk [vmem:[#allocation3 + $0xa8] sm:$0xff] %vm1779_vm5, %v1678_v45 }
 0x22e   : > { %1984 = vrot.lane.b32.xlu0 %v1858_v29, %s8475_s12  ;;  %1986 = vrot.lane.b32.xlu1 %v1859_v58, %s8475_s12  ;;  %v2131_v29 = vld [vmem:[%s8537_s29 + $0xa1] sm:$0xff]  ;;  %v2132_v58 = vld [vmem:[%s8537_s29 + $0xa9] sm:$0xff] }
 0x230   : > { %v1680_v50 = vpop.permute.xlu0 %1679  ;;  %v1682_v63 = vpop.permute.xlu1 %1681 }
 0x231   : > { %1802 = vst.msk [vmem:[#allocation3 + $0xb0] sm:$0xff] %vm1779_vm5, %v1680_v50  ;;  %1803 = vst.msk [vmem:[#allocation3 + $0xb8] sm:$0xff] %vm1779_vm5, %v1682_v63 }
 0x232   : > { %1988 = vrot.lane.b32.xlu0 %v1860_v59, %s8475_s12  ;;  %1990 = vrot.lane.b32.xlu1 %v1861_v62, %s8475_s12  ;;  %v2133_v59 = vld [vmem:[%s8537_s29 + $0xb1] sm:$0xff]  ;;  %v2134_v62 = vld [vmem:[%s8537_s29 + $0xb9] sm:$0xff] }
 0x234   : > { %v1684_v6 = vpop.permute.xlu0 %1683  ;;  %v1686_v7 = vpop.permute.xlu1 %1685 }
 0x235   : > { %1804 = vst.msk [vmem:[#allocation3 + $0xc0] sm:$0xff] %vm1779_vm5, %v1684_v6  ;;  %1805 = vst.msk [vmem:[#allocation3 + $0xc8] sm:$0xff] %vm1779_vm5, %v1686_v7 }
 0x236   : > { %1992 = vrot.lane.b32.xlu0 %v1862_v2, %s8475_s12  ;;  %1994 = vrot.lane.b32.xlu1 %v1863_v3, %s8475_s12  ;;  %v2135_v2 = vld [vmem:[%s8537_s29 + $0xc1] sm:$0xff]  ;;  %v2136_v3 = vld [vmem:[%s8537_s29 + $0xc9] sm:$0xff] }
 0x238   : > { %v1688_v14 = vpop.permute.xlu0 %1687  ;;  %v1690_v15 = vpop.permute.xlu1 %1689 }
 0x239   : > { %1806 = vst.msk [vmem:[#allocation3 + $0xd0] sm:$0xff] %vm1779_vm5, %v1688_v14  ;;  %1807 = vst.msk [vmem:[#allocation3 + $0xd8] sm:$0xff] %vm1779_vm5, %v1690_v15 }
 0x23a   : > { %1996 = vrot.lane.b32.xlu0 %v1864_v10, %s8475_s12  ;;  %1998 = vrot.lane.b32.xlu1 %v1865_v11, %s8475_s12  ;;  %v2137_v10 = vld [vmem:[%s8537_s29 + $0xd1] sm:$0xff]  ;;  %v2138_v11 = vld [vmem:[%s8537_s29 + $0xd9] sm:$0xff] }
 0x23c   : > { %v1692_v37 = vpop.permute.xlu0 %1691  ;;  %v1694_v44 = vpop.permute.xlu1 %1693 }
 0x23d   : > { %1808 = vst.msk [vmem:[#allocation3 + $0xe0] sm:$0xff] %vm1779_vm5, %v1692_v37  ;;  %1809 = vst.msk [vmem:[#allocation3 + $0xe8] sm:$0xff] %vm1779_vm5, %v1694_v44 }
 0x23e   : > { %2000 = vrot.lane.b32.xlu0 %v1866_v22, %s8475_s12  ;;  %2002 = vrot.lane.b32.xlu1 %v1867_v28, %s8475_s12  ;;  %v2139_v22 = vld [vmem:[%s8537_s29 + $0xe1] sm:$0xff]  ;;  %v2140_v28 = vld [vmem:[%s8537_s29 + $0xe9] sm:$0xff] }
 0x240   : > { %v1696_v55 = vpop.permute.xlu0 %1695  ;;  %v1698_v17 = vpop.permute.xlu1 %1697 }
 0x241   : > { %1810 = vst.msk [vmem:[#allocation3 + $0xf0] sm:$0xff] %vm1779_vm5, %v1696_v55  ;;  %1811 = vst.msk [vmem:[#allocation3 + $0xf8] sm:$0xff] %vm1779_vm5, %v1698_v17 }
 0x242   : > { %2004 = vrot.lane.b32.xlu0 %v1868_v51, %s8475_s12  ;;  %2006 = vrot.lane.b32.xlu1 %v1869_v54, %s8475_s12  ;;  %v2141_v51 = vld [vmem:[%s8537_s29 + $0xf1] sm:$0xff]  ;;  %v2142_v54 = vld [vmem:[%s8537_s29 + $0xf9] sm:$0xff] }
 0x244   : > { %v1700_v20 = vpop.permute.xlu0 %1699  ;;  %v1702_v23 = vpop.permute.xlu1 %1701 }
 0x245   : > { %1812 = vst.msk [vmem:[#allocation3 + $0x100] sm:$0xff] %vm1779_vm5, %v1700_v20  ;;  %1813 = vst.msk [vmem:[#allocation3 + $0x108] sm:$0xff] %vm1779_vm5, %v1702_v23 }
 0x246   : > { %2008 = vrot.lane.b32.xlu0 %v1870_v18, %s8475_s12  ;;  %2010 = vrot.lane.b32.xlu1 %v1871_v19, %s8475_s12  ;;  %v2143_v18 = vld [vmem:[%s8537_s29 + $0x101] sm:$0xff]  ;;  %v2144_v19 = vld [vmem:[%s8537_s29 + $0x109] sm:$0xff] }
 0x248   : > { %v1704_v26 = vpop.permute.xlu0 %1703  ;;  %v1706_v27 = vpop.permute.xlu1 %1705 }
 0x249   : > { %1814 = vst.msk [vmem:[#allocation3 + $0x110] sm:$0xff] %vm1779_vm5, %v1704_v26  ;;  %1815 = vst.msk [vmem:[#allocation3 + $0x118] sm:$0xff] %vm1779_vm5, %v1706_v27 }
 0x24a   : > { %2012 = vrot.lane.b32.xlu0 %v1872_v24, %s8475_s12  ;;  %2014 = vrot.lane.b32.xlu1 %v1873_v25, %s8475_s12  ;;  %v2145_v24 = vld [vmem:[%s8537_s29 + $0x111] sm:$0xff]  ;;  %v2146_v25 = vld [vmem:[%s8537_s29 + $0x119] sm:$0xff] }
 0x24c   : > { %v1708_v32 = vpop.permute.xlu0 %1707  ;;  %v1710_v33 = vpop.permute.xlu1 %1709 }
 0x24d   : > { %1816 = vst.msk [vmem:[#allocation3 + $0x120] sm:$0xff] %vm1779_vm5, %v1708_v32  ;;  %1817 = vst.msk [vmem:[#allocation3 + $0x128] sm:$0xff] %vm1779_vm5, %v1710_v33 }
 0x24e   : > { %2016 = vrot.lane.b32.xlu0 %v1874_v30, %s8475_s12  ;;  %2018 = vrot.lane.b32.xlu1 %v1875_v31, %s8475_s12  ;;  %v2147_v30 = vld [vmem:[%s8537_s29 + $0x121] sm:$0xff]  ;;  %v2148_v31 = vld [vmem:[%s8537_s29 + $0x129] sm:$0xff] }
 0x250   : > { %v1712_v38 = vpop.permute.xlu0 %1711  ;;  %v1714_v39 = vpop.permute.xlu1 %1713 }
 0x251   : > { %1818 = vst.msk [vmem:[#allocation3 + $0x130] sm:$0xff] %vm1779_vm5, %v1712_v38  ;;  %1819 = vst.msk [vmem:[#allocation3 + $0x138] sm:$0xff] %vm1779_vm5, %v1714_v39 }
 0x252   : > { %2213 = vrot.lane.b32.xlu0 %v2117_v34, %s8476_s13  ;;  %2215 = vrot.lane.b32.xlu1 %v2118_v36, %s8476_s13  ;;  %v2149_v34 = vld [vmem:[%s8537_s29 + $0x131] sm:$0xff]  ;;  %v2150_v36 = vld [vmem:[%s8537_s29 + $0x139] sm:$0xff] }
 0x254   : > { %v1716_v42 = vpop.permute.xlu0 %1715  ;;  %v1718_v43 = vpop.permute.xlu1 %1717 }
 0x255   : > { %1820 = vst.msk [vmem:[#allocation3 + $0x140] sm:$0xff] %vm1779_vm5, %v1716_v42  ;;  %1821 = vst.msk [vmem:[#allocation3 + $0x148] sm:$0xff] %vm1779_vm5, %v1718_v43 }
 0x256   : > { %2217 = vrot.lane.b32.xlu0 %v2119_v40, %s8476_s13  ;;  %2219 = vrot.lane.b32.xlu1 %v2120_v41, %s8476_s13  ;;  %v2151_v40 = vld [vmem:[%s8537_s29 + $0x141] sm:$0xff]  ;;  %v2152_v41 = vld [vmem:[%s8537_s29 + $0x149] sm:$0xff] }
 0x258   : > { %v1720_v48 = vpop.permute.xlu0 %1719  ;;  %v1722_v49 = vpop.permute.xlu1 %1721 }
 0x259   : > { %1822 = vst.msk [vmem:[#allocation3 + $0x150] sm:$0xff] %vm1779_vm5, %v1720_v48  ;;  %1823 = vst.msk [vmem:[#allocation3 + $0x158] sm:$0xff] %vm1779_vm5, %v1722_v49 }
 0x25a   : > { %2221 = vrot.lane.b32.xlu0 %v2121_v46, %s8476_s13  ;;  %2223 = vrot.lane.b32.xlu1 %v2122_v47, %s8476_s13  ;;  %v2153_v46 = vld [vmem:[%s8537_s29 + $0x151] sm:$0xff]  ;;  %v2154_v47 = vld [vmem:[%s8537_s29 + $0x159] sm:$0xff] }
 0x25c   : > { %v1724_v56 = vpop.permute.xlu0 %1723  ;;  %v1726_v57 = vpop.permute.xlu1 %1725 }
 0x25d   : > { %1824 = vst.msk [vmem:[#allocation3 + $0x160] sm:$0xff] %vm1779_vm5, %v1724_v56  ;;  %1825 = vst.msk [vmem:[#allocation3 + $0x168] sm:$0xff] %vm1779_vm5, %v1726_v57 }
 0x25e   : > { %2225 = vrot.lane.b32.xlu0 %v2123_v52, %s8476_s13  ;;  %2227 = vrot.lane.b32.xlu1 %v2124_v53, %s8476_s13  ;;  %v2155_v52 = vld [vmem:[%s8537_s29 + $0x161] sm:$0xff]  ;;  %v2156_v53 = vld [vmem:[%s8537_s29 + $0x169] sm:$0xff] }
 0x260   : > { %v1728_v0 = vpop.permute.xlu0 %1727  ;;  %v1730_v1 = vpop.permute.xlu1 %1729 }
 0x261   : > { %1826 = vst.msk [vmem:[#allocation3 + $0x170] sm:$0xff] %vm1779_vm5, %v1728_v0  ;;  %1827 = vst.msk [vmem:[#allocation3 + $0x178] sm:$0xff] %vm1779_vm5, %v1730_v1 }
 0x262   : > { %2229 = vrot.lane.b32.xlu0 %v2125_v60, %s8476_s13  ;;  %2231 = vrot.lane.b32.xlu1 %v2126_v61, %s8476_s13  ;;  %v2157_v60 = vld [vmem:[%s8537_s29 + $0x171] sm:$0xff]  ;;  %v2158_v61 = vld [vmem:[%s8537_s29 + $0x179] sm:$0xff] }
 0x264   : > { %v1925_v8 = vpop.permute.xlu0 %1924  ;;  %v1927_v9 = vpop.permute.xlu1 %1926 }
 0x265   : > { %2069 = vst.msk [vmem:[#allocation3] sm:$0xff] %vm2068_vm6, %v1925_v8  ;;  %2070 = vst.msk [vmem:[#allocation3 + $0x8] sm:$0xff] %vm2068_vm6, %v1927_v9  ;;  %v2160_v8 = vld [vmem:[%s8537_s29 + $0x189] sm:$0xff] }
 0x266   : > { %2233 = vrot.lane.b32.xlu0 %v2127_v4, %s8476_s13  ;;  %2235 = vrot.lane.b32.xlu1 %v2128_v5, %s8476_s13  ;;  %v2747_v4 = vld [vmem:[%s13403_s1 + $0x20] sm:$0xf] }
 0x267   : > { %v2159_v5 = vld [vmem:[%s8537_s29 + $0x181] sm:$0xff]  ;;  %8150 = vmatprep.subr.msk.mxu0 %vm2893_vm7, %v2747_v4 }
 0x268   : > { %v1929_v16 = vpop.permute.xlu0 %1928  ;;  %v1931_v21 = vpop.permute.xlu1 %1930  ;;  %8151 = vmatpush3.msk.msra.mxu0 %vm2893_vm7, %v2747_v4 }
 0x269   : > { %2071 = vst.msk [vmem:[#allocation3 + $0x10] sm:$0xff] %vm2068_vm6, %v1929_v16  ;;  %2072 = vst.msk [vmem:[#allocation3 + $0x18] sm:$0xff] %vm2068_vm6, %v1931_v21  ;;  %v2745_v16 = vld [vmem:[%s13403_s1 + $0x10] sm:$0xff] }
 0x26a   : > { %2237 = vrot.lane.b32.xlu0 %v2129_v12, %s8476_s13  ;;  %2239 = vrot.lane.b32.xlu1 %v2130_v13, %s8476_s13  ;;  %v2746_v13 = vld [vmem:[%s13403_s1 + $0x18] sm:$0xff] }
 0x26b   : > { %v2161_v21 = vld [vmem:[%s8537_s29 + $0x191] sm:$0xff]  ;;  %8152 = vmatprep.subr.mxu0 %v2746_v13 }
 0x26c   : > { %v1933_v35 = vpop.permute.xlu0 %1932  ;;  %v1935_v45 = vpop.permute.xlu1 %1934  ;;  %8153 = vmatpush3.msra.mxu0 %v2746_v13  ;;  %v2432_v13 = vld [vmem:[%s8537_s29 + $0x102] sm:$0xff] }
 0x26d   : > { %2073 = vst.msk [vmem:[#allocation3 + $0x20] sm:$0xff] %vm2068_vm6, %v1933_v35  ;;  %2074 = vst.msk [vmem:[#allocation3 + $0x28] sm:$0xff] %vm2068_vm6, %v1935_v45  ;;  %8154 = vmatprep.subr.mxu0 %v2745_v16  ;;  %v2744_v45 = vld [vmem:[%s13403_s1 + $0x8] sm:$0xff] }
 0x26e   : > { %2241 = vrot.lane.b32.xlu0 %v2131_v29, %s8476_s13  ;;  %2243 = vrot.lane.b32.xlu1 %v2132_v58, %s8476_s13  ;;  %v2162_v29 = vld [vmem:[%s8537_s29 + $0x199] sm:$0xff] }
 0x26f   : > { %8155 = vmatpush3.msra.mxu0 %v2745_v16  ;;  %v2433_v16 = vld [vmem:[%s8537_s29 + $0x10a] sm:$0xff] }
 0x270   : > { %v1937_v50 = vpop.permute.xlu0 %1936  ;;  %v1939_v63 = vpop.permute.xlu1 %1938  ;;  %8156 = vmatprep.subr.mxu0 %v2744_v45 }
 0x271   : > { %2075 = vst.msk [vmem:[#allocation3 + $0x30] sm:$0xff] %vm2068_vm6, %v1937_v50  ;;  %2076 = vst.msk [vmem:[#allocation3 + $0x38] sm:$0xff] %vm2068_vm6, %v1939_v63  ;;  %8157 = vmatpush3.msra.mxu0 %v2744_v45 }
 0x272   : > { %2245 = vrot.lane.b32.xlu0 %v2133_v59, %s8476_s13  ;;  %2247 = vrot.lane.b32.xlu1 %v2134_v62, %s8476_s13  ;;  %v2163_v59 = vld [vmem:[%s8537_s29 + $0x1a1] sm:$0xff]  ;;  %v2164_v62 = vld [vmem:[%s8537_s29 + $0x1a9] sm:$0xff] }
 0x274   : > { %v1941_v6 = vpop.permute.xlu0 %1940  ;;  %v1943_v7 = vpop.permute.xlu1 %1942 }
 0x275   : > { %2077 = vst.msk [vmem:[#allocation3 + $0x40] sm:$0xff] %vm2068_vm6, %v1941_v6  ;;  %2078 = vst.msk [vmem:[#allocation3 + $0x48] sm:$0xff] %vm2068_vm6, %v1943_v7  ;;  %v2407_v6 = vld [vmem:[%s8537_s29 + $0x3a] sm:$0xff] }
 0x276   : > { %2249 = vrot.lane.b32.xlu0 %v2135_v2, %s8476_s13  ;;  %2251 = vrot.lane.b32.xlu1 %v2136_v3, %s8476_s13  ;;  %v2743_v2 = vld [vmem:[%s13403_s1] sm:$0xff]  ;;  %v2406_v3 = vld [vmem:[%s8537_s29 + $0x32] sm:$0xff] }
 0x277   : > { %8158 = vmatprep.subr.mxu0 %v2743_v2 }
 0x278   : > { %v1945_v14 = vpop.permute.xlu0 %1944  ;;  %v1947_v15 = vpop.permute.xlu1 %1946  ;;  %8159 = vmatpush3.msra.mxu0 %v2743_v2 }
 0x279   : > { %2079 = vst.msk [vmem:[#allocation3 + $0x50] sm:$0xff] %vm2068_vm6, %v1945_v14  ;;  %2080 = vst.msk [vmem:[#allocation3 + $0x58] sm:$0xff] %vm2068_vm6, %v1947_v15  ;;  %v2409_v14 = vld [vmem:[%s8537_s29 + $0x4a] sm:$0xff] }
 0x27a   : > { %2253 = vrot.lane.b32.xlu0 %v2137_v10, %s8476_s13  ;;  %2255 = vrot.lane.b32.xlu1 %v2138_v11, %s8476_s13  ;;  %v2408_v11 = vld [vmem:[%s8537_s29 + $0x42] sm:$0xff] }
 0x27c   : > { %v1949_v37 = vpop.permute.xlu0 %1948  ;;  %v1951_v44 = vpop.permute.xlu1 %1950 }
 0x27d   : > { %2081 = vst.msk [vmem:[#allocation3 + $0x60] sm:$0xff] %vm2068_vm6, %v1949_v37  ;;  %2082 = vst.msk [vmem:[#allocation3 + $0x68] sm:$0xff] %vm2068_vm6, %v1951_v44  ;;  %v2411_v37 = vld [vmem:[%s8537_s29 + $0x5a] sm:$0xff] }
 0x27e   : > { %2257 = vrot.lane.b32.xlu0 %v2139_v22, %s8476_s13  ;;  %2259 = vrot.lane.b32.xlu1 %v2140_v28, %s8476_s13  ;;  %v2410_v28 = vld [vmem:[%s8537_s29 + $0x52] sm:$0xff] }
 0x280   : > { %v1953_v55 = vpop.permute.xlu0 %1952  ;;  %v1955_v17 = vpop.permute.xlu1 %1954 }
 0x281   : > { %2083 = vst.msk [vmem:[#allocation3 + $0x70] sm:$0xff] %vm2068_vm6, %v1953_v55  ;;  %2084 = vst.msk [vmem:[#allocation3 + $0x78] sm:$0xff] %vm2068_vm6, %v1955_v17  ;;  %v2413_v55 = vld [vmem:[%s8537_s29 + $0x6a] sm:$0xff] }
 0x282   : > { %2261 = vrot.lane.b32.xlu0 %v2141_v51, %s8476_s13  ;;  %2263 = vrot.lane.b32.xlu1 %v2142_v54, %s8476_s13  ;;  %v2412_v54 = vld [vmem:[%s8537_s29 + $0x62] sm:$0xff] }
 0x284   : > { %v1957_v20 = vpop.permute.xlu0 %1956  ;;  %v1959_v23 = vpop.permute.xlu1 %1958 }
 0x285   : > { %2085 = vst.msk [vmem:[#allocation3 + $0x80] sm:$0xff] %vm2068_vm6, %v1957_v20  ;;  %2086 = vst.msk [vmem:[#allocation3 + $0x88] sm:$0xff] %vm2068_vm6, %v1959_v23  ;;  %v2415_v20 = vld [vmem:[%s8537_s29 + $0x7a] sm:$0xff] }
 0x286   : > { %2265 = vrot.lane.b32.xlu0 %v2143_v18, %s8476_s13  ;;  %2267 = vrot.lane.b32.xlu1 %v2144_v19, %s8476_s13  ;;  %v2414_v19 = vld [vmem:[%s8537_s29 + $0x72] sm:$0xff] }
 0x288   : > { %v1961_v26 = vpop.permute.xlu0 %1960  ;;  %v1963_v27 = vpop.permute.xlu1 %1962 }
 0x289   : > { %2087 = vst.msk [vmem:[#allocation3 + $0x90] sm:$0xff] %vm2068_vm6, %v1961_v26  ;;  %2088 = vst.msk [vmem:[#allocation3 + $0x98] sm:$0xff] %vm2068_vm6, %v1963_v27  ;;  %v2417_v26 = vld [vmem:[%s8537_s29 + $0x8a] sm:$0xff] }
 0x28a   : > { %2269 = vrot.lane.b32.xlu0 %v2145_v24, %s8476_s13  ;;  %2271 = vrot.lane.b32.xlu1 %v2146_v25, %s8476_s13  ;;  %v2416_v25 = vld [vmem:[%s8537_s29 + $0x82] sm:$0xff] }
 0x28c   : > { %v1965_v32 = vpop.permute.xlu0 %1964  ;;  %v1967_v33 = vpop.permute.xlu1 %1966 }
 0x28d   : > { %2089 = vst.msk [vmem:[#allocation3 + $0xa0] sm:$0xff] %vm2068_vm6, %v1965_v32  ;;  %2090 = vst.msk [vmem:[#allocation3 + $0xa8] sm:$0xff] %vm2068_vm6, %v1967_v33  ;;  %v2419_v32 = vld [vmem:[%s8537_s29 + $0x9a] sm:$0xff] }
 0x28e   : > { %2273 = vrot.lane.b32.xlu0 %v2147_v30, %s8476_s13  ;;  %2275 = vrot.lane.b32.xlu1 %v2148_v31, %s8476_s13  ;;  %v2418_v31 = vld [vmem:[%s8537_s29 + $0x92] sm:$0xff] }
 0x290   : > { %v1969_v38 = vpop.permute.xlu0 %1968  ;;  %v1971_v39 = vpop.permute.xlu1 %1970 }
 0x291   : > { %2091 = vst.msk [vmem:[#allocation3 + $0xb0] sm:$0xff] %vm2068_vm6, %v1969_v38  ;;  %2092 = vst.msk [vmem:[#allocation3 + $0xb8] sm:$0xff] %vm2068_vm6, %v1971_v39  ;;  %v2421_v38 = vld [vmem:[%s8537_s29 + $0xaa] sm:$0xff] }
 0x292   : > { %2277 = vrot.lane.b32.xlu0 %v2149_v34, %s8476_s13  ;;  %2279 = vrot.lane.b32.xlu1 %v2150_v36, %s8476_s13  ;;  %v2420_v36 = vld [vmem:[%s8537_s29 + $0xa2] sm:$0xff] }
 0x294   : > { %v1973_v42 = vpop.permute.xlu0 %1972  ;;  %v1975_v43 = vpop.permute.xlu1 %1974 }
 0x295   : > { %2093 = vst.msk [vmem:[#allocation3 + $0xc0] sm:$0xff] %vm2068_vm6, %v1973_v42  ;;  %2094 = vst.msk [vmem:[#allocation3 + $0xc8] sm:$0xff] %vm2068_vm6, %v1975_v43  ;;  %v2423_v42 = vld [vmem:[%s8537_s29 + $0xba] sm:$0xff] }
 0x296   : > { %2281 = vrot.lane.b32.xlu0 %v2151_v40, %s8476_s13  ;;  %2283 = vrot.lane.b32.xlu1 %v2152_v41, %s8476_s13  ;;  %v2422_v41 = vld [vmem:[%s8537_s29 + $0xb2] sm:$0xff] }
 0x298   : > { %v1977_v48 = vpop.permute.xlu0 %1976  ;;  %v1979_v49 = vpop.permute.xlu1 %1978 }
 0x299   : > { %2095 = vst.msk [vmem:[#allocation3 + $0xd0] sm:$0xff] %vm2068_vm6, %v1977_v48  ;;  %2096 = vst.msk [vmem:[#allocation3 + $0xd8] sm:$0xff] %vm2068_vm6, %v1979_v49  ;;  %v2425_v48 = vld [vmem:[%s8537_s29 + $0xca] sm:$0xff] }
 0x29a   : > { %2285 = vrot.lane.b32.xlu0 %v2153_v46, %s8476_s13  ;;  %2287 = vrot.lane.b32.xlu1 %v2154_v47, %s8476_s13  ;;  %v2424_v47 = vld [vmem:[%s8537_s29 + $0xc2] sm:$0xff] }
 0x29c   : > { %v1981_v56 = vpop.permute.xlu0 %1980  ;;  %v1983_v57 = vpop.permute.xlu1 %1982 }
 0x29d   : > { %2097 = vst.msk [vmem:[#allocation3 + $0xe0] sm:$0xff] %vm2068_vm6, %v1981_v56  ;;  %2098 = vst.msk [vmem:[#allocation3 + $0xe8] sm:$0xff] %vm2068_vm6, %v1983_v57  ;;  %v2427_v56 = vld [vmem:[%s8537_s29 + $0xda] sm:$0xff] }
 0x29e   : > { %2289 = vrot.lane.b32.xlu0 %v2155_v52, %s8476_s13  ;;  %2291 = vrot.lane.b32.xlu1 %v2156_v53, %s8476_s13  ;;  %v2426_v53 = vld [vmem:[%s8537_s29 + $0xd2] sm:$0xff] }
 0x2a0   : > { %v1985_v0 = vpop.permute.xlu0 %1984  ;;  %v1987_v1 = vpop.permute.xlu1 %1986 }
 0x2a1   : > { %2099 = vst.msk [vmem:[#allocation3 + $0xf0] sm:$0xff] %vm2068_vm6, %v1985_v0  ;;  %2100 = vst.msk [vmem:[#allocation3 + $0xf8] sm:$0xff] %vm2068_vm6, %v1987_v1  ;;  %v2429_v0 = vld [vmem:[%s8537_s29 + $0xea] sm:$0xff] }
 0x2a2   : > { %2293 = vrot.lane.b32.xlu0 %v2157_v60, %s8476_s13  ;;  %2295 = vrot.lane.b32.xlu1 %v2158_v61, %s8476_s13  ;;  %v2428_v61 = vld [vmem:[%s8537_s29 + $0xe2] sm:$0xff] }
 0x2a4   : > { %v1989_v9 = vpop.permute.xlu0 %1988  ;;  %v1991_v12 = vpop.permute.xlu1 %1990 }
 0x2a5   : > { %2101 = vst.msk [vmem:[#allocation3 + $0x100] sm:$0xff] %vm2068_vm6, %v1989_v9  ;;  %2102 = vst.msk [vmem:[#allocation3 + $0x108] sm:$0xff] %vm2068_vm6, %v1991_v12 }
 0x2a6   : > { %2297 = vrot.lane.b32.xlu0 %v2159_v5, %s8476_s13  ;;  %2299 = vrot.lane.b32.xlu1 %v2160_v8, %s8476_s13  ;;  %v2430_v5 = vld [vmem:[%s8537_s29 + $0xf2] sm:$0xff]  ;;  %v2431_v8 = vld [vmem:[%s8537_s29 + $0xfa] sm:$0xff] }
 0x2a8   : > { %v1993_v58 = vpop.permute.xlu0 %1992  ;;  %v1995_v35 = vpop.permute.xlu1 %1994 }
 0x2a9   : > { %2103 = vst.msk [vmem:[#allocation3 + $0x110] sm:$0xff] %vm2068_vm6, %v1993_v58  ;;  %2104 = vst.msk [vmem:[#allocation3 + $0x118] sm:$0xff] %vm2068_vm6, %v1995_v35  ;;  %v2434_v58 = vld [vmem:[%s8537_s29 + $0x112] sm:$0xff]  ;;  %v2435_v35 = vld [vmem:[%s8537_s29 + $0x11a] sm:$0xff] }
 0x2aa   : > { %2301 = vrot.lane.b32.xlu0 %v2161_v21, %s8476_s13  ;;  %2303 = vrot.lane.b32.xlu1 %v2162_v29, %s8476_s13 }
 0x2ac   : > { %v1997_v50 = vpop.permute.xlu0 %1996  ;;  %v1999_v63 = vpop.permute.xlu1 %1998 }
 0x2ad   : > { %2105 = vst.msk [vmem:[#allocation3 + $0x120] sm:$0xff] %vm2068_vm6, %v1997_v50  ;;  %2106 = vst.msk [vmem:[#allocation3 + $0x128] sm:$0xff] %vm2068_vm6, %v1999_v63  ;;  %v2437_v50 = vld [vmem:[%s8537_s29 + $0x12a] sm:$0xff] }
 0x2ae   : > { %2305 = vrot.lane.b32.xlu0 %v2163_v59, %s8476_s13  ;;  %2307 = vrot.lane.b32.xlu1 %v2164_v62, %s8476_s13  ;;  %v2436_v62 = vld [vmem:[%s8537_s29 + $0x122] sm:$0xff] }
 0x2b0   : > { %v2001_v7 = vpop.permute.xlu0 %2000  ;;  %v2003_v10 = vpop.permute.xlu1 %2002 }
 0x2b1   : > { %2107 = vst.msk [vmem:[#allocation3 + $0x130] sm:$0xff] %vm2068_vm6, %v2001_v7  ;;  %2108 = vst.msk [vmem:[#allocation3 + $0x138] sm:$0xff] %vm2068_vm6, %v2003_v10 }
 0x2b2   : > { %2502 = vrot.lane.b32.xlu0 %v2406_v3, %s8477_s26  ;;  %2504 = vrot.lane.b32.xlu1 %v2407_v6, %s8477_s26  ;;  %v2438_v3 = vld [vmem:[%s8537_s29 + $0x132] sm:$0xff]  ;;  %v2439_v6 = vld [vmem:[%s8537_s29 + $0x13a] sm:$0xff] }
 0x2b4   : > { %v2005_v15 = vpop.permute.xlu0 %2004  ;;  %v2007_v22 = vpop.permute.xlu1 %2006 }
 0x2b5   : > { %2109 = vst.msk [vmem:[#allocation3 + $0x140] sm:$0xff] %vm2068_vm6, %v2005_v15  ;;  %2110 = vst.msk [vmem:[#allocation3 + $0x148] sm:$0xff] %vm2068_vm6, %v2007_v22 }
 0x2b6   : > { %2506 = vrot.lane.b32.xlu0 %v2408_v11, %s8477_s26  ;;  %2508 = vrot.lane.b32.xlu1 %v2409_v14, %s8477_s26  ;;  %v2440_v11 = vld [vmem:[%s8537_s29 + $0x142] sm:$0xff]  ;;  %v2441_v14 = vld [vmem:[%s8537_s29 + $0x14a] sm:$0xff] }
 0x2b8   : > { %v2009_v44 = vpop.permute.xlu0 %2008  ;;  %v2011_v51 = vpop.permute.xlu1 %2010 }
 0x2b9   : > { %2111 = vst.msk [vmem:[#allocation3 + $0x150] sm:$0xff] %vm2068_vm6, %v2009_v44  ;;  %2112 = vst.msk [vmem:[#allocation3 + $0x158] sm:$0xff] %vm2068_vm6, %v2011_v51 }
 0x2ba   : > { %2510 = vrot.lane.b32.xlu0 %v2410_v28, %s8477_s26  ;;  %2512 = vrot.lane.b32.xlu1 %v2411_v37, %s8477_s26  ;;  %v2442_v28 = vld [vmem:[%s8537_s29 + $0x152] sm:$0xff]  ;;  %v2443_v37 = vld [vmem:[%s8537_s29 + $0x15a] sm:$0xff] }
 0x2bc   : > { %v2013_v17 = vpop.permute.xlu0 %2012  ;;  %v2015_v18 = vpop.permute.xlu1 %2014 }
 0x2bd   : > { %2113 = vst.msk [vmem:[#allocation3 + $0x160] sm:$0xff] %vm2068_vm6, %v2013_v17  ;;  %2114 = vst.msk [vmem:[#allocation3 + $0x168] sm:$0xff] %vm2068_vm6, %v2015_v18 }
 0x2be   : > { %2514 = vrot.lane.b32.xlu0 %v2412_v54, %s8477_s26  ;;  %2516 = vrot.lane.b32.xlu1 %v2413_v55, %s8477_s26  ;;  %v2444_v54 = vld [vmem:[%s8537_s29 + $0x162] sm:$0xff]  ;;  %v2445_v55 = vld [vmem:[%s8537_s29 + $0x16a] sm:$0xff] }
 0x2c0   : > { %v2017_v23 = vpop.permute.xlu0 %2016  ;;  %v2019_v24 = vpop.permute.xlu1 %2018 }
 0x2c1   : > { %2115 = vst.msk [vmem:[#allocation3 + $0x170] sm:$0xff] %vm2068_vm6, %v2017_v23  ;;  %2116 = vst.msk [vmem:[#allocation3 + $0x178] sm:$0xff] %vm2068_vm6, %v2019_v24 }
 0x2c2   : > { %2518 = vrot.lane.b32.xlu0 %v2414_v19, %s8477_s26  ;;  %2520 = vrot.lane.b32.xlu1 %v2415_v20, %s8477_s26  ;;  %v2446_v19 = vld [vmem:[%s8537_s29 + $0x172] sm:$0xff]  ;;  %v2447_v20 = vld [vmem:[%s8537_s29 + $0x17a] sm:$0xff] }
 0x2c4   : > { %v2214_v27 = vpop.permute.xlu0 %2213  ;;  %v2216_v30 = vpop.permute.xlu1 %2215 }
 0x2c5   : > { %2358 = vst.msk [vmem:[#allocation3] sm:$0xff] %vm2357_vm8, %v2214_v27  ;;  %2359 = vst.msk [vmem:[#allocation3 + $0x8] sm:$0xff] %vm2357_vm8, %v2216_v30 }
 0x2c6   : > { %2522 = vrot.lane.b32.xlu0 %v2416_v25, %s8477_s26  ;;  %2524 = vrot.lane.b32.xlu1 %v2417_v26, %s8477_s26  ;;  %v2448_v25 = vld [vmem:[%s8537_s29 + $0x182] sm:$0xff]  ;;  %v2449_v26 = vld [vmem:[%s8537_s29 + $0x18a] sm:$0xff] }
 0x2c8   : > { %v2218_v33 = vpop.permute.xlu0 %2217  ;;  %v2220_v34 = vpop.permute.xlu1 %2219 }
 0x2c9   : > { %2360 = vst.msk [vmem:[#allocation3 + $0x10] sm:$0xff] %vm2357_vm8, %v2218_v33  ;;  %2361 = vst.msk [vmem:[#allocation3 + $0x18] sm:$0xff] %vm2357_vm8, %v2220_v34 }
 0x2ca   : > { %2526 = vrot.lane.b32.xlu0 %v2418_v31, %s8477_s26  ;;  %2528 = vrot.lane.b32.xlu1 %v2419_v32, %s8477_s26  ;;  %v2450_v31 = vld [vmem:[%s8537_s29 + $0x192] sm:$0xff]  ;;  %v2451_v32 = vld [vmem:[%s8537_s29 + $0x19a] sm:$0xff] }
 0x2cc   : > { %v2222_v39 = vpop.permute.xlu0 %2221  ;;  %v2224_v40 = vpop.permute.xlu1 %2223 }
 0x2cd   : > { %2362 = vst.msk [vmem:[#allocation3 + $0x20] sm:$0xff] %vm2357_vm8, %v2222_v39  ;;  %2363 = vst.msk [vmem:[#allocation3 + $0x28] sm:$0xff] %vm2357_vm8, %v2224_v40 }
 0x2ce   : > { %2530 = vrot.lane.b32.xlu0 %v2420_v36, %s8477_s26  ;;  %2532 = vrot.lane.b32.xlu1 %v2421_v38, %s8477_s26  ;;  %v2452_v36 = vld [vmem:[%s8537_s29 + $0x1a2] sm:$0xff]  ;;  %v2453_v38 = vld [vmem:[%s8537_s29 + $0x1aa] sm:$0xff] }
 0x2d0   : > { %v2226_v43 = vpop.permute.xlu0 %2225  ;;  %v2228_v46 = vpop.permute.xlu1 %2227 }
 0x2d1   : > { %2364 = vst.msk [vmem:[#allocation3 + $0x30] sm:$0xff] %vm2357_vm8, %v2226_v43  ;;  %2365 = vst.msk [vmem:[#allocation3 + $0x38] sm:$0xff] %vm2357_vm8, %v2228_v46 }
 0x2d2   : > { %2534 = vrot.lane.b32.xlu0 %v2422_v41, %s8477_s26  ;;  %2536 = vrot.lane.b32.xlu1 %v2423_v42, %s8477_s26 }
 0x2d4   : > { %v2230_v49 = vpop.permute.xlu0 %2229  ;;  %v2232_v52 = vpop.permute.xlu1 %2231 }
 0x2d5   : > { %2366 = vst.msk [vmem:[#allocation3 + $0x40] sm:$0xff] %vm2357_vm8, %v2230_v49  ;;  %2367 = vst.msk [vmem:[#allocation3 + $0x48] sm:$0xff] %vm2357_vm8, %v2232_v52 }
 0x2d6   : > { %2538 = vrot.lane.b32.xlu0 %v2424_v47, %s8477_s26  ;;  %2540 = vrot.lane.b32.xlu1 %v2425_v48, %s8477_s26 }
 0x2d8   : > { %v2234_v57 = vpop.permute.xlu0 %2233  ;;  %v2236_v60 = vpop.permute.xlu1 %2235 }
 0x2d9   : > { %2368 = vst.msk [vmem:[#allocation3 + $0x50] sm:$0xff] %vm2357_vm8, %v2234_v57  ;;  %2369 = vst.msk [vmem:[#allocation3 + $0x58] sm:$0xff] %vm2357_vm8, %v2236_v60 }
 0x2da   : > { %2542 = vrot.lane.b32.xlu0 %v2426_v53, %s8477_s26  ;;  %2544 = vrot.lane.b32.xlu1 %v2427_v56, %s8477_s26 }
 0x2dc   : > { %v2238_v1 = vpop.permute.xlu0 %2237  ;;  %v2240_v4 = vpop.permute.xlu1 %2239 }
 0x2dd   : > { %2370 = vst.msk [vmem:[#allocation3 + $0x60] sm:$0xff] %vm2357_vm8, %v2238_v1  ;;  %2371 = vst.msk [vmem:[#allocation3 + $0x68] sm:$0xff] %vm2357_vm8, %v2240_v4 }
 0x2de   : > { %2546 = vrot.lane.b32.xlu0 %v2428_v61, %s8477_s26  ;;  %2548 = vrot.lane.b32.xlu1 %v2429_v0, %s8477_s26 }
 0x2e0   : > { %v2242_v9 = vpop.permute.xlu0 %2241  ;;  %v2244_v12 = vpop.permute.xlu1 %2243 }
 0x2e1   : > { %2372 = vst.msk [vmem:[#allocation3 + $0x70] sm:$0xff] %vm2357_vm8, %v2242_v9  ;;  %2373 = vst.msk [vmem:[#allocation3 + $0x78] sm:$0xff] %vm2357_vm8, %v2244_v12 }
 0x2e2   : > { %2550 = vrot.lane.b32.xlu0 %v2430_v5, %s8477_s26  ;;  %2552 = vrot.lane.b32.xlu1 %v2431_v8, %s8477_s26 }
 0x2e4   : > { %v2246_v21 = vpop.permute.xlu0 %2245  ;;  %v2248_v29 = vpop.permute.xlu1 %2247 }
 0x2e5   : > { %2374 = vst.msk [vmem:[#allocation3 + $0x80] sm:$0xff] %vm2357_vm8, %v2246_v21  ;;  %2375 = vst.msk [vmem:[#allocation3 + $0x88] sm:$0xff] %vm2357_vm8, %v2248_v29 }
 0x2e6   : > { %2554 = vrot.lane.b32.xlu0 %v2432_v13, %s8477_s26  ;;  %2556 = vrot.lane.b32.xlu1 %v2433_v16, %s8477_s26 }
 0x2e8   : > { %v2250_v45 = vpop.permute.xlu0 %2249  ;;  %v2252_v59 = vpop.permute.xlu1 %2251 }
 0x2e9   : > { %2376 = vst.msk [vmem:[#allocation3 + $0x90] sm:$0xff] %vm2357_vm8, %v2250_v45  ;;  %2377 = vst.msk [vmem:[#allocation3 + $0x98] sm:$0xff] %vm2357_vm8, %v2252_v59 }
 0x2ea   : > { %2558 = vrot.lane.b32.xlu0 %v2434_v58, %s8477_s26  ;;  %2560 = vrot.lane.b32.xlu1 %v2435_v35, %s8477_s26 }
 0x2ec   : > { %v2254_v63 = vpop.permute.xlu0 %2253  ;;  %v2256_v2 = vpop.permute.xlu1 %2255 }
 0x2ed   : > { %2378 = vst.msk [vmem:[#allocation3 + $0xa0] sm:$0xff] %vm2357_vm8, %v2254_v63  ;;  %2379 = vst.msk [vmem:[#allocation3 + $0xa8] sm:$0xff] %vm2357_vm8, %v2256_v2 }
 0x2ee   : > { %2562 = vrot.lane.b32.xlu0 %v2436_v62, %s8477_s26  ;;  %2564 = vrot.lane.b32.xlu1 %v2437_v50, %s8477_s26 }
 0x2f0   : > { %v2258_v7 = vpop.permute.xlu0 %2257  ;;  %v2260_v10 = vpop.permute.xlu1 %2259 }
 0x2f1   : > { %2380 = vst.msk [vmem:[#allocation3 + $0xb0] sm:$0xff] %vm2357_vm8, %v2258_v7  ;;  %2381 = vst.msk [vmem:[#allocation3 + $0xb8] sm:$0xff] %vm2357_vm8, %v2260_v10 }
 0x2f2   : > { %2566 = vrot.lane.b32.xlu0 %v2438_v3, %s8477_s26  ;;  %2568 = vrot.lane.b32.xlu1 %v2439_v6, %s8477_s26 }
 0x2f4   : > { %v2262_v15 = vpop.permute.xlu0 %2261  ;;  %v2264_v22 = vpop.permute.xlu1 %2263 }
 0x2f5   : > { %2382 = vst.msk [vmem:[#allocation3 + $0xc0] sm:$0xff] %vm2357_vm8, %v2262_v15  ;;  %2383 = vst.msk [vmem:[#allocation3 + $0xc8] sm:$0xff] %vm2357_vm8, %v2264_v22 }
 0x2f6   : > { %2570 = vrot.lane.b32.xlu0 %v2440_v11, %s8477_s26  ;;  %2572 = vrot.lane.b32.xlu1 %v2441_v14, %s8477_s26 }
 0x2f8   : > { %v2266_v44 = vpop.permute.xlu0 %2265  ;;  %v2268_v51 = vpop.permute.xlu1 %2267 }
 0x2f9   : > { %2384 = vst.msk [vmem:[#allocation3 + $0xd0] sm:$0xff] %vm2357_vm8, %v2266_v44  ;;  %2385 = vst.msk [vmem:[#allocation3 + $0xd8] sm:$0xff] %vm2357_vm8, %v2268_v51 }
 0x2fa   : > { %2574 = vrot.lane.b32.xlu0 %v2442_v28, %s8477_s26  ;;  %2576 = vrot.lane.b32.xlu1 %v2443_v37, %s8477_s26 }
 0x2fc   : > { %v2270_v17 = vpop.permute.xlu0 %2269  ;;  %v2272_v18 = vpop.permute.xlu1 %2271 }
 0x2fd   : > { %2386 = vst.msk [vmem:[#allocation3 + $0xe0] sm:$0xff] %vm2357_vm8, %v2270_v17  ;;  %2387 = vst.msk [vmem:[#allocation3 + $0xe8] sm:$0xff] %vm2357_vm8, %v2272_v18 }
 0x2fe   : > { %2578 = vrot.lane.b32.xlu0 %v2444_v54, %s8477_s26  ;;  %2580 = vrot.lane.b32.xlu1 %v2445_v55, %s8477_s26 }
 0x300   : > { %v2274_v23 = vpop.permute.xlu0 %2273  ;;  %v2276_v24 = vpop.permute.xlu1 %2275 }
 0x301   : > { %2388 = vst.msk [vmem:[#allocation3 + $0xf0] sm:$0xff] %vm2357_vm8, %v2274_v23  ;;  %2389 = vst.msk [vmem:[#allocation3 + $0xf8] sm:$0xff] %vm2357_vm8, %v2276_v24 }
 0x302   : > { %2582 = vrot.lane.b32.xlu0 %v2446_v19, %s8477_s26  ;;  %2584 = vrot.lane.b32.xlu1 %v2447_v20, %s8477_s26 }
 0x304   : > { %v2278_v27 = vpop.permute.xlu0 %2277  ;;  %v2280_v30 = vpop.permute.xlu1 %2279 }
 0x305   : > { %2390 = vst.msk [vmem:[#allocation3 + $0x100] sm:$0xff] %vm2357_vm8, %v2278_v27  ;;  %2391 = vst.msk [vmem:[#allocation3 + $0x108] sm:$0xff] %vm2357_vm8, %v2280_v30 }
 0x306   : > { %2586 = vrot.lane.b32.xlu0 %v2448_v25, %s8477_s26  ;;  %2588 = vrot.lane.b32.xlu1 %v2449_v26, %s8477_s26 }
 0x308   : > { %v2282_v33 = vpop.permute.xlu0 %2281  ;;  %v2284_v34 = vpop.permute.xlu1 %2283 }
 0x309   : > { %2392 = vst.msk [vmem:[#allocation3 + $0x110] sm:$0xff] %vm2357_vm8, %v2282_v33  ;;  %2393 = vst.msk [vmem:[#allocation3 + $0x118] sm:$0xff] %vm2357_vm8, %v2284_v34 }
 0x30a   : > { %2590 = vrot.lane.b32.xlu0 %v2450_v31, %s8477_s26  ;;  %2592 = vrot.lane.b32.xlu1 %v2451_v32, %s8477_s26 }
 0x30c   : > { %v2286_v39 = vpop.permute.xlu0 %2285  ;;  %v2288_v40 = vpop.permute.xlu1 %2287 }
 0x30d   : > { %2394 = vst.msk [vmem:[#allocation3 + $0x120] sm:$0xff] %vm2357_vm8, %v2286_v39  ;;  %2395 = vst.msk [vmem:[#allocation3 + $0x128] sm:$0xff] %vm2357_vm8, %v2288_v40 }
 0x30e   : > { %2594 = vrot.lane.b32.xlu0 %v2452_v36, %s8477_s26  ;;  %2596 = vrot.lane.b32.xlu1 %v2453_v38, %s8477_s26 }
 0x310   : > { %v2290_v41 = vpop.permute.xlu0 %2289  ;;  %v2292_v42 = vpop.permute.xlu1 %2291 }
 0x311   : > { %2396 = vst.msk [vmem:[#allocation3 + $0x130] sm:$0xff] %vm2357_vm8, %v2290_v41  ;;  %2397 = vst.msk [vmem:[#allocation3 + $0x138] sm:$0xff] %vm2357_vm8, %v2292_v42 }
 0x314   : > { %v2294_v43 = vpop.permute.xlu0 %2293  ;;  %v2296_v46 = vpop.permute.xlu1 %2295 }
 0x315   : > { %2398 = vst.msk [vmem:[#allocation3 + $0x140] sm:$0xff] %vm2357_vm8, %v2294_v43  ;;  %2399 = vst.msk [vmem:[#allocation3 + $0x148] sm:$0xff] %vm2357_vm8, %v2296_v46 }
 0x318   : > { %v2298_v47 = vpop.permute.xlu0 %2297  ;;  %v2300_v48 = vpop.permute.xlu1 %2299 }
 0x319   : > { %2400 = vst.msk [vmem:[#allocation3 + $0x150] sm:$0xff] %vm2357_vm8, %v2298_v47  ;;  %2401 = vst.msk [vmem:[#allocation3 + $0x158] sm:$0xff] %vm2357_vm8, %v2300_v48 }
 0x31c   : > { %v2302_v49 = vpop.permute.xlu0 %2301  ;;  %v2304_v52 = vpop.permute.xlu1 %2303 }
 0x31d   : > { %2402 = vst.msk [vmem:[#allocation3 + $0x160] sm:$0xff] %vm2357_vm8, %v2302_v49  ;;  %2403 = vst.msk [vmem:[#allocation3 + $0x168] sm:$0xff] %vm2357_vm8, %v2304_v52 }
 0x320   : > { %v2306_v53 = vpop.permute.xlu0 %2305  ;;  %v2308_v56 = vpop.permute.xlu1 %2307 }
 0x321   : > { %2404 = vst.msk [vmem:[#allocation3 + $0x170] sm:$0xff] %vm2357_vm8, %v2306_v53  ;;  %2405 = vst.msk [vmem:[#allocation3 + $0x178] sm:$0xff] %vm2357_vm8, %v2308_v56 }
 0x324   : > { %v2503_v57 = vpop.permute.xlu0 %2502  ;;  %v2505_v60 = vpop.permute.xlu1 %2504 }
 0x325   : > { %2647 = vst.msk [vmem:[#allocation3] sm:$0xff] %vm2646_vm9, %v2503_v57  ;;  %2648 = vst.msk [vmem:[#allocation3 + $0x8] sm:$0xff] %vm2646_vm9, %v2505_v60 }
 0x328   : > { %v2507_v61 = vpop.permute.xlu0 %2506  ;;  %v2509_v0 = vpop.permute.xlu1 %2508 }
 0x329   : > { %2649 = vst.msk [vmem:[#allocation3 + $0x10] sm:$0xff] %vm2646_vm9, %v2507_v61  ;;  %2650 = vst.msk [vmem:[#allocation3 + $0x18] sm:$0xff] %vm2646_vm9, %v2509_v0 }
 0x32c   : > { %v2511_v1 = vpop.permute.xlu0 %2510  ;;  %v2513_v4 = vpop.permute.xlu1 %2512  ;;  %v2695_v5 = vld [vmem:[#allocation3] sm:$0xff]  ;;  %v2696_v8 = vld [vmem:[#allocation3 + $0x8] sm:$0xff] }
 0x32d   : > { %2651 = vst.msk [vmem:[#allocation3 + $0x20] sm:$0xff] %vm2646_vm9, %v2511_v1  ;;  %2652 = vst.msk [vmem:[#allocation3 + $0x28] sm:$0xff] %vm2646_vm9, %v2513_v4  ;;  %8160 = vmatprep.mubr.msk.f32.mxu0 %vm2748_vm10, %v2695_v5 }
 0x32e   : > { %8161 = vmatmul.mubr.msk.f32.vlgmr.msra.gmra.mxu0 %vm2748_vm10, %v2696_v8 }
 0x330   : > { %v2515_v9 = vpop.permute.xlu0 %2514  ;;  %v2517_v12 = vpop.permute.xlu1 %2516  ;;  %v2697_v13 = vld [vmem:[#allocation3 + $0x10] sm:$0xff]  ;;  %v2698_v16 = vld [vmem:[#allocation3 + $0x18] sm:$0xff] }
 0x331   : > { %2653 = vst.msk [vmem:[#allocation3 + $0x30] sm:$0xff] %vm2646_vm9, %v2515_v9  ;;  %2654 = vst.msk [vmem:[#allocation3 + $0x38] sm:$0xff] %vm2646_vm9, %v2517_v12  ;;  %8163 = vmatprep.mubr.msk.f32.mxu0 %vm2748_vm10, %v2697_v13  ;;  %v8478_v9 = vmov 0.0  }
 0x332   : > { %8164 = vmatmul.mubr.msk.f32.gmra.mxu0 %vm2748_vm10, %v2698_v16  ;;  %279 = vst.msk [vmem:[#allocation2 + $0x8] sm:$0xff] %vm13410_vm11, %v8478_v9  ;;  %278 = vst.msk [vmem:[#allocation2] sm:$0xff] %vm13410_vm11, %v8478_v9 }
 0x333   : > { %280 = vst.msk [vmem:[#allocation2 + $0x10] sm:$0xff] %vm13410_vm11, %v8478_v9  ;;  %281 = vst.msk [vmem:[#allocation2 + $0x18] sm:$0xff] %vm13410_vm11, %v8478_v9 }
 0x334   : > { %v2519_v21 = vpop.permute.xlu0 %2518  ;;  %v2521_v29 = vpop.permute.xlu1 %2520  ;;  %v2699_v58 = vld [vmem:[#allocation3 + $0x20] sm:$0xff]  ;;  %v2700_v35 = vld [vmem:[#allocation3 + $0x28] sm:$0xff]  ;;  %282 = vst.msk [vmem:[#allocation2 + $0x1a0] sm:$0xff] %vm13410_vm11, %v8478_v9  ;;  %283 = vst.msk [vmem:[#allocation2 + $0x1a8] sm:$0xff] %vm13410_vm11, %v8478_v9 }
 0x335   : > { %2655 = vst.msk [vmem:[#allocation3 + $0x40] sm:$0xff] %vm2646_vm9, %v2519_v21  ;;  %2656 = vst.msk [vmem:[#allocation3 + $0x48] sm:$0xff] %vm2646_vm9, %v2521_v29  ;;  %8166 = vmatprep.mubr.msk.f32.mxu0 %vm2748_vm10, %v2699_v58 }
 0x336   : > { %8167 = vmatmul.mubr.msk.f32.gmra.mxu0 %vm2748_vm10, %v2700_v35  ;;  %284 = vst.msk [vmem:[#allocation2 + $0x1b0] sm:$0xff] %vm13410_vm11, %v8478_v9  ;;  %285 = vst.msk [vmem:[#allocation2 + $0x1b8] sm:$0xff] %vm13410_vm11, %v8478_v9 }
 0x338   : > { %v2523_v45 = vpop.permute.xlu0 %2522  ;;  %v2525_v59 = vpop.permute.xlu1 %2524  ;;  %v2701_v62 = vld [vmem:[#allocation3 + $0x30] sm:$0xff]  ;;  %v2702_v50 = vld [vmem:[#allocation3 + $0x38] sm:$0xff] }
 0x339   : > { %2657 = vst.msk [vmem:[#allocation3 + $0x50] sm:$0xff] %vm2646_vm9, %v2523_v45  ;;  %2658 = vst.msk [vmem:[#allocation3 + $0x58] sm:$0xff] %vm2646_vm9, %v2525_v59  ;;  %8169 = vmatprep.mubr.msk.f32.mxu0 %vm2748_vm10, %v2701_v62  ;;  %v4513_v59 = vld [vmem:[#allocation2 + $0x8] sm:$0xff] }
 0x33a   : > { %8170 = vmatmul.mubr.msk.f32.gmra.mxu0 %vm2748_vm10, %v2702_v50  ;;  %4609 = vrot.lane.b32.xlu0 %v4513_v59, %s8471_s8 }
 0x33c   : > { %v2527_v63 = vpop.permute.xlu0 %2526  ;;  %v2529_v2 = vpop.permute.xlu1 %2528  ;;  %v2703_v3 = vld [vmem:[#allocation3 + $0x40] sm:$0xff]  ;;  %v2704_v6 = vld [vmem:[#allocation3 + $0x48] sm:$0xff] }
 0x33d   : > { %2659 = vst.msk [vmem:[#allocation3 + $0x60] sm:$0xff] %vm2646_vm9, %v2527_v63  ;;  %2660 = vst.msk [vmem:[#allocation3 + $0x68] sm:$0xff] %vm2646_vm9, %v2529_v2  ;;  %8172 = vmatprep.mubr.msk.f32.mxu0 %vm2748_vm10, %v2703_v3  ;;  %v4515_v3 = vld [vmem:[#allocation2 + $0x18] sm:$0xff] }
 0x33e   : > { %8173 = vmatmul.mubr.msk.f32.gmra.mxu0 %vm2748_vm10, %v2704_v6  ;;  %4613 = vrot.lane.b32.xlu0 %v4515_v3, %s8471_s8  ;;  %v4514_v6 = vld [vmem:[#allocation2 + $0x10] sm:$0xff] }
 0x33f   : > { %4611 = vrot.lane.b32.xlu1 %v4514_v6, %s8471_s8 }
 0x340   : > { %v2531_v7 = vpop.permute.xlu0 %2530  ;;  %v2533_v10 = vpop.permute.xlu1 %2532  ;;  %v2705_v11 = vld [vmem:[#allocation3 + $0x50] sm:$0xff]  ;;  %v2706_v14 = vld [vmem:[#allocation3 + $0x58] sm:$0xff] }
 0x341   : > { %2661 = vst.msk [vmem:[#allocation3 + $0x70] sm:$0xff] %vm2646_vm9, %v2531_v7  ;;  %2662 = vst.msk [vmem:[#allocation3 + $0x78] sm:$0xff] %vm2646_vm9, %v2533_v10  ;;  %8175 = vmatprep.mubr.msk.f32.mxu0 %vm2748_vm10, %v2705_v11 }
 0x342   : > { %8176 = vmatmul.mubr.msk.f32.gmra.mxu0 %vm2748_vm10, %v2706_v14 }
 0x344   : > { %v2535_v15 = vpop.permute.xlu0 %2534  ;;  %v2537_v22 = vpop.permute.xlu1 %2536  ;;  %v2707_v28 = vld [vmem:[#allocation3 + $0x60] sm:$0xff]  ;;  %v2708_v37 = vld [vmem:[#allocation3 + $0x68] sm:$0xff] }
 0x345   : > { %2663 = vst.msk [vmem:[#allocation3 + $0x80] sm:$0xff] %vm2646_vm9, %v2535_v15  ;;  %2664 = vst.msk [vmem:[#allocation3 + $0x88] sm:$0xff] %vm2646_vm9, %v2537_v22  ;;  %8178 = vmatprep.mubr.msk.f32.mxu0 %vm2748_vm10, %v2707_v28 }
 0x346   : > { %8179 = vmatmul.mubr.msk.f32.gmra.mxu0 %vm2748_vm10, %v2708_v37 }
 0x348   : > { %v2539_v44 = vpop.permute.xlu0 %2538  ;;  %v2541_v51 = vpop.permute.xlu1 %2540  ;;  %v2709_v54 = vld [vmem:[#allocation3 + $0x70] sm:$0xff]  ;;  %v2710_v55 = vld [vmem:[#allocation3 + $0x78] sm:$0xff] }
 0x349   : > { %2665 = vst.msk [vmem:[#allocation3 + $0x90] sm:$0xff] %vm2646_vm9, %v2539_v44  ;;  %2666 = vst.msk [vmem:[#allocation3 + $0x98] sm:$0xff] %vm2646_vm9, %v2541_v51  ;;  %8181 = vmatprep.mubr.msk.f32.mxu0 %vm2748_vm10, %v2709_v54 }
 0x34a   : > { %8182 = vmatmul.mubr.msk.f32.gmra.mxu0 %vm2748_vm10, %v2710_v55 }
 0x34c   : > { %v2543_v17 = vpop.permute.xlu0 %2542  ;;  %v2545_v18 = vpop.permute.xlu1 %2544  ;;  %v2711_v19 = vld [vmem:[#allocation3 + $0x80] sm:$0xff]  ;;  %v2712_v20 = vld [vmem:[#allocation3 + $0x88] sm:$0xff] }
 0x34d   : > { %2667 = vst.msk [vmem:[#allocation3 + $0xa0] sm:$0xff] %vm2646_vm9, %v2543_v17  ;;  %2668 = vst.msk [vmem:[#allocation3 + $0xa8] sm:$0xff] %vm2646_vm9, %v2545_v18  ;;  %8184 = vmatprep.mubr.msk.f32.mxu0 %vm2748_vm10, %v2711_v19  ;;  %v3360_v17 = vlaneseq }
 0x34e   : > { %8185 = vmatmul.mubr.msk.f32.gmra.mxu0 %vm2748_vm10, %v2712_v20 }
 0x34f   : > { %v9996_v18 = vshrl.u32 %v3360_v17, 7 }
 0x350   : > { %v2547_v23 = vpop.permute.xlu0 %2546  ;;  %v2549_v24 = vpop.permute.xlu1 %2548  ;;  %v2713_v25 = vld [vmem:[#allocation3 + $0x90] sm:$0xff]  ;;  %v2714_v26 = vld [vmem:[#allocation3 + $0x98] sm:$0xff] }
 0x351   : > { %2669 = vst.msk [vmem:[#allocation3 + $0xb0] sm:$0xff] %vm2646_vm9, %v2547_v23  ;;  %2670 = vst.msk [vmem:[#allocation3 + $0xb8] sm:$0xff] %vm2646_vm9, %v2549_v24  ;;  %8187 = vmatprep.mubr.msk.f32.mxu0 %vm2748_vm10, %v2713_v25  ;;  %v3362_v19 = vadd.s32 8, %v9996_v18  ;;  %v3364_v20 = vadd.s32 24, %v9996_v18  ;;  %v3363_v25 = vadd.s32 16, %v9996_v18  ;;  %v10073_v59 = vadd.s32 88, %v9996_v18 }
 0x352   : > { %8188 = vmatmul.mubr.msk.f32.gmra.mxu0 %vm2748_vm10, %v2714_v26 }
 0x353   : > { %v10000_v23 = vmul.u32.u64.low 2863311531, %v3362_v19  ;;  %v10001_v24 = vmul.u32.u64.high 2863311531, %v3362_v19, %v10000_v23 }
 0x354   : > { %v2551_v27 = vpop.permute.xlu0 %2550  ;;  %v2553_v30 = vpop.permute.xlu1 %2552  ;;  %v2715_v31 = vld [vmem:[#allocation3 + $0xa0] sm:$0xff]  ;;  %v2716_v32 = vld [vmem:[#allocation3 + $0xa8] sm:$0xff] }
 0x355   : > { %2671 = vst.msk [vmem:[#allocation3 + $0xc0] sm:$0xff] %vm2646_vm9, %v2551_v27  ;;  %2672 = vst.msk [vmem:[#allocation3 + $0xc8] sm:$0xff] %vm2646_vm9, %v2553_v30  ;;  %8190 = vmatprep.mubr.msk.f32.mxu0 %vm2748_vm10, %v2715_v31  ;;  %v10005_v26 = vmul.u32.u64.low 2863311531, %v9996_v18  ;;  %v10006_v27 = vmul.u32.u64.high 2863311531, %v9996_v18, %v10005_v26  ;;  %v10008_v30 = vmul.u32.u64.low 2863311531, %v3364_v20  ;;  %v10009_v31 = vmul.u32.u64.high 2863311531, %v3364_v20, %v10008_v30 }
 0x356   : > { %8191 = vmatmul.mubr.msk.f32.gmra.mxu0 %vm2748_vm10, %v2716_v32 }
 0x358   : > { %v2555_v33 = vpop.permute.xlu0 %2554  ;;  %v2557_v34 = vpop.permute.xlu1 %2556  ;;  %v2717_v36 = vld [vmem:[#allocation3 + $0xb0] sm:$0xff]  ;;  %v2718_v38 = vld [vmem:[#allocation3 + $0xb8] sm:$0xff] }
 0x359   : > { %2673 = vst.msk [vmem:[#allocation3 + $0xd0] sm:$0xff] %vm2646_vm9, %v2555_v33  ;;  %2674 = vst.msk [vmem:[#allocation3 + $0xd8] sm:$0xff] %vm2646_vm9, %v2557_v34  ;;  %8193 = vmatprep.mubr.msk.f32.mxu0 %vm2748_vm10, %v2717_v36  ;;  %v10011_v32 = vmul.u32.u64.low 2863311531, %v3363_v25  ;;  %v10012_v33 = vmul.u32.u64.high 2863311531, %v3363_v25, %v10011_v32  ;;  %v3426_v34 = vshrl.u32 %v10001_v24, 4  ;;  %v3366_v36 = vadd.s32 40, %v9996_v18 }
 0x35a   : > { %8194 = vmatmul.mubr.msk.f32.gmra.mxu0 %vm2748_vm10, %v2718_v38  ;;  %v3415_v38 = vshrl.u32 %v10006_v27, 4  ;;  %v13512_v27 = vmov 0 }
 0x35c   : > { %v2559_v39 = vpop.permute.xlu0 %2558  ;;  %v2561_v40 = vpop.permute.xlu1 %2560  ;;  %v2719_v41 = vld [vmem:[#allocation3 + $0xc0] sm:$0xff]  ;;  %v2720_v42 = vld [vmem:[#allocation3 + $0xc8] sm:$0xff] }
 0x35d   : > { %2675 = vst.msk [vmem:[#allocation3 + $0xe0] sm:$0xff] %vm2646_vm9, %v2559_v39  ;;  %2676 = vst.msk [vmem:[#allocation3 + $0xe8] sm:$0xff] %vm2646_vm9, %v2561_v40  ;;  %8196 = vmatprep.mubr.msk.f32.mxu0 %vm2748_vm10, %v2719_v41  ;;  %v10018_v39 = vadd.s32 32, %v9996_v18  ;;  %v3448_v40 = vshrl.u32 %v10009_v31, 4  ;;  %v10022_v41 = vadd.s32 56, %v9996_v18  ;;  %v10149_v31 = vadd.s32 120, %v9996_v18 }
 0x35e   : > { %8197 = vmatmul.mubr.msk.f32.gmra.mxu0 %vm2748_vm10, %v2720_v42  ;;  %v3427_v42 = vmul.u32 24, %v3426_v34 }
 0x360   : > { %v2563_v43 = vpop.permute.xlu0 %2562  ;;  %v2565_v46 = vpop.permute.xlu1 %2564  ;;  %v2721_v47 = vld [vmem:[#allocation3 + $0xd0] sm:$0xff]  ;;  %v2722_v48 = vld [vmem:[#allocation3 + $0xd8] sm:$0xff] }
 0x361   : > { %2677 = vst.msk [vmem:[#allocation3 + $0xf0] sm:$0xff] %vm2646_vm9, %v2563_v43  ;;  %2678 = vst.msk [vmem:[#allocation3 + $0xf8] sm:$0xff] %vm2646_vm9, %v2565_v46  ;;  %8199 = vmatprep.mubr.msk.f32.mxu0 %vm2748_vm10, %v2721_v47  ;;  %v10024_v43 = vmul.u32.u64.low 2863311531, %v3366_v36  ;;  %v10025_v46 = vmul.u32.u64.high 2863311531, %v3366_v36, %v10024_v43  ;;  %v10028_v47 = vadd.s32 48, %v9996_v18 }
 0x362   : > { %8200 = vmatmul.mubr.msk.f32.gmra.mxu0 %vm2748_vm10, %v2722_v48  ;;  %v3437_v48 = vshrl.u32 %v10012_v33, 4  ;;  %v10372_v43 = vadd.s32 200, %v9996_v18 }
 0x364   : > { %v2567_v49 = vpop.permute.xlu0 %2566  ;;  %v2569_v52 = vpop.permute.xlu1 %2568  ;;  %v2723_v53 = vld [vmem:[#allocation3 + $0xe0] sm:$0xff]  ;;  %v2724_v56 = vld [vmem:[#allocation3 + $0xe8] sm:$0xff] }
 0x365   : > { %2679 = vst.msk [vmem:[#allocation3 + $0x100] sm:$0xff] %vm2646_vm9, %v2567_v49  ;;  %2680 = vst.msk [vmem:[#allocation3 + $0x108] sm:$0xff] %vm2646_vm9, %v2569_v52  ;;  %8202 = vmatprep.mubr.msk.f32.mxu0 %vm2748_vm10, %v2723_v53  ;;  %v10032_v49 = vadd.s32 72, %v9996_v18  ;;  %v3416_v52 = vmul.u32 24, %v3415_v38 }
 0x366   : > { %8203 = vmatmul.mubr.msk.f32.gmra.mxu0 %vm2748_vm10, %v2724_v56  ;;  %v10035_v53 = vmul.u32.u64.low 2863311531, %v10018_v39  ;;  %v10036_v56 = vmul.u32.u64.high 2863311531, %v10018_v39, %v10035_v53 }
 0x368   : > { %v2571_v57 = vpop.permute.xlu0 %2570  ;;  %v2573_v60 = vpop.permute.xlu1 %2572  ;;  %v2725_v61 = vld [vmem:[#allocation3 + $0xf0] sm:$0xff]  ;;  %v2726_v0 = vld [vmem:[#allocation3 + $0xf8] sm:$0xff] }
 0x369   : > { %2681 = vst.msk [vmem:[#allocation3 + $0x110] sm:$0xff] %vm2646_vm9, %v2571_v57  ;;  %2682 = vst.msk [vmem:[#allocation3 + $0x118] sm:$0xff] %vm2646_vm9, %v2573_v60  ;;  %8205 = vmatprep.mubr.msk.f32.mxu0 %vm2748_vm10, %v2725_v61  ;;  %v10039_v57 = vadd.s32 64, %v9996_v18  ;;  %v3449_v60 = vmul.u32 24, %v3448_v40 }
 0x36a   : > { %8206 = vmatmul.mubr.msk.f32.gmra.mxu0 %vm2748_vm10, %v2726_v0  ;;  %v10042_v61 = vmul.u32.u64.low 2863311531, %v10022_v41  ;;  %v10043_v0 = vmul.u32.u64.high 2863311531, %v10022_v41, %v10042_v61 }
 0x36b   : > { %v13519_v61 = vmov 0 }
 0x36c   : > { %v2575_v1 = vpop.permute.xlu0 %2574  ;;  %v2577_v4 = vpop.permute.xlu1 %2576  ;;  %v2727_v5 = vld [vmem:[#allocation3 + $0x100] sm:$0xff]  ;;  %v2728_v8 = vld [vmem:[#allocation3 + $0x108] sm:$0xff] }
 0x36d   : > { %2683 = vst.msk [vmem:[#allocation3 + $0x120] sm:$0xff] %vm2646_vm9, %v2575_v1  ;;  %2684 = vst.msk [vmem:[#allocation3 + $0x128] sm:$0xff] %vm2646_vm9, %v2577_v4  ;;  %8208 = vmatprep.mubr.msk.f32.mxu0 %vm2748_vm10, %v2727_v5  ;;  %v10045_v1 = vsub.s32 %v3362_v19, %v3427_v42  ;;  %v10048_v4 = vmul.u32.u64.low 2863311531, %v10028_v47  ;;  %v10049_v5 = vmul.u32.u64.high 2863311531, %v10028_v47, %v10048_v4 }
 0x36e   : > { %8209 = vmatmul.mubr.msk.f32.gmra.mxu0 %vm2748_vm10, %v2728_v8  ;;  %v3438_v8 = vmul.u32 24, %v3437_v48  ;;  %v13521_v4 = vmov 0 }
 0x36f   : > { %vm3938_vm12 = vcmp.ne.s32.totalorder %v10045_v1, 0  ;;  %vm3986_vm13 = vcmp.lt.s32.totalorder %v10045_v1, 0 }
 0x370   : > { %v2579_v12 = vpop.permute.xlu0 %2578  ;;  %v2581_v13 = vpop.permute.xlu1 %2580  ;;  %v2729_v16 = vld [vmem:[#allocation3 + $0x110] sm:$0xff]  ;;  %v2730_v21 = vld [vmem:[#allocation3 + $0x118] sm:$0xff]  ;;  %vm10104_vm3 = vmand %vm3986_vm13, %vm3938_vm12 }
 0x371   : > { %2685 = vst.msk [vmem:[#allocation3 + $0x130] sm:$0xff] %vm2646_vm9, %v2579_v12  ;;  %2686 = vst.msk [vmem:[#allocation3 + $0x138] sm:$0xff] %vm2646_vm9, %v2581_v13  ;;  %8211 = vmatprep.mubr.msk.f32.mxu0 %vm2748_vm10, %v2729_v16  ;;  %v10052_v9 = vmul.u32.u64.low 2863311531, %v10032_v49  ;;  %v10053_v12 = vmul.u32.u64.high 2863311531, %v10032_v49, %v10052_v9  ;;  %v10056_v13 = vsub.s32 %v9996_v18, %v3416_v52 }
 0x372   : > { %8212 = vmatmul.mubr.msk.f32.gmra.mxu0 %vm2748_vm10, %v2730_v21  ;;  %v10059_v16 = vmul.u32.u64.low 2863311531, %v10039_v57  ;;  %v10060_v21 = vmul.u32.u64.high 2863311531, %v10039_v57, %v10059_v16  ;;  %v13524_v9 = vmov 0 }
 0x373   : > { %vm3937_vm14 = vcmp.ne.s32.totalorder %v10056_v13, 0  ;;  %vm3985_vm15 = vcmp.lt.s32.totalorder %v10056_v13, 0  ;;  %v10235_v16 = vadd.s32 136, %v9996_v18 }
 0x374   : > { %v2583_v29 = vpop.permute.xlu0 %2582  ;;  %v2585_v58 = vpop.permute.xlu1 %2584  ;;  %v2731_v35 = vld [vmem:[#allocation3 + $0x120] sm:$0xff]  ;;  %v2732_v45 = vld [vmem:[#allocation3 + $0x128] sm:$0xff]  ;;  %vm10117_vm5 = vmand %vm3985_vm15, %vm3937_vm14 }
 0x375   : > { %2687 = vst.msk [vmem:[#allocation3 + $0x140] sm:$0xff] %vm2646_vm9, %v2583_v29  ;;  %2688 = vst.msk [vmem:[#allocation3 + $0x148] sm:$0xff] %vm2646_vm9, %v2585_v58  ;;  %8214 = vmatprep.mubr.msk.f32.mxu0 %vm2748_vm10, %v2731_v35  ;;  %v10062_v29 = vsub.s32 %v3364_v20, %v3449_v60  ;;  %v3470_v58 = vshrl.u32 %v10025_v46, 4  ;;  %v10068_v35 = vadd.s32 24, %v10045_v1  ;;  %v13510_v20 = vmov 0 }
 0x376   : > { %8215 = vmatmul.mubr.msk.f32.gmra.mxu0 %vm2748_vm10, %v2732_v45  ;;  %v10070_v45 = vsub.s32 %v3363_v25, %v3438_v8 }
 0x377   : > { %vm3940_vm0 = vcmp.ne.s32.totalorder %v10062_v29, 0  ;;  %vm3988_vm1 = vcmp.lt.s32.totalorder %v10062_v29, 0  ;;  %v10088_v3 = vadd.s32 24, %v10062_v29  ;;  %v3471_v6 = vmul.u32 24, %v3470_v58 }
 0x378   : > { %v2587_v62 = vpop.permute.xlu0 %2586  ;;  %v2589_v50 = vpop.permute.xlu1 %2588  ;;  %v2733_v63 = vld [vmem:[#allocation3 + $0x130] sm:$0xff]  ;;  %v2734_v2 = vld [vmem:[#allocation3 + $0x138] sm:$0xff]  ;;  %vm3939_vm2 = vcmp.ne.s32.totalorder %v10070_v45, 0  ;;  %vm3987_vm4 = vcmp.lt.s32.totalorder %v10070_v45, 0  ;;  %vm10132_vm6 = vmand %vm3988_vm1, %vm3940_vm0 }
 0x379   : > { %2689 = vst.msk [vmem:[#allocation3 + $0x150] sm:$0xff] %vm2646_vm9, %v2587_v62  ;;  %2690 = vst.msk [vmem:[#allocation3 + $0x158] sm:$0xff] %vm2646_vm9, %v2589_v50  ;;  %8217 = vmatprep.mubr.msk.f32.mxu0 %vm2748_vm10, %v2733_v63  ;;  %v10078_v62 = vadd.s32 24, %v10056_v13  ;;  %v3459_v50 = vshrl.u32 %v10036_v56, 4  ;;  %v3492_v63 = vshrl.u32 %v10043_v0, 4  ;;  %v13511_v20 = vsel %vm10132_vm6, 4294967295, %v13510_v20 }
 0x37a   : > { %8218 = vmatmul.mubr.msk.f32.gmra.mxu0 %vm2748_vm10, %v2734_v2  ;;  %v10085_v2 = vadd.s32 80, %v9996_v18  ;;  %v10136_v23 = vsub.s32 %v3366_v36, %v3471_v6  ;;  %vm10144_vm7 = vmand %vm3987_vm4, %vm3939_vm2  ;;  %v10216_v0 = vadd.s32 112, %v9996_v18  ;;  %v10250_v6 = vadd.s32 128, %v9996_v18 }
 0x37b   : > { %v13513_v27 = vsel %vm10144_vm7, 4294967295, %v13512_v27 }
 0x37c   : > { %v2591_v7 = vpop.permute.xlu0 %2590  ;;  %v2593_v10 = vpop.permute.xlu1 %2592  ;;  %v2735_v11 = vld [vmem:[#allocation3 + $0x140] sm:$0xff]  ;;  %v2736_v14 = vld [vmem:[#allocation3 + $0x148] sm:$0xff]  ;;  %v10125_v17 = vmul.u32.u64.low 2863311531, %v10085_v2  ;;  %v10126_v19 = vmul.u32.u64.high 2863311531, %v10085_v2, %v10125_v17  ;;  %vm3942_vm8 = vcmp.ne.s32.totalorder %v10136_v23, 0  ;;  %v10191_v56 = vadd.s32 24, %v10136_v23 }
 0x37d   : > { %2691 = vst.msk [vmem:[#allocation3 + $0x160] sm:$0xff] %vm2646_vm9, %v2591_v7  ;;  %2692 = vst.msk [vmem:[#allocation3 + $0x168] sm:$0xff] %vm2646_vm9, %v2593_v10  ;;  %8220 = vmatprep.mubr.msk.f32.mxu0 %vm2748_vm10, %v2735_v11  ;;  %v3481_v7 = vshrl.u32 %v10049_v5, 4  ;;  %v10092_v10 = vadd.s32 104, %v9996_v18  ;;  %v3514_v11 = vshrl.u32 %v10053_v12, 4  ;;  %v13537_v17 = vmov 0 }
 0x37e   : > { %8221 = vmatmul.mubr.msk.f32.gmra.mxu0 %vm2748_vm10, %v2736_v14 }
 0x37f   : > { %v3482_v24 = vmul.u32 24, %v3481_v7  ;;  %v10139_v25 = vmul.u32.u64.low 2863311531, %v10092_v10  ;;  %v10140_v26 = vmul.u32.u64.high 2863311531, %v10092_v10, %v10139_v25  ;;  %v13533_v7 = vmov 0 }
 0x380   : > { %v2595_v15 = vpop.permute.xlu0 %2594  ;;  %v2597_v22 = vpop.permute.xlu1 %2596  ;;  %v2737_v28 = vld [vmem:[#allocation3 + $0x150] sm:$0xff]  ;;  %v2738_v37 = vld [vmem:[#allocation3 + $0x158] sm:$0xff]  ;;  %v3515_v30 = vmul.u32 24, %v3514_v11 }
 0x381   : > { %2693 = vst.msk [vmem:[#allocation3 + $0x170] sm:$0xff] %vm2646_vm9, %v2595_v15  ;;  %2694 = vst.msk [vmem:[#allocation3 + $0x178] sm:$0xff] %vm2646_vm9, %v2597_v22  ;;  %8223 = vmatprep.mubr.msk.f32.mxu0 %vm2748_vm10, %v2737_v28  ;;  %v10097_v14 = vmul.u32.u64.low 2863311531, %v10073_v59  ;;  %v10098_v15 = vmul.u32.u64.high 2863311531, %v10073_v59, %v10097_v14  ;;  %v3460_v28 = vmul.u32 24, %v3459_v50  ;;  %vm3990_vm9 = vcmp.lt.s32.totalorder %v10136_v23, 0 }
 0x382   : > { %8224 = vmatmul.mubr.msk.f32.gmra.mxu0 %vm2748_vm10, %v2738_v37  ;;  %v3503_v37 = vshrl.u32 %v10060_v21, 4  ;;  %v10180_v46 = vsub.s32 %v10028_v47, %v3482_v24  ;;  %v10183_v48 = vsub.s32 %v10032_v49, %v3515_v30  ;;  %v3525_v49 = vshrl.u32 %v10126_v19, 4  ;;  %vm10208_vm15 = vmand %vm3990_vm9, %vm3942_vm8 }
 0x383   : > { %v10152_v32 = vsub.s32 %v10018_v39, %v3460_v28  ;;  %v3536_v52 = vshrl.u32 %v10098_v15, 4  ;;  %v13520_v61 = vsel %vm10208_vm15, 4294967295, %v13519_v61  ;;  %v13528_v21 = vmov 0 }
 0x384   : > { %v2739_v44 = vld [vmem:[#allocation3 + $0x160] sm:$0xff]  ;;  %v2740_v51 = vld [vmem:[#allocation3 + $0x168] sm:$0xff]  ;;  %v3504_v33 = vmul.u32 24, %v3503_v37  ;;  %13516 = vst [vmem:[#allocation6_spill] sm:$0xff] %v10180_v46  ;;  %13517 = vst [vmem:[#allocation7_spill] sm:$0xff] %v10183_v48  ;;  %vm3991_vm1 = vcmp.lt.s32.totalorder %v10180_v46, 0 }
 0x385   : > { %8226 = vmatprep.mubr.msk.f32.mxu0 %vm2748_vm10, %v2739_v44  ;;  %v10111_v44 = vadd.s32 96, %v9996_v18  ;;  %13514 = vst [vmem:[#allocation4_spill] sm:$0xff] %v10152_v32  ;;  %vm3989_vm12 = vcmp.lt.s32.totalorder %v10152_v32, 0  ;;  %v10199_v47 = vadd.s32 24, %v10152_v32  ;;  %vm3946_vm4 = vcmp.ne.s32.totalorder %v10183_v48, 0 }
 0x386   : > { %8227 = vmatmul.mubr.msk.f32.gmra.mxu0 %vm2748_vm10, %v2740_v51  ;;  %v10196_v60 = vsub.s32 %v10039_v57, %v3504_v33  ;;  %v3558_v57 = vshrl.u32 %v10140_v26, 4  ;;  %vm3994_vm8 = vcmp.lt.s32.totalorder %v10183_v48, 0  ;;  %v3537_v8 = vmul.u32 24, %v3536_v52 }
 0x387   : > { %v10155_v34 = vmul.u32.u64.low 2863311531, %v10111_v44  ;;  %v10156_v36 = vmul.u32.u64.high 2863311531, %v10111_v44, %v10155_v34  ;;  %v10244_v58 = vadd.s32 24, %v10180_v46  ;;  %v10247_v50 = vadd.s32 24, %v10183_v48 }
 0x388   : > { %v2741_v54 = vld [vmem:[#allocation3 + $0x170] sm:$0xff]  ;;  %v2742_v55 = vld [vmem:[#allocation3 + $0x178] sm:$0xff]  ;;  %13518 = vst [vmem:[#allocation8_spill] sm:$0xff] %v10196_v60  ;;  %vm3945_vm11 = vcmp.ne.s32.totalorder %v10196_v60, 0  ;;  %vm3993_vm0 = vcmp.lt.s32.totalorder %v10196_v60, 0  ;;  %v10257_v11 = vadd.s32 24, %v10196_v60  ;;  %v10282_v25 = vsub.s32 %v10073_v59, %v3537_v8 }
 0x389   : > { %8229 = vmatprep.mubr.msk.f32.mxu0 %vm2748_vm10, %v2741_v54  ;;  %v10122_v54 = vadd.s32 24, %v10070_v45  ;;  %v3547_v12 = vshrl.u32 %v10156_v36, 4  ;;  %13531 = vst [vmem:[#allocation12_spill] sm:$0xff] %v10244_v58  ;;  %13532 = vst [vmem:[#allocation13_spill] sm:$0xff] %v10247_v50  ;;  %v3559_v14 = vmul.u32 24, %v3558_v57  ;;  %v10279_v24 = vadd.s32 152, %v9996_v18 }
 0x38a   : > { %8230 = vmatmul.mubr.msk.f32.gmra.mxu0 %vm2748_vm10, %v2742_v55  ;;  %v3493_v55 = vmul.u32 24, %v3492_v63  ;;  %vm3941_vm10 = vcmp.ne.s32.totalorder %v10152_v32, 0  ;;  %v3526_v63 = vmul.u32 24, %v3525_v49  ;;  %13536 = vst [vmem:[#allocation15_spill] sm:$0xff] %v10257_v11  ;;  %13540 = vst [vmem:[#allocation17_spill] sm:$0xff] %v10282_v25  ;;  %v10416_v48 = vadd.s32 216, %v9996_v18 }
 0x38b   : > { %vm10218_vm2 = vmand %vm3989_vm12, %vm3941_vm10  ;;  %vm13527_vm10 = vcmp.ne.s32.totalorder %v10180_v46, 0  ;;  %v10260_v15 = vmul.u32.u64.low 2863311531, %v10216_v0  ;;  %v10261_v28 = vmul.u32.u64.high 2863311531, %v10216_v0, %v10260_v15  ;;  %v3548_v26 = vmul.u32 24, %v3547_v12 }
 0x38c   : > { %v10171_v42 = vsub.s32 %v10022_v41, %v3493_v55  ;;  %v10187_v41 = vmul.u32.u64.low 2863311531, %v10149_v31  ;;  %v10188_v53 = vmul.u32.u64.high 2863311531, %v10149_v31, %v10187_v41  ;;  %v13522_v4 = vsel %vm10218_vm2, 4294967295, %v13521_v4  ;;  %vm10239_vm12 = vmand %vm3991_vm1, %vm13527_vm10 }
 0x38d   : > { %v13529_v21 = vsel %vm10239_vm12, 4294967295, %v13528_v21  ;;  %v10285_v30 = vmul.u32.u64.low 2863311531, %v10235_v16  ;;  %v10286_v33 = vmul.u32.u64.high 2863311531, %v10235_v16, %v10285_v30  ;;  %v10293_v36 = vsub.s32 %v10085_v2, %v3526_v63 }
 0x38e   : > { %13515 = vst [vmem:[#allocation5_spill] sm:$0xff] %v10171_v42  ;;  %vm3944_vm13 = vcmp.ne.s32.totalorder %v10171_v42, 0  ;;  %vm3992_vm14 = vcmp.lt.s32.totalorder %v10171_v42, 0  ;;  %v10223_v5 = vadd.s32 24, %v10171_v42  ;;  %13530 = vst [vmem:[#allocation11_spill] sm:$0xff] %v13529_v21  ;;  %v3580_v19 = vshrl.u32 %v10188_v53, 4 }
 0x38f   : > { %vm10227_vm9 = vmand %vm3992_vm14, %vm3944_vm13  ;;  %13541 = vst [vmem:[#allocation18_spill] sm:$0xff] %v10293_v36  ;;  %v10296_v52 = vmul.u32.u64.low 2863311531, %v10250_v6  ;;  %v10297_v41 = vmul.u32.u64.high 2863311531, %v10250_v6, %v10296_v52  ;;  %v10312_v49 = vsub.s32 %v10092_v10, %v3559_v14  ;;  %v10319_v63 = vadd.s32 144, %v9996_v18 }
 0x390   : > { %13523 = vst [vmem:[#allocation9_spill] sm:$0xff] %v10223_v5  ;;  %v13525_v9 = vsel %vm10227_vm9, 4294967295, %v13524_v9  ;;  %vm10252_vm13 = vmand %vm3994_vm8, %vm3946_vm4  ;;  %v3581_v57 = vmul.u32 24, %v3580_v19  ;;  %v10315_v8 = vmul.u32.u64.low 2863311531, %v10279_v24  ;;  %v10316_v12 = vmul.u32.u64.high 2863311531, %v10279_v24, %v10315_v8 }
 0x391   : > { %13526 = vst [vmem:[#allocation10_spill] sm:$0xff] %v13525_v9  ;;  %v13534_v7 = vsel %vm10252_vm13, 4294967295, %v13533_v7  ;;  %vm10273_vm14 = vmand %vm3993_vm0, %vm3945_vm11  ;;  %vm3948_vm11 = vcmp.ne.s32.totalorder %v10282_v25, 0  ;;  %vm3996_vm0 = vcmp.lt.s32.totalorder %v10282_v25, 0  ;;  %v10324_v15 = vadd.s32 24, %v10282_v25 }
 0x392   : > { %13535 = vst [vmem:[#allocation14_spill] sm:$0xff] %v13534_v7  ;;  %v13538_v17 = vsel %vm10273_vm14, 4294967295, %v13537_v17  ;;  %13542 = vst [vmem:[#allocation19_spill] sm:$0xff] %v10312_v49  ;;  %v10327_v30 = vsub.s32 %v10111_v44, %v3548_v26  ;;  %vm3947_vm1 = vcmp.ne.s32.totalorder %v10293_v36, 0  ;;  %v10332_v10 = vadd.s32 24, %v10293_v36 }
 0x393   : > { %13539 = vst [vmem:[#allocation16_spill] sm:$0xff] %v13538_v17  ;;  %13543 = vst [vmem:[#allocation20_spill] sm:$0xff] %v10324_v15  ;;  %v10335_v14 = vadd.s32 168, %v9996_v18  ;;  %v3569_v19 = vshrl.u32 %v10261_v28, 4  ;;  %v10341_v52 = vadd.s32 160, %v9996_v18  ;;  %v10344_v44 = vadd.s32 24, %v10312_v49 }
 0x394   : > { %13544 = vst [vmem:[#allocation21_spill] sm:$0xff] %v10327_v30  ;;  %13545 = vst [vmem:[#allocation22_spill] sm:$0xff] %v10332_v10  ;;  %v10347_v26 = vsub.s32 %v10149_v31, %v3581_v57  ;;  %v10350_v8 = vmul.u32.u64.low 2863311531, %v10319_v63  ;;  %v10351_v2 = vmul.u32.u64.high 2863311531, %v10319_v63, %v10350_v8  ;;  %v3602_v53 = vshrl.u32 %v10286_v33, 4 }
 0x395   : > { %13546 = vst [vmem:[#allocation23_spill] sm:$0xff] %v10344_v44  ;;  %v10357_v28 = vadd.s32 184, %v9996_v18  ;;  %v3591_v59 = vshrl.u32 %v10297_v41, 4  ;;  %v10361_v34 = vmul.u32.u64.low 2863311531, %v10335_v14  ;;  %v10362_v55 = vmul.u32.u64.high 2863311531, %v10335_v14, %v10361_v34  ;;  %vm10378_vm8 = vmand %vm3996_vm0, %vm3948_vm11 }
 0x396   : > { %13547 = vst [vmem:[#allocation24_spill] sm:$0xff] %v10347_v26  ;;  %v10365_v31 = vadd.s32 176, %v9996_v18  ;;  %v3570_v57 = vmul.u32 24, %v3569_v19  ;;  %v10368_v8 = vmul.u32.u64.low 2863311531, %v10341_v52  ;;  %v10369_v37 = vmul.u32.u64.high 2863311531, %v10341_v52, %v10368_v8 }
 0x397   : > { %v13548_v33 = vmov 0  ;;  %v10383_v34 = vadd.s32 24, %v10327_v30  ;;  %v3624_v41 = vshrl.u32 %v10316_v12, 4  ;;  %v10388_v19 = vadd.s32 192, %v9996_v18 }
 0x398   : > { %v13549_v33 = vsel %vm10378_vm8, 4294967295, %v13548_v33  ;;  %vm13552_vm10 = vcmp.lt.s32.totalorder %v10293_v36, 0  ;;  %v13553_v8 = vmov 0  ;;  %vm4000_vm11 = vcmp.lt.s32.totalorder %v10347_v26, 0 }
 0x399   : > { %13550 = vst [vmem:[#allocation25_spill] sm:$0xff] %v13549_v33  ;;  %13551 = vst [vmem:[#allocation26_spill] sm:$0xff] %v10383_v34  ;;  %v3603_v39 = vmul.u32 24, %v3602_v53  ;;  %v10400_v40 = vmul.u32.u64.low 2863311531, %v10357_v28  ;;  %v10401_v38 = vmul.u32.u64.high 2863311531, %v10357_v28, %v10400_v40  ;;  %vm13556_vm0 = vcmp.ne.s32.totalorder %v10312_v49, 0 }
 0x39a   : > { %vm10394_vm14 = vmand %vm13552_vm10, %vm3947_vm1  ;;  %vm13557_vm4 = vcmp.lt.s32.totalorder %v10312_v49, 0  ;;  %v13558_v12 = vmov 0  ;;  %v3592_v60 = vmul.u32 24, %v3591_v59  ;;  %vm13561_vm1 = vcmp.ne.s32.totalorder %v10327_v30, 0 }
 0x39b   : > { %v13554_v8 = vsel %vm10394_vm14, 4294967295, %v13553_v8  ;;  %vm10407_vm13 = vmand %vm13557_vm4, %vm13556_vm0  ;;  %v10412_v11 = vmul.u32.u64.low 2863311531, %v10365_v31  ;;  %v10413_v17 = vmul.u32.u64.high 2863311531, %v10365_v31, %v10412_v11  ;;  %vm13562_vm10 = vcmp.lt.s32.totalorder %v10327_v30, 0 }
 0x39c   : > { %13555 = vst [vmem:[#allocation27_spill] sm:$0xff] %v13554_v8  ;;  %v13559_v12 = vsel %vm10407_vm13, 4294967295, %v13558_v12  ;;  %vm10422_vm12 = vmand %vm13562_vm10, %vm13561_vm1  ;;  %v13563_v40 = vmov 0  ;;  %v10427_v53 = vadd.s32 24, %v10347_v26  ;;  %v10430_v59 = vsub.s32 %v10216_v0, %v3570_v57 }
 0x39d   : > { %13560 = vst [vmem:[#allocation28_spill] sm:$0xff] %v13559_v12  ;;  %v13564_v40 = vsel %vm10422_vm12, 4294967295, %v13563_v40  ;;  %v10433_v50 = vmul.u32.u64.low 2863311531, %v10372_v43  ;;  %v10434_v11 = vmul.u32.u64.high 2863311531, %v10372_v43, %v10433_v50  ;;  %vm13567_vm4 = vcmp.ne.s32.totalorder %v10347_v26, 0 }
 0x39e   : > { %13565 = vst [vmem:[#allocation29_spill] sm:$0xff] %v13564_v40  ;;  %13566 = vst [vmem:[#allocation30_spill] sm:$0xff] %v10427_v53  ;;  %v13568_v7 = vmov 0  ;;  %v3625_v46 = vmul.u32 24, %v3624_v41  ;;  %v3613_v58 = vshrl.u32 %v10351_v2, 4  ;;  %v10460_v2 = vsub.s32 %v10235_v16, %v3603_v39 }
 0x39f   : > { %vm10438_vm0 = vmand %vm4000_vm11, %vm13567_vm4  ;;  %v10444_v21 = vmul.u32.u64.low 2863311531, %v10388_v19  ;;  %v10445_v42 = vmul.u32.u64.high 2863311531, %v10388_v19, %v10444_v21  ;;  %v3646_v41 = vshrl.u32 %v10362_v55, 4  ;;  %v10482_v16 = vadd.s32 24, %v10430_v59 }
 0x3a0   : > { %v13569_v7 = vsel %vm10438_vm0, 4294967295, %v13568_v7  ;;  %13571 = vst [vmem:[#allocation32_spill] sm:$0xff] %v10460_v2  ;;  %v10463_v21 = vsub.s32 %v10250_v6, %v3592_v60  ;;  %v10467_v0 = vmul.u32.u64.low 2863311531, %v10416_v48  ;;  %v10468_v25 = vmul.u32.u64.high 2863311531, %v10416_v48, %v10467_v0 }
 0x3a1   : > { %13570 = vst [vmem:[#allocation31_spill] sm:$0xff] %v13569_v7  ;;  %v3635_v60 = vshrl.u32 %v10369_v37, 4  ;;  %v10485_v6 = vsub.s32 %v10279_v24, %v3625_v46  ;;  %v3614_v55 = vmul.u32 24, %v3613_v58  ;;  %v3668_v0 = vshrl.u32 %v10401_v38, 4 }
 0x3a2   : > { %v10491_v39 = vadd.s32 208, %v9996_v18  ;;  %v10494_v37 = vadd.s32 24, %v10460_v2  ;;  %v3647_v50 = vmul.u32 24, %v3646_v41  ;;  %v3657_v57 = vshrl.u32 %v10413_v17, 4 }
 0x3a3   : > { %13572 = vst [vmem:[#allocation33_spill] sm:$0xff] %v10485_v6  ;;  %v3636_v46 = vmul.u32 24, %v3635_v60  ;;  %v3690_v58 = vshrl.u32 %v10434_v11, 4  ;;  %v10501_v24 = vadd.s32 232, %v9996_v18  ;;  %v10504_v38 = vadd.s32 24, %v10463_v21 }
 0x3a4   : > { %v10508_v26 = vsub.s32 %v10319_v63, %v3614_v55  ;;  %v3679_v41 = vshrl.u32 %v10445_v42, 4  ;;  %v3669_v53 = vmul.u32 24, %v3668_v0  ;;  %v10516_v11 = vadd.s32 224, %v9996_v18 }
 0x3a5   : > { %v10512_v17 = vmul.u32.u64.low 2863311531, %v10491_v39  ;;  %v10513_v7 = vmul.u32.u64.high 2863311531, %v10491_v39, %v10512_v17  ;;  %v10520_v60 = vsub.s32 %v10335_v14, %v3647_v50  ;;  %v3658_v30 = vmul.u32 24, %v3657_v57 }
 0x3a6   : > { %v3712_v34 = vshrl.u32 %v10468_v25, 4  ;;  %v10524_v63 = vsub.s32 %v10341_v52, %v3636_v46  ;;  %v3691_v42 = vmul.u32 24, %v3690_v58  ;;  %v10531_v17 = vadd.s32 24, %v10485_v6 }
 0x3a7   : > { %v10527_v55 = vmul.u32.u64.low 2863311531, %v10501_v24  ;;  %v10528_v0 = vmul.u32.u64.high 2863311531, %v10501_v24, %v10527_v55  ;;  %v3680_v40 = vmul.u32 24, %v3679_v41  ;;  %v10535_v14 = vadd.s32 248, %v9996_v18 }
 0x3a8   : > { %v10539_v25 = vsub.s32 %v10357_v28, %v3669_v53  ;;  %v10542_v52 = vmul.u32.u64.low 2863311531, %v10516_v11  ;;  %v10543_v50 = vmul.u32.u64.high 2863311531, %v10516_v11, %v10542_v52  ;;  %vm13573_vm1 = vcmp.ne.s32.totalorder %v10430_v59, 0 }
 0x3a9   : > { %vm13574_vm10 = vcmp.lt.s32.totalorder %v10430_v59, 0  ;;  %v10554_v46 = vadd.s32 24, %v10508_v26  ;;  %v3713_v28 = vmul.u32 24, %v3712_v34  ;;  %vm13577_vm12 = vcmp.ne.s32.totalorder %v10460_v2, 0 }
 0x3aa   : > { %vm10549_vm0 = vmand %vm13574_vm10, %vm13573_vm1  ;;  %vm13578_vm13 = vcmp.lt.s32.totalorder %v10460_v2, 0  ;;  %v10567_v58 = vadd.s32 24, %v10520_v60  ;;  %v10571_v41 = vsub.s32 %v10365_v31, %v3658_v30  ;;  %v10574_v55 = vsub.s32 %v10372_v43, %v3691_v42  ;;  %v13693_v2 = vld [vmem:[#allocation12_spill] sm:$0xff] }
 0x3ab   : > { %vm10562_vm14 = vmand %vm13578_vm13, %vm13577_vm12  ;;  %vm13582_vm10 = vcmp.ne.s32.totalorder %v10463_v21, 0  ;;  %vm13583_vm4 = vcmp.lt.s32.totalorder %v10463_v21, 0  ;;  %v10586_v52 = vsub.s32 %v10388_v19, %v3680_v40  ;;  %vm13587_vm13 = vcmp.ne.s32.totalorder %v10485_v6, 0 }
 0x3ac   : > { %13581 = vst [vmem:[#allocation34_spill] sm:$0xff] %v10574_v55  ;;  %vm10580_vm11 = vmand %vm13583_vm4, %vm13582_vm10  ;;  %v10589_v49 = vmul.u32.u64.low 2863311531, %v10535_v14  ;;  %v10590_v30 = vmul.u32.u64.high 2863311531, %v10535_v14, %v10589_v49  ;;  %vm13588_vm1 = vcmp.lt.s32.totalorder %v10485_v6, 0  ;;  %v13589_v43 = vmov 0  ;;  %v13709_v6 = vld [vmem:[#allocation15_spill] sm:$0xff] }
 0x3ad   : > { %13586 = vst [vmem:[#allocation35_spill] sm:$0xff] %v10586_v52  ;;  %vm10596_vm8 = vmand %vm13588_vm1, %vm13587_vm13  ;;  %v10601_v31 = vadd.s32 24, %v10524_v63  ;;  %v3701_v19 = vshrl.u32 %v10513_v7, 4  ;;  %v10606_v40 = vadd.s32 240, %v9996_v18  ;;  %vm13592_vm10 = vcmp.ne.s32.totalorder %v10508_v26, 0 }
 0x3ae   : > { %v13590_v43 = vsel %vm10596_vm8, 4294967295, %v13589_v43  ;;  %vm13593_vm12 = vcmp.lt.s32.totalorder %v10508_v26, 0  ;;  %v13594_v49 = vmov 0  ;;  %v10618_v42 = vadd.s32 24, %v10539_v25 }
 0x3af   : > { %13591 = vst [vmem:[#allocation36_spill] sm:$0xff] %v10606_v40  ;;  %vm10612_vm9 = vmand %vm13593_vm12, %vm13592_vm10  ;;  %v10621_v44 = vsub.s32 %v10416_v48, %v3713_v28  ;;  %v10624_v7 = vadd.s32 264, %v9996_v18  ;;  %vm13598_vm13 = vcmp.ne.s32.totalorder %v10520_v60, 0  ;;  %vm13599_vm4 = vcmp.lt.s32.totalorder %v10520_v60, 0  ;;  %v4417_v28 = vld [vmem:[#allocation2 + $0x7] sm:$0xff] }
 0x3b0   : > { %v13595_v49 = vsel %vm10612_vm9, 4294967295, %v13594_v49  ;;  %vm10630_vm2 = vmand %vm13599_vm4, %vm13598_vm13  ;;  %v13600_v12 = vmov 0  ;;  %v3734_v48 = vshrl.u32 %v10528_v0, 4  ;;  %vm13602_vm15 = vcmp.ne.s32.totalorder %v10524_v63, 0 }
 0x3b1   : > { %13596 = vst [vmem:[#allocation37_spill] sm:$0xff] %v10621_v44  ;;  %13597 = vst [vmem:[#allocation38_spill] sm:$0xff] %v10624_v7  ;;  %v13601_v12 = vsel %vm10630_vm2, 4294967295, %v13600_v12  ;;  %vm13603_vm7 = vcmp.lt.s32.totalorder %v10524_v63, 0  ;;  %v13604_v36 = vmov 0  ;;  %vm4010_vm4 = vcmp.lt.s32.totalorder %v10574_v55, 0 }
 0x3b2   : > { %vm10642_vm6 = vmand %vm13603_vm7, %vm13602_vm15  ;;  %vm3961_vm13 = vcmp.ne.s32.totalorder %v10586_v52, 0  ;;  %vm13459_vm10 = vcmask 130112   ;;  %vm13606_vm2 = vcmask 64512   ;;  %vm13607_vm1 = vcmp.ne.s32.totalorder %v10539_v25, 0 }
 0x3b3   : > { %v13605_v36 = vsel %vm10642_vm6, 4294967295, %v13604_v36  ;;  %4465 = vst.msk [vmem:[#allocation3] sm:$0xff] %vm13606_vm2, %v4417_v28  ;;  %vm13608_vm9 = vcmp.lt.s32.totalorder %v10539_v25, 0  ;;  %v13609_v0 = vmov 0  ;;  %v3702_v10 = vmul.u32 24, %v3701_v19 }
 0x3b4   : > { %vm10654_vm8 = vmand %vm13608_vm9, %vm13607_vm1  ;;  %v3723_v8 = vshrl.u32 %v10543_v50, 4  ;;  %v10660_v15 = vmul.u32.u64.low 2863311531, %v10606_v40  ;;  %v10661_v33 = vmul.u32.u64.high 2863311531, %v10606_v40, %v10660_v15  ;;  %vm13611_vm7 = vcmp.ne.s32.totalorder %v10571_v41, 0  ;;  %v4610_v50 = vpop.permute.xlu0 %4609  ;;  %v13848_v53 = vld [vmem:[#allocation35_spill] sm:$0xff] }
 0x3b5   : > { %v13610_v0 = vsel %vm10654_vm8, 4294967295, %v13609_v0  ;;  %vm13612_vm15 = vcmp.lt.s32.totalorder %v10571_v41, 0  ;;  %v13613_v28 = vmov 0  ;;  %vm3964_vm9 = vcmp.ne.s32.totalorder %v10621_v44, 0  ;;  %4754 = vst.msk [vmem:[#allocation3] sm:$0xff] %vm13459_vm10, %v4610_v50 }
 0x3b6   : > { %vm10667_vm2 = vmand %vm13612_vm15, %vm13611_vm7  ;;  %vm4012_vm1 = vcmp.lt.s32.totalorder %v10621_v44, 0  ;;  %v10674_v19 = vmul.u32.u64.low 2863311531, %v10624_v7  ;;  %v10675_v5 = vmul.u32.u64.high 2863311531, %v10624_v7, %v10674_v19  ;;  %v13615_v15 = vsel %vm10104_vm3, %v10068_v35, %v10045_v1 }
 0x3b7   : > { %v13614_v28 = vsel %vm10667_vm2, 4294967295, %v13613_v28  ;;  %vm10682_vm12 = vcmp.lt.s32.totalorder %v13615_v15, 16  ;;  %v13616_v40 = vmov 0  ;;  %v10687_v9 = vadd.s32 24, %v10571_v41  ;;  %v4419_v19 = vld [vmem:[#allocation2 + $0x17] sm:$0xff] }
 0x3b8   : > { %v13617_v40 = vsel %vm10682_vm12, 4294967295, %v13616_v40  ;;  %vm13619_vm7 = vcmp.ne.s32.totalorder %v10574_v55, 0  ;;  %v13620_v7 = vmov 0  ;;  %v10698_v22 = vadd.s32 24, %v10574_v55  ;;  %v10728_v15 = vld [vmem:[%s13404_s2] ss:$0 sm:$0xff] }
 0x3b9   : > { %13618 = vst [vmem:[#allocation39_spill] sm:$0xff] %v13617_v40  ;;  %vm10693_vm15 = vmand %vm4010_vm4, %vm13619_vm7  ;;  %v10701_v1 = vadd.s32 24, %v10586_v52  ;;  %v3735_v35 = vmul.u32 24, %v3734_v48  ;;  %vm13625_vm3 = vcmp.lt.s32.totalorder %v10586_v52, 0  ;;  %v13626_v32 = vmov 0 }
 0x3ba   : > { %v13621_v7 = vsel %vm10693_vm15, 4294967295, %v13620_v7  ;;  %13623 = vst [vmem:[#allocation41_spill] sm:$0xff] %v10698_v22  ;;  %vm10716_vm4 = vmand %vm13625_vm3, %vm3961_vm13  ;;  %v10721_v48 = vadd.s32 24, %v10621_v44  ;;  %v3756_v50 = vshrl.u32 %v10590_v30, 4  ;;  %vm13630_vm7 = vcmask 64512  }
 0x3bb   : > { %13622 = vst [vmem:[#allocation40_spill] sm:$0xff] %v13621_v7  ;;  %13624 = vst [vmem:[#allocation42_spill] sm:$0xff] %v10701_v1  ;;  %v13627_v32 = vsel %vm10716_vm4, 4294967295, %v13626_v32  ;;  %v13631_v40 = vsel %vm10117_vm5, %v10078_v62, %v10056_v13  ;;  %v13635_v13 = vmov 0  ;;  %v10756_v62 = vsub.s32 %v10491_v39, %v3702_v10  ;;  %v10778_v30 = vld [vmem:[%s13405_s3] ss:$0 sm:$0xff] }
 0x3bc   : > { %13628 = vst [vmem:[#allocation43_spill] sm:$0xff] %v13627_v32  ;;  %13629 = vst [vmem:[#allocation44_spill] sm:$0xff] %v10721_v48  ;;  %vm10735_vm13 = vcmp.lt.s32.totalorder %v13631_v40, 16  ;;  %v3724_v51 = vmul.u32 24, %v3723_v8  ;;  %v4418_v40 = vld [vmem:[#allocation2 + $0xf] sm:$0xff]  ;;  %v4614_v8 = vpop.permute.xlu0 %4613  ;;  %v3757_v7 = vmul.u32 24, %v3756_v50  ;;  %vm13649_vm4 = vnez %v13513_v27 }
 0x3bd   : > { %4467 = vst.msk [vmem:[#allocation3 + $0x10] sm:$0xff] %vm13630_vm7, %v4419_v19  ;;  %vm10751_vm7 = vmand %vm4012_vm1, %vm3964_vm9  ;;  %vm13641_vm9 = vcmask 64512   ;;  %vm13642_vm1 = vnez %v13511_v20  ;;  %v10811_v10 = vadd.s32 256, %v9996_v18  ;;  %v10826_v50 = vadd.s32 24, %v10756_v62 }
 0x3be   : > { %v13636_v13 = vsel %vm10751_vm7, 4294967295, %v13635_v13  ;;  %13638 = vst [vmem:[#allocation46_spill] sm:$0xff] %v10756_v62  ;;  %4466 = vst.msk [vmem:[#allocation3 + $0x8] sm:$0xff] %vm13641_vm9, %v4418_v40  ;;  %v13643_v19 = vsel %vm13642_vm1, %v10088_v3, %v10062_v29  ;;  %v10802_v29 = vsub.s32 %v10501_v24, %v3735_v35  ;;  %vm13647_vm9 = vcmask 130112   ;;  %v4612_v3 = vpop.permute.xlu1 %4611 }
 0x3bf   : > { %13637 = vst [vmem:[#allocation45_spill] sm:$0xff] %v13636_v13  ;;  %vm10785_vm6 = vcmp.lt.s32.totalorder %v13643_v19, 16  ;;  %4756 = vst.msk [vmem:[#allocation3 + $0x10] sm:$0xff] %vm13647_vm9, %v4614_v8  ;;  %v13650_v24 = vsel %vm13649_vm4, %v10122_v54, %v10070_v45  ;;  %v10829_v8 = vsub.s32 %v10516_v11, %v3724_v51  ;;  %v3745_v45 = vshrl.u32 %v10661_v33, 4 }
 0x3c0   : > { %13646 = vst [vmem:[#allocation47_spill] sm:$0xff] %v10802_v29  ;;  %vm13648_vm1 = vmmov %vm13647_vm9  ;;  %vm10819_vm9 = vcmp.lt.s32.totalorder %v13650_v24, 16  ;;  %v3778_v54 = vshrl.u32 %v10675_v5, 4  ;;  %vm13655_vm4 = vnez %v13520_v61  ;;  %v10847_v11 = vadd.s32 24, %v10802_v29 }
 0x3c1   : > { %4755 = vst.msk [vmem:[#allocation3 + $0x8] sm:$0xff] %vm13648_vm1, %v4612_v3  ;;  %13653 = vst [vmem:[#allocation48_spill] sm:$0xff] %v10826_v50  ;;  %v13656_v24 = vsel %vm13655_vm4, %v10191_v56, %v10136_v23  ;;  %v10850_v33 = vadd.s32 280, %v9996_v18  ;;  %v10855_v23 = vsub.s32 %v10535_v14, %v3757_v7  ;;  %vm13660_vm4 = vnez %v13522_v4  ;;  %v13701_v50 = vld [vmem:[#allocation13_spill] sm:$0xff] }
 0x3c2   : > { %13654 = vst [vmem:[#allocation49_spill] sm:$0xff] %v10829_v8  ;;  %vm10840_vm1 = vcmp.lt.s32.totalorder %v13656_v24, 16  ;;  %13659 = vst [vmem:[#allocation50_spill] sm:$0xff] %v10847_v11  ;;  %vm13665_vm7 = vcmp.ne.s32.totalorder %v10756_v62, 0  ;;  %vm13666_vm2 = vcmp.lt.s32.totalorder %v10756_v62, 0  ;;  %vm13676_vm5 = vcmask 64512  }
 0x3c3   : > { %vm10870_vm8 = vmand %vm13666_vm2, %vm13665_vm7  ;;  %v10877_v4 = vmul.u32.u64.low 2863311531, %v10811_v10  ;;  %v10878_v14 = vmul.u32.u64.high 2863311531, %v10811_v10, %v10877_v4  ;;  %vm13671_vm2 = vcmp.ne.s32.totalorder %v10802_v29, 0  ;;  %vm13672_vm7 = vcmp.lt.s32.totalorder %v10802_v29, 0  ;;  %v13699_v62 = vld [vmem:[#allocation14_spill] sm:$0xff] }
 0x3c4   : > { %v13677_v4 = vld [vmem:[#allocation10_spill] sm:$0xff]  ;;  %v3746_v48 = vmul.u32 24, %v3745_v45  ;;  %v10906_v13 = vmul.u32.u64.low 2863311531, %v10850_v33  ;;  %v10907_v52 = vmul.u32.u64.high 2863311531, %v10850_v33, %v10906_v13 }
 0x3c5   : > { %vm13678_vm10 = vnez %v13677_v4  ;;  %v13691_v13 = vld [vmem:[#allocation11_spill] sm:$0xff]  ;;  %v13744_v11 = vld [vmem:[#allocation26_spill] sm:$0xff] }
 0x3c6   : > { %vm13692_vm3 = vnez %v13691_v13  ;;  %v10940_v13 = vadd.s32 272, %v9996_v18 }
 0x3ee   : > { %v8162_v39 = vpop.f32.mrf.mxu0 }
 0x3ef   : > { %v3210_v19 = vmul.f32 %v8162_v39, %v10728_v15 }
 0x3f0   : > { %v2963_v20 = vpop.f32.mrf.mxu0 }
 0x3f1   : > { %v3265_v39 = vadd.f32 %v10778_v30, %v3210_v19  ;;  %v3209_v27 = vmul.f32 %v10728_v15, %v2963_v20  ;;  %v13661_v20 = vld [vmem:[#allocation4_spill] sm:$0xff] }
 0x3f2   : > { %v8165_v3 = vpop.f32.mrf.mxu0  ;;  %v13662_v19 = vsel %vm13660_vm4, %v10199_v47, %v13661_v20  ;;  %vm10888_vm4 = vmand %vm13672_vm7, %vm13671_vm2  ;;  %v13679_v47 = vld [vmem:[#allocation9_spill] sm:$0xff]  ;;  %vm13690_vm7 = vcmask 64512  }
 0x3f3   : > { %v3313_v5 = vmax.f32 %v3265_v39, 0.0  ;;  %v3264_v61 = vadd.f32 %v10778_v30, %v3209_v27  ;;  %v3212_v51 = vmul.f32 %v8165_v3, %v10728_v15  ;;  %vm10862_vm15 = vcmp.lt.s32.totalorder %v13662_v19, 16 }
 0x3f4   : > { %v2973_v56 = vpop.f32.mrf.mxu0  ;;  %v13667_v39 = vmov 0  ;;  %v13673_v19 = vmov 0 }
 0x3f5   : > { %v13668_v39 = vsel %vm10870_vm8, 4294967295, %v13667_v39  ;;  %v4322_v7 = vsel %vm10682_vm12, %v3313_v5, 0.0  ;;  %v3312_v27 = vmax.f32 %v3264_v61, 0.0  ;;  %v3267_v3 = vadd.f32 %v10778_v30, %v3212_v51  ;;  %v13680_v5 = vld [vmem:[#allocation5_spill] sm:$0xff]  ;;  %v13736_v51 = vld [vmem:[#allocation23_spill] sm:$0xff] }
 0x3f6   : > { %13669 = vst [vmem:[#allocation4_spill] sm:$0xff] %v13668_v39  ;;  %v3211_v20 = vmul.f32 %v10728_v15, %v2973_v56  ;;  %v13674_v19 = vsel %vm10888_vm4, 4294967295, %v13673_v19  ;;  %4370 = vst.msk [vmem:[#allocation2 + $0x28] sm:$0xff] %vm13676_vm5, %v4322_v7  ;;  %v8168_v44 = vpop.f32.mrf.mxu0  ;;  %v13681_v61 = vsel %vm13678_vm10, %v13679_v47, %v13680_v5  ;;  %v10903_v56 = vadd.s32 24, %v10829_v8  ;;  %v13745_v39 = vld [vmem:[#allocation21_spill] sm:$0xff] }
 0x3f7   : > { %13675 = vst [vmem:[#allocation39_spill] sm:$0xff] %v13674_v19  ;;  %vm10898_vm12 = vcmp.lt.s32.totalorder %v13681_v61, 16  ;;  %v4321_v7 = vsel %vm10735_vm13, %v3312_v27, 0.0  ;;  %v3315_v1 = vmax.f32 %v3267_v3, 0.0  ;;  %v3214_v47 = vmul.f32 %v8168_v44, %v10728_v15  ;;  %v13694_v27 = vld [vmem:[#allocation6_spill] sm:$0xff]  ;;  %v13702_v19 = vld [vmem:[#allocation7_spill] sm:$0xff] }
 0x3f8   : > { %13684 = vst [vmem:[#allocation10_spill] sm:$0xff] %v10903_v56  ;;  %v3266_v4 = vadd.f32 %v10778_v30, %v3211_v20  ;;  %vm13685_vm10 = vcmp.ne.s32.totalorder %v10829_v8, 0  ;;  %vm13686_vm5 = vcmp.lt.s32.totalorder %v10829_v8, 0  ;;  %v13687_v5 = vmov 0  ;;  %4369 = vst.msk [vmem:[#allocation2 + $0x20] sm:$0xff] %vm13690_vm7, %v4321_v7  ;;  %v2983_v45 = vpop.f32.mrf.mxu0  ;;  %v13710_v8 = vld [vmem:[#allocation8_spill] sm:$0xff] }
 0x3f9   : > { %vm10917_vm2 = vmand %vm13686_vm5, %vm13685_vm10  ;;  %v13695_v3 = vsel %vm13692_vm3, %v13693_v2, %v13694_v27  ;;  %v3779_v7 = vmul.u32 24, %v3778_v54  ;;  %v4324_v2 = vsel %vm10785_vm6, %v3315_v1, 0.0  ;;  %v3213_v32 = vmul.f32 %v10728_v15, %v2983_v45 }
 0x3fa   : > { %v13688_v5 = vsel %vm10917_vm2, 4294967295, %v13687_v5  ;;  %vm10927_vm13 = vcmp.lt.s32.totalorder %v13695_v3, 16  ;;  %v3314_v27 = vmax.f32 %v3266_v4, 0.0  ;;  %v3269_v3 = vadd.f32 %v10778_v30, %v3214_v47  ;;  %vm13698_vm3 = vmmov %vm13690_vm7  ;;  %v8171_v44 = vpop.f32.mrf.mxu0 }
 0x3fb   : > { %13689 = vst [vmem:[#allocation9_spill] sm:$0xff] %v13688_v5  ;;  %4372 = vst.msk [vmem:[#allocation2 + $0x38] sm:$0xff] %vm13698_vm3, %v4324_v2  ;;  %vm13700_vm10 = vnez %v13699_v62  ;;  %v10963_v1 = vadd.s32 24, %v10855_v23  ;;  %v13706_v62 = vld [vmem:[#allocation36_spill] sm:$0xff]  ;;  %v3268_v47 = vadd.f32 %v10778_v30, %v3213_v32  ;;  %v3216_v45 = vmul.f32 %v8171_v44, %v10728_v15 }
 0x3fc   : > { %v13703_v61 = vsel %vm13700_vm10, %v13701_v50, %v13702_v19  ;;  %v10966_v4 = vsub.s32 %v13706_v62, %v3746_v48  ;;  %v4323_v50 = vsel %vm10819_vm9, %v3314_v27, 0.0  ;;  %v3317_v19 = vmax.f32 %v3269_v3, 0.0  ;;  %v13707_v2 = vld [vmem:[#allocation16_spill] sm:$0xff]  ;;  %v13714_v48 = vld [vmem:[#allocation38_spill] sm:$0xff]  ;;  %vm13715_vm9 = vmmov %vm13698_vm3 }
 0x3fd   : > { %vm10952_vm5 = vcmp.lt.s32.totalorder %v13703_v61, 16  ;;  %4371 = vst.msk [vmem:[#allocation2 + $0x30] sm:$0xff] %vm13698_vm3, %v4323_v50  ;;  %v2993_v61 = vpop.f32.mrf.mxu0  ;;  %vm13708_vm10 = vnez %v13707_v2  ;;  %v10983_v35 = vsub.s32 %v13714_v48, %v3779_v7  ;;  %v3767_v27 = vshrl.u32 %v10878_v14, 4  ;;  %v13718_v14 = vld [vmem:[#allocation20_spill] sm:$0xff]  ;;  %v13719_v2 = vld [vmem:[#allocation17_spill] sm:$0xff] }
 0x3fe   : > { %v13711_v56 = vsel %vm13708_vm10, %v13709_v6, %v13710_v8  ;;  %v10987_v32 = vmul.u32.u64.low 2863311531, %v10940_v13  ;;  %v10988_v44 = vmul.u32.u64.high 2863311531, %v10940_v13, %v10987_v32  ;;  %v4326_v3 = vsel %vm10840_vm1, %v3317_v19, 0.0  ;;  %v13716_v6 = vld [vmem:[#allocation25_spill] sm:$0xff] }
 0x3ff   : > { %vm10978_vm7 = vcmp.lt.s32.totalorder %v13711_v56, 16  ;;  %v3316_v62 = vmax.f32 %v3268_v47, 0.0  ;;  %v3271_v50 = vadd.f32 %v10778_v30, %v3216_v45  ;;  %v3215_v8 = vmul.f32 %v10728_v15, %v2993_v61  ;;  %v4517_v56 = vld [vmem:[#allocation2 + $0x28] sm:$0xff]  ;;  %4374 = vst.msk [vmem:[#allocation2 + $0x48] sm:$0xff] %vm13715_vm9, %v4326_v3  ;;  %v8174_v7 = vpop.f32.mrf.mxu0  ;;  %v13780_v32 = vld [vmem:[#allocation32_spill] sm:$0xff] }
 0x400   : > { %4617 = vrot.lane.b32.xlu0 %v4517_v56, %s8471_s8  ;;  %vm13717_vm3 = vnez %v13716_v6  ;;  %v11008_v40 = vadd.s32 24, %v10966_v4  ;;  %v3800_v19 = vshrl.u32 %v10907_v52, 4  ;;  %v3218_v3 = vmul.f32 %v8174_v7, %v10728_v15  ;;  %v4516_v56 = vld [vmem:[#allocation2 + $0x20] sm:$0xff] }
 0x401   : > { %v13720_v48 = vsel %vm13717_vm3, %v13718_v14, %v13719_v2  ;;  %v4325_v47 = vsel %vm10862_vm15, %v3316_v62, 0.0  ;;  %v3319_v45 = vmax.f32 %v3271_v50, 0.0  ;;  %v3270_v61 = vadd.f32 %v10778_v30, %v3215_v8  ;;  %4615 = vrot.lane.b32.xlu1 %v4516_v56, %s8471_s8  ;;  %v3003_v6 = vpop.f32.mrf.mxu0  ;;  %v13723_v14 = vld [vmem:[#allocation27_spill] sm:$0xff]  ;;  %v13725_v2 = vld [vmem:[#allocation22_spill] sm:$0xff]  ;;  %v11031_v50 = vld [vmem:[#allocation2 + $0x27] sm:$0xff] }
 0x402   : > { %vm11001_vm10 = vcmp.lt.s32.totalorder %v13720_v48, 16  ;;  %4373 = vst.msk [vmem:[#allocation2 + $0x40] sm:$0xff] %vm13715_vm9, %v4325_v47  ;;  %vm13724_vm3 = vnez %v13723_v14  ;;  %v13726_v48 = vld [vmem:[#allocation18_spill] sm:$0xff]  ;;  %v3768_v24 = vmul.u32 24, %v3767_v27  ;;  %v11029_v62 = vadd.s32 296, %v9996_v18  ;;  %13730 = vst [vmem:[#allocation5_spill] sm:$0xff] %v11031_v50 }
 0x403   : > { %v13727_v29 = vsel %vm13724_vm3, %v13725_v2, %v13726_v48  ;;  %v11033_v8 = vld [vmem:[#allocation2 + $0x1f] sm:$0xff]  ;;  %v4328_v7 = vsel %vm10898_vm12, %v3319_v45, 0.0  ;;  %v3318_v47 = vmax.f32 %v3270_v61, 0.0  ;;  %v3217_v56 = vmul.f32 %v10728_v15, %v3003_v6  ;;  %4469 = vst.msk [vmem:[#allocation3 + $0x20] sm:$0xff] %vm13715_vm9, %v11031_v50  ;;  %vm13732_vm3 = vmmov %vm13715_vm9  ;;  %v8177_v27 = vpop.f32.mrf.mxu0 }
 0x404   : > { %vm11022_vm6 = vcmp.lt.s32.totalorder %v13727_v29, 16  ;;  %13731 = vst [vmem:[#allocation11_spill] sm:$0xff] %v11033_v8  ;;  %v3273_v29 = vadd.f32 %v10778_v30, %v3218_v3  ;;  %v4519_v14 = vld [vmem:[#allocation2 + $0x38] sm:$0xff]  ;;  %4468 = vst.msk [vmem:[#allocation3 + $0x18] sm:$0xff] %vm13732_vm3, %v11033_v8  ;;  %v13734_v2 = vld [vmem:[#allocation28_spill] sm:$0xff]  ;;  %v11055_v6 = vadd.s32 24, %v10983_v35  ;;  %v11079_v20 = vsub.s32 %v10811_v10, %v3768_v24 }
 0x405   : > { %vm13733_vm1 = vmmov %vm13732_vm3  ;;  %4621 = vrot.lane.b32.xlu0 %v4519_v14, %s8471_s8  ;;  %vm13735_vm15 = vnez %v13734_v2  ;;  %v13737_v45 = vld [vmem:[#allocation19_spill] sm:$0xff]  ;;  %v3801_v48 = vmul.u32 24, %v3800_v19  ;;  %v11058_v50 = vadd.s32 288, %v9996_v18  ;;  %v4327_v14 = vsel %vm10927_vm13, %v3318_v47, 0.0  ;;  %v3013_v19 = vpop.f32.mrf.mxu0  ;;  %v13742_v8 = vld [vmem:[#allocation29_spill] sm:$0xff] }
 0x406   : > { %4376 = vst.msk [vmem:[#allocation2 + $0x58] sm:$0xff] %vm13733_vm1, %v4328_v7  ;;  %v13738_v61 = vsel %vm13735_vm15, %v13736_v51, %v13737_v45  ;;  %v11061_v7 = vadd.s32 312, %v9996_v18  ;;  %v3321_v2 = vmax.f32 %v3273_v29, 0.0  ;;  %v3272_v51 = vadd.f32 %v10778_v30, %v3217_v56  ;;  %4375 = vst.msk [vmem:[#allocation2 + $0x50] sm:$0xff] %vm13733_vm1, %v4327_v14  ;;  %v11088_v14 = vld [vmem:[#allocation2 + $0x2f] sm:$0xff]  ;;  %v13758_v24 = vld [vmem:[#allocation31_spill] sm:$0xff] }
 0x407   : > { %vm11050_vm12 = vcmp.lt.s32.totalorder %v13738_v61, 16  ;;  %13741 = vst [vmem:[#allocation12_spill] sm:$0xff] %v11058_v50  ;;  %v3220_v45 = vmul.f32 %v8177_v27, %v10728_v15  ;;  %v4518_v61 = vld [vmem:[#allocation2 + $0x30] sm:$0xff]  ;;  %vm13743_vm15 = vnez %v13742_v8  ;;  %v3789_v47 = vshrl.u32 %v10988_v44, 4  ;;  %13750 = vst [vmem:[#allocation14_spill] sm:$0xff] %v11088_v14  ;;  %v4521_v10 = vld [vmem:[#allocation2 + $0x48] sm:$0xff]  ;;  %v8180_v54 = vpop.f32.mrf.mxu0 }
 0x408   : > { %4619 = vrot.lane.b32.xlu1 %v4518_v61, %s8471_s8  ;;  %v13746_v55 = vsel %vm13743_vm15, %v13744_v11, %v13745_v39  ;;  %v11083_v29 = vmul.u32.u64.low 2863311531, %v11029_v62  ;;  %v11084_v56 = vmul.u32.u64.high 2863311531, %v11029_v62, %v11083_v29  ;;  %v11086_v27 = vld [vmem:[#allocation2 + $0x37] sm:$0xff]  ;;  %v4330_v11 = vsel %vm10952_vm5, %v3321_v2, 0.0  ;;  %v13794_v3 = vld [vmem:[#allocation33_spill] sm:$0xff] }
 0x409   : > { %vm11074_vm9 = vcmp.lt.s32.totalorder %v13746_v55, 16  ;;  %13749 = vst [vmem:[#allocation6_spill] sm:$0xff] %v11086_v27  ;;  %v3320_v55 = vmax.f32 %v3272_v51, 0.0  ;;  %v3275_v39 = vadd.f32 %v10778_v30, %v3220_v45  ;;  %v3219_v8 = vmul.f32 %v10728_v15, %v3013_v19  ;;  %4625 = vrot.lane.b32.xlu0 %v4521_v10, %s8471_s8  ;;  %v13760_v2 = vld [vmem:[#allocation30_spill] sm:$0xff]  ;;  %v13761_v51 = vld [vmem:[#allocation24_spill] sm:$0xff]  ;;  %v3023_v5 = vpop.f32.mrf.mxu0 }
 0x40a   : > { %vm13751_vm13 = vcmp.ne.s32.totalorder %v10855_v23, 0  ;;  %vm13752_vm3 = vcmp.lt.s32.totalorder %v10855_v23, 0  ;;  %vm13755_vm15 = vcmask 64512   ;;  %vm13759_vm4 = vnez %v13758_v24 }
 0x40b   : > { %vm11098_vm1 = vmand %vm13752_vm3, %vm13751_vm13  ;;  %4471 = vst.msk [vmem:[#allocation3 + $0x30] sm:$0xff] %vm13755_vm15, %v11086_v27  ;;  %v13762_v45 = vsel %vm13759_vm4, %v13760_v2, %v13761_v51  ;;  %vm13765_vm3 = vcmp.ne.s32.totalorder %v10966_v4, 0  ;;  %v11130_v10 = vmul.u32.u64.low 2863311531, %v11061_v7  ;;  %v11131_v24 = vmul.u32.u64.high 2863311531, %v11061_v7, %v11130_v10 }
 0x40c   : > { %vm13756_vm2 = vmmov %vm13755_vm15  ;;  %vm11113_vm13 = vcmp.lt.s32.totalorder %v13762_v45, 16  ;;  %vm13766_vm15 = vcmp.lt.s32.totalorder %v10966_v4, 0  ;;  %v4329_v2 = vsel %vm10978_vm7, %v3320_v55, 0.0  ;;  %v3323_v51 = vmax.f32 %v3275_v39, 0.0 }
 0x40d   : > { %4470 = vst.msk [vmem:[#allocation3 + $0x28] sm:$0xff] %vm13756_vm2, %v11088_v14  ;;  %vm13757_vm5 = vmmov %vm13756_vm2  ;;  %v3274_v45 = vadd.f32 %v10778_v30, %v3219_v8  ;;  %v3222_v27 = vmul.f32 %v8180_v54, %v10728_v15  ;;  %v4520_v14 = vld [vmem:[#allocation2 + $0x40] sm:$0xff]  ;;  %vm13769_vm4 = vcmp.ne.s32.totalorder %v10983_v35, 0  ;;  %vm13770_vm2 = vcmp.lt.s32.totalorder %v10983_v35, 0 }
 0x40e   : > { %4378 = vst.msk [vmem:[#allocation2 + $0x68] sm:$0xff] %vm13757_vm5, %v4330_v11  ;;  %vm11121_vm8 = vmand %vm13766_vm15, %vm13765_vm3  ;;  %v11126_v29 = vmul.u32.u64.low 2863311531, %v11058_v50  ;;  %v11127_v11 = vmul.u32.u64.high 2863311531, %v11058_v50, %v11126_v29  ;;  %vm13773_vm3 = vcmask 64512   ;;  %4623 = vrot.lane.b32.xlu1 %v4520_v14, %s8471_s8  ;;  %v13774_v55 = vsel %vm10549_vm0, %v10482_v16, %v10430_v59  ;;  %v11163_v14 = vld [vmem:[#allocation2 + $0x3f] sm:$0xff] }
 0x40f   : > { %vm11141_vm5 = vmand %vm13770_vm2, %vm13769_vm4  ;;  %4377 = vst.msk [vmem:[#allocation2 + $0x60] sm:$0xff] %vm13773_vm3, %v4329_v2  ;;  %vm11152_vm7 = vcmp.lt.s32.totalorder %v13774_v55, 16  ;;  %vm3969_vm15 = vcmp.ne.s32.totalorder %v11079_v20, 0  ;;  %vm4017_vm4 = vcmp.lt.s32.totalorder %v11079_v20, 0  ;;  %v11159_v8 = vsub.s32 %v10850_v33, %v3801_v48  ;;  %v11161_v29 = vld [vmem:[#allocation2 + $0x47] sm:$0xff]  ;;  %v4523_v2 = vld [vmem:[#allocation2 + $0x58] sm:$0xff]  ;;  %v8183_v33 = vpop.f32.mrf.mxu0 }
 0x410   : > { %v3790_v54 = vmul.u32 24, %v3789_v47  ;;  %v4332_v57 = vsel %vm11001_vm10, %v3323_v51, 0.0  ;;  %v3322_v59 = vmax.f32 %v3274_v45, 0.0  ;;  %v3277_v16 = vadd.f32 %v10778_v30, %v3222_v27  ;;  %vm13777_vm0 = vmmov %vm13773_vm3  ;;  %4629 = vrot.lane.b32.xlu0 %v4523_v2, %s8471_s8  ;;  %v4522_v2 = vld [vmem:[#allocation2 + $0x50] sm:$0xff] }
 0x411   : > { %v3221_v10 = vmul.f32 %v10728_v15, %v3023_v5  ;;  %4473 = vst.msk [vmem:[#allocation3 + $0x40] sm:$0xff] %vm13777_vm0, %v11161_v29  ;;  %vm13778_vm2 = vmmov %vm13777_vm0  ;;  %v13781_v48 = vsel %vm10562_vm14, %v10494_v37, %v13780_v32  ;;  %v11197_v37 = vadd.s32 24, %v11079_v20  ;;  %v13784_v32 = vmov 0  ;;  %v3033_v52 = vpop.f32.mrf.mxu0 }
 0x412   : > { %4472 = vst.msk [vmem:[#allocation3 + $0x38] sm:$0xff] %vm13778_vm2, %v11163_v14  ;;  %vm13779_vm3 = vmmov %vm13777_vm0  ;;  %vm11180_vm10 = vcmp.lt.s32.totalorder %v13781_v48, 16  ;;  %v4331_v45 = vsel %vm11022_vm6, %v3322_v59, 0.0  ;;  %v3325_v5 = vmax.f32 %v3277_v16, 0.0  ;;  %4627 = vrot.lane.b32.xlu1 %v4522_v2, %s8471_s8  ;;  %v13786_v59 = vsel %vm10580_vm11, %v10504_v38, %v10463_v21  ;;  %v11228_v48 = vld [vmem:[#allocation2 + $0x57] sm:$0xff]  ;;  %v13832_v16 = vld [vmem:[#allocation12_spill] sm:$0xff] }
 0x413   : > { %4380 = vst.msk [vmem:[#allocation2 + $0x78] sm:$0xff] %vm13779_vm3, %v4332_v57  ;;  %v3276_v55 = vadd.f32 %v10778_v30, %v3221_v10  ;;  %v3224_v57 = vmul.f32 %v8183_v33, %v10728_v15  ;;  %vm11207_vm14 = vmand %vm4017_vm4, %vm3969_vm15  ;;  %vm11218_vm6 = vcmp.lt.s32.totalorder %v13786_v59, 16  ;;  %vm3972_vm2 = vcmp.ne.s32.totalorder %v11159_v8, 0 }
 0x414   : > { %v13785_v32 = vsel %vm11207_vm14, 4294967295, %v13784_v32  ;;  %4379 = vst.msk [vmem:[#allocation2 + $0x70] sm:$0xff] %vm13777_vm0, %v4331_v45  ;;  %vm4020_vm15 = vcmp.lt.s32.totalorder %v11159_v8, 0  ;;  %v11225_v10 = vsub.s32 %v10940_v13, %v3790_v54  ;;  %v3822_v33 = vshrl.u32 %v11084_v56, 4  ;;  %13789 = vst [vmem:[#allocation13_spill] sm:$0xff] %v11228_v48  ;;  %v11230_v45 = vld [vmem:[#allocation2 + $0x4f] sm:$0xff]  ;;  %v8186_v13 = vpop.f32.mrf.mxu0 }
 0x415   : > { %v4334_v21 = vsel %vm11050_vm12, %v3325_v5, 0.0  ;;  %v3324_v38 = vmax.f32 %v3276_v55, 0.0  ;;  %v3279_v34 = vadd.f32 %v10778_v30, %v3224_v57  ;;  %v3223_v2 = vmul.f32 %v10728_v15, %v3033_v52  ;;  %v4525_v59 = vld [vmem:[#allocation2 + $0x68] sm:$0xff]  ;;  %vm13790_vm11 = vmmov %vm13777_vm0 }
 0x416   : > { %4475 = vst.msk [vmem:[#allocation3 + $0x50] sm:$0xff] %vm13790_vm11, %v11228_v48  ;;  %vm13791_vm4 = vmmov %vm13777_vm0  ;;  %4633 = vrot.lane.b32.xlu0 %v4525_v59, %s8471_s8  ;;  %v11256_v55 = vadd.s32 24, %v11159_v8  ;;  %v3811_v57 = vshrl.u32 %v11127_v11, 4  ;;  %v11260_v52 = vadd.s32 304, %v9996_v18  ;;  %v3226_v59 = vmul.f32 %v8186_v13, %v10728_v15  ;;  %v3043_v22 = vpop.f32.mrf.mxu0  ;;  %v11288_v13 = vld [vmem:[#allocation2 + $0x67] sm:$0xff] }
 0x417   : > { %4474 = vst.msk [vmem:[#allocation3 + $0x48] sm:$0xff] %vm13791_vm4, %v11230_v45  ;;  %vm13792_vm3 = vmmov %vm13777_vm0  ;;  %vm13793_vm0 = vnez %v13590_v43  ;;  %v3327_v43 = vmax.f32 %v3279_v34, 0.0  ;;  %v3823_v34 = vmul.u32 24, %v3822_v33  ;;  %v13839_v54 = vld [vmem:[#allocation41_spill] sm:$0xff]  ;;  %v13858_v33 = vld [vmem:[#allocation44_spill] sm:$0xff] }
 0x418   : > { %4382 = vst.msk [vmem:[#allocation2 + $0x88] sm:$0xff] %vm13792_vm3, %v4334_v21  ;;  %v13795_v56 = vsel %vm13793_vm0, %v10531_v17, %v13794_v3  ;;  %v4333_v17 = vsel %vm11074_vm9, %v3324_v38, 0.0  ;;  %v3278_v21 = vadd.f32 %v10778_v30, %v3223_v2  ;;  %v4524_v3 = vld [vmem:[#allocation2 + $0x60] sm:$0xff]  ;;  %vm11270_vm11 = vmand %vm4020_vm15, %vm3972_vm2  ;;  %vm13801_vm9 = vnez %v13595_v49 }
 0x419   : > { %vm11247_vm12 = vcmp.lt.s32.totalorder %v13795_v56, 16  ;;  %v13798_v56 = vmov 0  ;;  %vm13800_vm4 = vmmov %vm13792_vm3  ;;  %4631 = vrot.lane.b32.xlu1 %v4524_v3, %s8471_s8  ;;  %v13802_v11 = vsel %vm13801_vm9, %v10554_v46, %v10508_v26  ;;  %vm3971_vm0 = vcmp.ne.s32.totalorder %v11225_v10, 0  ;;  %13805 = vst [vmem:[#allocation7_spill] sm:$0xff] %v11288_v13 }
 0x41a   : > { %v13799_v56 = vsel %vm11270_vm11, 4294967295, %v13798_v56  ;;  %4381 = vst.msk [vmem:[#allocation2 + $0x80] sm:$0xff] %vm13800_vm4, %v4333_v17  ;;  %vm11281_vm3 = vcmp.lt.s32.totalorder %v13802_v11, 16  ;;  %v3844_v2 = vshrl.u32 %v11131_v24, 4  ;;  %v11290_v17 = vld [vmem:[#allocation2 + $0x5f] sm:$0xff]  ;;  %v4336_v49 = vsel %vm11113_vm13, %v3327_v43, 0.0  ;;  %vm13806_vm15 = vmmov %vm13800_vm4  ;;  %v8189_v24 = vpop.f32.mrf.mxu0 }
 0x41b   : > { %v3326_v3 = vmax.f32 %v3278_v21, 0.0  ;;  %v3281_v26 = vadd.f32 %v10778_v30, %v3226_v59  ;;  %v3225_v46 = vmul.f32 %v10728_v15, %v3043_v22  ;;  %v4527_v11 = vld [vmem:[#allocation2 + $0x78] sm:$0xff]  ;;  %4477 = vst.msk [vmem:[#allocation3 + $0x60] sm:$0xff] %vm13806_vm15, %v11288_v13  ;;  %vm13807_vm9 = vmmov %vm13800_vm4  ;;  %vm13808_vm2 = vnez %v13601_v12 }
 0x41c   : > { %4476 = vst.msk [vmem:[#allocation3 + $0x58] sm:$0xff] %vm13800_vm4, %v11290_v17  ;;  %4637 = vrot.lane.b32.xlu0 %v4527_v11, %s8471_s8  ;;  %v13809_v61 = vsel %vm13808_vm2, %v10567_v58, %v10520_v60  ;;  %v11316_v21 = vadd.s32 24, %v11225_v10  ;;  %v3812_v59 = vmul.u32 24, %v3811_v57  ;;  %v11319_v22 = vadd.s32 328, %v9996_v18  ;;  %v4526_v11 = vld [vmem:[#allocation2 + $0x70] sm:$0xff]  ;;  %v3053_v39 = vpop.f32.mrf.mxu0 }
 0x41d   : > { %4384 = vst.msk [vmem:[#allocation2 + $0x98] sm:$0xff] %vm13807_vm9, %v4336_v49  ;;  %vm11307_vm13 = vcmp.lt.s32.totalorder %v13809_v61, 16  ;;  %v4335_v12 = vsel %vm11152_vm7, %v3326_v3, 0.0  ;;  %v3329_v60 = vmax.f32 %v3281_v26, 0.0  ;;  %v3280_v58 = vadd.f32 %v10778_v30, %v3225_v46  ;;  %4635 = vrot.lane.b32.xlu1 %v4526_v11, %s8471_s8  ;;  %v11353_v11 = vld [vmem:[#allocation2 + $0x6f] sm:$0xff] }
 0x41e   : > { %v3228_v49 = vmul.f32 %v8189_v24, %v10728_v15  ;;  %vm13812_vm2 = vcmp.lt.s32.totalorder %v11225_v10, 0  ;;  %v13813_v61 = vmov 0  ;;  %4383 = vst.msk [vmem:[#allocation2 + $0x90] sm:$0xff] %vm13800_vm4, %v4335_v12  ;;  %vm13815_vm7 = vnez %v13605_v36  ;;  %v11351_v12 = vld [vmem:[#allocation2 + $0x77] sm:$0xff]  ;;  %13820 = vst [vmem:[#allocation16_spill] sm:$0xff] %v11353_v11 }
 0x41f   : > { %vm11329_vm15 = vmand %vm13812_vm2, %vm3971_vm0  ;;  %v13816_v57 = vsel %vm13815_vm7, %v10601_v31, %v10524_v63  ;;  %v11345_v26 = vsub.s32 %v11029_v62, %v3823_v34  ;;  %v3845_v46 = vmul.u32 24, %v3844_v2  ;;  %13819 = vst [vmem:[#allocation36_spill] sm:$0xff] %v11351_v12  ;;  %v4338_v36 = vsel %vm11180_vm10, %v3329_v60, 0.0  ;;  %v4529_v5 = vld [vmem:[#allocation2 + $0x88] sm:$0xff]  ;;  %v8192_v62 = vpop.f32.mrf.mxu0 }
 0x420   : > { %v13814_v61 = vsel %vm11329_vm15, 4294967295, %v13813_v61  ;;  %vm11340_vm9 = vcmp.lt.s32.totalorder %v13816_v57, 16  ;;  %v11348_v24 = vmul.u32.u64.low 2863311531, %v11260_v52  ;;  %v11349_v43 = vmul.u32.u64.high 2863311531, %v11260_v52, %v11348_v24  ;;  %vm13821_vm0 = vmmov %vm13800_vm4  ;;  %4641 = vrot.lane.b32.xlu0 %v4529_v5, %s8471_s8 }
 0x421   : > { %v3328_v63 = vmax.f32 %v3280_v58, 0.0  ;;  %v3283_v31 = vadd.f32 %v10778_v30, %v3228_v49  ;;  %v3227_v57 = vmul.f32 %v10728_v15, %v3053_v39  ;;  %4479 = vst.msk [vmem:[#allocation3 + $0x70] sm:$0xff] %vm13821_vm0, %v11351_v12  ;;  %vm13822_vm2 = vmmov %vm13821_vm0  ;;  %vm13824_vm7 = vnez %v13610_v0  ;;  %v4528_v39 = vld [vmem:[#allocation2 + $0x80] sm:$0xff]  ;;  %v3063_v24 = vpop.f32.mrf.mxu0 }
 0x422   : > { %4478 = vst.msk [vmem:[#allocation3 + $0x68] sm:$0xff] %vm13822_vm2, %v11353_v11  ;;  %vm13823_vm4 = vmmov %vm13821_vm0  ;;  %v13825_v47 = vsel %vm13824_vm7, %v10618_v42, %v10539_v25  ;;  %v11379_v60 = vmul.u32.u64.low 2863311531, %v11319_v22  ;;  %v11380_v58 = vmul.u32.u64.high 2863311531, %v11319_v22, %v11379_v60  ;;  %v11383_v5 = vadd.s32 320, %v9996_v18  ;;  %4639 = vrot.lane.b32.xlu1 %v4528_v39, %s8471_s8  ;;  %v13837_v39 = vld [vmem:[#allocation40_spill] sm:$0xff]  ;;  %v13896_v11 = vld [vmem:[#allocation9_spill] sm:$0xff] }
 0x423   : > { %4386 = vst.msk [vmem:[#allocation2 + $0xa8] sm:$0xff] %vm13823_vm4, %v4338_v36  ;;  %vm11370_vm10 = vcmp.lt.s32.totalorder %v13825_v47, 16  ;;  %v4337_v0 = vsel %vm11218_vm6, %v3328_v63, 0.0  ;;  %v3331_v25 = vmax.f32 %v3283_v31, 0.0  ;;  %v3282_v42 = vadd.f32 %v10778_v30, %v3227_v57  ;;  %v11408_v57 = vld [vmem:[#allocation2 + $0x87] sm:$0xff]  ;;  %vm13836_vm7 = vmmov %vm13821_vm0 }
 0x424   : > { %v3230_v49 = vmul.f32 %v8192_v62, %v10728_v15  ;;  %4385 = vst.msk [vmem:[#allocation2 + $0xa0] sm:$0xff] %vm13821_vm0, %v4337_v0  ;;  %vm13828_vm2 = vnez %v13614_v28  ;;  %v11403_v63 = vsub.s32 %v13832_v16, %v3812_v59  ;;  %v11406_v31 = vadd.s32 344, %v9996_v18  ;;  %13833 = vst [vmem:[#allocation15_spill] sm:$0xff] %v11408_v57  ;;  %v11410_v28 = vld [vmem:[#allocation2 + $0x7f] sm:$0xff]  ;;  %v8195_v59 = vpop.f32.mrf.mxu0 }
 0x425   : > { %v13829_v36 = vsel %vm13828_vm2, %v10687_v9, %v10571_v41  ;;  %13834 = vst [vmem:[#allocation8_spill] sm:$0xff] %v11410_v28  ;;  %v4340_v9 = vsel %vm11247_vm12, %v3331_v25, 0.0  ;;  %v3330_v41 = vmax.f32 %v3282_v42, 0.0  ;;  %v3229_v60 = vmul.f32 %v10728_v15, %v3063_v24  ;;  %v4531_v0 = vld [vmem:[#allocation2 + $0x98] sm:$0xff]  ;;  %4481 = vst.msk [vmem:[#allocation3 + $0x80] sm:$0xff] %vm13821_vm0, %v11408_v57  ;;  %v13840_v25 = vld [vmem:[#allocation34_spill] sm:$0xff] }
 0x426   : > { %vm11396_vm4 = vcmp.lt.s32.totalorder %v13829_v36, 16  ;;  %v3285_v62 = vadd.f32 %v10778_v30, %v3230_v49  ;;  %vm13835_vm2 = vmmov %vm13821_vm0  ;;  %4388 = vst.msk [vmem:[#allocation2 + $0xb8] sm:$0xff] %vm13836_vm7, %v4340_v9  ;;  %4645 = vrot.lane.b32.xlu0 %v4531_v0, %s8471_s8  ;;  %vm13838_vm6 = vnez %v13837_v39  ;;  %v11432_v24 = vadd.s32 24, %v11345_v26  ;;  %v3073_v2 = vpop.f32.mrf.mxu0 }
 0x427   : > { %4480 = vst.msk [vmem:[#allocation3 + $0x78] sm:$0xff] %vm13835_vm2, %v11410_v28  ;;  %v13841_v42 = vsel %vm13838_vm6, %v13839_v54, %v13840_v25  ;;  %v11435_v36 = vsub.s32 %v11061_v7, %v3845_v46  ;;  %v11438_v16 = vmul.u32.u64.low 2863311531, %v11383_v5  ;;  %v11439_v9 = vmul.u32.u64.high 2863311531, %v11383_v5, %v11438_v16  ;;  %vm13844_vm6 = vmmov %vm13821_vm0  ;;  %v13845_v7 = vld [vmem:[#allocation43_spill] sm:$0xff]  ;;  %v13847_v46 = vld [vmem:[#allocation42_spill] sm:$0xff] }
 0x428   : > { %vm11427_vm12 = vcmp.lt.s32.totalorder %v13841_v42, 16  ;;  %v4339_v0 = vsel %vm11281_vm3, %v3330_v41, 0.0  ;;  %v3333_v39 = vmax.f32 %v3285_v62, 0.0  ;;  %v3284_v54 = vadd.f32 %v10778_v30, %v3229_v60  ;;  %v4530_v42 = vld [vmem:[#allocation2 + $0x90] sm:$0xff] }
 0x429   : > { %v3232_v25 = vmul.f32 %v8195_v59, %v10728_v15  ;;  %4387 = vst.msk [vmem:[#allocation2 + $0xb0] sm:$0xff] %vm13844_vm6, %v4339_v0  ;;  %4643 = vrot.lane.b32.xlu1 %v4530_v42, %s8471_s8  ;;  %vm13846_vm7 = vnez %v13845_v7  ;;  %v3833_v38 = vshrl.u32 %v11349_v43, 4  ;;  %v11460_v41 = vadd.s32 336, %v9996_v18  ;;  %v11462_v62 = vld [vmem:[#allocation2 + $0x97] sm:$0xff]  ;;  %v11464_v60 = vld [vmem:[#allocation2 + $0x8f] sm:$0xff]  ;;  %vm13854_vm6 = vmmov %vm13835_vm2  ;;  %v8198_v43 = vpop.f32.mrf.mxu0 }
 0x42a   : > { %v13849_v51 = vsel %vm13846_vm7, %v13847_v46, %v13848_v53  ;;  %13852 = vst [vmem:[#allocation38_spill] sm:$0xff] %v11462_v62  ;;  %13853 = vst [vmem:[#allocation25_spill] sm:$0xff] %v11464_v60  ;;  %v4342_v53 = vsel %vm11307_vm13, %v3333_v39, 0.0  ;;  %v3231_v0 = vmul.f32 %v10728_v15, %v3073_v2  ;;  %v4533_v42 = vld [vmem:[#allocation2 + $0xa8] sm:$0xff]  ;;  %vm13863_vm15 = vcmp.ne.s32.totalorder %v11345_v26, 0 }
 0x42b   : > { %vm11452_vm0 = vcmp.lt.s32.totalorder %v13849_v51, 16  ;;  %v3332_v51 = vmax.f32 %v3284_v54, 0.0  ;;  %v3287_v59 = vadd.f32 %v10778_v30, %v3232_v25  ;;  %4483 = vst.msk [vmem:[#allocation3 + $0x90] sm:$0xff] %vm13854_vm6, %v11462_v62  ;;  %vm13855_vm7 = vmmov %vm13835_vm2  ;;  %4649 = vrot.lane.b32.xlu0 %v4533_v42, %s8471_s8  ;;  %v13856_v7 = vld [vmem:[#allocation45_spill] sm:$0xff]  ;;  %vm13864_vm6 = vcmp.lt.s32.totalorder %v11345_v26, 0  ;;  %v3083_v3 = vpop.f32.mrf.mxu0 }
 0x42c   : > { %4482 = vst.msk [vmem:[#allocation3 + $0x88] sm:$0xff] %vm13855_vm7, %v11464_v60  ;;  %vm13857_vm3 = vnez %v13856_v7  ;;  %v13859_v39 = vld [vmem:[#allocation37_spill] sm:$0xff]  ;;  %vm11489_vm11 = vmand %vm13864_vm6, %vm13863_vm15  ;;  %v11494_v46 = vadd.s32 24, %v11403_v63  ;;  %vm13867_vm15 = vcmp.ne.s32.totalorder %v11403_v63, 0  ;;  %v11523_v62 = vadd.s32 24, %v11435_v36 }
 0x42d   : > { %4390 = vst.msk [vmem:[#allocation2 + $0xc8] sm:$0xff] %vm13835_vm2, %v4342_v53  ;;  %v13860_v54 = vsel %vm13857_vm3, %v13858_v33, %v13859_v39  ;;  %v3866_v53 = vshrl.u32 %v11380_v58, 4  ;;  %v4341_v42 = vsel %vm11340_vm9, %v3332_v51, 0.0  ;;  %v3335_v7 = vmax.f32 %v3287_v59, 0.0  ;;  %vm13871_vm7 = vmmov %vm13835_vm2  ;;  %v13872_v58 = vld [vmem:[#allocation4_spill] sm:$0xff]  ;;  %v13875_v59 = vld [vmem:[#allocation46_spill] sm:$0xff]  ;;  %v8201_v34 = vpop.f32.mrf.mxu0 }
 0x42e   : > { %vm11481_vm13 = vcmp.lt.s32.totalorder %v13860_v54, 16  ;;  %v3286_v33 = vadd.f32 %v10778_v30, %v3231_v0  ;;  %v3234_v39 = vmul.f32 %v8198_v43, %v10728_v15  ;;  %v4532_v54 = vld [vmem:[#allocation2 + $0xa0] sm:$0xff]  ;;  %vm13868_vm3 = vcmp.lt.s32.totalorder %v11403_v63, 0  ;;  %4389 = vst.msk [vmem:[#allocation2 + $0xc0] sm:$0xff] %vm13871_vm7, %v4341_v42  ;;  %v4535_v28 = vld [vmem:[#allocation2 + $0xb8] sm:$0xff] }
 0x42f   : > { %vm11507_vm6 = vmand %vm13868_vm3, %vm13867_vm15  ;;  %4647 = vrot.lane.b32.xlu1 %v4532_v54, %s8471_s8  ;;  %vm13873_vm9 = vnez %v13872_v58  ;;  %v13874_v51 = vld [vmem:[#allocation48_spill] sm:$0xff]  ;;  %v13877_v43 = vmov 0  ;;  %v3834_v57 = vmul.u32 24, %v3833_v38  ;;  %v4344_v58 = vsel %vm11370_vm10, %v3335_v7, 0.0  ;;  %4653 = vrot.lane.b32.xlu0 %v4535_v28, %s8471_s8  ;;  %v13890_v7 = vld [vmem:[#allocation50_spill] sm:$0xff] }
 0x430   : > { %v13876_v0 = vsel %vm13873_vm9, %v13874_v51, %v13875_v59  ;;  %v11526_v60 = vmul.u32.u64.low 2863311531, %v11406_v31  ;;  %v11527_v12 = vmul.u32.u64.high 2863311531, %v11406_v31, %v11526_v60  ;;  %v11529_v42 = vld [vmem:[#allocation2 + $0xa7] sm:$0xff]  ;;  %v11531_v54 = vld [vmem:[#allocation2 + $0x9f] sm:$0xff]  ;;  %v3334_v51 = vmax.f32 %v3286_v33, 0.0  ;;  %v4534_v13 = vld [vmem:[#allocation2 + $0xb0] sm:$0xff] }
 0x431   : > { %vm11518_vm2 = vcmp.lt.s32.totalorder %v13876_v0, 16  ;;  %13879 = vst [vmem:[#allocation20_spill] sm:$0xff] %v11529_v42  ;;  %13880 = vst [vmem:[#allocation17_spill] sm:$0xff] %v11531_v54  ;;  %v3289_v59 = vadd.f32 %v10778_v30, %v3234_v39  ;;  %v3233_v0 = vmul.f32 %v10728_v15, %v3083_v3  ;;  %vm13881_vm7 = vcmp.ne.s32.totalorder %v11435_v36, 0  ;;  %v13888_v60 = vld [vmem:[#allocation39_spill] sm:$0xff]  ;;  %v13898_v28 = vld [vmem:[#allocation10_spill] sm:$0xff] }
 0x432   : > { %v13878_v43 = vsel %vm11518_vm2, 4294967295, %v13877_v43  ;;  %vm13882_vm15 = vcmp.lt.s32.totalorder %v11435_v36, 0  ;;  %vm13885_vm9 = vcmask 64512   ;;  %vm13889_vm2 = vnez %v13888_v60  ;;  %v13891_v33 = vld [vmem:[#allocation47_spill] sm:$0xff] }
 0x433   : > { %vm11541_vm3 = vmand %vm13882_vm15, %vm13881_vm7  ;;  %4485 = vst.msk [vmem:[#allocation3 + $0xa0] sm:$0xff] %vm13885_vm9, %v11529_v42  ;;  %v13892_v39 = vsel %vm13889_vm2, %v13890_v7, %v13891_v33  ;;  %v3855_v60 = vshrl.u32 %v11439_v9, 4  ;;  %v4343_v7 = vsel %vm11396_vm4, %v3334_v51, 0.0  ;;  %v3337_v33 = vmax.f32 %v3289_v59, 0.0  ;;  %4651 = vrot.lane.b32.xlu1 %v4534_v13, %s8471_s8  ;;  %v3093_v42 = vpop.f32.mrf.mxu0 }
 0x434   : > { %vm13886_vm14 = vmmov %vm13885_vm9  ;;  %vm11556_vm7 = vcmp.lt.s32.totalorder %v13892_v39, 16  ;;  %v3288_v39 = vadd.f32 %v10778_v30, %v3233_v0  ;;  %vm13897_vm2 = vnez %v13896_v11  ;;  %v4168_v47 = vsel %vm11541_vm3, %v11523_v62, %v11435_v36  ;;  %v11596_v11 = vld [vmem:[#allocation2 + $0xb7] sm:$0xff]  ;;  %v11598_v0 = vld [vmem:[#allocation2 + $0xaf] sm:$0xff] }
 0x435   : > { %4484 = vst.msk [vmem:[#allocation3 + $0x98] sm:$0xff] %vm13886_vm14, %v11531_v54  ;;  %vm13887_vm10 = vmmov %vm13885_vm9  ;;  %v3236_v54 = vmul.f32 %v8201_v34, %v10728_v15  ;;  %v11589_v51 = vsub.s32 %v11260_v52, %v3834_v57  ;;  %v11592_v13 = vmul.u32.u64.low 2863311531, %v11460_v41  ;;  %v11593_v59 = vmul.u32.u64.high 2863311531, %v11460_v41, %v11592_v13  ;;  %v8204_v52 = vpop.f32.mrf.mxu0 }
 0x436   : > { %4392 = vst.msk [vmem:[#allocation2 + $0xd8] sm:$0xff] %vm13887_vm10, %v4344_v58  ;;  %v3867_v58 = vmul.u32 24, %v3866_v53  ;;  %vm13895_vm14 = vmmov %vm13885_vm9  ;;  %v13899_v53 = vld [vmem:[#allocation49_spill] sm:$0xff]  ;;  %v3336_v34 = vmax.f32 %v3288_v39, 0.0  ;;  %v13906_v57 = vsel %vm11098_vm1, %v10963_v1, %v10855_v23  ;;  %v11626_v39 = vadd.s32 352, %v9996_v18 }
 0x437   : > { %4391 = vst.msk [vmem:[#allocation2 + $0xd0] sm:$0xff] %vm13895_vm14, %v4343_v7  ;;  %v13900_v48 = vsel %vm13897_vm2, %v13898_v28, %v13899_v53  ;;  %v3291_v28 = vadd.f32 %v10778_v30, %v3236_v54  ;;  %v3235_v7 = vmul.f32 %v10728_v15, %v3093_v42  ;;  %v4537_v53 = vld [vmem:[#allocation2 + $0xc8] sm:$0xff]  ;;  %vm13903_vm4 = vmmov %vm13885_vm9  ;;  %v3856_v54 = vmul.u32 24, %v3855_v60 }
 0x438   : > { %vm11580_vm15 = vcmp.lt.s32.totalorder %v13900_v48, 16  ;;  %v4346_v48 = vsel %vm11427_vm12, %v3337_v33, 0.0  ;;  %4487 = vst.msk [vmem:[#allocation3 + $0xb0] sm:$0xff] %vm13903_vm4, %v11596_v11  ;;  %vm13904_vm9 = vmmov %vm13903_vm4  ;;  %4657 = vrot.lane.b32.xlu0 %v4537_v53, %s8471_s8  ;;  %vm11615_vm12 = vcmp.lt.s32.totalorder %v13906_v57, 16  ;;  %v11620_v42 = vsub.s32 %v11319_v22, %v3867_v58  ;;  %v3103_v22 = vpop.f32.mrf.mxu0 }
 0x439   : > { %4486 = vst.msk [vmem:[#allocation3 + $0xa8] sm:$0xff] %vm13904_vm9, %v11598_v0  ;;  %vm13905_vm10 = vmmov %vm13903_vm4  ;;  %v11623_v33 = vadd.s32 360, %v9996_v18  ;;  %v4345_v44 = vsel %vm11452_vm0, %v3336_v34, 0.0  ;;  %v3339_v13 = vmax.f32 %v3291_v28, 0.0  ;;  %v3290_v23 = vadd.f32 %v10778_v30, %v3235_v7  ;;  %v11649_v28 = vld [vmem:[#allocation2 + $0xc7] sm:$0xff]  ;;  %v11651_v7 = vld [vmem:[#allocation2 + $0xbf] sm:$0xff] }
 0x43a   : > { %4394 = vst.msk [vmem:[#allocation2 + $0xe8] sm:$0xff] %vm13905_vm10, %v4346_v48  ;;  %v3238_v1 = vmul.f32 %v8204_v52, %v10728_v15  ;;  %v4536_v48 = vld [vmem:[#allocation2 + $0xc0] sm:$0xff]  ;;  %vm13909_vm1 = vmmov %vm13903_vm4  ;;  %v13910_v58 = vsel %vm11121_vm8, %v11008_v40, %v10966_v4  ;;  %vm3975_vm0 = vcmp.ne.s32.totalorder %v11589_v51, 0  ;;  %vm4023_vm2 = vcmp.lt.s32.totalorder %v11589_v51, 0 }
 0x43b   : > { %4393 = vst.msk [vmem:[#allocation2 + $0xe0] sm:$0xff] %vm13909_vm1, %v4345_v44  ;;  %4655 = vrot.lane.b32.xlu1 %v4536_v48, %s8471_s8  ;;  %vm11639_vm14 = vcmp.lt.s32.totalorder %v13910_v58, 16  ;;  %v3888_v16 = vshrl.u32 %v11527_v12, 4  ;;  %v11647_v34 = vadd.s32 376, %v9996_v18  ;;  %v4348_v4 = vsel %vm11481_vm13, %v3339_v13, 0.0  ;;  %vm13913_vm8 = vmmov %vm13909_vm1  ;;  %v8207_v12 = vpop.f32.mrf.mxu0 }
 0x43c   : > { %v3338_v40 = vmax.f32 %v3290_v23, 0.0  ;;  %v3293_v19 = vadd.f32 %v10778_v30, %v3238_v1  ;;  %v3237_v53 = vmul.f32 %v10728_v15, %v3103_v22  ;;  %4489 = vst.msk [vmem:[#allocation3 + $0xc0] sm:$0xff] %vm13913_vm8, %v11649_v28  ;;  %vm13914_vm4 = vmmov %vm13909_vm1  ;;  %v13916_v25 = vsel %vm11141_vm5, %v11055_v6, %v10983_v35 }
 0x43d   : > { %v4539_v52 = vld [vmem:[#allocation2 + $0xd8] sm:$0xff]  ;;  %4488 = vst.msk [vmem:[#allocation3 + $0xb8] sm:$0xff] %vm13914_vm4, %v11651_v7  ;;  %vm13915_vm9 = vmmov %vm13909_vm1  ;;  %vm11668_vm13 = vcmp.lt.s32.totalorder %v13916_v25, 16  ;;  %v11673_v44 = vadd.s32 24, %v11589_v51  ;;  %vm3978_vm10 = vcmp.ne.s32.totalorder %v11620_v42, 0  ;;  %v11677_v13 = vsub.s32 %v11383_v5, %v3856_v54 }
 0x43e   : > { %4396 = vst.msk [vmem:[#allocation2 + $0xf8] sm:$0xff] %vm13915_vm9, %v4348_v4  ;;  %4661 = vrot.lane.b32.xlu0 %v4539_v52, %s8471_s8  ;;  %v11680_v23 = vadd.s32 368, %v9996_v18  ;;  %vm13919_vm1 = vnez %v13878_v43  ;;  %v3341_v1 = vmax.f32 %v3293_v19, 0.0  ;;  %v3292_v35 = vadd.f32 %v10778_v30, %v3237_v53  ;;  %v4538_v48 = vld [vmem:[#allocation2 + $0xd0] sm:$0xff]  ;;  %vm11690_vm5 = vmand %vm4023_vm2, %vm3975_vm0  ;;  %v3113_v18 = vpop.f32.mrf.mxu0 }
 0x43f   : > { %v4347_v50 = vsel %vm13919_vm1, %v3338_v40, 0.0  ;;  %v3240_v6 = vmul.f32 %v8207_v12, %v10728_v15  ;;  %vm13922_vm8 = vmmov %vm13914_vm4  ;;  %4659 = vrot.lane.b32.xlu1 %v4538_v48, %s8471_s8  ;;  %vm13923_vm4 = vnez %v13785_v32  ;;  %vm4026_vm1 = vcmp.lt.s32.totalorder %v11620_v42, 0  ;;  %v11710_v40 = vld [vmem:[#allocation2 + $0xd7] sm:$0xff]  ;;  %v11712_v19 = vld [vmem:[#allocation2 + $0xcf] sm:$0xff] }
 0x440   : > { %4395 = vst.msk [vmem:[#allocation2 + $0xf0] sm:$0xff] %vm13922_vm8, %v4347_v50  ;;  %v13924_v5 = vsel %vm13923_vm4, %v11197_v37, %v11079_v20  ;;  %v3889_v54 = vmul.u32 24, %v3888_v16  ;;  %v11707_v58 = vmul.u32.u64.low 2863311531, %v11623_v33  ;;  %v11708_v4 = vmul.u32.u64.high 2863311531, %v11623_v33, %v11707_v58  ;;  %vm13927_vm0 = vmmov %vm13922_vm8  ;;  %v8210_v16 = vpop.f32.mrf.mxu0 }
 0x441   : > { %vm11701_vm9 = vcmp.lt.s32.totalorder %v13924_v5, 16  ;;  %v4350_v32 = vsel %vm11556_vm7, %v3341_v1, 0.0  ;;  %v3340_v53 = vmax.f32 %v3292_v35, 0.0  ;;  %v3295_v20 = vadd.f32 %v10778_v30, %v3240_v6  ;;  %v4541_v52 = vld [vmem:[#allocation2 + $0xe8] sm:$0xff]  ;;  %4491 = vst.msk [vmem:[#allocation3 + $0xd0] sm:$0xff] %vm13927_vm0, %v11710_v40  ;;  %vm13928_vm2 = vmmov %vm13927_vm0 }
 0x442   : > { %v3239_v37 = vmul.f32 %v10728_v15, %v3113_v18  ;;  %4490 = vst.msk [vmem:[#allocation3 + $0xc8] sm:$0xff] %vm13928_vm2, %v11712_v19  ;;  %vm13929_vm8 = vmmov %vm13927_vm0  ;;  %4665 = vrot.lane.b32.xlu0 %v4541_v52, %s8471_s8  ;;  %vm13930_vm4 = vnez %v13799_v56  ;;  %v4167_v25 = vsel %vm11690_vm5, %v11673_v44, %v11589_v51  ;;  %v11738_v50 = vadd.s32 24, %v11620_v42  ;;  %v4540_v48 = vld [vmem:[#allocation2 + $0xe0] sm:$0xff]  ;;  %v3123_v18 = vpop.f32.mrf.mxu0 }
 0x443   : > { %4398 = vst.msk [vmem:[#allocation2 + $0x108] sm:$0xff] %vm13929_vm8, %v4350_v32  ;;  %v13931_v3 = vsel %vm13930_vm4, %v11256_v55, %v11159_v8  ;;  %v11741_v1 = vmul.u32.u64.low 2863311531, %v11626_v39  ;;  %v11742_v35 = vmul.u32.u64.high 2863311531, %v11626_v39, %v11741_v1  ;;  %v4349_v56 = vsel %vm11580_vm15, %v3340_v53, 0.0  ;;  %4663 = vrot.lane.b32.xlu1 %v4540_v48, %s8471_s8  ;;  %vm13938_vm4 = vmmov %vm13927_vm0 }
 0x444   : > { %vm11729_vm7 = vcmp.lt.s32.totalorder %v13931_v3, 16  ;;  %v3343_v8 = vmax.f32 %v3295_v20, 0.0  ;;  %v3294_v55 = vadd.f32 %v10778_v30, %v3239_v37  ;;  %v3242_v6 = vmul.f32 %v8210_v16, %v10728_v15  ;;  %4397 = vst.msk [vmem:[#allocation2 + $0x100] sm:$0xff] %vm13927_vm0, %v4349_v56  ;;  %v11767_v20 = vld [vmem:[#allocation2 + $0xe7] sm:$0xff]  ;;  %v11769_v37 = vld [vmem:[#allocation2 + $0xdf] sm:$0xff] }
 0x445   : > { %vm13934_vm2 = vnez %v13814_v61  ;;  %v11761_v9 = vsub.s32 %v11406_v31, %v3889_v54  ;;  %v11764_v32 = vmul.u32.u64.low 2863311531, %v11647_v34  ;;  %v11765_v53 = vmul.u32.u64.high 2863311531, %v11647_v34, %v11764_v32  ;;  %v4543_v16 = vld [vmem:[#allocation2 + $0xf8] sm:$0xff]  ;;  %4493 = vst.msk [vmem:[#allocation3 + $0xe0] sm:$0xff] %vm13938_vm4, %v11767_v20  ;;  %v8213_v31 = vpop.f32.mrf.mxu0  ;;  %vm11820_vm4 = vmand %vm4026_vm1, %vm3978_vm10  ;;  %v4810_v54 = vld [vmem:[#allocation2 + $0x49] sm:$0xff] }
 0x446   : > { %v13935_v5 = vsel %vm13934_vm2, %v11316_v21, %v11225_v10  ;;  %v4352_v10 = vsel %vm11615_vm12, %v3343_v8, 0.0  ;;  %v3342_v21 = vmax.f32 %v3294_v55, 0.0  ;;  %v3297_v61 = vadd.f32 %v10778_v30, %v3242_v6  ;;  %4492 = vst.msk [vmem:[#allocation3 + $0xd8] sm:$0xff] %vm13927_vm0, %v11769_v37  ;;  %vm13939_vm2 = vmmov %vm13927_vm0  ;;  %4669 = vrot.lane.b32.xlu0 %v4543_v16, %s8471_s8  ;;  %v11839_v32 = vld [vmem:[%s13405_s3] ss:$0 sm:$0xff] }
 0x447   : > { %vm11755_vm8 = vcmp.lt.s32.totalorder %v13935_v5, 16  ;;  %v3241_v52 = vmul.f32 %v10728_v15, %v3123_v18  ;;  %4400 = vst.msk [vmem:[#allocation2 + $0x118] sm:$0xff] %vm13939_vm2, %v4352_v10  ;;  %v13940_v49 = vsel %vm11489_vm11, %v11432_v24, %v11345_v26  ;;  %vm4025_vm15 = vcmp.lt.s32.totalorder %v11677_v13, 0  ;;  %v11802_v26 = vld [vmem:[%s13404_s2] ss:$0 sm:$0xff]  ;;  %v4542_v55 = vld [vmem:[#allocation2 + $0xf0] sm:$0xff]  ;;  %vm13943_vm11 = vmmov %vm13927_vm0 }
 0x448   : > { %vm11786_vm12 = vcmp.lt.s32.totalorder %v13940_v49, 16  ;;  %v3877_v15 = vshrl.u32 %v11593_v59, 4  ;;  %v11793_v3 = vmul.u32.u64.low 2863311531, %v11680_v23  ;;  %v11794_v1 = vmul.u32.u64.high 2863311531, %v11680_v23, %v11793_v3  ;;  %4667 = vrot.lane.b32.xlu1 %v4542_v55, %s8471_s8  ;;  %v3133_v59 = vpop.f32.mrf.mxu0  ;;  %vm13953_vm1 = vmmov %vm13943_vm11 }
 0x449   : > { %v4351_v56 = vsel %vm11639_vm14, %v3342_v21, 0.0  ;;  %v3345_v8 = vmax.f32 %v3297_v61, 0.0  ;;  %v3296_v2 = vadd.f32 %v10778_v30, %v3241_v52  ;;  %v3244_v24 = vmul.f32 %v11802_v26, %v8213_v31  ;;  %vm13962_vm5 = vmmov %vm13953_vm1 }
 0x44a   : > { %4399 = vst.msk [vmem:[#allocation2 + $0x110] sm:$0xff] %vm13943_vm11, %v4351_v56  ;;  %v13944_v60 = vsel %vm11507_vm6, %v11494_v46, %v11403_v63  ;;  %v11825_v48 = vadd.s32 24, %v11677_v13  ;;  %vm3980_vm0 = vcmp.ne.s32.totalorder %v11761_v9, 0  ;;  %vm4028_vm2 = vcmp.lt.s32.totalorder %v11761_v9, 0  ;;  %v11830_v63 = vld [vmem:[#allocation2 + $0xf7] sm:$0xff]  ;;  %v11832_v46 = vld [vmem:[#allocation2 + $0xef] sm:$0xff]  ;;  %v8216_v57 = vpop.f32.mrf.mxu0 }
 0x44b   : > { %vm11812_vm14 = vcmp.lt.s32.totalorder %v13944_v60, 16  ;;  %v3910_v27 = vshrl.u32 %v11708_v4, 4  ;;  %v4354_v18 = vsel %vm11668_vm13, %v3345_v8, 0.0  ;;  %v3344_v5 = vmax.f32 %v3296_v2, 0.0  ;;  %v4545_v61 = vld [vmem:[#allocation2 + $0x108] sm:$0xff]  ;;  %vm13952_vm13 = vmmov %vm13943_vm11  ;;  %4494 = vst.msk [vmem:[#allocation3 + $0xe8] sm:$0xff] %vm13953_vm1, %v11832_v46 }
 0x44c   : > { %v3299_v10 = vadd.f32 %v11839_v32, %v3244_v24  ;;  %v3243_v21 = vmul.f32 %v11802_v26, %v3133_v59  ;;  %vm13949_vm6 = vcmp.ne.s32.totalorder %v11677_v13, 0  ;;  %4495 = vst.msk [vmem:[#allocation3 + $0xf0] sm:$0xff] %vm13952_vm13, %v11830_v63  ;;  %vm13954_vm11 = vmmov %vm13953_vm1  ;;  %4673 = vrot.lane.b32.xlu0 %v4545_v61, %s8471_s8  ;;  %v4124_v16 = vadd.s32 24, %v11761_v9  ;;  %v4544_v2 = vld [vmem:[#allocation2 + $0x100] sm:$0xff]  ;;  %v3143_v62 = vpop.f32.mrf.mxu0 }
 0x44d   : > { %vm11847_vm10 = vmand %vm4025_vm15, %vm13949_vm6  ;;  %4402 = vst.msk [vmem:[#allocation2 + $0x128] sm:$0xff] %vm13954_vm11, %v4354_v18  ;;  %vm11862_vm15 = vcmp.lt.s32.totalorder %v4168_v47, 16  ;;  %v3878_v31 = vmul.u32 24, %v3877_v15  ;;  %v3899_v49 = vshrl.u32 %v11742_v35, 4  ;;  %v4353_v3 = vsel %vm11701_vm9, %v3344_v5, 0.0  ;;  %4671 = vrot.lane.b32.xlu1 %v4544_v2, %s8471_s8  ;;  %v11900_v24 = vld [vmem:[#allocation2 + $0x107] sm:$0xff] }
 0x44e   : > { %v3347_v56 = vmax.f32 %v3299_v10, 0.0  ;;  %v3298_v8 = vadd.f32 %v11839_v32, %v3243_v21  ;;  %v3246_v38 = vmul.f32 %v11802_v26, %v8216_v57  ;;  %vm11876_vm3 = vmand %vm4028_vm2, %vm3980_vm0  ;;  %vm11887_vm9 = vcmp.lt.s32.totalorder %v4167_v25, 16  ;;  %v11902_v51 = vld [vmem:[#allocation2 + $0xff] sm:$0xff]  ;;  %4497 = vst.msk [vmem:[#allocation3 + $0x100] sm:$0xff] %vm13962_vm5, %v11900_v24 }
 0x44f   : > { %vm13959_vm6 = vmmov %vm13953_vm1  ;;  %v4170_v43 = vsel %vm11820_vm4, %v11738_v50, %v11620_v42  ;;  %v4169_v35 = vsel %vm11847_vm10, %v11825_v48, %v11677_v13  ;;  %v3911_v15 = vmul.u32 24, %v3910_v27  ;;  %v3932_v22 = vshrl.u32 %v11765_v53, 4  ;;  %v4547_v50 = vld [vmem:[#allocation2 + $0x118] sm:$0xff]  ;;  %v8219_v13 = vpop.f32.mrf.mxu0 }
 0x450   : > { %4401 = vst.msk [vmem:[#allocation2 + $0x120] sm:$0xff] %vm13959_vm6, %v4353_v3  ;;  %v4356_v44 = vsel %vm11729_vm7, %v3347_v56, 0.0  ;;  %v3346_v25 = vmax.f32 %v3298_v8, 0.0  ;;  %v3301_v55 = vadd.f32 %v11839_v32, %v3246_v38  ;;  %v3245_v42 = vmul.f32 %v11802_v26, %v3143_v62  ;;  %vm13963_vm4 = vmmov %vm13953_vm1  ;;  %4677 = vrot.lane.b32.xlu0 %v4547_v50, %s8471_s8 }
 0x451   : > { %4496 = vst.msk [vmem:[#allocation3 + $0xf8] sm:$0xff] %vm13963_vm4, %v11902_v51  ;;  %vm13964_vm0 = vmmov %vm13953_vm1  ;;  %v4172_v12 = vsel %vm11876_vm3, %v4124_v16, %v11761_v9  ;;  %v11918_v53 = vsub.s32 %v11460_v41, %v3878_v31  ;;  %v3900_v59 = vmul.u32 24, %v3899_v49  ;;  %v3921_v60 = vshrl.u32 %v11794_v1, 4  ;;  %v4546_v5 = vld [vmem:[#allocation2 + $0x110] sm:$0xff]  ;;  %v3153_v9 = vpop.f32.mrf.mxu0 }
 0x452   : > { %4404 = vst.msk [vmem:[#allocation2 + $0x138] sm:$0xff] %vm13964_vm0, %v4356_v44  ;;  %v4355_v6 = vsel %vm11755_vm8, %v3346_v25, 0.0  ;;  %v3349_v48 = vmax.f32 %v3301_v55, 0.0  ;;  %v3300_v27 = vadd.f32 %v11839_v32, %v3245_v42  ;;  %v3248_v18 = vmul.f32 %v11802_v26, %v8219_v13  ;;  %vm13965_vm7 = vmmov %vm13964_vm0  ;;  %4675 = vrot.lane.b32.xlu1 %v4546_v5, %s8471_s8  ;;  %v11938_v21 = vld [vmem:[#allocation2 + $0x117] sm:$0xff]  ;;  %v11940_v61 = vld [vmem:[#allocation2 + $0x10f] sm:$0xff] }
 0x453   : > { %4403 = vst.msk [vmem:[#allocation2 + $0x130] sm:$0xff] %vm13965_vm7, %v4355_v6  ;;  %vm11927_vm2 = vcmp.lt.s32.totalorder %v4170_v43, 16  ;;  %vm11931_vm10 = vcmp.lt.s32.totalorder %v4169_v35, 16  ;;  %v11936_v58 = vsub.s32 %v11623_v33, %v3911_v15  ;;  %v3933_v10 = vmul.u32 24, %v3932_v22  ;;  %vm13970_vm8 = vmmov %vm13964_vm0  ;;  %v8222_v33 = vpop.f32.mrf.mxu0 }
 0x454   : > { %v4358_v4 = vsel %vm11786_vm12, %v3349_v48, 0.0  ;;  %v3348_v57 = vmax.f32 %v3300_v27, 0.0  ;;  %v3303_v16 = vadd.f32 %v11839_v32, %v3248_v18  ;;  %v3247_v31 = vmul.f32 %v11802_v26, %v3153_v9  ;;  %v4549_v49 = vld [vmem:[#allocation2 + $0x128] sm:$0xff]  ;;  %4499 = vst.msk [vmem:[#allocation3 + $0x110] sm:$0xff] %vm13970_vm8, %v11938_v21  ;;  %vm13971_vm13 = vmmov %vm13964_vm0 }
 0x455   : > { %4498 = vst.msk [vmem:[#allocation3 + $0x108] sm:$0xff] %vm13971_vm13, %v11940_v61  ;;  %vm13972_vm1 = vmmov %vm13964_vm0  ;;  %4681 = vrot.lane.b32.xlu0 %v4549_v49, %s8471_s8  ;;  %vm11952_vm11 = vcmp.lt.s32.totalorder %v4172_v12, 16  ;;  %vm3979_vm12 = vcmp.ne.s32.totalorder %v11918_v53, 0  ;;  %vm4027_vm3 = vcmp.lt.s32.totalorder %v11918_v53, 0  ;;  %v11959_v3 = vsub.s32 %v11626_v39, %v3900_v59  ;;  %v3163_v43 = vpop.f32.mrf.mxu0 }
 0x456   : > { %4406 = vst.msk [vmem:[#allocation2 + $0x148] sm:$0xff] %vm13972_vm1, %v4358_v4  ;;  %v3922_v56 = vmul.u32 24, %v3921_v60  ;;  %v4357_v8 = vsel %vm11812_vm14, %v3348_v57, 0.0  ;;  %v3351_v38 = vmax.f32 %v3303_v16, 0.0  ;;  %v3302_v2 = vadd.f32 %v11839_v32, %v3247_v31  ;;  %vm13975_vm6 = vmmov %vm13964_vm0 }
 0x457   : > { %v3250_v36 = vmul.f32 %v11802_v26, %v8222_v33  ;;  %v4548_v62 = vld [vmem:[#allocation2 + $0x120] sm:$0xff]  ;;  %4405 = vst.msk [vmem:[#allocation2 + $0x140] sm:$0xff] %vm13975_vm6, %v4357_v8  ;;  %v4123_v35 = vadd.s32 24, %v11918_v53  ;;  %vm3982_vm5 = vcmp.ne.s32.totalorder %v11936_v58, 0  ;;  %vm4030_vm4 = vcmp.lt.s32.totalorder %v11936_v58, 0  ;;  %vm11985_vm14 = vmand %vm4027_vm3, %vm3979_vm12  ;;  %v8225_v52 = vpop.f32.mrf.mxu0 }
 0x458   : > { %4679 = vrot.lane.b32.xlu1 %v4548_v62, %s8471_s8  ;;  %v11971_v39 = vsub.s32 %v11647_v34, %v3933_v10  ;;  %v11973_v30 = vld [vmem:[#allocation2 + $0x127] sm:$0xff]  ;;  %v11975_v15 = vld [vmem:[#allocation2 + $0x11f] sm:$0xff]  ;;  %v4360_v22 = vsel %vm11862_vm15, %v3351_v38, 0.0  ;;  %v3350_v44 = vmax.f32 %v3302_v2, 0.0  ;;  %v3249_v55 = vmul.f32 %v11802_v26, %v3163_v43  ;;  %vm13978_vm7 = vmmov %vm13964_vm0 }
 0x459   : > { %v3305_v25 = vadd.f32 %v11839_v32, %v3250_v36  ;;  %v4551_v42 = vld [vmem:[#allocation2 + $0x138] sm:$0xff]  ;;  %4501 = vst.msk [vmem:[#allocation3 + $0x120] sm:$0xff] %vm13964_vm0, %v11973_v30  ;;  %vm13979_vm15 = vmmov %vm13964_vm0  ;;  %v4126_v50 = vadd.s32 24, %v11936_v58  ;;  %vm3981_vm8 = vcmp.ne.s32.totalorder %v11959_v3, 0  ;;  %vm4029_vm13 = vcmp.lt.s32.totalorder %v11959_v3, 0 }
 0x45a   : > { %4500 = vst.msk [vmem:[#allocation3 + $0x118] sm:$0xff] %vm13978_vm7, %v11975_v15  ;;  %4685 = vrot.lane.b32.xlu0 %v4551_v42, %s8471_s8  ;;  %v11999_v13 = vsub.s32 %v11680_v23, %v3922_v56  ;;  %v4359_v12 = vsel %vm11887_vm9, %v3350_v44, 0.0  ;;  %v3304_v60 = vadd.f32 %v11839_v32, %v3249_v55  ;;  %v3252_v6 = vmul.f32 %v11802_v26, %v8225_v52  ;;  %v4550_v48 = vld [vmem:[#allocation2 + $0x130] sm:$0xff]  ;;  %vm12009_vm1 = vmand %vm4030_vm4, %vm3982_vm5  ;;  %v3173_v23 = vpop.f32.mrf.mxu0 }
 0x45b   : > { %4408 = vst.msk [vmem:[#allocation2 + $0x158] sm:$0xff] %vm13979_vm15, %v4360_v22  ;;  %v3353_v59 = vmax.f32 %v3305_v25, 0.0  ;;  %vm13982_vm12 = vmmov %vm13964_vm0  ;;  %v4171_v47 = vsel %vm11985_vm14, %v4123_v35, %v11918_v53  ;;  %v4125_v18 = vadd.s32 24, %v11959_v3  ;;  %vm3984_vm9 = vcmp.ne.s32.totalorder %v11971_v39, 0  ;;  %v12021_v5 = vld [vmem:[#allocation2 + $0x137] sm:$0xff]  ;;  %v12023_v9 = vld [vmem:[#allocation2 + $0x12f] sm:$0xff] }
 0x45c   : > { %4407 = vst.msk [vmem:[#allocation2 + $0x150] sm:$0xff] %vm13982_vm12, %v4359_v12  ;;  %4683 = vrot.lane.b32.xlu1 %v4550_v48, %s8471_s8  ;;  %vm4032_vm3 = vcmp.lt.s32.totalorder %v11971_v39, 0  ;;  %v3352_v4 = vmax.f32 %v3304_v60, 0.0  ;;  %v3307_v57 = vadd.f32 %v11839_v32, %v3252_v6  ;;  %v3251_v16 = vmul.f32 %v11802_v26, %v3173_v23  ;;  %vm12033_vm6 = vmand %vm4029_vm13, %vm3981_vm8  ;;  %v8228_v41 = vpop.f32.mrf.mxu0 }
 0x45d   : > { %v4362_v10 = vsel %vm11927_vm2, %v3353_v59, 0.0  ;;  %v4553_v31 = vld [vmem:[#allocation2 + $0x148] sm:$0xff]  ;;  %vm13985_vm5 = vmmov %vm13964_vm0  ;;  %v4174_v49 = vsel %vm12009_vm1, %v4126_v50, %v11936_v58  ;;  %v4128_v33 = vadd.s32 24, %v11971_v39  ;;  %vm3983_vm14 = vcmp.ne.s32.totalorder %v11999_v13, 0 }
 0x45e   : > { %4503 = vst.msk [vmem:[#allocation3 + $0x130] sm:$0xff] %vm13985_vm5, %v12021_v5  ;;  %vm13986_vm4 = vmmov %vm13964_vm0  ;;  %4689 = vrot.lane.b32.xlu0 %v4553_v31, %s8471_s8  ;;  %v4361_v56 = vsel %vm11931_vm10, %v3352_v4, 0.0  ;;  %v3355_v8 = vmax.f32 %v3307_v57, 0.0  ;;  %v3306_v38 = vadd.f32 %v11839_v32, %v3251_v16  ;;  %v3254_v2 = vmul.f32 %v11802_v26, %v8228_v41  ;;  %v4552_v36 = vld [vmem:[#allocation2 + $0x140] sm:$0xff]  ;;  %v3183_v1 = vpop.f32.mrf.mxu0  ;;  %v4802_v58 = vld [vmem:[#allocation2 + $0x9] sm:$0xff] }
 0x45f   : > { %4502 = vst.msk [vmem:[#allocation3 + $0x128] sm:$0xff] %vm13986_vm4, %v12023_v9  ;;  %vm13987_vm2 = vmmov %vm13964_vm0  ;;  %vm4031_vm0 = vcmp.lt.s32.totalorder %v11999_v13, 0  ;;  %vm12062_vm8 = vcmp.lt.s32.totalorder %v4171_v47, 16  ;;  %v4173_v43 = vsel %vm12033_vm6, %v4125_v18, %v11959_v3  ;;  %v4127_v35 = vadd.s32 24, %v11999_v13  ;;  %v12071_v22 = vld [vmem:[#allocation2 + $0x147] sm:$0xff]  ;;  %v12073_v44 = vld [vmem:[#allocation2 + $0x13f] sm:$0xff] }
 0x460   : > { %4410 = vst.msk [vmem:[#allocation2 + $0x168] sm:$0xff] %vm13987_vm2, %v4362_v10  ;;  %vm12057_vm7 = vmand %vm4032_vm3, %vm3984_vm9  ;;  %4687 = vrot.lane.b32.xlu1 %v4552_v36, %s8471_s8  ;;  %v4364_v25 = vsel %vm11952_vm11, %v3355_v8, 0.0  ;;  %v3354_v55 = vmax.f32 %v3306_v38, 0.0  ;;  %v3309_v42 = vadd.f32 %v11839_v32, %v3254_v2  ;;  %v3253_v34 = vmul.f32 %v11802_v26, %v3183_v1  ;;  %v8231_v50 = vpop.f32.mrf.mxu0  ;;  %v4807_v3 = vld [vmem:[#allocation2 + $0x31] sm:$0xff] }
 0x461   : > { %vm13990_vm15 = vmmov %vm13987_vm2  ;;  %vm12092_vm12 = vcmp.lt.s32.totalorder %v4174_v49, 16  ;;  %v4176_v12 = vsel %vm12057_vm7, %v4128_v33, %v11971_v39  ;;  %v3256_v48 = vmul.f32 %v11802_v26, %v8231_v50  ;;  %vm12105_vm3 = vcmp.lt.s32.totalorder %v4173_v43, 16  ;;  %v4809_v50 = vld [vmem:[#allocation2 + $0x41] sm:$0xff] }
 0x462   : > { %4409 = vst.msk [vmem:[#allocation2 + $0x160] sm:$0xff] %vm13990_vm15, %v4361_v56  ;;  %v4555_v52 = vld [vmem:[#allocation2 + $0x158] sm:$0xff]  ;;  %vm12083_vm10 = vmand %vm4031_vm0, %vm3983_vm14  ;;  %v4363_v59 = vsel %vm12062_vm8, %v3354_v55, 0.0  ;;  %v3357_v60 = vmax.f32 %v3309_v42, 0.0  ;;  %v3308_v6 = vadd.f32 %v11839_v32, %v3253_v34  ;;  %v3193_v47 = vpop.f32.mrf.mxu0  ;;  %v4806_v42 = vld [vmem:[#allocation2 + $0x29] sm:$0xff] }
 0x463   : > { %vm13995_vm13 = vmmov %vm13987_vm2  ;;  %4693 = vrot.lane.b32.xlu0 %v4555_v52, %s8471_s8  ;;  %v4554_v27 = vld [vmem:[#allocation2 + $0x150] sm:$0xff]  ;;  %v4175_v39 = vsel %vm12083_vm10, %v4127_v35, %v11999_v13  ;;  %v3311_v16 = vadd.f32 %v11839_v32, %v3256_v48  ;;  %v3255_v31 = vmul.f32 %v11802_v26, %v3193_v47  ;;  %v4805_v34 = vld [vmem:[#allocation2 + $0x21] sm:$0xff] }
 0x464   : > { %4505 = vst.msk [vmem:[#allocation3 + $0x140] sm:$0xff] %vm13995_vm13, %v12071_v22  ;;  %vm13996_vm1 = vmmov %vm13987_vm2  ;;  %4691 = vrot.lane.b32.xlu1 %v4554_v27, %s8471_s8  ;;  %v12113_v18 = vld [vmem:[#allocation2 + $0x157] sm:$0xff]  ;;  %v12115_v10 = vld [vmem:[#allocation2 + $0x14f] sm:$0xff]  ;;  %v4366_v4 = vsel %vm12092_vm12, %v3357_v60, 0.0  ;;  %v3356_v57 = vmax.f32 %v3308_v6, 0.0  ;;  %vm4224_vm2 = vcmp.lt.s32.totalorder %v4176_v12, 16 }
 0x465   : > { %4504 = vst.msk [vmem:[#allocation3 + $0x138] sm:$0xff] %vm13996_vm1, %v12073_v44  ;;  %vm13997_vm11 = vmmov %vm13996_vm1  ;;  %v3359_v41 = vmax.f32 %v3311_v16, 0.0  ;;  %v3310_v49 = vadd.f32 %v11839_v32, %v3255_v31  ;;  %vm4223_vm0 = vcmp.lt.s32.totalorder %v4175_v39, 16  ;;  %v4803_v55 = vld [vmem:[#allocation2 + $0x11] sm:$0xff]  ;;  %v4808_v52 = vld [vmem:[#allocation2 + $0x39] sm:$0xff]  ;;  %vm14013_vm12 = vcmask 130112  }
 0x466   : > { %4412 = vst.msk [vmem:[#allocation2 + $0x178] sm:$0xff] %vm13997_vm11, %v4364_v25  ;;  %vm14000_vm9 = vmmov %vm13996_vm1  ;;  %v4365_v13 = vsel %vm12105_vm3, %v3356_v57, 0.0  ;;  %v4804_v25 = vld [vmem:[#allocation2 + $0x19] sm:$0xff]  ;;  %v4814_v60 = vld [vmem:[#allocation2 + $0x69] sm:$0xff] }
 0x467   : > { %4411 = vst.msk [vmem:[#allocation2 + $0x170] sm:$0xff] %vm14000_vm9, %v4363_v59  ;;  %v4557_v53 = vld [vmem:[#allocation2 + $0x168] sm:$0xff]  ;;  %vm14003_vm6 = vmmov %vm13996_vm1  ;;  %v4368_v8 = vsel %vm4224_vm2, %v3359_v41, 0.0  ;;  %v3358_v38 = vmax.f32 %v3310_v49, 0.0  ;;  %v4812_v12 = vld [vmem:[#allocation2 + $0x59] sm:$0xff] }
 0x468   : > { %4507 = vst.msk [vmem:[#allocation3 + $0x150] sm:$0xff] %vm14003_vm6, %v12113_v18  ;;  %vm14004_vm5 = vmmov %vm13996_vm1  ;;  %4697 = vrot.lane.b32.xlu0 %v4557_v53, %s8471_s8  ;;  %v4811_v59 = vld [vmem:[#allocation2 + $0x51] sm:$0xff]  ;;  %v4813_v6 = vld [vmem:[#allocation2 + $0x61] sm:$0xff] }
 0x469   : > { %4506 = vst.msk [vmem:[#allocation3 + $0x148] sm:$0xff] %vm14004_vm5, %v12115_v10  ;;  %vm14005_vm4 = vmmov %vm13996_vm1  ;;  %v4556_v33 = vld [vmem:[#allocation2 + $0x160] sm:$0xff]  ;;  %v4367_v32 = vsel %vm4223_vm0, %v3358_v38, 0.0  ;;  %v4815_v47 = vld [vmem:[#allocation2 + $0x71] sm:$0xff] }
 0x46a   : > { %4414 = vst.msk [vmem:[#allocation2 + $0x188] sm:$0xff] %vm14005_vm4, %v4366_v4  ;;  %vm14006_vm14 = vmmov %vm13996_vm1  ;;  %4695 = vrot.lane.b32.xlu1 %v4556_v33, %s8471_s8  ;;  %v12132_v26 = vld [vmem:[#allocation2 + $0x167] sm:$0xff]  ;;  %v12134_v56 = vld [vmem:[#allocation2 + $0x15f] sm:$0xff] }
 0x46b   : > { %4413 = vst.msk [vmem:[#allocation2 + $0x180] sm:$0xff] %vm14006_vm14, %v4365_v13  ;;  %vm14007_vm7 = vmmov %vm13996_vm1  ;;  %v4816_v27 = vld [vmem:[#allocation2 + $0x79] sm:$0xff]  ;;  %v4818_v4 = vld [vmem:[#allocation2 + $0x89] sm:$0xff] }
 0x46c   : > { %4509 = vst.msk [vmem:[#allocation3 + $0x160] sm:$0xff] %vm14007_vm7, %v12132_v26  ;;  %vm14008_vm15 = vmmov %vm13996_vm1  ;;  %v4817_v16 = vld [vmem:[#allocation2 + $0x81] sm:$0xff]  ;;  %v4820_v53 = vld [vmem:[#allocation2 + $0x99] sm:$0xff] }
 0x46d   : > { %v4559_v2 = vld [vmem:[#allocation2 + $0x178] sm:$0xff]  ;;  %4508 = vst.msk [vmem:[#allocation3 + $0x158] sm:$0xff] %vm14008_vm15, %v12134_v56  ;;  %vm14009_vm8 = vmmov %vm13996_vm1  ;;  %v4822_v33 = vld [vmem:[#allocation2 + $0xa9] sm:$0xff] }
 0x46e   : > { %4416 = vst.msk [vmem:[#allocation2 + $0x198] sm:$0xff] %vm14009_vm8, %v4368_v8  ;;  %4701 = vrot.lane.b32.xlu0 %v4559_v2, %s8471_s8  ;;  %v4558_v36 = vld [vmem:[#allocation2 + $0x170] sm:$0xff]  ;;  %vm14010_vm10 = vmmov %vm13996_vm1  ;;  %v4821_v38 = vld [vmem:[#allocation2 + $0xa1] sm:$0xff] }
 0x46f   : > { %4415 = vst.msk [vmem:[#allocation2 + $0x190] sm:$0xff] %vm14010_vm10, %v4367_v32  ;;  %4699 = vrot.lane.b32.xlu1 %v4558_v36, %s8471_s8  ;;  %v12144_v62 = vld [vmem:[#allocation2 + $0x177] sm:$0xff]  ;;  %v12146_v1 = vld [vmem:[#allocation2 + $0x16f] sm:$0xff]  ;;  %vm14011_vm13 = vmmov %vm13996_vm1 }
 0x470   : > { %4511 = vst.msk [vmem:[#allocation3 + $0x170] sm:$0xff] %vm14011_vm13, %v12144_v62  ;;  %vm14012_vm11 = vmmov %vm13996_vm1  ;;  %v4819_v41 = vld [vmem:[#allocation2 + $0x91] sm:$0xff]  ;;  %v4824_v32 = vld [vmem:[#allocation2 + $0xb9] sm:$0xff] }
 0x471   : > { %4510 = vst.msk [vmem:[#allocation3 + $0x168] sm:$0xff] %vm13996_vm1, %v12146_v1  ;;  %vm14014_vm9 = vmmov %vm14013_vm12 }
 0x472   : > { %4898 = vrot.lane.b32.xlu0 %v4802_v58, %s8473_s10  ;;  %v4560_v43 = vld [vmem:[#allocation2 + $0x180] sm:$0xff]  ;;  %v4618_v48 = vpop.permute.xlu0 %4617  ;;  %vm14015_vm3 = vmmov %vm14014_vm9  ;;  %v4823_v58 = vld [vmem:[#allocation2 + $0xb1] sm:$0xff] }
 0x473   : > { %4703 = vrot.lane.b32.xlu1 %v4560_v43, %s8471_s8  ;;  %v12154_v35 = vld [vmem:[#allocation2 + $0x17f] sm:$0xff]  ;;  %4758 = vst.msk [vmem:[#allocation3 + $0x20] sm:$0xff] %vm14013_vm12, %v4618_v48  ;;  %v4616_v23 = vpop.permute.xlu1 %4615  ;;  %vm14016_vm6 = vmmov %vm14015_vm3  ;;  %s8482_s8 = smov 64  }
 0x474   : > { %4512 = vst.msk [vmem:[#allocation3 + $0x178] sm:$0xff] %vm14012_vm11, %v12154_v35  ;;  %vm14017_vm5 = vmmov %vm14015_vm3  ;;  %v4832_v48 = vld [vmem:[#allocation2 + $0xf9] sm:$0xff] }
 0x475   : > { %4757 = vst.msk [vmem:[#allocation3 + $0x18] sm:$0xff] %vm14014_vm9, %v4616_v23  ;;  %vm14018_vm4 = vmmov %vm14015_vm3  ;;  %v4831_v23 = vld [vmem:[#allocation2 + $0xf1] sm:$0xff] }
 0x476   : > { %4902 = vrot.lane.b32.xlu0 %v4804_v25, %s8473_s10  ;;  %vm14019_vm2 = vmmov %vm14015_vm3  ;;  %v4826_v25 = vld [vmem:[#allocation2 + $0xc9] sm:$0xff] }
 0x477   : > { %4900 = vrot.lane.b32.xlu1 %v4803_v55, %s8473_s10  ;;  %v4622_v39 = vpop.permute.xlu0 %4621  ;;  %vm14020_vm14 = vmmov %vm14019_vm2 }
 0x478   : > { %4760 = vst.msk [vmem:[#allocation3 + $0x30] sm:$0xff] %vm14015_vm3, %v4622_v39  ;;  %vm14021_vm0 = vmmov %vm14019_vm2  ;;  %v4834_v39 = vld [vmem:[#allocation2 + $0x109] sm:$0xff] }
 0x479   : > { %vm14022_vm7 = vmmov %vm14021_vm0 }
 0x47a   : > { %4906 = vrot.lane.b32.xlu0 %v4806_v42, %s8473_s10  ;;  %v4620_v57 = vpop.permute.xlu1 %4619  ;;  %vm14023_vm15 = vmmov %vm14021_vm0  ;;  %v4825_v42 = vld [vmem:[#allocation2 + $0xc1] sm:$0xff] }
 0x47b   : > { %4904 = vrot.lane.b32.xlu1 %v4805_v34, %s8473_s10  ;;  %4759 = vst.msk [vmem:[#allocation3 + $0x28] sm:$0xff] %vm14016_vm6, %v4620_v57  ;;  %v4626_v31 = vpop.permute.xlu0 %4625  ;;  %vm14024_vm8 = vmmov %vm14021_vm0  ;;  %v4833_v57 = vld [vmem:[#allocation2 + $0x101] sm:$0xff] }
 0x47c   : > { %4762 = vst.msk [vmem:[#allocation3 + $0x40] sm:$0xff] %vm14017_vm5, %v4626_v31  ;;  %vm14025_vm10 = vmmov %vm14021_vm0  ;;  %v4836_v31 = vld [vmem:[#allocation2 + $0x119] sm:$0xff] }
 0x47d   : > { %vm14026_vm13 = vmmov %vm14021_vm0 }
 0x47e   : > { %4910 = vrot.lane.b32.xlu0 %v4808_v52, %s8473_s10  ;;  %v4828_v52 = vld [vmem:[#allocation2 + $0xd9] sm:$0xff]  ;;  %vm14027_vm1 = vmmov %vm14021_vm0 }
 0x47f   : > { %4908 = vrot.lane.b32.xlu1 %v4807_v3, %s8473_s10  ;;  %vm14028_vm11 = vmmov %vm14021_vm0 }
 0x480   : > { %v4624_v13 = vpop.permute.xlu1 %4623  ;;  %vm14029_vm12 = vmmov %vm14021_vm0 }
 0x481   : > { %4761 = vst.msk [vmem:[#allocation3 + $0x38] sm:$0xff] %vm14018_vm4, %v4624_v13  ;;  %vm14030_vm9 = vmmov %vm14021_vm0  ;;  %v4835_v13 = vld [vmem:[#allocation2 + $0x111] sm:$0xff] }
 0x482   : > { %4914 = vrot.lane.b32.xlu0 %v4810_v54, %s8473_s10  ;;  %v4630_v49 = vpop.permute.xlu0 %4629  ;;  %v4827_v54 = vld [vmem:[#allocation2 + $0xd1] sm:$0xff]  ;;  %vm14031_vm3 = vmmov %vm14021_vm0 }
 0x483   : > { %4912 = vrot.lane.b32.xlu1 %v4809_v50, %s8473_s10  ;;  %4764 = vst.msk [vmem:[#allocation3 + $0x50] sm:$0xff] %vm14019_vm2, %v4630_v49  ;;  %vm14032_vm6 = vmmov %vm14021_vm0  ;;  %v4838_v49 = vld [vmem:[#allocation2 + $0x129] sm:$0xff] }
 0x484   : > { %v4628_v8 = vpop.permute.xlu1 %4627  ;;  %vm14033_vm5 = vmmov %vm14021_vm0 }
 0x485   : > { %4763 = vst.msk [vmem:[#allocation3 + $0x48] sm:$0xff] %vm14020_vm14, %v4628_v8  ;;  %vm14034_vm4 = vmmov %vm14021_vm0  ;;  %v4837_v8 = vld [vmem:[#allocation2 + $0x121] sm:$0xff] }
 0x486   : > { %4918 = vrot.lane.b32.xlu0 %v4812_v12, %s8473_s10  ;;  %v4830_v12 = vld [vmem:[#allocation2 + $0xe9] sm:$0xff]  ;;  %vm14035_vm2 = vmmov %vm14021_vm0 }
 0x487   : > { %4916 = vrot.lane.b32.xlu1 %v4811_v59, %s8473_s10  ;;  %vm14036_vm14 = vmmov %vm14021_vm0 }
 0x488   : > { %v4634_v2 = vpop.permute.xlu0 %4633 }
 0x489   : > { %4766 = vst.msk [vmem:[#allocation3 + $0x60] sm:$0xff] %vm14021_vm0, %v4634_v2  ;;  %v4840_v2 = vld [vmem:[#allocation2 + $0x139] sm:$0xff] }
 0x48a   : > { %4922 = vrot.lane.b32.xlu0 %v4814_v60, %s8473_s10  ;;  %v4829_v60 = vld [vmem:[#allocation2 + $0xe1] sm:$0xff] }
 0x48b   : > { %4920 = vrot.lane.b32.xlu1 %v4813_v6, %s8473_s10  ;;  %v4632_v36 = vpop.permute.xlu1 %4631 }
 0x48c   : > { %4765 = vst.msk [vmem:[#allocation3 + $0x58] sm:$0xff] %vm14022_vm7, %v4632_v36  ;;  %vm14037_vm7 = vmmov %vm14021_vm0  ;;  %v4839_v36 = vld [vmem:[#allocation2 + $0x131] sm:$0xff] }
 0x48e   : > { %4926 = vrot.lane.b32.xlu0 %v4816_v27, %s8473_s10  ;;  %v4638_v43 = vpop.permute.xlu0 %4637 }
 0x48f   : > { %4924 = vrot.lane.b32.xlu1 %v4815_v47, %s8473_s10  ;;  %4768 = vst.msk [vmem:[#allocation3 + $0x70] sm:$0xff] %vm14023_vm15, %v4638_v43  ;;  %v4636_v55 = vpop.permute.xlu1 %4635  ;;  %vm14038_vm15 = vmmov %vm14021_vm0  ;;  %v4842_v43 = vld [vmem:[#allocation2 + $0x149] sm:$0xff] }
 0x490   : > { %4767 = vst.msk [vmem:[#allocation3 + $0x68] sm:$0xff] %vm14024_vm8, %v4636_v55  ;;  %vm14039_vm8 = vmmov %vm14021_vm0  ;;  %v4841_v55 = vld [vmem:[#allocation2 + $0x141] sm:$0xff] }
 0x492   : > { %4930 = vrot.lane.b32.xlu0 %v4818_v4, %s8473_s10  ;;  %v4642_v34 = vpop.permute.xlu0 %4641 }
 0x493   : > { %4928 = vrot.lane.b32.xlu1 %v4817_v16, %s8473_s10  ;;  %4770 = vst.msk [vmem:[#allocation3 + $0x80] sm:$0xff] %vm14025_vm10, %v4642_v34  ;;  %vm14040_vm10 = vmmov %vm14021_vm0  ;;  %v4844_v34 = vld [vmem:[#allocation2 + $0x159] sm:$0xff] }
 0x494   : > { %v4640_v3 = vpop.permute.xlu1 %4639 }
 0x495   : > { %4769 = vst.msk [vmem:[#allocation3 + $0x78] sm:$0xff] %vm14026_vm13, %v4640_v3  ;;  %vm14041_vm13 = vmmov %vm14021_vm0  ;;  %v4843_v3 = vld [vmem:[#allocation2 + $0x151] sm:$0xff] }
 0x496   : > { %4934 = vrot.lane.b32.xlu0 %v4820_v53, %s8473_s10 }
 0x497   : > { %4932 = vrot.lane.b32.xlu1 %v4819_v41, %s8473_s10 }
 0x498   : > { %v4646_v50 = vpop.permute.xlu0 %4645 }
 0x499   : > { %4772 = vst.msk [vmem:[#allocation3 + $0x90] sm:$0xff] %vm14027_vm1, %v4646_v50  ;;  %vm14042_vm1 = vmmov %vm14021_vm0  ;;  %v4846_v50 = vld [vmem:[#allocation2 + $0x169] sm:$0xff] }
 0x49a   : > { %4938 = vrot.lane.b32.xlu0 %v4822_v33, %s8473_s10 }
 0x49b   : > { %4936 = vrot.lane.b32.xlu1 %v4821_v38, %s8473_s10  ;;  %v4644_v59 = vpop.permute.xlu1 %4643 }
 0x49c   : > { %4771 = vst.msk [vmem:[#allocation3 + $0x88] sm:$0xff] %vm14028_vm11, %v4644_v59  ;;  %vm14043_vm11 = vmmov %vm14021_vm0  ;;  %v4845_v59 = vld [vmem:[#allocation2 + $0x161] sm:$0xff] }
 0x49d   : > { %v4650_v6 = vpop.permute.xlu0 %4649 }
 0x49e   : > { %4942 = vrot.lane.b32.xlu0 %v4824_v32, %s8473_s10  ;;  %4774 = vst.msk [vmem:[#allocation3 + $0xa0] sm:$0xff] %vm14029_vm12, %v4650_v6  ;;  %vm14044_vm12 = vmmov %vm14021_vm0  ;;  %v4848_v6 = vld [vmem:[#allocation2 + $0x179] sm:$0xff] }
 0x49f   : > { %4940 = vrot.lane.b32.xlu1 %v4823_v58, %s8473_s10 }
 0x4a1   : > { %v4648_v27 = vpop.permute.xlu1 %4647  ;;  %v4654_v47 = vpop.permute.xlu0 %4653 }
 0x4a2   : > { %4946 = vrot.lane.b32.xlu0 %v4826_v25, %s8473_s10  ;;  %4773 = vst.msk [vmem:[#allocation3 + $0x98] sm:$0xff] %vm14030_vm9, %v4648_v27  ;;  %vm14045_vm9 = vmmov %vm14021_vm0  ;;  %v4847_v27 = vld [vmem:[#allocation2 + $0x171] sm:$0xff] }
 0x4a3   : > { %4944 = vrot.lane.b32.xlu1 %v4825_v42, %s8473_s10  ;;  %4776 = vst.msk [vmem:[#allocation3 + $0xb0] sm:$0xff] %vm14031_vm3, %v4654_v47  ;;  %vm14046_vm3 = vmmov %vm14021_vm0 }
 0x4a5   : > { %v4652_v4 = vpop.permute.xlu1 %4651 }
 0x4a6   : > { %4950 = vrot.lane.b32.xlu0 %v4828_v52, %s8473_s10  ;;  %4775 = vst.msk [vmem:[#allocation3 + $0xa8] sm:$0xff] %vm14032_vm6, %v4652_v4  ;;  %vm14048_vm6 = vmmov %vm14021_vm0  ;;  %v4849_v4 = vld [vmem:[#allocation2 + $0x181] sm:$0xff] }
 0x4a7   : > { %4948 = vrot.lane.b32.xlu1 %v4827_v54, %s8473_s10 }
 0x4aa   : > { %4954 = vrot.lane.b32.xlu0 %v4830_v12, %s8473_s10  ;;  %v4658_v16 = vpop.permute.xlu0 %4657 }
 0x4ab   : > { %4952 = vrot.lane.b32.xlu1 %v4829_v60, %s8473_s10  ;;  %4778 = vst.msk [vmem:[#allocation3 + $0xc0] sm:$0xff] %vm14033_vm5, %v4658_v16  ;;  %vm14049_vm5 = vmmov %vm14021_vm0 }
 0x4ad   : > { %v4656_v53 = vpop.permute.xlu1 %4655 }
 0x4ae   : > { %4958 = vrot.lane.b32.xlu0 %v4832_v48, %s8473_s10  ;;  %4777 = vst.msk [vmem:[#allocation3 + $0xb8] sm:$0xff] %vm14034_vm4, %v4656_v53  ;;  %vm14051_vm4 = vmmov %vm14021_vm0 }
 0x4af   : > { %4956 = vrot.lane.b32.xlu1 %v4831_v23, %s8473_s10 }
 0x4b0   : > { %v4662_v41 = vpop.permute.xlu0 %4661 }
 0x4b1   : > { %4780 = vst.msk [vmem:[#allocation3 + $0xd0] sm:$0xff] %vm14035_vm2, %v4662_v41  ;;  %v4660_v33 = vpop.permute.xlu1 %4659  ;;  %vm14053_vm2 = vmmov %vm14021_vm0 }
 0x4b2   : > { %4962 = vrot.lane.b32.xlu0 %v4834_v39, %s8473_s10  ;;  %4779 = vst.msk [vmem:[#allocation3 + $0xc8] sm:$0xff] %vm14036_vm14, %v4660_v33  ;;  %v14047_v39 = vld [vmem:[#allocation11_spill] sm:$0xff]  ;;  %vm14054_vm14 = vmmov %vm14021_vm0  ;;  %v14055_v33 = vld [vmem:[#allocation6_spill] sm:$0xff] }
 0x4b3   : > { %4960 = vrot.lane.b32.xlu1 %v4833_v57, %s8473_s10 }
 0x4b4   : > { %v4666_v38 = vpop.permute.xlu0 %4665 }
 0x4b5   : > { %4782 = vst.msk [vmem:[#allocation3 + $0xe0] sm:$0xff] %vm14021_vm0, %v4666_v38  ;;  %v4664_v32 = vpop.permute.xlu1 %4663 }
 0x4b6   : > { %4966 = vrot.lane.b32.xlu0 %v4836_v31, %s8473_s10  ;;  %4781 = vst.msk [vmem:[#allocation3 + $0xd8] sm:$0xff] %vm14037_vm7, %v4664_v32  ;;  %v14050_v31 = vld [vmem:[#allocation14_spill] sm:$0xff]  ;;  %vm14056_vm7 = vmmov %vm14021_vm0  ;;  %v14059_v32 = vld [vmem:[#allocation13_spill] sm:$0xff] }
 0x4b7   : > { %4964 = vrot.lane.b32.xlu1 %v4835_v13, %s8473_s10  ;;  %v14052_v13 = vld [vmem:[#allocation5_spill] sm:$0xff] }
 0x4b8   : > { %v4670_v58 = vpop.permute.xlu0 %4669 }
 0x4b9   : > { %4784 = vst.msk [vmem:[#allocation3 + $0xf0] sm:$0xff] %vm14038_vm15, %v4670_v58  ;;  %vm14057_vm15 = vmmov %vm14021_vm0  ;;  %v14062_v58 = vld [vmem:[#allocation7_spill] sm:$0xff] }
 0x4ba   : > { %4970 = vrot.lane.b32.xlu0 %v4838_v49, %s8473_s10  ;;  %v4668_v25 = vpop.permute.xlu1 %4667 }
 0x4bb   : > { %4968 = vrot.lane.b32.xlu1 %v4837_v8, %s8473_s10  ;;  %4783 = vst.msk [vmem:[#allocation3 + $0xe8] sm:$0xff] %vm14039_vm8, %v4668_v25  ;;  %vm5042_vm8 = vcmask 195712  }
 0x4be   : > { %4974 = vrot.lane.b32.xlu0 %v4840_v2, %s8473_s10  ;;  %v4674_v42 = vpop.permute.xlu0 %4673 }
 0x4bf   : > { %4972 = vrot.lane.b32.xlu1 %v4839_v36, %s8473_s10  ;;  %4786 = vst.msk [vmem:[#allocation3 + $0x100] sm:$0xff] %vm14040_vm10, %v4674_v42  ;;  %v4672_v52 = vpop.permute.xlu1 %4671  ;;  %vm14058_vm10 = vmmov %vm14021_vm0  ;;  %v14065_v42 = vld [vmem:[#allocation25_spill] sm:$0xff] }
 0x4c0   : > { %4785 = vst.msk [vmem:[#allocation3 + $0xf8] sm:$0xff] %vm14041_vm13, %v4672_v52  ;;  %vm14061_vm13 = vmmov %vm14021_vm0 }
 0x4c2   : > { %4978 = vrot.lane.b32.xlu0 %v4842_v43, %s8473_s10  ;;  %v4678_v54 = vpop.permute.xlu0 %4677 }
 0x4c3   : > { %4976 = vrot.lane.b32.xlu1 %v4841_v55, %s8473_s10  ;;  %4788 = vst.msk [vmem:[#allocation3 + $0x110] sm:$0xff] %vm14042_vm1, %v4678_v54  ;;  %v14064_v55 = vld [vmem:[#allocation36_spill] sm:$0xff]  ;;  %v14067_v54 = vld [vmem:[#allocation17_spill] sm:$0xff]  ;;  %vm5331_vm1 = vcmask 261312  }
 0x4c4   : > { %v4676_v12 = vpop.permute.xlu1 %4675 }
 0x4c5   : > { %4787 = vst.msk [vmem:[#allocation3 + $0x108] sm:$0xff] %vm14043_vm11, %v4676_v12  ;;  %vm5620_vm11 = vcmask 326912  }
 0x4c6   : > { %4982 = vrot.lane.b32.xlu0 %v4844_v34, %s8473_s10 }
 0x4c7   : > { %4980 = vrot.lane.b32.xlu1 %v4843_v3, %s8473_s10  ;;  %v4682_v60 = vpop.permute.xlu0 %4681  ;;  %v14066_v3 = vld [vmem:[#allocation15_spill] sm:$0xff] }
 0x4c8   : > { %4790 = vst.msk [vmem:[#allocation3 + $0x120] sm:$0xff] %vm14044_vm12, %v4682_v60  ;;  %vm5909_vm12 = vcmask 392512  }
 0x4ca   : > { %4986 = vrot.lane.b32.xlu0 %v4846_v50, %s8473_s10  ;;  %v4680_v48 = vpop.permute.xlu1 %4679 }
 0x4cb   : > { %4984 = vrot.lane.b32.xlu1 %v4845_v59, %s8473_s10  ;;  %4789 = vst.msk [vmem:[#allocation3 + $0x118] sm:$0xff] %vm14045_vm9, %v4680_v48  ;;  %v14068_v59 = vld [vmem:[#allocation38_spill] sm:$0xff]  ;;  %v14069_v48 = vld [vmem:[#allocation20_spill] sm:$0xff]  ;;  %vm6198_vm9 = vcmask 458112  }
 0x4cc   : > { %v4686_v23 = vpop.permute.xlu0 %4685 }
 0x4cd   : > { %4792 = vst.msk [vmem:[#allocation3 + $0x130] sm:$0xff] %vm14046_vm3, %v4686_v23  ;;  %vm6487_vm3 = vcmask 523712  }
 0x4ce   : > { %4990 = vrot.lane.b32.xlu0 %v4848_v6, %s8473_s10  ;;  %v4684_v47 = vpop.permute.xlu1 %4683 }
 0x4cf   : > { %4988 = vrot.lane.b32.xlu1 %v4847_v27, %s8473_s10  ;;  %4791 = vst.msk [vmem:[#allocation3 + $0x128] sm:$0xff] %vm14048_vm6, %v4684_v47  ;;  %vm6776_vm6 = vcmask 589312  }
 0x4d0   : > { %v4690_v57 = vpop.permute.xlu0 %4689 }
 0x4d1   : > { %4794 = vst.msk [vmem:[#allocation3 + $0x140] sm:$0xff] %vm14049_vm5, %v4690_v57  ;;  %vm6882_vm5 = vcmask 588800  }
 0x4d2   : > { %5187 = vrot.lane.b32.xlu0 %v14047_v39, %s8475_s12  ;;  %v4688_v16 = vpop.permute.xlu1 %4687 }
 0x4d3   : > { %4992 = vrot.lane.b32.xlu1 %v4849_v4, %s8473_s10  ;;  %4793 = vst.msk [vmem:[#allocation3 + $0x138] sm:$0xff] %vm14051_vm4, %v4688_v16  ;;  %vm7538_vm4 = vcmask 1046528  }
 0x4d5   : > { %v4694_v53 = vpop.permute.xlu0 %4693 }
 0x4d6   : > { %5191 = vrot.lane.b32.xlu0 %v14050_v31, %s8475_s12  ;;  %4796 = vst.msk [vmem:[#allocation3 + $0x150] sm:$0xff] %vm14053_vm2, %v4694_v53  ;;  %v4692_v41 = vpop.permute.xlu1 %4691  ;;  %v5382_v31 = vld [vmem:[#allocation2 + $0x30] sm:$0xff]  ;;  %vm14070_vm2 = vcmask 64512  }
 0x4d7   : > { %5189 = vrot.lane.b32.xlu1 %v14052_v13, %s8475_s12  ;;  %4795 = vst.msk [vmem:[#allocation3 + $0x148] sm:$0xff] %vm14054_vm14, %v4692_v41  ;;  %v5381_v13 = vld [vmem:[#allocation2 + $0x28] sm:$0xff]  ;;  %vm14071_vm14 = vmmov %vm14070_vm2 }
 0x4da   : > { %5195 = vrot.lane.b32.xlu0 %v11163_v14, %s8475_s12  ;;  %v4698_v49 = vpop.permute.xlu0 %4697 }
 0x4db   : > { %5193 = vrot.lane.b32.xlu1 %v14055_v33, %s8475_s12  ;;  %4798 = vst.msk [vmem:[#allocation3 + $0x160] sm:$0xff] %vm14021_vm0, %v4698_v49  ;;  %v5384_v49 = vld [vmem:[#allocation2 + $0x40] sm:$0xff]  ;;  %vm14072_vm0 = vmmov %vm14070_vm2 }
 0x4dc   : > { %v4696_v8 = vpop.permute.xlu1 %4695 }
 0x4dd   : > { %4797 = vst.msk [vmem:[#allocation3 + $0x158] sm:$0xff] %vm14056_vm7, %v4696_v8  ;;  %v5383_v8 = vld [vmem:[#allocation2 + $0x38] sm:$0xff]  ;;  %vm14073_vm7 = vmmov %vm14072_vm0 }
 0x4de   : > { %5199 = vrot.lane.b32.xlu0 %v11230_v45, %s8475_s12  ;;  %v14060_v45 = vld [vmem:[#allocation16_spill] sm:$0xff] }
 0x4df   : > { %5197 = vrot.lane.b32.xlu1 %v11161_v29, %s8475_s12 }
 0x4e0   : > { %v4702_v38 = vpop.permute.xlu0 %4701 }
 0x4e1   : > { %4800 = vst.msk [vmem:[#allocation3 + $0x170] sm:$0xff] %vm14057_vm15, %v4702_v38  ;;  %v4700_v14 = vpop.permute.xlu1 %4699  ;;  %vm14074_vm15 = vmmov %vm14072_vm0 }
 0x4e2   : > { %5203 = vrot.lane.b32.xlu0 %v11290_v17, %s8475_s12  ;;  %4799 = vst.msk [vmem:[#allocation3 + $0x168] sm:$0xff] %vm14058_vm10, %v4700_v14  ;;  %v14063_v17 = vld [vmem:[#allocation8_spill] sm:$0xff]  ;;  %v12392_v14 = vld [vmem:[#allocation2 + $0x50] sm:$0xff]  ;;  %vm14076_vm10 = vmmov %vm14072_vm0 }
 0x4e3   : > { %5201 = vrot.lane.b32.xlu1 %v14059_v32, %s8475_s12  ;;  %v12397_v32 = vld [vmem:[#allocation2 + $0x48] sm:$0xff] }
 0x4e4   : > { %v4899_v2 = vpop.permute.xlu0 %4898 }
 0x4e5   : > { %5043 = vst.msk [vmem:[#allocation3] sm:$0xff] %vm5042_vm8, %v4899_v2  ;;  %v4704_v36 = vpop.permute.xlu1 %4703 }
 0x4e6   : > { %5207 = vrot.lane.b32.xlu0 %v14060_v45, %s8475_s12  ;;  %4801 = vst.msk [vmem:[#allocation3 + $0x178] sm:$0xff] %vm14061_vm13, %v4704_v36  ;;  %v12402_v36 = vld [vmem:[#allocation2 + $0x60] sm:$0xff]  ;;  %vm14077_vm13 = vmmov %vm14072_vm0 }
 0x4e7   : > { %5205 = vrot.lane.b32.xlu1 %v14062_v58, %s8475_s12  ;;  %v12407_v58 = vld [vmem:[#allocation2 + $0x58] sm:$0xff] }
 0x4e8   : > { %v4903_v29 = vpop.permute.xlu0 %4902 }
 0x4e9   : > { %5045 = vst.msk [vmem:[#allocation3 + $0x10] sm:$0xff] %vm5042_vm8, %v4903_v29  ;;  %v4901_v43 = vpop.permute.xlu1 %4900 }
 0x4ea   : > { %5211 = vrot.lane.b32.xlu0 %v14063_v17, %s8475_s12  ;;  %5044 = vst.msk [vmem:[#allocation3 + $0x8] sm:$0xff] %vm5042_vm8, %v4901_v43  ;;  %v12412_v43 = vld [vmem:[#allocation2 + $0x70] sm:$0xff] }
 0x4eb   : > { %5209 = vrot.lane.b32.xlu1 %v14064_v55, %s8475_s12  ;;  %v12417_v55 = vld [vmem:[#allocation2 + $0x68] sm:$0xff] }
 0x4ec   : > { %v4907_v25 = vpop.permute.xlu0 %4906 }
 0x4ed   : > { %5047 = vst.msk [vmem:[#allocation3 + $0x20] sm:$0xff] %vm5042_vm8, %v4907_v25  ;;  %v4905_v34 = vpop.permute.xlu1 %4904 }
 0x4ee   : > { %5215 = vrot.lane.b32.xlu0 %v14065_v42, %s8475_s12  ;;  %5046 = vst.msk [vmem:[#allocation3 + $0x18] sm:$0xff] %vm5042_vm8, %v4905_v34  ;;  %v12422_v34 = vld [vmem:[#allocation2 + $0x80] sm:$0xff] }
 0x4ef   : > { %5213 = vrot.lane.b32.xlu1 %v14066_v3, %s8475_s12  ;;  %v12427_v3 = vld [vmem:[#allocation2 + $0x78] sm:$0xff] }
 0x4f0   : > { %v4911_v52 = vpop.permute.xlu0 %4910 }
 0x4f1   : > { %5049 = vst.msk [vmem:[#allocation3 + $0x30] sm:$0xff] %vm5042_vm8, %v4911_v52  ;;  %v4909_v50 = vpop.permute.xlu1 %4908 }
 0x4f2   : > { %5219 = vrot.lane.b32.xlu0 %v14067_v54, %s8475_s12  ;;  %5048 = vst.msk [vmem:[#allocation3 + $0x28] sm:$0xff] %vm5042_vm8, %v4909_v50  ;;  %v12432_v50 = vld [vmem:[#allocation2 + $0x90] sm:$0xff] }
 0x4f3   : > { %5217 = vrot.lane.b32.xlu1 %v14068_v59, %s8475_s12  ;;  %v12437_v59 = vld [vmem:[#allocation2 + $0x88] sm:$0xff] }
 0x4f4   : > { %v4915_v12 = vpop.permute.xlu0 %4914 }
 0x4f5   : > { %5051 = vst.msk [vmem:[#allocation3 + $0x40] sm:$0xff] %vm5042_vm8, %v4915_v12  ;;  %v4913_v60 = vpop.permute.xlu1 %4912 }
 0x4f6   : > { %5223 = vrot.lane.b32.xlu0 %v11598_v0, %s8475_s12  ;;  %5050 = vst.msk [vmem:[#allocation3 + $0x38] sm:$0xff] %vm5042_vm8, %v4913_v60 }
 0x4f7   : > { %5221 = vrot.lane.b32.xlu1 %v14069_v48, %s8475_s12 }
 0x4f8   : > { %v4919_v6 = vpop.permute.xlu0 %4918 }
 0x4f9   : > { %5053 = vst.msk [vmem:[#allocation3 + $0x50] sm:$0xff] %vm5042_vm8, %v4919_v6  ;;  %v4917_v27 = vpop.permute.xlu1 %4916  ;;  %v12442_v6 = vld [vmem:[#allocation2 + $0xa0] sm:$0xff] }
 0x4fa   : > { %5227 = vrot.lane.b32.xlu0 %v11651_v7, %s8475_s12  ;;  %5052 = vst.msk [vmem:[#allocation3 + $0x48] sm:$0xff] %vm5042_vm8, %v4917_v27  ;;  %v12447_v27 = vld [vmem:[#allocation2 + $0x98] sm:$0xff] }
 0x4fb   : > { %5225 = vrot.lane.b32.xlu1 %v11596_v11, %s8475_s12 }
 0x4fc   : > { %v4923_v23 = vpop.permute.xlu0 %4922 }
 0x4fd   : > { %5055 = vst.msk [vmem:[#allocation3 + $0x60] sm:$0xff] %vm5042_vm8, %v4923_v23  ;;  %v4921_v0 = vpop.permute.xlu1 %4920 }
 0x4fe   : > { %5231 = vrot.lane.b32.xlu0 %v11712_v19, %s8475_s12  ;;  %5054 = vst.msk [vmem:[#allocation3 + $0x58] sm:$0xff] %vm5042_vm8, %v4921_v0  ;;  %v12452_v0 = vld [vmem:[#allocation2 + $0xb0] sm:$0xff] }
 0x4ff   : > { %5229 = vrot.lane.b32.xlu1 %v11649_v28, %s8475_s12 }
 0x500   : > { %v4927_v47 = vpop.permute.xlu0 %4926 }
 0x501   : > { %5057 = vst.msk [vmem:[#allocation3 + $0x70] sm:$0xff] %vm5042_vm8, %v4927_v47  ;;  %v4925_v7 = vpop.permute.xlu1 %4924 }
 0x502   : > { %5235 = vrot.lane.b32.xlu0 %v11769_v37, %s8475_s12  ;;  %5056 = vst.msk [vmem:[#allocation3 + $0x68] sm:$0xff] %vm5042_vm8, %v4925_v7  ;;  %v12457_v7 = vld [vmem:[#allocation2 + $0xa8] sm:$0xff] }
 0x503   : > { %5233 = vrot.lane.b32.xlu1 %v11710_v40, %s8475_s12 }
 0x504   : > { %v4931_v11 = vpop.permute.xlu0 %4930 }
 0x505   : > { %5059 = vst.msk [vmem:[#allocation3 + $0x80] sm:$0xff] %vm5042_vm8, %v4931_v11  ;;  %v4929_v19 = vpop.permute.xlu1 %4928 }
 0x506   : > { %5239 = vrot.lane.b32.xlu0 %v11832_v46, %s8475_s12  ;;  %5058 = vst.msk [vmem:[#allocation3 + $0x78] sm:$0xff] %vm5042_vm8, %v4929_v19  ;;  %v12462_v19 = vld [vmem:[#allocation2 + $0xc0] sm:$0xff] }
 0x507   : > { %5237 = vrot.lane.b32.xlu1 %v11767_v20, %s8475_s12 }
 0x508   : > { %v4935_v28 = vpop.permute.xlu0 %4934 }
 0x509   : > { %5061 = vst.msk [vmem:[#allocation3 + $0x90] sm:$0xff] %vm5042_vm8, %v4935_v28  ;;  %v4933_v37 = vpop.permute.xlu1 %4932 }
 0x50a   : > { %5243 = vrot.lane.b32.xlu0 %v11902_v51, %s8475_s12  ;;  %5060 = vst.msk [vmem:[#allocation3 + $0x88] sm:$0xff] %vm5042_vm8, %v4933_v37  ;;  %v12467_v37 = vld [vmem:[#allocation2 + $0xb8] sm:$0xff] }
 0x50b   : > { %5241 = vrot.lane.b32.xlu1 %v11830_v63, %s8475_s12 }
 0x50c   : > { %v4939_v40 = vpop.permute.xlu0 %4938 }
 0x50d   : > { %5063 = vst.msk [vmem:[#allocation3 + $0xa0] sm:$0xff] %vm5042_vm8, %v4939_v40  ;;  %v4937_v46 = vpop.permute.xlu1 %4936 }
 0x50e   : > { %5247 = vrot.lane.b32.xlu0 %v11940_v61, %s8475_s12  ;;  %5062 = vst.msk [vmem:[#allocation3 + $0x98] sm:$0xff] %vm5042_vm8, %v4937_v46  ;;  %v12472_v46 = vld [vmem:[#allocation2 + $0xd0] sm:$0xff] }
 0x50f   : > { %5245 = vrot.lane.b32.xlu1 %v11900_v24, %s8475_s12 }
 0x510   : > { %v4943_v20 = vpop.permute.xlu0 %4942 }
 0x511   : > { %5065 = vst.msk [vmem:[#allocation3 + $0xb0] sm:$0xff] %vm5042_vm8, %v4943_v20  ;;  %v4941_v51 = vpop.permute.xlu1 %4940 }
 0x512   : > { %5251 = vrot.lane.b32.xlu0 %v11975_v15, %s8475_s12  ;;  %5064 = vst.msk [vmem:[#allocation3 + $0xa8] sm:$0xff] %vm5042_vm8, %v4941_v51  ;;  %v12477_v51 = vld [vmem:[#allocation2 + $0xc8] sm:$0xff] }
 0x513   : > { %5249 = vrot.lane.b32.xlu1 %v11938_v21, %s8475_s12 }
 0x514   : > { %v4947_v63 = vpop.permute.xlu0 %4946 }
 0x515   : > { %5067 = vst.msk [vmem:[#allocation3 + $0xc0] sm:$0xff] %vm5042_vm8, %v4947_v63  ;;  %v4945_v61 = vpop.permute.xlu1 %4944 }
 0x516   : > { %5255 = vrot.lane.b32.xlu0 %v12023_v9, %s8475_s12  ;;  %5066 = vst.msk [vmem:[#allocation3 + $0xb8] sm:$0xff] %vm5042_vm8, %v4945_v61  ;;  %v12482_v61 = vld [vmem:[#allocation2 + $0xe0] sm:$0xff] }
 0x517   : > { %5253 = vrot.lane.b32.xlu1 %v11973_v30, %s8475_s12 }
 0x518   : > { %v4951_v24 = vpop.permute.xlu0 %4950 }
 0x519   : > { %5069 = vst.msk [vmem:[#allocation3 + $0xd0] sm:$0xff] %vm5042_vm8, %v4951_v24  ;;  %v4949_v15 = vpop.permute.xlu1 %4948 }
 0x51a   : > { %5259 = vrot.lane.b32.xlu0 %v12073_v44, %s8475_s12  ;;  %5068 = vst.msk [vmem:[#allocation3 + $0xc8] sm:$0xff] %vm5042_vm8, %v4949_v15  ;;  %v12487_v15 = vld [vmem:[#allocation2 + $0xd8] sm:$0xff] }
 0x51b   : > { %5257 = vrot.lane.b32.xlu1 %v12021_v5, %s8475_s12 }
 0x51c   : > { %v4955_v21 = vpop.permute.xlu0 %4954 }
 0x51d   : > { %5071 = vst.msk [vmem:[#allocation3 + $0xe0] sm:$0xff] %vm5042_vm8, %v4955_v21  ;;  %v4953_v9 = vpop.permute.xlu1 %4952 }
 0x51e   : > { %5263 = vrot.lane.b32.xlu0 %v12115_v10, %s8475_s12  ;;  %5070 = vst.msk [vmem:[#allocation3 + $0xd8] sm:$0xff] %vm5042_vm8, %v4953_v9  ;;  %v12492_v9 = vld [vmem:[#allocation2 + $0xf0] sm:$0xff] }
 0x51f   : > { %5261 = vrot.lane.b32.xlu1 %v12071_v22, %s8475_s12 }
 0x520   : > { %v4959_v30 = vpop.permute.xlu0 %4958 }
 0x521   : > { %5073 = vst.msk [vmem:[#allocation3 + $0xf0] sm:$0xff] %vm5042_vm8, %v4959_v30  ;;  %v4957_v44 = vpop.permute.xlu1 %4956 }
 0x522   : > { %5267 = vrot.lane.b32.xlu0 %v12134_v56, %s8475_s12  ;;  %5072 = vst.msk [vmem:[#allocation3 + $0xe8] sm:$0xff] %vm5042_vm8, %v4957_v44  ;;  %v12497_v44 = vld [vmem:[#allocation2 + $0xe8] sm:$0xff] }
 0x523   : > { %5265 = vrot.lane.b32.xlu1 %v12113_v18, %s8475_s12 }
 0x524   : > { %v4963_v5 = vpop.permute.xlu0 %4962 }
 0x525   : > { %5075 = vst.msk [vmem:[#allocation3 + $0x100] sm:$0xff] %vm5042_vm8, %v4963_v5  ;;  %v4961_v10 = vpop.permute.xlu1 %4960 }
 0x526   : > { %5271 = vrot.lane.b32.xlu0 %v12146_v1, %s8475_s12  ;;  %5074 = vst.msk [vmem:[#allocation3 + $0xf8] sm:$0xff] %vm5042_vm8, %v4961_v10  ;;  %v5137_v1 = vld [vmem:[#allocation2 + $0x18f] sm:$0xff]  ;;  %v5408_v10 = vld [vmem:[#allocation2 + $0x100] sm:$0xff] }
 0x527   : > { %5269 = vrot.lane.b32.xlu1 %v12132_v26, %s8475_s12  ;;  %v5136_v26 = vld [vmem:[#allocation2 + $0x187] sm:$0xff] }
 0x528   : > { %v4967_v22 = vpop.permute.xlu0 %4966 }
 0x529   : > { %5077 = vst.msk [vmem:[#allocation3 + $0x110] sm:$0xff] %vm5042_vm8, %v4967_v22  ;;  %v4965_v56 = vpop.permute.xlu1 %4964 }
 0x52a   : > { %5275 = vrot.lane.b32.xlu0 %v12154_v35, %s8475_s12  ;;  %5076 = vst.msk [vmem:[#allocation3 + $0x108] sm:$0xff] %vm5042_vm8, %v4965_v56  ;;  %v5380_v35 = vld [vmem:[#allocation2 + $0x20] sm:$0xff]  ;;  %v12504_v56 = vld [vmem:[#allocation2 + $0xf8] sm:$0xff] }
 0x52b   : > { %5273 = vrot.lane.b32.xlu1 %v12144_v62, %s8475_s12  ;;  %v5138_v62 = vld [vmem:[#allocation2 + $0x197] sm:$0xff] }
 0x52c   : > { %v4971_v18 = vpop.permute.xlu0 %4970 }
 0x52d   : > { %5079 = vst.msk [vmem:[#allocation3 + $0x120] sm:$0xff] %vm5042_vm8, %v4971_v18  ;;  %v4969_v39 = vpop.permute.xlu1 %4968 }
 0x52e   : > { %5279 = vrot.lane.b32.xlu0 %v5137_v1, %s8475_s12  ;;  %5078 = vst.msk [vmem:[#allocation3 + $0x118] sm:$0xff] %vm5042_vm8, %v4969_v39  ;;  %v5410_v1 = vld [vmem:[#allocation2 + $0x110] sm:$0xff] }
 0x52f   : > { %5277 = vrot.lane.b32.xlu1 %v5136_v26, %s8475_s12  ;;  %v5409_v26 = vld [vmem:[#allocation2 + $0x108] sm:$0xff] }
 0x530   : > { %v4975_v4 = vpop.permute.xlu0 %4974 }
 0x531   : > { %5081 = vst.msk [vmem:[#allocation3 + $0x130] sm:$0xff] %vm5042_vm8, %v4975_v4  ;;  %v4973_v57 = vpop.permute.xlu1 %4972 }
 0x532   : > { %5476 = vrot.lane.b32.xlu0 %v5380_v35, %s8477_s26  ;;  %5080 = vst.msk [vmem:[#allocation3 + $0x128] sm:$0xff] %vm5042_vm8, %v4973_v57  ;;  %v5412_v35 = vld [vmem:[#allocation2 + $0x120] sm:$0xff] }
 0x533   : > { %5281 = vrot.lane.b32.xlu1 %v5138_v62, %s8475_s12  ;;  %v5411_v62 = vld [vmem:[#allocation2 + $0x118] sm:$0xff] }
 0x534   : > { %v4979_v16 = vpop.permute.xlu0 %4978 }
 0x535   : > { %5083 = vst.msk [vmem:[#allocation3 + $0x140] sm:$0xff] %vm5042_vm8, %v4979_v16  ;;  %v4977_v53 = vpop.permute.xlu1 %4976 }
 0x536   : > { %5480 = vrot.lane.b32.xlu0 %v5382_v31, %s8477_s26  ;;  %5082 = vst.msk [vmem:[#allocation3 + $0x138] sm:$0xff] %vm5042_vm8, %v4977_v53  ;;  %v5414_v31 = vld [vmem:[#allocation2 + $0x130] sm:$0xff] }
 0x537   : > { %5478 = vrot.lane.b32.xlu1 %v5381_v13, %s8477_s26  ;;  %v5413_v13 = vld [vmem:[#allocation2 + $0x128] sm:$0xff] }
 0x538   : > { %v4983_v41 = vpop.permute.xlu0 %4982 }
 0x539   : > { %5085 = vst.msk [vmem:[#allocation3 + $0x150] sm:$0xff] %vm5042_vm8, %v4983_v41  ;;  %v4981_v33 = vpop.permute.xlu1 %4980 }
 0x53a   : > { %5484 = vrot.lane.b32.xlu0 %v5384_v49, %s8477_s26  ;;  %5084 = vst.msk [vmem:[#allocation3 + $0x148] sm:$0xff] %vm5042_vm8, %v4981_v33  ;;  %v5416_v49 = vld [vmem:[#allocation2 + $0x140] sm:$0xff] }
 0x53b   : > { %5482 = vrot.lane.b32.xlu1 %v5383_v8, %s8477_s26  ;;  %v5415_v8 = vld [vmem:[#allocation2 + $0x138] sm:$0xff] }
 0x53c   : > { %v4987_v38 = vpop.permute.xlu0 %4986 }
 0x53d   : > { %5087 = vst.msk [vmem:[#allocation3 + $0x160] sm:$0xff] %vm5042_vm8, %v4987_v38  ;;  %v4985_v2 = vpop.permute.xlu1 %4984 }
 0x53e   : > { %5488 = vrot.lane.b32.xlu0 %v12392_v14, %s8477_s26  ;;  %5086 = vst.msk [vmem:[#allocation3 + $0x158] sm:$0xff] %vm5042_vm8, %v4985_v2  ;;  %v5418_v2 = vld [vmem:[#allocation2 + $0x150] sm:$0xff] }
 0x53f   : > { %5486 = vrot.lane.b32.xlu1 %v12397_v32, %s8477_s26 }
 0x540   : > { %v4991_v45 = vpop.permute.xlu0 %4990 }
 0x541   : > { %5089 = vst.msk [vmem:[#allocation3 + $0x170] sm:$0xff] %vm5042_vm8, %v4991_v45  ;;  %v4989_v29 = vpop.permute.xlu1 %4988 }
 0x542   : > { %5492 = vrot.lane.b32.xlu0 %v12402_v36, %s8477_s26  ;;  %5088 = vst.msk [vmem:[#allocation3 + $0x168] sm:$0xff] %vm5042_vm8, %v4989_v29  ;;  %v5417_v29 = vld [vmem:[#allocation2 + $0x148] sm:$0xff] }
 0x543   : > { %5490 = vrot.lane.b32.xlu1 %v12407_v58, %s8477_s26 }
 0x544   : > { %v5188_v17 = vpop.permute.xlu0 %5187 }
 0x545   : > { %5332 = vst.msk [vmem:[#allocation3] sm:$0xff] %vm5331_vm1, %v5188_v17  ;;  %v4993_v25 = vpop.permute.xlu1 %4992 }
 0x546   : > { %5496 = vrot.lane.b32.xlu0 %v12412_v43, %s8477_s26  ;;  %5090 = vst.msk [vmem:[#allocation3 + $0x178] sm:$0xff] %vm5042_vm8, %v4993_v25  ;;  %v5420_v25 = vld [vmem:[#allocation2 + $0x160] sm:$0xff]  ;;  %vm14075_vm8 = vmmov %vm14072_vm0 }
 0x547   : > { %5494 = vrot.lane.b32.xlu1 %v12417_v55, %s8477_s26 }
 0x548   : > { %v5192_v42 = vpop.permute.xlu0 %5191 }
 0x549   : > { %5334 = vst.msk [vmem:[#allocation3 + $0x10] sm:$0xff] %vm5331_vm1, %v5192_v42  ;;  %v5190_v52 = vpop.permute.xlu1 %5189 }
 0x54a   : > { %5500 = vrot.lane.b32.xlu0 %v12422_v34, %s8477_s26  ;;  %5333 = vst.msk [vmem:[#allocation3 + $0x8] sm:$0xff] %vm5331_vm1, %v5190_v52  ;;  %v5419_v52 = vld [vmem:[#allocation2 + $0x158] sm:$0xff] }
 0x54b   : > { %5498 = vrot.lane.b32.xlu1 %v12427_v3, %s8477_s26 }
 0x54c   : > { %v5196_v54 = vpop.permute.xlu0 %5195 }
 0x54d   : > { %5336 = vst.msk [vmem:[#allocation3 + $0x20] sm:$0xff] %vm5331_vm1, %v5196_v54  ;;  %v5194_v12 = vpop.permute.xlu1 %5193 }
 0x54e   : > { %5504 = vrot.lane.b32.xlu0 %v12432_v50, %s8477_s26  ;;  %5335 = vst.msk [vmem:[#allocation3 + $0x18] sm:$0xff] %vm5331_vm1, %v5194_v12  ;;  %v5422_v12 = vld [vmem:[#allocation2 + $0x170] sm:$0xff] }
 0x54f   : > { %5502 = vrot.lane.b32.xlu1 %v12437_v59, %s8477_s26 }
 0x550   : > { %v5200_v60 = vpop.permute.xlu0 %5199 }
 0x551   : > { %5338 = vst.msk [vmem:[#allocation3 + $0x30] sm:$0xff] %vm5331_vm1, %v5200_v60  ;;  %v5198_v48 = vpop.permute.xlu1 %5197 }
 0x552   : > { %5508 = vrot.lane.b32.xlu0 %v12442_v6, %s8477_s26  ;;  %5337 = vst.msk [vmem:[#allocation3 + $0x28] sm:$0xff] %vm5331_vm1, %v5198_v48  ;;  %v5421_v48 = vld [vmem:[#allocation2 + $0x168] sm:$0xff] }
 0x553   : > { %5506 = vrot.lane.b32.xlu1 %v12447_v27, %s8477_s26 }
 0x554   : > { %v5204_v23 = vpop.permute.xlu0 %5203 }
 0x555   : > { %5340 = vst.msk [vmem:[#allocation3 + $0x40] sm:$0xff] %vm5331_vm1, %v5204_v23  ;;  %v5202_v47 = vpop.permute.xlu1 %5201 }
 0x556   : > { %5512 = vrot.lane.b32.xlu0 %v12452_v0, %s8477_s26  ;;  %5339 = vst.msk [vmem:[#allocation3 + $0x38] sm:$0xff] %vm5331_vm1, %v5202_v47  ;;  %v5424_v47 = vld [vmem:[#allocation2 + $0x180] sm:$0xff] }
 0x557   : > { %5510 = vrot.lane.b32.xlu1 %v12457_v7, %s8477_s26 }
 0x558   : > { %v5208_v11 = vpop.permute.xlu0 %5207 }
 0x559   : > { %5342 = vst.msk [vmem:[#allocation3 + $0x50] sm:$0xff] %vm5331_vm1, %v5208_v11  ;;  %v5206_v28 = vpop.permute.xlu1 %5205 }
 0x55a   : > { %5516 = vrot.lane.b32.xlu0 %v12462_v19, %s8477_s26  ;;  %5341 = vst.msk [vmem:[#allocation3 + $0x48] sm:$0xff] %vm5331_vm1, %v5206_v28  ;;  %v5423_v28 = vld [vmem:[#allocation2 + $0x178] sm:$0xff] }
 0x55b   : > { %5514 = vrot.lane.b32.xlu1 %v12467_v37, %s8477_s26 }
 0x55c   : > { %v5212_v40 = vpop.permute.xlu0 %5211 }
 0x55d   : > { %5344 = vst.msk [vmem:[#allocation3 + $0x60] sm:$0xff] %vm5331_vm1, %v5212_v40  ;;  %v5210_v20 = vpop.permute.xlu1 %5209 }
 0x55e   : > { %5520 = vrot.lane.b32.xlu0 %v12472_v46, %s8477_s26  ;;  %5343 = vst.msk [vmem:[#allocation3 + $0x58] sm:$0xff] %vm5331_vm1, %v5210_v20  ;;  %v5426_v20 = vld [vmem:[#allocation2 + $0x190] sm:$0xff] }
 0x55f   : > { %5518 = vrot.lane.b32.xlu1 %v12477_v51, %s8477_s26 }
 0x560   : > { %v5216_v63 = vpop.permute.xlu0 %5215 }
 0x561   : > { %5346 = vst.msk [vmem:[#allocation3 + $0x70] sm:$0xff] %vm5331_vm1, %v5216_v63  ;;  %v5214_v24 = vpop.permute.xlu1 %5213 }
 0x562   : > { %5524 = vrot.lane.b32.xlu0 %v12482_v61, %s8477_s26  ;;  %5345 = vst.msk [vmem:[#allocation3 + $0x68] sm:$0xff] %vm5331_vm1, %v5214_v24  ;;  %v5425_v24 = vld [vmem:[#allocation2 + $0x188] sm:$0xff] }
 0x563   : > { %5522 = vrot.lane.b32.xlu1 %v12487_v15, %s8477_s26 }
 0x564   : > { %v5220_v21 = vpop.permute.xlu0 %5219 }
 0x565   : > { %5348 = vst.msk [vmem:[#allocation3 + $0x80] sm:$0xff] %vm5331_vm1, %v5220_v21  ;;  %v5218_v30 = vpop.permute.xlu1 %5217  ;;  %v6881_v21 = vld [vmem:[%s13406_s4 + $0x40] sm:$0xff] }
 0x566   : > { %5528 = vrot.lane.b32.xlu0 %v12492_v9, %s8477_s26  ;;  %5347 = vst.msk [vmem:[#allocation3 + $0x78] sm:$0xff] %vm5331_vm1, %v5218_v30  ;;  %8322 = vmatprep.subr.mxu1 %v6881_v21 }
 0x567   : > { %5526 = vrot.lane.b32.xlu1 %v12497_v44, %s8477_s26  ;;  %8331 = vmatpush3.msra.mxu1 %v6881_v21 }
 0x568   : > { %v5224_v5 = vpop.permute.xlu0 %5223  ;;  %8232 = vmatprep.subr.mxu0 %v6881_v21 }
 0x569   : > { %5350 = vst.msk [vmem:[#allocation3 + $0x90] sm:$0xff] %vm5331_vm1, %v5224_v5  ;;  %v5222_v22 = vpop.permute.xlu1 %5221  ;;  %v5669_v5 = vld [vmem:[#allocation2 + $0x21] sm:$0xff]  ;;  %8233 = vmatpush3.msra.mxu0 %v6881_v21 }
 0x56a   : > { %5532 = vrot.lane.b32.xlu0 %v5408_v10, %s8477_s26  ;;  %5349 = vst.msk [vmem:[#allocation3 + $0x88] sm:$0xff] %vm5331_vm1, %v5222_v22  ;;  %v6880_v10 = vld [vmem:[%s13406_s4 + $0x38] sm:$0xff]  ;;  %v5964_v21 = vld [vmem:[#allocation2 + $0x67] sm:$0xff] }
 0x56b   : > { %5530 = vrot.lane.b32.xlu1 %v12504_v56, %s8477_s26  ;;  %8323 = vmatprep.subr.mxu1 %v6880_v10 }
 0x56c   : > { %v5228_v18 = vpop.permute.xlu0 %5227  ;;  %8332 = vmatpush3.msra.mxu1 %v6880_v10  ;;  %8234 = vmatprep.subr.mxu0 %v6880_v10 }
 0x56d   : > { %5352 = vst.msk [vmem:[#allocation3 + $0xa0] sm:$0xff] %vm5331_vm1, %v5228_v18  ;;  %v5226_v39 = vpop.permute.xlu1 %5225  ;;  %v5427_v18 = vld [vmem:[#allocation2 + $0x198] sm:$0xff]  ;;  %8235 = vmatpush3.msra.mxu0 %v6880_v10  ;;  %v5965_v10 = vld [vmem:[#allocation2 + $0x6f] sm:$0xff] }
 0x56e   : > { %5536 = vrot.lane.b32.xlu0 %v5410_v1, %s8477_s26  ;;  %5351 = vst.msk [vmem:[#allocation3 + $0x98] sm:$0xff] %vm5331_vm1, %v5226_v39  ;;  %v6879_v1 = vld [vmem:[%s13406_s4 + $0x30] sm:$0xff] }
 0x56f   : > { %5534 = vrot.lane.b32.xlu1 %v5409_v26, %s8477_s26  ;;  %8324 = vmatprep.subr.mxu1 %v6879_v1  ;;  %v5671_v26 = vld [vmem:[#allocation2 + $0x31] sm:$0xff] }
 0x570   : > { %v5232_v4 = vpop.permute.xlu0 %5231  ;;  %8333 = vmatpush3.msra.mxu1 %v6879_v1  ;;  %8236 = vmatprep.subr.mxu0 %v6879_v1 }
 0x571   : > { %5354 = vst.msk [vmem:[#allocation3 + $0xb0] sm:$0xff] %vm5331_vm1, %v5232_v4  ;;  %v5230_v57 = vpop.permute.xlu1 %5229  ;;  %v6878_v4 = vld [vmem:[%s13406_s4 + $0x28] sm:$0xff]  ;;  %8237 = vmatpush3.msra.mxu0 %v6879_v1 }
 0x572   : > { %5540 = vrot.lane.b32.xlu0 %v5412_v35, %s8477_s26  ;;  %5353 = vst.msk [vmem:[#allocation3 + $0xa8] sm:$0xff] %vm5331_vm1, %v5230_v57  ;;  %8325 = vmatprep.subr.mxu1 %v6878_v4  ;;  %v5670_v57 = vld [vmem:[#allocation2 + $0x29] sm:$0xff] }
 0x573   : > { %5538 = vrot.lane.b32.xlu1 %v5411_v62, %s8477_s26  ;;  %8334 = vmatpush3.msra.mxu1 %v6878_v4  ;;  %v6877_v62 = vld [vmem:[%s13406_s4 + $0x20] sm:$0xff] }
 0x574   : > { %v5236_v16 = vpop.permute.xlu0 %5235  ;;  %8326 = vmatprep.subr.mxu1 %v6877_v62  ;;  %8238 = vmatprep.subr.mxu0 %v6878_v4 }
 0x575   : > { %5356 = vst.msk [vmem:[#allocation3 + $0xc0] sm:$0xff] %vm5331_vm1, %v5236_v16  ;;  %v5234_v53 = vpop.permute.xlu1 %5233  ;;  %8335 = vmatpush3.msra.mxu1 %v6877_v62  ;;  %8239 = vmatpush3.msra.mxu0 %v6878_v4 }
 0x576   : > { %5544 = vrot.lane.b32.xlu0 %v5414_v31, %s8477_s26  ;;  %5355 = vst.msk [vmem:[#allocation3 + $0xb8] sm:$0xff] %vm5331_vm1, %v5234_v53  ;;  %v5960_v31 = vld [vmem:[#allocation2 + $0x47] sm:$0xff]  ;;  %v6876_v53 = vld [vmem:[%s13406_s4 + $0x18] sm:$0xff]  ;;  %8240 = vmatprep.subr.mxu0 %v6877_v62 }
 0x577   : > { %5542 = vrot.lane.b32.xlu1 %v5413_v13, %s8477_s26  ;;  %8327 = vmatprep.subr.mxu1 %v6876_v53 }
 0x578   : > { %v5240_v41 = vpop.permute.xlu0 %5239  ;;  %8336 = vmatpush3.msra.mxu1 %v6876_v53  ;;  %8241 = vmatpush3.msra.mxu0 %v6877_v62 }
 0x579   : > { %5358 = vst.msk [vmem:[#allocation3 + $0xd0] sm:$0xff] %vm5331_vm1, %v5240_v41  ;;  %v5238_v33 = vpop.permute.xlu1 %5237  ;;  %v5672_v41 = vld [vmem:[#allocation2 + $0x39] sm:$0xff]  ;;  %8242 = vmatprep.subr.mxu0 %v6876_v53 }
 0x57a   : > { %5548 = vrot.lane.b32.xlu0 %v5416_v49, %s8477_s26  ;;  %5357 = vst.msk [vmem:[#allocation3 + $0xc8] sm:$0xff] %vm5331_vm1, %v5238_v33  ;;  %v6875_v49 = vld [vmem:[%s13406_s4 + $0x10] sm:$0xff]  ;;  %8243 = vmatpush3.msra.mxu0 %v6876_v53  ;;  %v6544_v53 = vld [vmem:[#allocation2 + $0x79] sm:$0xff] }
 0x57b   : > { %5546 = vrot.lane.b32.xlu1 %v5415_v8, %s8477_s26  ;;  %8328 = vmatprep.subr.mxu1 %v6875_v49  ;;  %v6874_v8 = vld [vmem:[%s13406_s4 + $0x8] sm:$0xff] }
 0x57c   : > { %v5244_v38 = vpop.permute.xlu0 %5243  ;;  %8337 = vmatpush3.msra.mxu1 %v6875_v49  ;;  %8244 = vmatprep.subr.mxu0 %v6875_v49 }
 0x57d   : > { %5360 = vst.msk [vmem:[#allocation3 + $0xe0] sm:$0xff] %vm5331_vm1, %v5244_v38  ;;  %v5242_v45 = vpop.permute.xlu1 %5241  ;;  %8329 = vmatprep.subr.mxu1 %v6874_v8  ;;  %8245 = vmatpush3.msra.mxu0 %v6875_v49 }
 0x57e   : > { %5552 = vrot.lane.b32.xlu0 %v5418_v2, %s8477_s26  ;;  %5359 = vst.msk [vmem:[#allocation3 + $0xd8] sm:$0xff] %vm5331_vm1, %v5242_v45  ;;  %v5961_v2 = vld [vmem:[#allocation2 + $0x4f] sm:$0xff]  ;;  %8338 = vmatpush3.msra.mxu1 %v6874_v8  ;;  %v6873_v45 = vld [vmem:[%s13406_s4] sm:$0xff] }
 0x57f   : > { %5550 = vrot.lane.b32.xlu1 %v5417_v29, %s8477_s26  ;;  %8330 = vmatprep.subr.mxu1 %v6873_v45 }
 0x580   : > { %v5248_v17 = vpop.permute.xlu0 %5247  ;;  %8339 = vmatpush3.msra.mxu1 %v6873_v45  ;;  %8246 = vmatprep.subr.mxu0 %v6874_v8 }
 0x581   : > { %5362 = vst.msk [vmem:[#allocation3 + $0xf0] sm:$0xff] %vm5331_vm1, %v5248_v17  ;;  %v5246_v42 = vpop.permute.xlu1 %5245  ;;  %v6538_v17 = vld [vmem:[#allocation2 + $0x49] sm:$0xff]  ;;  %8247 = vmatpush3.msra.mxu0 %v6874_v8 }
 0x582   : > { %5556 = vrot.lane.b32.xlu0 %v5420_v25, %s8477_s26  ;;  %5361 = vst.msk [vmem:[#allocation3 + $0xe8] sm:$0xff] %vm5331_vm1, %v5246_v42  ;;  %v6539_v42 = vld [vmem:[#allocation2 + $0x51] sm:$0xff]  ;;  %8248 = vmatprep.subr.mxu0 %v6873_v45  ;;  %v5968_v8 = vld [vmem:[#allocation2 + $0x87] sm:$0xff] }
 0x583   : > { %5554 = vrot.lane.b32.xlu1 %v5419_v52, %s8477_s26  ;;  %8249 = vmatpush3.msra.mxu0 %v6873_v45  ;;  %v5969_v45 = vld [vmem:[#allocation2 + $0x8f] sm:$0xff] }
 0x584   : > { %v5252_v54 = vpop.permute.xlu0 %5251 }
 0x585   : > { %5364 = vst.msk [vmem:[#allocation3 + $0x100] sm:$0xff] %vm5331_vm1, %v5252_v54  ;;  %v5250_v60 = vpop.permute.xlu1 %5249  ;;  %v5673_v54 = vld [vmem:[#allocation2 + $0x41] sm:$0xff] }
 0x586   : > { %5560 = vrot.lane.b32.xlu0 %v5422_v12, %s8477_s26  ;;  %5363 = vst.msk [vmem:[#allocation3 + $0xf8] sm:$0xff] %vm5331_vm1, %v5250_v60 }
 0x587   : > { %5558 = vrot.lane.b32.xlu1 %v5421_v48, %s8477_s26 }
 0x588   : > { %v5256_v23 = vpop.permute.xlu0 %5255 }
 0x589   : > { %5366 = vst.msk [vmem:[#allocation3 + $0x110] sm:$0xff] %vm5331_vm1, %v5256_v23  ;;  %v5254_v11 = vpop.permute.xlu1 %5253 }
 0x58a   : > { %5564 = vrot.lane.b32.xlu0 %v5424_v47, %s8477_s26  ;;  %5365 = vst.msk [vmem:[#allocation3 + $0x108] sm:$0xff] %vm5331_vm1, %v5254_v11  ;;  %v5963_v47 = vld [vmem:[#allocation2 + $0x5f] sm:$0xff] }
 0x58b   : > { %5562 = vrot.lane.b32.xlu1 %v5423_v28, %s8477_s26  ;;  %v6540_v28 = vld [vmem:[#allocation2 + $0x59] sm:$0xff] }
 0x58c   : > { %v5260_v40 = vpop.permute.xlu0 %5259 }
 0x58d   : > { %5368 = vst.msk [vmem:[#allocation3 + $0x120] sm:$0xff] %vm5331_vm1, %v5260_v40  ;;  %v5258_v63 = vpop.permute.xlu1 %5257 }
 0x58e   : > { %5568 = vrot.lane.b32.xlu0 %v5426_v20, %s8477_s26  ;;  %5367 = vst.msk [vmem:[#allocation3 + $0x118] sm:$0xff] %vm5331_vm1, %v5258_v63 }
 0x58f   : > { %5566 = vrot.lane.b32.xlu1 %v5425_v24, %s8477_s26 }
 0x590   : > { %v5264_v30 = vpop.permute.xlu0 %5263 }
 0x591   : > { %5370 = vst.msk [vmem:[#allocation3 + $0x130] sm:$0xff] %vm5331_vm1, %v5264_v30  ;;  %v5262_v22 = vpop.permute.xlu1 %5261 }
 0x592   : > { %5765 = vrot.lane.b32.xlu0 %v5669_v5, %s8479_s16  ;;  %5369 = vst.msk [vmem:[#allocation3 + $0x128] sm:$0xff] %vm5331_vm1, %v5262_v22 }
 0x593   : > { %5570 = vrot.lane.b32.xlu1 %v5427_v18, %s8477_s26  ;;  %v6542_v18 = vld [vmem:[#allocation2 + $0x69] sm:$0xff]  ;;  %s276_s26 = scalar_lea.vmem %s13409_s7, %s7936_s21 }
 0x594   : > { %v5268_v39 = vpop.permute.xlu0 %5267 }
 0x595   : > { %5372 = vst.msk [vmem:[#allocation3 + $0x140] sm:$0xff] %vm5331_vm1, %v5268_v39  ;;  %v5266_v35 = vpop.permute.xlu1 %5265 }
 0x596   : > { %5769 = vrot.lane.b32.xlu0 %v5671_v26, %s8479_s16  ;;  %5371 = vst.msk [vmem:[#allocation3 + $0x138] sm:$0xff] %vm5331_vm1, %v5266_v35  ;;  %v5966_v35 = vld [vmem:[#allocation2 + $0x77] sm:$0xff] }
 0x597   : > { %5767 = vrot.lane.b32.xlu1 %v5670_v57, %s8479_s16 }
 0x598   : > { %v5272_v16 = vpop.permute.xlu0 %5271 }
 0x599   : > { %5374 = vst.msk [vmem:[#allocation3 + $0x150] sm:$0xff] %vm5331_vm1, %v5272_v16  ;;  %v5270_v13 = vpop.permute.xlu1 %5269  ;;  %v5967_v16 = vld [vmem:[#allocation2 + $0x7f] sm:$0xff] }
 0x59a   : > { %6058 = vrot.lane.b32.xlu0 %v5960_v31, %s8480_s27  ;;  %5373 = vst.msk [vmem:[#allocation3 + $0x148] sm:$0xff] %vm5331_vm1, %v5270_v13 }
 0x59b   : > { %5771 = vrot.lane.b32.xlu1 %v5672_v41, %s8479_s16 }
 0x59c   : > { %v5276_v33 = vpop.permute.xlu0 %5275 }
 0x59d   : > { %5376 = vst.msk [vmem:[#allocation3 + $0x160] sm:$0xff] %vm5331_vm1, %v5276_v33  ;;  %v5274_v38 = vpop.permute.xlu1 %5273 }
 0x59e   : > { %6347 = vrot.lane.b32.xlu0 %v12397_v32, %s8481_s11  ;;  %5375 = vst.msk [vmem:[#allocation3 + $0x158] sm:$0xff] %vm5331_vm1, %v5274_v38 }
 0x59f   : > { %6060 = vrot.lane.b32.xlu1 %v5961_v2, %s8480_s27 }
 0x5a0   : > { %v5280_v29 = vpop.permute.xlu0 %5279 }
 0x5a1   : > { %5378 = vst.msk [vmem:[#allocation3 + $0x170] sm:$0xff] %vm5331_vm1, %v5280_v29  ;;  %v5278_v32 = vpop.permute.xlu1 %5277 }
 0x5a2   : > { %6636 = vrot.lane.b32.xlu0 %v6538_v17, %s8482_s8  ;;  %5377 = vst.msk [vmem:[#allocation3 + $0x168] sm:$0xff] %vm5331_vm1, %v5278_v32 }
 0x5a3   : > { %6349 = vrot.lane.b32.xlu1 %v12392_v14, %s8481_s11  ;;  %v5962_v14 = vld [vmem:[#allocation2 + $0x57] sm:$0xff] }
 0x5a4   : > { %v5477_v25 = vpop.permute.xlu0 %5476 }
 0x5a5   : > { %5621 = vst.msk [vmem:[#allocation3] sm:$0xff] %vm5620_vm11, %v5477_v25  ;;  %v5282_v52 = vpop.permute.xlu1 %5281 }
 0x5a6   : > { %6638 = vrot.lane.b32.xlu0 %v6539_v42, %s8482_s8  ;;  %5379 = vst.msk [vmem:[#allocation3 + $0x178] sm:$0xff] %vm5331_vm1, %v5282_v52  ;;  %vm14078_vm1 = vmmov %vm14072_vm0 }
 0x5a7   : > { %5773 = vrot.lane.b32.xlu1 %v5673_v54, %s8479_s16  ;;  %v5970_v54 = vld [vmem:[#allocation2 + $0x97] sm:$0xff] }
 0x5a8   : > { %v5481_v12 = vpop.permute.xlu0 %5480 }
 0x5a9   : > { %5623 = vst.msk [vmem:[#allocation3 + $0x10] sm:$0xff] %vm5620_vm11, %v5481_v12  ;;  %v5479_v60 = vpop.permute.xlu1 %5478 }
 0x5aa   : > { %6062 = vrot.lane.b32.xlu0 %v5962_v14, %s8480_s27  ;;  %5622 = vst.msk [vmem:[#allocation3 + $0x8] sm:$0xff] %vm5620_vm11, %v5479_v60  ;;  %v5971_v60 = vld [vmem:[#allocation2 + $0x9f] sm:$0xff] }
 0x5ab   : > { %5775 = vrot.lane.b32.xlu1 %v6538_v17, %s8479_s16  ;;  %v6546_v17 = vld [vmem:[#allocation2 + $0x89] sm:$0xff] }
 0x5ac   : > { %v5485_v48 = vpop.permute.xlu0 %5484 }
 0x5ad   : > { %5625 = vst.msk [vmem:[#allocation3 + $0x20] sm:$0xff] %vm5620_vm11, %v5485_v48  ;;  %v5483_v23 = vpop.permute.xlu1 %5482 }
 0x5ae   : > { %6351 = vrot.lane.b32.xlu0 %v12407_v58, %s8481_s11  ;;  %5624 = vst.msk [vmem:[#allocation3 + $0x18] sm:$0xff] %vm5620_vm11, %v5483_v23  ;;  %v6541_v58 = vld [vmem:[#allocation2 + $0x61] sm:$0xff]  ;;  %v6548_v23 = vld [vmem:[#allocation2 + $0x99] sm:$0xff] }
 0x5af   : > { %6064 = vrot.lane.b32.xlu1 %v5963_v47, %s8480_s27 }
 0x5b0   : > { %v5489_v11 = vpop.permute.xlu0 %5488 }
 0x5b1   : > { %5627 = vst.msk [vmem:[#allocation3 + $0x30] sm:$0xff] %vm5620_vm11, %v5489_v11  ;;  %v5487_v40 = vpop.permute.xlu1 %5486 }
 0x5b2   : > { %6640 = vrot.lane.b32.xlu0 %v6540_v28, %s8482_s8  ;;  %5626 = vst.msk [vmem:[#allocation3 + $0x28] sm:$0xff] %vm5620_vm11, %v5487_v40 }
 0x5b3   : > { %6353 = vrot.lane.b32.xlu1 %v12402_v36, %s8481_s11 }
 0x5b4   : > { %v5493_v20 = vpop.permute.xlu0 %5492 }
 0x5b5   : > { %5629 = vst.msk [vmem:[#allocation3 + $0x40] sm:$0xff] %vm5620_vm11, %v5493_v20  ;;  %v5491_v63 = vpop.permute.xlu1 %5490  ;;  %v5972_v20 = vld [vmem:[#allocation2 + $0xa7] sm:$0xff] }
 0x5b6   : > { %6642 = vrot.lane.b32.xlu0 %v6541_v58, %s8482_s8  ;;  %5628 = vst.msk [vmem:[#allocation3 + $0x38] sm:$0xff] %vm5620_vm11, %v5491_v63 }
 0x5b7   : > { %5777 = vrot.lane.b32.xlu1 %v6539_v42, %s8479_s16 }
 0x5b8   : > { %v5497_v24 = vpop.permute.xlu0 %5496 }
 0x5b9   : > { %5631 = vst.msk [vmem:[#allocation3 + $0x50] sm:$0xff] %vm5620_vm11, %v5497_v24  ;;  %v5495_v30 = vpop.permute.xlu1 %5494  ;;  %v5973_v24 = vld [vmem:[#allocation2 + $0xaf] sm:$0xff] }
 0x5ba   : > { %6066 = vrot.lane.b32.xlu0 %v5964_v21, %s8480_s27  ;;  %5630 = vst.msk [vmem:[#allocation3 + $0x48] sm:$0xff] %vm5620_vm11, %v5495_v30  ;;  %v6550_v30 = vld [vmem:[#allocation2 + $0xa9] sm:$0xff] }
 0x5bb   : > { %5779 = vrot.lane.b32.xlu1 %v6540_v28, %s8479_s16 }
 0x5bc   : > { %v5501_v36 = vpop.permute.xlu0 %5500 }
 0x5bd   : > { %5633 = vst.msk [vmem:[#allocation3 + $0x60] sm:$0xff] %vm5620_vm11, %v5501_v36  ;;  %v5499_v5 = vpop.permute.xlu1 %5498 }
 0x5be   : > { %6355 = vrot.lane.b32.xlu0 %v12417_v55, %s8481_s11  ;;  %5632 = vst.msk [vmem:[#allocation3 + $0x58] sm:$0xff] %vm5620_vm11, %v5499_v5  ;;  %v6543_v55 = vld [vmem:[#allocation2 + $0x71] sm:$0xff] }
 0x5bf   : > { %6068 = vrot.lane.b32.xlu1 %v5965_v10, %s8480_s27 }
 0x5c0   : > { %v5505_v22 = vpop.permute.xlu0 %5504 }
 0x5c1   : > { %5635 = vst.msk [vmem:[#allocation3 + $0x70] sm:$0xff] %vm5620_vm11, %v5505_v22  ;;  %v5503_v1 = vpop.permute.xlu1 %5502 }
 0x5c2   : > { %6644 = vrot.lane.b32.xlu0 %v6542_v18, %s8482_s8  ;;  %5634 = vst.msk [vmem:[#allocation3 + $0x68] sm:$0xff] %vm5620_vm11, %v5503_v1 }
 0x5c3   : > { %6357 = vrot.lane.b32.xlu1 %v12412_v43, %s8481_s11 }
 0x5c4   : > { %v5509_v39 = vpop.permute.xlu0 %5508 }
 0x5c5   : > { %5637 = vst.msk [vmem:[#allocation3 + $0x80] sm:$0xff] %vm5620_vm11, %v5509_v39  ;;  %v5507_v26 = vpop.permute.xlu1 %5506 }
 0x5c6   : > { %6646 = vrot.lane.b32.xlu0 %v6543_v55, %s8482_s8  ;;  %5636 = vst.msk [vmem:[#allocation3 + $0x78] sm:$0xff] %vm5620_vm11, %v5507_v26 }
 0x5c7   : > { %5781 = vrot.lane.b32.xlu1 %v6541_v58, %s8479_s16 }
 0x5c8   : > { %v5513_v4 = vpop.permute.xlu0 %5512 }
 0x5c9   : > { %5639 = vst.msk [vmem:[#allocation3 + $0x90] sm:$0xff] %vm5620_vm11, %v5513_v4  ;;  %v5511_v57 = vpop.permute.xlu1 %5510  ;;  %v6552_v4 = vld [vmem:[#allocation2 + $0xb9] sm:$0xff] }
 0x5ca   : > { %6070 = vrot.lane.b32.xlu0 %v5966_v35, %s8480_s27  ;;  %5638 = vst.msk [vmem:[#allocation3 + $0x88] sm:$0xff] %vm5620_vm11, %v5511_v57  ;;  %v6553_v57 = vld [vmem:[#allocation2 + $0xc1] sm:$0xff] }
 0x5cb   : > { %5783 = vrot.lane.b32.xlu1 %v6542_v18, %s8479_s16  ;;  %v5974_v18 = vld [vmem:[#allocation2 + $0xb7] sm:$0xff] }
 0x5cc   : > { %v5517_v43 = vpop.permute.xlu0 %5516 }
 0x5cd   : > { %5641 = vst.msk [vmem:[#allocation3 + $0xa0] sm:$0xff] %vm5620_vm11, %v5517_v43  ;;  %v5515_v62 = vpop.permute.xlu1 %5514 }
 0x5ce   : > { %6359 = vrot.lane.b32.xlu0 %v12427_v3, %s8481_s11  ;;  %5640 = vst.msk [vmem:[#allocation3 + $0x98] sm:$0xff] %vm5620_vm11, %v5515_v62  ;;  %v6545_v3 = vld [vmem:[#allocation2 + $0x81] sm:$0xff] }
 0x5cf   : > { %6072 = vrot.lane.b32.xlu1 %v5967_v16, %s8480_s27  ;;  %v5976_v16 = vld [vmem:[#allocation2 + $0xc7] sm:$0xff] }
 0x5d0   : > { %v5521_v31 = vpop.permute.xlu0 %5520 }
 0x5d1   : > { %5643 = vst.msk [vmem:[#allocation3 + $0xb0] sm:$0xff] %vm5620_vm11, %v5521_v31  ;;  %v5519_v13 = vpop.permute.xlu1 %5518 }
 0x5d2   : > { %6648 = vrot.lane.b32.xlu0 %v6544_v53, %s8482_s8  ;;  %5642 = vst.msk [vmem:[#allocation3 + $0xa8] sm:$0xff] %vm5620_vm11, %v5519_v13 }
 0x5d3   : > { %6361 = vrot.lane.b32.xlu1 %v12422_v34, %s8481_s11 }
 0x5d4   : > { %v5525_v41 = vpop.permute.xlu0 %5524 }
 0x5d5   : > { %5645 = vst.msk [vmem:[#allocation3 + $0xc0] sm:$0xff] %vm5620_vm11, %v5525_v41  ;;  %v5523_v49 = vpop.permute.xlu1 %5522  ;;  %v5977_v41 = vld [vmem:[#allocation2 + $0xcf] sm:$0xff] }
 0x5d6   : > { %6650 = vrot.lane.b32.xlu0 %v6545_v3, %s8482_s8  ;;  %5644 = vst.msk [vmem:[#allocation3 + $0xb8] sm:$0xff] %vm5620_vm11, %v5523_v49 }
 0x5d7   : > { %5785 = vrot.lane.b32.xlu1 %v6543_v55, %s8479_s16  ;;  %v5975_v55 = vld [vmem:[#allocation2 + $0xbf] sm:$0xff] }
 0x5d8   : > { %v5529_v33 = vpop.permute.xlu0 %5528 }
 0x5d9   : > { %5647 = vst.msk [vmem:[#allocation3 + $0xd0] sm:$0xff] %vm5620_vm11, %v5529_v33  ;;  %v5527_v38 = vpop.permute.xlu1 %5526  ;;  %v6554_v33 = vld [vmem:[#allocation2 + $0xc9] sm:$0xff] }
 0x5da   : > { %6074 = vrot.lane.b32.xlu0 %v5968_v8, %s8480_s27  ;;  %5646 = vst.msk [vmem:[#allocation3 + $0xc8] sm:$0xff] %vm5620_vm11, %v5527_v38  ;;  %v6555_v38 = vld [vmem:[#allocation2 + $0xd1] sm:$0xff] }
 0x5db   : > { %5787 = vrot.lane.b32.xlu1 %v6544_v53, %s8479_s16 }
 0x5dc   : > { %v5533_v34 = vpop.permute.xlu0 %5532 }
 0x5dd   : > { %5649 = vst.msk [vmem:[#allocation3 + $0xe0] sm:$0xff] %vm5620_vm11, %v5533_v34  ;;  %v5531_v2 = vpop.permute.xlu1 %5530 }
 0x5de   : > { %6363 = vrot.lane.b32.xlu0 %v12437_v59, %s8481_s11  ;;  %5648 = vst.msk [vmem:[#allocation3 + $0xd8] sm:$0xff] %vm5620_vm11, %v5531_v2  ;;  %v6547_v59 = vld [vmem:[#allocation2 + $0x91] sm:$0xff] }
 0x5df   : > { %6076 = vrot.lane.b32.xlu1 %v5969_v45, %s8480_s27  ;;  %v5978_v45 = vld [vmem:[#allocation2 + $0xd7] sm:$0xff] }
 0x5e0   : > { %v5537_v29 = vpop.permute.xlu0 %5536 }
 0x5e1   : > { %5651 = vst.msk [vmem:[#allocation3 + $0xf0] sm:$0xff] %vm5620_vm11, %v5537_v29  ;;  %v5535_v32 = vpop.permute.xlu1 %5534 }
 0x5e2   : > { %6652 = vrot.lane.b32.xlu0 %v6546_v17, %s8482_s8  ;;  %5650 = vst.msk [vmem:[#allocation3 + $0xe8] sm:$0xff] %vm5620_vm11, %v5535_v32 }
 0x5e3   : > { %6365 = vrot.lane.b32.xlu1 %v12432_v50, %s8481_s11 }
 0x5e4   : > { %v5541_v25 = vpop.permute.xlu0 %5540 }
 0x5e5   : > { %5653 = vst.msk [vmem:[#allocation3 + $0x100] sm:$0xff] %vm5620_vm11, %v5541_v25  ;;  %v5539_v42 = vpop.permute.xlu1 %5538  ;;  %v5979_v25 = vld [vmem:[#allocation2 + $0xdf] sm:$0xff] }
 0x5e6   : > { %6654 = vrot.lane.b32.xlu0 %v6547_v59, %s8482_s8  ;;  %5652 = vst.msk [vmem:[#allocation3 + $0xf8] sm:$0xff] %vm5620_vm11, %v5539_v42 }
 0x5e7   : > { %5789 = vrot.lane.b32.xlu1 %v6545_v3, %s8479_s16 }
 0x5e8   : > { %v5545_v52 = vpop.permute.xlu0 %5544 }
 0x5e9   : > { %5655 = vst.msk [vmem:[#allocation3 + $0x110] sm:$0xff] %vm5620_vm11, %v5545_v52  ;;  %v5543_v12 = vpop.permute.xlu1 %5542  ;;  %v6556_v52 = vld [vmem:[#allocation2 + $0xd9] sm:$0xff] }
 0x5ea   : > { %6078 = vrot.lane.b32.xlu0 %v5970_v54, %s8480_s27  ;;  %5654 = vst.msk [vmem:[#allocation3 + $0x108] sm:$0xff] %vm5620_vm11, %v5543_v12  ;;  %v6557_v12 = vld [vmem:[#allocation2 + $0xe1] sm:$0xff] }
 0x5eb   : > { %5791 = vrot.lane.b32.xlu1 %v6546_v17, %s8479_s16 }
 0x5ec   : > { %v5549_v50 = vpop.permute.xlu0 %5548 }
 0x5ed   : > { %5657 = vst.msk [vmem:[#allocation3 + $0x120] sm:$0xff] %vm5620_vm11, %v5549_v50  ;;  %v5547_v14 = vpop.permute.xlu1 %5546 }
 0x5ee   : > { %6367 = vrot.lane.b32.xlu0 %v12447_v27, %s8481_s11  ;;  %5656 = vst.msk [vmem:[#allocation3 + $0x118] sm:$0xff] %vm5620_vm11, %v5547_v14  ;;  %v6549_v27 = vld [vmem:[#allocation2 + $0xa1] sm:$0xff] }
 0x5ef   : > { %6080 = vrot.lane.b32.xlu1 %v5971_v60, %s8480_s27  ;;  %v5980_v60 = vld [vmem:[#allocation2 + $0xe7] sm:$0xff] }
 0x5f0   : > { %v5553_v48 = vpop.permute.xlu0 %5552 }
 0x5f1   : > { %5659 = vst.msk [vmem:[#allocation3 + $0x130] sm:$0xff] %vm5620_vm11, %v5553_v48  ;;  %v5551_v47 = vpop.permute.xlu1 %5550 }
 0x5f2   : > { %6656 = vrot.lane.b32.xlu0 %v6548_v23, %s8482_s8  ;;  %5658 = vst.msk [vmem:[#allocation3 + $0x128] sm:$0xff] %vm5620_vm11, %v5551_v47 }
 0x5f3   : > { %6369 = vrot.lane.b32.xlu1 %v12442_v6, %s8481_s11 }
 0x5f4   : > { %v5557_v11 = vpop.permute.xlu0 %5556 }
 0x5f5   : > { %5661 = vst.msk [vmem:[#allocation3 + $0x140] sm:$0xff] %vm5620_vm11, %v5557_v11  ;;  %v5555_v28 = vpop.permute.xlu1 %5554  ;;  %v5981_v11 = vld [vmem:[#allocation2 + $0xef] sm:$0xff] }
 0x5f6   : > { %6658 = vrot.lane.b32.xlu0 %v6549_v27, %s8482_s8  ;;  %5660 = vst.msk [vmem:[#allocation3 + $0x138] sm:$0xff] %vm5620_vm11, %v5555_v28 }
 0x5f7   : > { %5793 = vrot.lane.b32.xlu1 %v6547_v59, %s8479_s16 }
 0x5f8   : > { %v5561_v40 = vpop.permute.xlu0 %5560 }
 0x5f9   : > { %5663 = vst.msk [vmem:[#allocation3 + $0x150] sm:$0xff] %vm5620_vm11, %v5561_v40  ;;  %v5559_v58 = vpop.permute.xlu1 %5558  ;;  %v6558_v40 = vld [vmem:[#allocation2 + $0xe9] sm:$0xff] }
 0x5fa   : > { %6082 = vrot.lane.b32.xlu0 %v5972_v20, %s8480_s27  ;;  %5662 = vst.msk [vmem:[#allocation3 + $0x148] sm:$0xff] %vm5620_vm11, %v5559_v58  ;;  %v6559_v58 = vld [vmem:[#allocation2 + $0xf1] sm:$0xff] }
 0x5fb   : > { %5795 = vrot.lane.b32.xlu1 %v6548_v23, %s8479_s16 }
 0x5fc   : > { %v5565_v6 = vpop.permute.xlu0 %5564 }
 0x5fd   : > { %5665 = vst.msk [vmem:[#allocation3 + $0x160] sm:$0xff] %vm5620_vm11, %v5565_v6  ;;  %v5563_v63 = vpop.permute.xlu1 %5562 }
 0x5fe   : > { %6371 = vrot.lane.b32.xlu0 %v12457_v7, %s8481_s11  ;;  %5664 = vst.msk [vmem:[#allocation3 + $0x158] sm:$0xff] %vm5620_vm11, %v5563_v63  ;;  %v6551_v7 = vld [vmem:[#allocation2 + $0xb1] sm:$0xff] }
 0x5ff   : > { %6084 = vrot.lane.b32.xlu1 %v5973_v24, %s8480_s27  ;;  %v5982_v24 = vld [vmem:[#allocation2 + $0xf7] sm:$0xff] }
 0x600   : > { %v5569_v21 = vpop.permute.xlu0 %5568 }
 0x601   : > { %5667 = vst.msk [vmem:[#allocation3 + $0x170] sm:$0xff] %vm5620_vm11, %v5569_v21  ;;  %v5567_v36 = vpop.permute.xlu1 %5566 }
 0x602   : > { %6660 = vrot.lane.b32.xlu0 %v6550_v30, %s8482_s8  ;;  %5666 = vst.msk [vmem:[#allocation3 + $0x168] sm:$0xff] %vm5620_vm11, %v5567_v36 }
 0x603   : > { %6373 = vrot.lane.b32.xlu1 %v12452_v0, %s8481_s11 }
 0x604   : > { %v5766_v5 = vpop.permute.xlu0 %5765 }
 0x605   : > { %5910 = vst.msk [vmem:[#allocation3] sm:$0xff] %vm5909_vm12, %v5766_v5  ;;  %v5571_v10 = vpop.permute.xlu1 %5570  ;;  %v5983_v5 = vld [vmem:[#allocation2 + $0xff] sm:$0xff] }
 0x606   : > { %6662 = vrot.lane.b32.xlu0 %v6551_v7, %s8482_s8  ;;  %5668 = vst.msk [vmem:[#allocation3 + $0x178] sm:$0xff] %vm5620_vm11, %v5571_v10  ;;  %vm14079_vm11 = vmmov %vm14072_vm0 }
 0x607   : > { %5797 = vrot.lane.b32.xlu1 %v6549_v27, %s8479_s16 }
 0x608   : > { %v5770_v22 = vpop.permute.xlu0 %5769 }
 0x609   : > { %5912 = vst.msk [vmem:[#allocation3 + $0x10] sm:$0xff] %vm5909_vm12, %v5770_v22  ;;  %v5768_v1 = vpop.permute.xlu1 %5767  ;;  %v6560_v22 = vld [vmem:[#allocation2 + $0xf9] sm:$0xff] }
 0x60a   : > { %6086 = vrot.lane.b32.xlu0 %v5974_v18, %s8480_s27  ;;  %5911 = vst.msk [vmem:[#allocation3 + $0x8] sm:$0xff] %vm5909_vm12, %v5768_v1  ;;  %v6272_v1 = vld [vmem:[#allocation2 + $0x100] sm:$0xff] }
 0x60b   : > { %5799 = vrot.lane.b32.xlu1 %v6550_v30, %s8479_s16 }
 0x60c   : > { %v6059_v0 = vpop.permute.xlu0 %6058 }
 0x60d   : > { %6201 = vst.msk [vmem:[#allocation3 + $0x10] sm:$0xff] %vm6198_vm9, %v6059_v0  ;;  %v5772_v39 = vpop.permute.xlu1 %5771  ;;  %v6561_v0 = vld [vmem:[#allocation2 + $0x101] sm:$0xff] }
 0x60e   : > { %6375 = vrot.lane.b32.xlu0 %v12467_v37, %s8481_s11  ;;  %5913 = vst.msk [vmem:[#allocation3 + $0x18] sm:$0xff] %vm5909_vm12, %v5772_v39 }
 0x60f   : > { %6088 = vrot.lane.b32.xlu1 %v5975_v55, %s8480_s27 }
 0x610   : > { %v6348_v26 = vpop.permute.xlu0 %6347 }
 0x611   : > { %6490 = vst.msk [vmem:[#allocation3 + $0x10] sm:$0xff] %vm6487_vm3, %v6348_v26  ;;  %v6061_v35 = vpop.permute.xlu1 %6060  ;;  %v5984_v26 = vld [vmem:[#allocation2 + $0x107] sm:$0xff] }
 0x612   : > { %6664 = vrot.lane.b32.xlu0 %v6552_v4, %s8482_s8  ;;  %6202 = vst.msk [vmem:[#allocation3 + $0x18] sm:$0xff] %vm6198_vm9, %v6061_v35 }
 0x613   : > { %6377 = vrot.lane.b32.xlu1 %v12462_v19, %s8481_s11 }
 0x614   : > { %v6637_v37 = vpop.permute.xlu0 %6636 }
 0x615   : > { %6779 = vst.msk [vmem:[#allocation3 + $0x10] sm:$0xff] %vm6776_vm6, %v6637_v37  ;;  %v6350_v43 = vpop.permute.xlu1 %6349 }
 0x616   : > { %6666 = vrot.lane.b32.xlu0 %v6553_v57, %s8482_s8  ;;  %6491 = vst.msk [vmem:[#allocation3 + $0x18] sm:$0xff] %vm6487_vm3, %v6350_v43 }
 0x617   : > { %5801 = vrot.lane.b32.xlu1 %v6551_v7, %s8479_s16 }
 0x618   : > { %v6639_v62 = vpop.permute.xlu0 %6638 }
 0x619   : > { %6780 = vst.msk [vmem:[#allocation3 + $0x18] sm:$0xff] %vm6776_vm6, %v6639_v62  ;;  %v5774_v31 = vpop.permute.xlu1 %5773  ;;  %v5985_v62 = vld [vmem:[#allocation2 + $0x10f] sm:$0xff] }
 0x61a   : > { %6090 = vrot.lane.b32.xlu0 %v5976_v16, %s8480_s27  ;;  %5914 = vst.msk [vmem:[#allocation3 + $0x20] sm:$0xff] %vm5909_vm12, %v5774_v31 }
 0x61b   : > { %5803 = vrot.lane.b32.xlu1 %v6552_v4, %s8479_s16 }
 0x61c   : > { %v6063_v19 = vpop.permute.xlu0 %6062  ;;  %v6827_v53 = vld [vmem:[#allocation3 + $0x10] sm:$0xff] }
 0x61d   : > { %6203 = vst.msk [vmem:[#allocation3 + $0x20] sm:$0xff] %vm6198_vm9, %v6063_v19  ;;  %8253 = vmatprep.mubr.msk.f32.mxu1 %vm6882_vm5, %v6827_v53  ;;  %v5776_v13 = vpop.permute.xlu1 %5775  ;;  %v6562_v19 = vld [vmem:[#allocation2 + $0x109] sm:$0xff] }
 0x61e   : > { %6379 = vrot.lane.b32.xlu0 %v12477_v51, %s8481_s11  ;;  %5915 = vst.msk [vmem:[#allocation3 + $0x28] sm:$0xff] %vm5909_vm12, %v5776_v13  ;;  %v6274_v13 = vld [vmem:[#allocation2 + $0x110] sm:$0xff] }
 0x61f   : > { %6092 = vrot.lane.b32.xlu1 %v5977_v41, %s8480_s27 }
 0x620   : > { %v6352_v3 = vpop.permute.xlu0 %6351  ;;  %v6828_v49 = vld [vmem:[#allocation3 + $0x18] sm:$0xff] }
 0x621   : > { %6492 = vst.msk [vmem:[#allocation3 + $0x20] sm:$0xff] %vm6487_vm3, %v6352_v3  ;;  %8254 = vmatmul.mubr.msk.f32.vlgmr.msra.gmra.mxu1 %vm6882_vm5, %v6828_v49  ;;  %v6065_v8 = vpop.permute.xlu1 %6064  ;;  %v6563_v3 = vld [vmem:[#allocation2 + $0x111] sm:$0xff] }
 0x622   : > { %6668 = vrot.lane.b32.xlu0 %v6554_v33, %s8482_s8  ;;  %6204 = vst.msk [vmem:[#allocation3 + $0x28] sm:$0xff] %vm6198_vm9, %v6065_v8  ;;  %v5986_v8 = vld [vmem:[#allocation2 + $0x117] sm:$0xff] }
 0x623   : > { %6381 = vrot.lane.b32.xlu1 %v12472_v46, %s8481_s11 }
 0x624   : > { %v6641_v51 = vpop.permute.xlu0 %6640 }
 0x625   : > { %6781 = vst.msk [vmem:[#allocation3 + $0x20] sm:$0xff] %vm6776_vm6, %v6641_v51  ;;  %v6354_v34 = vpop.permute.xlu1 %6353 }
 0x626   : > { %6670 = vrot.lane.b32.xlu0 %v6555_v38, %s8482_s8  ;;  %6493 = vst.msk [vmem:[#allocation3 + $0x28] sm:$0xff] %vm6487_vm3, %v6354_v34 }
 0x627   : > { %5805 = vrot.lane.b32.xlu1 %v6553_v57, %s8479_s16  ;;  %v6273_v57 = vld [vmem:[#allocation2 + $0x108] sm:$0xff] }
 0x628   : > { %v6643_v2 = vpop.permute.xlu0 %6642 }
 0x629   : > { %6782 = vst.msk [vmem:[#allocation3 + $0x28] sm:$0xff] %vm6776_vm6, %v6643_v2  ;;  %v5778_v29 = vpop.permute.xlu1 %5777  ;;  %v6275_v2 = vld [vmem:[#allocation2 + $0x118] sm:$0xff] }
 0x62a   : > { %6094 = vrot.lane.b32.xlu0 %v5978_v45, %s8480_s27  ;;  %5916 = vst.msk [vmem:[#allocation3 + $0x30] sm:$0xff] %vm5909_vm12, %v5778_v29  ;;  %v5987_v29 = vld [vmem:[#allocation2 + $0x11f] sm:$0xff] }
 0x62b   : > { %5807 = vrot.lane.b32.xlu1 %v6554_v33, %s8479_s16 }
 0x62c   : > { %v6067_v46 = vpop.permute.xlu0 %6066  ;;  %v6829_v17 = vld [vmem:[#allocation3 + $0x20] sm:$0xff] }
 0x62d   : > { %6205 = vst.msk [vmem:[#allocation3 + $0x30] sm:$0xff] %vm6198_vm9, %v6067_v46  ;;  %8256 = vmatprep.mubr.msk.f32.mxu1 %vm6882_vm5, %v6829_v17  ;;  %v5780_v32 = vpop.permute.xlu1 %5779 }
 0x62e   : > { %6383 = vrot.lane.b32.xlu0 %v12487_v15, %s8481_s11  ;;  %5917 = vst.msk [vmem:[#allocation3 + $0x38] sm:$0xff] %vm5909_vm12, %v5780_v32  ;;  %v6564_v32 = vld [vmem:[#allocation2 + $0x119] sm:$0xff] }
 0x62f   : > { %6096 = vrot.lane.b32.xlu1 %v5979_v25, %s8480_s27 }
 0x630   : > { %v6356_v59 = vpop.permute.xlu0 %6355  ;;  %v6830_v42 = vld [vmem:[#allocation3 + $0x28] sm:$0xff] }
 0x631   : > { %6494 = vst.msk [vmem:[#allocation3 + $0x30] sm:$0xff] %vm6487_vm3, %v6356_v59  ;;  %8257 = vmatmul.mubr.msk.f32.gmra.mxu1 %vm6882_vm5, %v6830_v42  ;;  %v6069_v54 = vpop.permute.xlu1 %6068  ;;  %v6276_v59 = vld [vmem:[#allocation2 + $0x120] sm:$0xff] }
 0x632   : > { %6672 = vrot.lane.b32.xlu0 %v6556_v52, %s8482_s8  ;;  %6206 = vst.msk [vmem:[#allocation3 + $0x38] sm:$0xff] %vm6198_vm9, %v6069_v54 }
 0x633   : > { %6385 = vrot.lane.b32.xlu1 %v12482_v61, %s8481_s11 }
 0x634   : > { %v6645_v15 = vpop.permute.xlu0 %6644 }
 0x635   : > { %6783 = vst.msk [vmem:[#allocation3 + $0x30] sm:$0xff] %vm6776_vm6, %v6645_v15  ;;  %v6358_v50 = vpop.permute.xlu1 %6357 }
 0x636   : > { %6674 = vrot.lane.b32.xlu0 %v6557_v12, %s8482_s8  ;;  %6495 = vst.msk [vmem:[#allocation3 + $0x38] sm:$0xff] %vm6487_vm3, %v6358_v50 }
 0x637   : > { %5809 = vrot.lane.b32.xlu1 %v6555_v38, %s8479_s16 }
 0x638   : > { %v6647_v14 = vpop.permute.xlu0 %6646 }
 0x639   : > { %6784 = vst.msk [vmem:[#allocation3 + $0x38] sm:$0xff] %vm6776_vm6, %v6647_v14  ;;  %v5782_v48 = vpop.permute.xlu1 %5781 }
 0x63a   : > { %6098 = vrot.lane.b32.xlu0 %v5980_v60, %s8480_s27  ;;  %5918 = vst.msk [vmem:[#allocation3 + $0x40] sm:$0xff] %vm5909_vm12, %v5782_v48  ;;  %v6277_v48 = vld [vmem:[#allocation2 + $0x128] sm:$0xff] }
 0x63b   : > { %5811 = vrot.lane.b32.xlu1 %v6556_v52, %s8479_s16  ;;  %v6565_v52 = vld [vmem:[#allocation2 + $0x121] sm:$0xff] }
 0x63c   : > { %v6071_v61 = vpop.permute.xlu0 %6070  ;;  %v6831_v23 = vld [vmem:[#allocation3 + $0x30] sm:$0xff] }
 0x63d   : > { %6207 = vst.msk [vmem:[#allocation3 + $0x40] sm:$0xff] %vm6198_vm9, %v6071_v61  ;;  %8259 = vmatprep.mubr.msk.f32.mxu1 %vm6882_vm5, %v6831_v23  ;;  %v5784_v47 = vpop.permute.xlu1 %5783  ;;  %v5989_v23 = vld [vmem:[#allocation2 + $0x12f] sm:$0xff] }
 0x63e   : > { %6387 = vrot.lane.b32.xlu0 %v12497_v44, %s8481_s11  ;;  %5919 = vst.msk [vmem:[#allocation3 + $0x48] sm:$0xff] %vm5909_vm12, %v5784_v47 }
 0x63f   : > { %6100 = vrot.lane.b32.xlu1 %v5981_v11, %s8480_s27 }
 0x640   : > { %v6360_v27 = vpop.permute.xlu0 %6359  ;;  %v6832_v28 = vld [vmem:[#allocation3 + $0x38] sm:$0xff] }
 0x641   : > { %6496 = vst.msk [vmem:[#allocation3 + $0x40] sm:$0xff] %vm6487_vm3, %v6360_v27  ;;  %8260 = vmatmul.mubr.msk.f32.gmra.mxu1 %vm6882_vm5, %v6832_v28  ;;  %v6073_v20 = vpop.permute.xlu1 %6072  ;;  %v6566_v27 = vld [vmem:[#allocation2 + $0x129] sm:$0xff] }
 0x642   : > { %6676 = vrot.lane.b32.xlu0 %v6558_v40, %s8482_s8  ;;  %6208 = vst.msk [vmem:[#allocation3 + $0x48] sm:$0xff] %vm6198_vm9, %v6073_v20 }
 0x643   : > { %6389 = vrot.lane.b32.xlu1 %v12492_v9, %s8481_s11 }
 0x644   : > { %v6649_v44 = vpop.permute.xlu0 %6648 }
 0x645   : > { %6785 = vst.msk [vmem:[#allocation3 + $0x40] sm:$0xff] %vm6776_vm6, %v6649_v44  ;;  %v6362_v6 = vpop.permute.xlu1 %6361  ;;  %v6567_v44 = vld [vmem:[#allocation2 + $0x131] sm:$0xff] }
 0x646   : > { %6678 = vrot.lane.b32.xlu0 %v6559_v58, %s8482_s8  ;;  %6497 = vst.msk [vmem:[#allocation3 + $0x48] sm:$0xff] %vm6487_vm3, %v6362_v6 }
 0x647   : > { %5813 = vrot.lane.b32.xlu1 %v6557_v12, %s8479_s16  ;;  %v5988_v12 = vld [vmem:[#allocation2 + $0x127] sm:$0xff] }
 0x648   : > { %v6651_v63 = vpop.permute.xlu0 %6650 }
 0x649   : > { %6786 = vst.msk [vmem:[#allocation3 + $0x48] sm:$0xff] %vm6776_vm6, %v6651_v63  ;;  %v5786_v21 = vpop.permute.xlu1 %5785  ;;  %v5990_v63 = vld [vmem:[#allocation2 + $0x137] sm:$0xff] }
 0x64a   : > { %6102 = vrot.lane.b32.xlu0 %v5982_v24, %s8480_s27  ;;  %5920 = vst.msk [vmem:[#allocation3 + $0x50] sm:$0xff] %vm5909_vm12, %v5786_v21 }
 0x64b   : > { %5815 = vrot.lane.b32.xlu1 %v6558_v40, %s8479_s16  ;;  %v6278_v40 = vld [vmem:[#allocation2 + $0x130] sm:$0xff] }
 0x64c   : > { %v6075_v9 = vpop.permute.xlu0 %6074  ;;  %v6833_v30 = vld [vmem:[#allocation3 + $0x40] sm:$0xff] }
 0x64d   : > { %6209 = vst.msk [vmem:[#allocation3 + $0x50] sm:$0xff] %vm6198_vm9, %v6075_v9  ;;  %8262 = vmatprep.mubr.msk.f32.mxu1 %vm6882_vm5, %v6833_v30  ;;  %v5788_v36 = vpop.permute.xlu1 %5787  ;;  %v6279_v30 = vld [vmem:[#allocation2 + $0x138] sm:$0xff] }
 0x64e   : > { %6391 = vrot.lane.b32.xlu0 %v12504_v56, %s8481_s11  ;;  %5921 = vst.msk [vmem:[#allocation3 + $0x58] sm:$0xff] %vm5909_vm12, %v5788_v36 }
 0x64f   : > { %6104 = vrot.lane.b32.xlu1 %v5983_v5, %s8480_s27  ;;  %v5991_v5 = vld [vmem:[#allocation2 + $0x13f] sm:$0xff] }
 0x650   : > { %v6364_v7 = vpop.permute.xlu0 %6363  ;;  %v6834_v10 = vld [vmem:[#allocation3 + $0x48] sm:$0xff] }
 0x651   : > { %6498 = vst.msk [vmem:[#allocation3 + $0x50] sm:$0xff] %vm6487_vm3, %v6364_v7  ;;  %8263 = vmatmul.mubr.msk.f32.gmra.mxu1 %vm6882_vm5, %v6834_v10  ;;  %v6077_v18 = vpop.permute.xlu1 %6076 }
 0x652   : > { %6680 = vrot.lane.b32.xlu0 %v6560_v22, %s8482_s8  ;;  %6210 = vst.msk [vmem:[#allocation3 + $0x58] sm:$0xff] %vm6198_vm9, %v6077_v18 }
 0x653   : > { %6393 = vrot.lane.b32.xlu1 %v6272_v1, %s8481_s11  ;;  %v6280_v1 = vld [vmem:[#allocation2 + $0x140] sm:$0xff] }
 0x654   : > { %v6653_v56 = vpop.permute.xlu0 %6652 }
 0x655   : > { %6787 = vst.msk [vmem:[#allocation3 + $0x50] sm:$0xff] %vm6776_vm6, %v6653_v56  ;;  %v6366_v39 = vpop.permute.xlu1 %6365 }
 0x656   : > { %6682 = vrot.lane.b32.xlu0 %v6561_v0, %s8482_s8  ;;  %6499 = vst.msk [vmem:[#allocation3 + $0x58] sm:$0xff] %vm6487_vm3, %v6366_v39 }
 0x657   : > { %5817 = vrot.lane.b32.xlu1 %v6559_v58, %s8479_s16 }
 0x658   : > { %v6655_v55 = vpop.permute.xlu0 %6654 }
 0x659   : > { %6788 = vst.msk [vmem:[#allocation3 + $0x58] sm:$0xff] %vm6776_vm6, %v6655_v55  ;;  %v5790_v4 = vpop.permute.xlu1 %5789 }
 0x65a   : > { %6106 = vrot.lane.b32.xlu0 %v5984_v26, %s8480_s27  ;;  %5922 = vst.msk [vmem:[#allocation3 + $0x60] sm:$0xff] %vm5909_vm12, %v5790_v4  ;;  %v5992_v26 = vld [vmem:[#allocation2 + $0x147] sm:$0xff] }
 0x65b   : > { %5819 = vrot.lane.b32.xlu1 %v6560_v22, %s8479_s16  ;;  %v6568_v22 = vld [vmem:[#allocation2 + $0x139] sm:$0xff] }
 0x65c   : > { %v6079_v35 = vpop.permute.xlu0 %6078  ;;  %v6835_v37 = vld [vmem:[#allocation3 + $0x50] sm:$0xff] }
 0x65d   : > { %6211 = vst.msk [vmem:[#allocation3 + $0x60] sm:$0xff] %vm6198_vm9, %v6079_v35  ;;  %8265 = vmatprep.mubr.msk.f32.mxu1 %vm6882_vm5, %v6835_v37  ;;  %v5792_v43 = vpop.permute.xlu1 %5791 }
 0x65e   : > { %6395 = vrot.lane.b32.xlu0 %v6273_v57, %s8481_s11  ;;  %5923 = vst.msk [vmem:[#allocation3 + $0x68] sm:$0xff] %vm5909_vm12, %v5792_v43  ;;  %v6281_v57 = vld [vmem:[#allocation2 + $0x148] sm:$0xff] }
 0x65f   : > { %6108 = vrot.lane.b32.xlu1 %v5985_v62, %s8480_s27  ;;  %v5993_v62 = vld [vmem:[#allocation2 + $0x14f] sm:$0xff] }
 0x660   : > { %v6368_v16 = vpop.permute.xlu0 %6367  ;;  %v6836_v31 = vld [vmem:[#allocation3 + $0x58] sm:$0xff] }
 0x661   : > { %6500 = vst.msk [vmem:[#allocation3 + $0x60] sm:$0xff] %vm6487_vm3, %v6368_v16  ;;  %8266 = vmatmul.mubr.msk.f32.gmra.mxu1 %vm6882_vm5, %v6836_v31  ;;  %v6081_v53 = vpop.permute.xlu1 %6080 }
 0x662   : > { %6684 = vrot.lane.b32.xlu0 %v6562_v19, %s8482_s8  ;;  %6212 = vst.msk [vmem:[#allocation3 + $0x68] sm:$0xff] %vm6198_vm9, %v6081_v53 }
 0x663   : > { %6397 = vrot.lane.b32.xlu1 %v6274_v13, %s8481_s11  ;;  %v6282_v13 = vld [vmem:[#allocation2 + $0x150] sm:$0xff] }
 0x664   : > { %v6657_v41 = vpop.permute.xlu0 %6656 }
 0x665   : > { %6789 = vst.msk [vmem:[#allocation3 + $0x60] sm:$0xff] %vm6776_vm6, %v6657_v41  ;;  %v6370_v49 = vpop.permute.xlu1 %6369 }
 0x666   : > { %6686 = vrot.lane.b32.xlu0 %v6563_v3, %s8482_s8  ;;  %6501 = vst.msk [vmem:[#allocation3 + $0x68] sm:$0xff] %vm6487_vm3, %v6370_v49 }
 0x667   : > { %5821 = vrot.lane.b32.xlu1 %v6561_v0, %s8479_s16  ;;  %v6569_v0 = vld [vmem:[#allocation2 + $0x141] sm:$0xff] }
 0x668   : > { %v6659_v33 = vpop.permute.xlu0 %6658 }
 0x669   : > { %6790 = vst.msk [vmem:[#allocation3 + $0x68] sm:$0xff] %vm6776_vm6, %v6659_v33  ;;  %v5794_v51 = vpop.permute.xlu1 %5793 }
 0x66a   : > { %6110 = vrot.lane.b32.xlu0 %v5986_v8, %s8480_s27  ;;  %5924 = vst.msk [vmem:[#allocation3 + $0x70] sm:$0xff] %vm5909_vm12, %v5794_v51  ;;  %v5994_v8 = vld [vmem:[#allocation2 + $0x157] sm:$0xff] }
 0x66b   : > { %5823 = vrot.lane.b32.xlu1 %v6562_v19, %s8479_s16  ;;  %v6570_v19 = vld [vmem:[#allocation2 + $0x149] sm:$0xff] }
 0x66c   : > { %v6083_v38 = vpop.permute.xlu0 %6082  ;;  %v6837_v34 = vld [vmem:[#allocation3 + $0x60] sm:$0xff] }
 0x66d   : > { %6213 = vst.msk [vmem:[#allocation3 + $0x70] sm:$0xff] %vm6198_vm9, %v6083_v38  ;;  %8268 = vmatprep.mubr.msk.f32.mxu1 %vm6882_vm5, %v6837_v34  ;;  %v5796_v45 = vpop.permute.xlu1 %5795 }
 0x66e   : > { %6399 = vrot.lane.b32.xlu0 %v6275_v2, %s8481_s11  ;;  %5925 = vst.msk [vmem:[#allocation3 + $0x78] sm:$0xff] %vm5909_vm12, %v5796_v45  ;;  %v6283_v2 = vld [vmem:[#allocation2 + $0x158] sm:$0xff] }
 0x66f   : > { %6112 = vrot.lane.b32.xlu1 %v5987_v29, %s8480_s27  ;;  %v5995_v29 = vld [vmem:[#allocation2 + $0x15f] sm:$0xff] }
 0x670   : > { %v6372_v46 = vpop.permute.xlu0 %6371  ;;  %v6838_v17 = vld [vmem:[#allocation3 + $0x68] sm:$0xff] }
 0x671   : > { %6502 = vst.msk [vmem:[#allocation3 + $0x70] sm:$0xff] %vm6487_vm3, %v6372_v46  ;;  %8269 = vmatmul.mubr.msk.f32.gmra.mxu1 %vm6882_vm5, %v6838_v17  ;;  %v6085_v25 = vpop.permute.xlu1 %6084 }
 0x672   : > { %6688 = vrot.lane.b32.xlu0 %v6564_v32, %s8482_s8  ;;  %6214 = vst.msk [vmem:[#allocation3 + $0x78] sm:$0xff] %vm6198_vm9, %v6085_v25 }
 0x673   : > { %6401 = vrot.lane.b32.xlu1 %v6276_v59, %s8481_s11  ;;  %v6284_v59 = vld [vmem:[#allocation2 + $0x160] sm:$0xff] }
 0x674   : > { %v6661_v42 = vpop.permute.xlu0 %6660 }
 0x675   : > { %6791 = vst.msk [vmem:[#allocation3 + $0x70] sm:$0xff] %vm6776_vm6, %v6661_v42  ;;  %v6374_v54 = vpop.permute.xlu1 %6373 }
 0x676   : > { %6690 = vrot.lane.b32.xlu0 %v6565_v52, %s8482_s8  ;;  %6503 = vst.msk [vmem:[#allocation3 + $0x78] sm:$0xff] %vm6487_vm3, %v6374_v54 }
 0x677   : > { %5825 = vrot.lane.b32.xlu1 %v6563_v3, %s8479_s16  ;;  %v6571_v3 = vld [vmem:[#allocation2 + $0x151] sm:$0xff] }
 0x678   : > { %v6663_v15 = vpop.permute.xlu0 %6662 }
 0x679   : > { %6792 = vst.msk [vmem:[#allocation3 + $0x78] sm:$0xff] %vm6776_vm6, %v6663_v15  ;;  %v5798_v50 = vpop.permute.xlu1 %5797 }
 0x67a   : > { %6114 = vrot.lane.b32.xlu0 %v5988_v12, %s8480_s27  ;;  %5926 = vst.msk [vmem:[#allocation3 + $0x80] sm:$0xff] %vm5909_vm12, %v5798_v50  ;;  %v5996_v12 = vld [vmem:[#allocation2 + $0x167] sm:$0xff] }
 0x67b   : > { %5827 = vrot.lane.b32.xlu1 %v6564_v32, %s8479_s16  ;;  %v6572_v32 = vld [vmem:[#allocation2 + $0x159] sm:$0xff] }
 0x67c   : > { %v6087_v14 = vpop.permute.xlu0 %6086  ;;  %v6839_v60 = vld [vmem:[#allocation3 + $0x70] sm:$0xff] }
 0x67d   : > { %6215 = vst.msk [vmem:[#allocation3 + $0x80] sm:$0xff] %vm6198_vm9, %v6087_v14  ;;  %8271 = vmatprep.mubr.msk.f32.mxu1 %vm6882_vm5, %v6839_v60  ;;  %v5800_v61 = vpop.permute.xlu1 %5799 }
 0x67e   : > { %6403 = vrot.lane.b32.xlu0 %v6277_v48, %s8481_s11  ;;  %5927 = vst.msk [vmem:[#allocation3 + $0x88] sm:$0xff] %vm5909_vm12, %v5800_v61  ;;  %v6285_v48 = vld [vmem:[#allocation2 + $0x168] sm:$0xff] }
 0x67f   : > { %6116 = vrot.lane.b32.xlu1 %v5989_v23, %s8480_s27  ;;  %v5997_v23 = vld [vmem:[#allocation2 + $0x16f] sm:$0xff] }
 0x680   : > { %v6376_v47 = vpop.permute.xlu0 %6375  ;;  %v6840_v11 = vld [vmem:[#allocation3 + $0x78] sm:$0xff] }
 0x681   : > { %6504 = vst.msk [vmem:[#allocation3 + $0x80] sm:$0xff] %vm6487_vm3, %v6376_v47  ;;  %8272 = vmatmul.mubr.msk.f32.gmra.mxu1 %vm6882_vm5, %v6840_v11  ;;  %v6089_v28 = vpop.permute.xlu1 %6088 }
 0x682   : > { %6692 = vrot.lane.b32.xlu0 %v6566_v27, %s8482_s8  ;;  %6216 = vst.msk [vmem:[#allocation3 + $0x88] sm:$0xff] %vm6198_vm9, %v6089_v28 }
 0x683   : > { %6405 = vrot.lane.b32.xlu1 %v6278_v40, %s8481_s11  ;;  %v5958_v40 = vld [vmem:[#allocation2 + $0x37] sm:$0xff] }
 0x684   : > { %v6665_v20 = vpop.permute.xlu0 %6664 }
 0x685   : > { %6793 = vst.msk [vmem:[#allocation3 + $0x80] sm:$0xff] %vm6776_vm6, %v6665_v20  ;;  %v6378_v58 = vpop.permute.xlu1 %6377 }
 0x686   : > { %6694 = vrot.lane.b32.xlu0 %v6567_v44, %s8482_s8  ;;  %6505 = vst.msk [vmem:[#allocation3 + $0x88] sm:$0xff] %vm6487_vm3, %v6378_v58  ;;  %v6574_v58 = vld [vmem:[#allocation2 + $0x169] sm:$0xff] }
 0x687   : > { %5829 = vrot.lane.b32.xlu1 %v6565_v52, %s8479_s16  ;;  %v6573_v52 = vld [vmem:[#allocation2 + $0x161] sm:$0xff] }
 0x688   : > { %v6667_v6 = vpop.permute.xlu0 %6666 }
 0x689   : > { %6794 = vst.msk [vmem:[#allocation3 + $0x88] sm:$0xff] %vm6776_vm6, %v6667_v6  ;;  %v5802_v24 = vpop.permute.xlu1 %5801 }
 0x68a   : > { %6118 = vrot.lane.b32.xlu0 %v5990_v63, %s8480_s27  ;;  %5928 = vst.msk [vmem:[#allocation3 + $0x90] sm:$0xff] %vm5909_vm12, %v5802_v24  ;;  %v6247_v63 = vld [vmem:[#allocation2 + $0x38] sm:$0xff] }
 0x68b   : > { %5831 = vrot.lane.b32.xlu1 %v6566_v27, %s8479_s16  ;;  %v6286_v27 = vld [vmem:[#allocation2 + $0x170] sm:$0xff] }
 0x68c   : > { %v6091_v21 = vpop.permute.xlu0 %6090  ;;  %v6841_v9 = vld [vmem:[#allocation3 + $0x80] sm:$0xff] }
 0x68d   : > { %6217 = vst.msk [vmem:[#allocation3 + $0x90] sm:$0xff] %vm6198_vm9, %v6091_v21  ;;  %8274 = vmatprep.mubr.msk.f32.mxu1 %vm6882_vm5, %v6841_v9  ;;  %v5804_v36 = vpop.permute.xlu1 %5803  ;;  %v5959_v21 = vld [vmem:[#allocation2 + $0x3f] sm:$0xff] }
 0x68e   : > { %6407 = vrot.lane.b32.xlu0 %v6279_v30, %s8481_s11  ;;  %5929 = vst.msk [vmem:[#allocation3 + $0x98] sm:$0xff] %vm5909_vm12, %v5804_v36 }
 0x68f   : > { %6120 = vrot.lane.b32.xlu1 %v5991_v5, %s8480_s27  ;;  %v6575_v5 = vld [vmem:[#allocation2 + $0x171] sm:$0xff] }
 0x690   : > { %v6380_v7 = vpop.permute.xlu0 %6379  ;;  %v6842_v10 = vld [vmem:[#allocation3 + $0x88] sm:$0xff] }
 0x691   : > { %6506 = vst.msk [vmem:[#allocation3 + $0x90] sm:$0xff] %vm6487_vm3, %v6380_v7  ;;  %8275 = vmatmul.mubr.msk.f32.gmra.mxu1 %vm6882_vm5, %v6842_v10  ;;  %v6093_v18 = vpop.permute.xlu1 %6092 }
 0x692   : > { %6696 = vrot.lane.b32.xlu0 %v6568_v22, %s8482_s8  ;;  %6218 = vst.msk [vmem:[#allocation3 + $0x98] sm:$0xff] %vm6198_vm9, %v6093_v18 }
 0x693   : > { %6409 = vrot.lane.b32.xlu1 %v6280_v1, %s8481_s11  ;;  %v5998_v1 = vld [vmem:[#allocation2 + $0x177] sm:$0xff] }
 0x694   : > { %v6669_v56 = vpop.permute.xlu0 %6668 }
 0x695   : > { %6795 = vst.msk [vmem:[#allocation3 + $0x90] sm:$0xff] %vm6776_vm6, %v6669_v56  ;;  %v6382_v39 = vpop.permute.xlu1 %6381 }
 0x696   : > { %6698 = vrot.lane.b32.xlu0 %v6569_v0, %s8482_s8  ;;  %6507 = vst.msk [vmem:[#allocation3 + $0x98] sm:$0xff] %vm6487_vm3, %v6382_v39 }
 0x697   : > { %5833 = vrot.lane.b32.xlu1 %v6567_v44, %s8479_s16 }
 0x698   : > { %v6671_v55 = vpop.permute.xlu0 %6670 }
 0x699   : > { %6796 = vst.msk [vmem:[#allocation3 + $0x98] sm:$0xff] %vm6776_vm6, %v6671_v55  ;;  %v5806_v4 = vpop.permute.xlu1 %5805  ;;  %v6536_v55 = vld [vmem:[#allocation2 + $0x39] sm:$0xff] }
 0x69a   : > { %6122 = vrot.lane.b32.xlu0 %v5992_v26, %s8480_s27  ;;  %5930 = vst.msk [vmem:[#allocation3 + $0xa0] sm:$0xff] %vm5909_vm12, %v5806_v4  ;;  %v6537_v4 = vld [vmem:[#allocation2 + $0x41] sm:$0xff] }
 0x69b   : > { %5835 = vrot.lane.b32.xlu1 %v6568_v22, %s8479_s16  ;;  %v6248_v22 = vld [vmem:[#allocation2 + $0x40] sm:$0xff] }
 0x69c   : > { %v6095_v35 = vpop.permute.xlu0 %6094  ;;  %v6843_v37 = vld [vmem:[#allocation3 + $0x90] sm:$0xff] }
 0x69d   : > { %6219 = vst.msk [vmem:[#allocation3 + $0xa0] sm:$0xff] %vm6198_vm9, %v6095_v35  ;;  %8277 = vmatprep.mubr.msk.f32.mxu1 %vm6882_vm5, %v6843_v37  ;;  %v5808_v43 = vpop.permute.xlu1 %5807  ;;  %v6287_v37 = vld [vmem:[#allocation2 + $0x178] sm:$0xff] }
 0x69e   : > { %6411 = vrot.lane.b32.xlu0 %v6281_v57, %s8481_s11  ;;  %5931 = vst.msk [vmem:[#allocation3 + $0xa8] sm:$0xff] %vm5909_vm12, %v5808_v43 }
 0x69f   : > { %6124 = vrot.lane.b32.xlu1 %v5993_v62, %s8480_s27  ;;  %v6576_v62 = vld [vmem:[#allocation2 + $0x179] sm:$0xff] }
 0x6a0   : > { %v6384_v16 = vpop.permute.xlu0 %6383  ;;  %v6844_v31 = vld [vmem:[#allocation3 + $0x98] sm:$0xff] }
 0x6a1   : > { %6508 = vst.msk [vmem:[#allocation3 + $0xa0] sm:$0xff] %vm6487_vm3, %v6384_v16  ;;  %8278 = vmatmul.mubr.msk.f32.gmra.mxu1 %vm6882_vm5, %v6844_v31  ;;  %v6097_v53 = vpop.permute.xlu1 %6096  ;;  %v6288_v31 = vld [vmem:[#allocation2 + $0x180] sm:$0xff] }
 0x6a2   : > { %6700 = vrot.lane.b32.xlu0 %v6570_v19, %s8482_s8  ;;  %6220 = vst.msk [vmem:[#allocation3 + $0xa8] sm:$0xff] %vm6198_vm9, %v6097_v53 }
 0x6a3   : > { %6413 = vrot.lane.b32.xlu1 %v6282_v13, %s8481_s11  ;;  %v6577_v13 = vld [vmem:[#allocation2 + $0x181] sm:$0xff] }
 0x6a4   : > { %v6673_v41 = vpop.permute.xlu0 %6672 }
 0x6a5   : > { %6797 = vst.msk [vmem:[#allocation3 + $0xa0] sm:$0xff] %vm6776_vm6, %v6673_v41  ;;  %v6386_v49 = vpop.permute.xlu1 %6385 }
 0x6a6   : > { %6702 = vrot.lane.b32.xlu0 %v6571_v3, %s8482_s8  ;;  %6509 = vst.msk [vmem:[#allocation3 + $0xa8] sm:$0xff] %vm6487_vm3, %v6386_v49  ;;  %v6000_v49 = vld [vmem:[#allocation2 + $0x187] sm:$0xff] }
 0x6a7   : > { %5837 = vrot.lane.b32.xlu1 %v6569_v0, %s8479_s16  ;;  %v5999_v0 = vld [vmem:[#allocation2 + $0x17f] sm:$0xff] }
 0x6a8   : > { %v6675_v33 = vpop.permute.xlu0 %6674 }
 0x6a9   : > { %6798 = vst.msk [vmem:[#allocation3 + $0xa8] sm:$0xff] %vm6776_vm6, %v6675_v33  ;;  %v5810_v51 = vpop.permute.xlu1 %5809 }
 0x6aa   : > { %6126 = vrot.lane.b32.xlu0 %v5994_v8, %s8480_s27  ;;  %5932 = vst.msk [vmem:[#allocation3 + $0xb0] sm:$0xff] %vm5909_vm12, %v5810_v51  ;;  %v6289_v51 = vld [vmem:[#allocation2 + $0x188] sm:$0xff] }
 0x6ab   : > { %5839 = vrot.lane.b32.xlu1 %v6570_v19, %s8479_s16 }
 0x6ac   : > { %v6099_v38 = vpop.permute.xlu0 %6098  ;;  %v6845_v34 = vld [vmem:[#allocation3 + $0xa0] sm:$0xff] }
 0x6ad   : > { %6221 = vst.msk [vmem:[#allocation3 + $0xb0] sm:$0xff] %vm6198_vm9, %v6099_v38  ;;  %8280 = vmatprep.mubr.msk.f32.mxu1 %vm6882_vm5, %v6845_v34  ;;  %v5812_v45 = vpop.permute.xlu1 %5811  ;;  %v6001_v34 = vld [vmem:[#allocation2 + $0x18f] sm:$0xff] }
 0x6ae   : > { %6415 = vrot.lane.b32.xlu0 %v6283_v2, %s8481_s11  ;;  %5933 = vst.msk [vmem:[#allocation3 + $0xb8] sm:$0xff] %vm5909_vm12, %v5812_v45 }
 0x6af   : > { %6128 = vrot.lane.b32.xlu1 %v5995_v29, %s8480_s27 }
 0x6b0   : > { %v6388_v46 = vpop.permute.xlu0 %6387  ;;  %v6846_v17 = vld [vmem:[#allocation3 + $0xa8] sm:$0xff] }
 0x6b1   : > { %6510 = vst.msk [vmem:[#allocation3 + $0xb0] sm:$0xff] %vm6487_vm3, %v6388_v46  ;;  %8281 = vmatmul.mubr.msk.f32.gmra.mxu1 %vm6882_vm5, %v6846_v17  ;;  %v6101_v25 = vpop.permute.xlu1 %6100  ;;  %v6578_v46 = vld [vmem:[#allocation2 + $0x189] sm:$0xff] }
 0x6b2   : > { %6704 = vrot.lane.b32.xlu0 %v6572_v32, %s8482_s8  ;;  %6222 = vst.msk [vmem:[#allocation3 + $0xb8] sm:$0xff] %vm6198_vm9, %v6101_v25 }
 0x6b3   : > { %6417 = vrot.lane.b32.xlu1 %v6284_v59, %s8481_s11 }
 0x6b4   : > { %v6677_v42 = vpop.permute.xlu0 %6676 }
 0x6b5   : > { %6799 = vst.msk [vmem:[#allocation3 + $0xb0] sm:$0xff] %vm6776_vm6, %v6677_v42  ;;  %v6390_v54 = vpop.permute.xlu1 %6389 }
 0x6b6   : > { %6706 = vrot.lane.b32.xlu0 %v6573_v52, %s8482_s8  ;;  %6511 = vst.msk [vmem:[#allocation3 + $0xb8] sm:$0xff] %vm6487_vm3, %v6390_v54 }
 0x6b7   : > { %5841 = vrot.lane.b32.xlu1 %v6571_v3, %s8479_s16 }
 0x6b8   : > { %v6679_v15 = vpop.permute.xlu0 %6678 }
 0x6b9   : > { %6800 = vst.msk [vmem:[#allocation3 + $0xb8] sm:$0xff] %vm6776_vm6, %v6679_v15  ;;  %v5814_v50 = vpop.permute.xlu1 %5813 }
 0x6ba   : > { %6130 = vrot.lane.b32.xlu0 %v5996_v12, %s8480_s27  ;;  %5934 = vst.msk [vmem:[#allocation3 + $0xc0] sm:$0xff] %vm5909_vm12, %v5814_v50  ;;  %v6002_v50 = vld [vmem:[#allocation2 + $0x197] sm:$0xff] }
 0x6bb   : > { %5843 = vrot.lane.b32.xlu1 %v6572_v32, %s8479_s16  ;;  %v6290_v32 = vld [vmem:[#allocation2 + $0x190] sm:$0xff] }
 0x6bc   : > { %v6103_v14 = vpop.permute.xlu0 %6102  ;;  %v6847_v60 = vld [vmem:[#allocation3 + $0xb0] sm:$0xff] }
 0x6bd   : > { %6223 = vst.msk [vmem:[#allocation3 + $0xc0] sm:$0xff] %vm6198_vm9, %v6103_v14  ;;  %8283 = vmatprep.mubr.msk.f32.mxu1 %vm6882_vm5, %v6847_v60  ;;  %v5816_v61 = vpop.permute.xlu1 %5815 }
 0x6be   : > { %6419 = vrot.lane.b32.xlu0 %v6285_v48, %s8481_s11  ;;  %5935 = vst.msk [vmem:[#allocation3 + $0xc8] sm:$0xff] %vm5909_vm12, %v5816_v61  ;;  %v12984_v48 = vld [vmem:[%s13407_s5] ss:$0 sm:$0xff] }
 0x6bf   : > { %6132 = vrot.lane.b32.xlu1 %v5997_v23, %s8480_s27 }
 0x6c0   : > { %v6392_v47 = vpop.permute.xlu0 %6391  ;;  %v6848_v11 = vld [vmem:[#allocation3 + $0xb8] sm:$0xff] }
 0x6c1   : > { %6512 = vst.msk [vmem:[#allocation3 + $0xc0] sm:$0xff] %vm6487_vm3, %v6392_v47  ;;  %8284 = vmatmul.mubr.msk.f32.gmra.mxu1 %vm6882_vm5, %v6848_v11  ;;  %v6105_v28 = vpop.permute.xlu1 %6104  ;;  %v6291_v47 = vld [vmem:[#allocation2 + $0x198] sm:$0xff] }
 0x6c2   : > { %6421 = vrot.lane.b32.xlu0 %v6286_v27, %s8481_s11  ;;  %6224 = vst.msk [vmem:[#allocation3 + $0xc8] sm:$0xff] %vm6198_vm9, %v6105_v28 }
 0x6c3   : > { %6054 = vrot.lane.b32.xlu1 %v5958_v40, %s8480_s27  ;;  %v6003_v40 = vld [vmem:[#allocation2 + $0x19f] sm:$0xff] }
 0x6c4   : > { %v6681_v20 = vpop.permute.xlu0 %6680 }
 0x6c5   : > { %6801 = vst.msk [vmem:[#allocation3 + $0xc0] sm:$0xff] %vm6776_vm6, %v6681_v20  ;;  %v6394_v44 = vpop.permute.xlu1 %6393  ;;  %v12996_v20 = vld [vmem:[%s13408_s6] ss:$0 sm:$0xff] }
 0x6c6   : > { %5845 = vrot.lane.b32.xlu0 %v6573_v52, %s8479_s16  ;;  %6513 = vst.msk [vmem:[#allocation3 + $0xc8] sm:$0xff] %vm6487_vm3, %v6394_v44  ;;  %v6579_v52 = vld [vmem:[#allocation2 + $0x191] sm:$0xff] }
 0x6c7   : > { %6708 = vrot.lane.b32.xlu1 %v6574_v58, %s8482_s8 }
 0x6c8   : > { %v6683_v6 = vpop.permute.xlu0 %6682 }
 0x6c9   : > { %6802 = vst.msk [vmem:[#allocation3 + $0xc8] sm:$0xff] %vm6776_vm6, %v6683_v6  ;;  %v5818_v24 = vpop.permute.xlu1 %5817 }
 0x6ca   : > { %6343 = vrot.lane.b32.xlu0 %v6247_v63, %s8481_s11  ;;  %5936 = vst.msk [vmem:[#allocation3 + $0xd0] sm:$0xff] %vm5909_vm12, %v5818_v24  ;;  %v6580_v63 = vld [vmem:[#allocation2 + $0x199] sm:$0xff] }
 0x6cb   : > { %6056 = vrot.lane.b32.xlu1 %v5959_v21, %s8480_s27  ;;  %v6292_v24 = vld [vmem:[#allocation2 + $0x1a0] sm:$0xff] }
 0x6cc   : > { %v6107_v9 = vpop.permute.xlu0 %6106  ;;  %v6849_v30 = vld [vmem:[#allocation3 + $0xc0] sm:$0xff] }
 0x6cd   : > { %6225 = vst.msk [vmem:[#allocation3 + $0xd0] sm:$0xff] %vm6198_vm9, %v6107_v9  ;;  %8286 = vmatprep.mubr.msk.f32.mxu1 %vm6882_vm5, %v6849_v30  ;;  %v5820_v36 = vpop.permute.xlu1 %5819 }
 0x6ce   : > { %5847 = vrot.lane.b32.xlu0 %v6574_v58, %s8479_s16  ;;  %5937 = vst.msk [vmem:[#allocation3 + $0xd8] sm:$0xff] %vm5909_vm12, %v5820_v36 }
 0x6cf   : > { %6710 = vrot.lane.b32.xlu1 %v6575_v5, %s8482_s8 }
 0x6d0   : > { %v6396_v7 = vpop.permute.xlu0 %6395  ;;  %v6850_v10 = vld [vmem:[#allocation3 + $0xc8] sm:$0xff] }
 0x6d1   : > { %6514 = vst.msk [vmem:[#allocation3 + $0xd0] sm:$0xff] %vm6487_vm3, %v6396_v7  ;;  %8287 = vmatmul.mubr.msk.f32.gmra.mxu1 %vm6882_vm5, %v6850_v10  ;;  %v6109_v18 = vpop.permute.xlu1 %6108 }
 0x6d2   : > { %6345 = vrot.lane.b32.xlu0 %v6248_v22, %s8481_s11  ;;  %6226 = vst.msk [vmem:[#allocation3 + $0xd8] sm:$0xff] %vm6198_vm9, %v6109_v18 }
 0x6d3   : > { %6134 = vrot.lane.b32.xlu1 %v5998_v1, %s8480_s27 }
 0x6d4   : > { %v6685_v56 = vpop.permute.xlu0 %6684 }
 0x6d5   : > { %6803 = vst.msk [vmem:[#allocation3 + $0xd0] sm:$0xff] %vm6776_vm6, %v6685_v56  ;;  %v6398_v39 = vpop.permute.xlu1 %6397 }
 0x6d6   : > { %6136 = vrot.lane.b32.xlu0 %v5999_v0, %s8480_s27  ;;  %6515 = vst.msk [vmem:[#allocation3 + $0xd8] sm:$0xff] %vm6487_vm3, %v6398_v39 }
 0x6d7   : > { %6632 = vrot.lane.b32.xlu1 %v6536_v55, %s8482_s8 }
 0x6d8   : > { %v6687_v26 = vpop.permute.xlu0 %6686 }
 0x6d9   : > { %6804 = vst.msk [vmem:[#allocation3 + $0xd8] sm:$0xff] %vm6776_vm6, %v6687_v26  ;;  %v5822_v35 = vpop.permute.xlu1 %5821 }
 0x6da   : > { %6634 = vrot.lane.b32.xlu0 %v6537_v4, %s8482_s8  ;;  %5938 = vst.msk [vmem:[#allocation3 + $0xe0] sm:$0xff] %vm5909_vm12, %v5822_v35  ;;  %v6004_v4 = vld [vmem:[#allocation2 + $0x1a7] sm:$0xff] }
 0x6db   : > { %6423 = vrot.lane.b32.xlu1 %v6287_v37, %s8481_s11 }
 0x6dc   : > { %v6111_v57 = vpop.permute.xlu0 %6110  ;;  %v6851_v43 = vld [vmem:[#allocation3 + $0xd0] sm:$0xff] }
 0x6dd   : > { %6227 = vst.msk [vmem:[#allocation3 + $0xe0] sm:$0xff] %vm6198_vm9, %v6111_v57  ;;  %8289 = vmatprep.mubr.msk.f32.mxu1 %vm6882_vm5, %v6851_v43  ;;  %v5824_v16 = vpop.permute.xlu1 %5823 }
 0x6de   : > { %6712 = vrot.lane.b32.xlu0 %v6576_v62, %s8482_s8  ;;  %5939 = vst.msk [vmem:[#allocation3 + $0xe8] sm:$0xff] %vm5909_vm12, %v5824_v16 }
 0x6df   : > { %6425 = vrot.lane.b32.xlu1 %v6288_v31, %s8481_s11 }
 0x6e0   : > { %v6400_v19 = vpop.permute.xlu0 %6399  ;;  %v6852_v53 = vld [vmem:[#allocation3 + $0xd8] sm:$0xff] }
 0x6e1   : > { %6516 = vst.msk [vmem:[#allocation3 + $0xe0] sm:$0xff] %vm6487_vm3, %v6400_v19  ;;  %8290 = vmatmul.mubr.msk.f32.gmra.mxu1 %vm6882_vm5, %v6852_v53  ;;  %v6113_v41 = vpop.permute.xlu1 %6112  ;;  %v8255_v29 = vpop.f32.mrf.mxu1 }
 0x6e2   : > { %6714 = vrot.lane.b32.xlu0 %v6577_v13, %s8482_s8  ;;  %6228 = vst.msk [vmem:[#allocation3 + $0xe8] sm:$0xff] %vm6198_vm9, %v6113_v41  ;;  %v7342_v28 = vmul.f32 %v8255_v29, %v12984_v48  ;;  %v6293_v41 = vld [vmem:[#allocation2 + $0x1a8] sm:$0xff] }
 0x6e3   : > { %5849 = vrot.lane.b32.xlu1 %v6575_v5, %s8479_s16  ;;  %v7103_v42 = vpop.f32.mrf.mxu1  ;;  %v6581_v5 = vld [vmem:[#allocation2 + $0x1a1] sm:$0xff]  ;;  %v6582_v29 = vld [vmem:[#allocation2 + $0x1a9] sm:$0xff] }
 0x6e4   : > { %v6689_v3 = vpop.permute.xlu0 %6688  ;;  %v7341_v23 = vmul.f32 %v12984_v48, %v7103_v42  ;;  %v7397_v36 = vadd.f32 %v12996_v20, %v7342_v28 }
 0x6e5   : > { %6805 = vst.msk [vmem:[#allocation3 + $0xe0] sm:$0xff] %vm6776_vm6, %v6689_v3  ;;  %v6402_v33 = vpop.permute.xlu1 %6401 }
 0x6e6   : > { %6138 = vrot.lane.b32.xlu0 %v6000_v49, %s8480_s27  ;;  %6517 = vst.msk [vmem:[#allocation3 + $0xe8] sm:$0xff] %vm6487_vm3, %v6402_v33  ;;  %v13000_v6 = vadd.f32 %v12996_v20, %v7341_v23  ;;  %v7445_v55 = vmax.f32 %v7397_v36, 0.0 }
 0x6e7   : > { %5851 = vrot.lane.b32.xlu1 %v6576_v62, %s8479_s16 }
 0x6e8   : > { %v6691_v8 = vpop.permute.xlu0 %6690  ;;  %v7444_v22 = vmax.f32 %v13000_v6, 0.0 }
 0x6e9   : > { %6806 = vst.msk [vmem:[#allocation3 + $0xe8] sm:$0xff] %vm6776_vm6, %v6691_v8  ;;  %v5826_v38 = vpop.permute.xlu1 %5825  ;;  %v6005_v8 = vld [vmem:[#allocation2 + $0x1af] sm:$0xff] }
 0x6ea   : > { %6427 = vrot.lane.b32.xlu0 %v6289_v51, %s8481_s11  ;;  %5940 = vst.msk [vmem:[#allocation3 + $0xf0] sm:$0xff] %vm5909_vm12, %v5826_v38  ;;  %v13025_v43 = vrot.slane %v7444_v22, 1 }
 0x6eb   : > { %6140 = vrot.lane.b32.xlu1 %v6001_v34, %s8480_s27 }
 0x6ec   : > { %v6115_v2 = vpop.permute.xlu0 %6114  ;;  %v6853_v45 = vld [vmem:[#allocation3 + $0xe0] sm:$0xff] }
 0x6ed   : > { %6229 = vst.msk [vmem:[#allocation3 + $0xf0] sm:$0xff] %vm6198_vm9, %v6115_v2  ;;  %8292 = vmatprep.mubr.msk.f32.mxu1 %vm6882_vm5, %v6853_v45  ;;  %v5828_v17 = vpop.permute.xlu1 %5827 }
 0x6ee   : > { %6716 = vrot.lane.b32.xlu0 %v6578_v46, %s8482_s8  ;;  %5941 = vst.msk [vmem:[#allocation3 + $0xf8] sm:$0xff] %vm5909_vm12, %v5828_v17 }
 0x6ef   : > { %6429 = vrot.lane.b32.xlu1 %v6290_v32, %s8481_s11 }
 0x6f0   : > { %v6404_v25 = vpop.permute.xlu0 %6403  ;;  %v6854_v59 = vld [vmem:[#allocation3 + $0xe8] sm:$0xff] }
 0x6f1   : > { %6518 = vst.msk [vmem:[#allocation3 + $0xf0] sm:$0xff] %vm6487_vm3, %v6404_v25  ;;  %8293 = vmatmul.mubr.msk.f32.gmra.mxu1 %vm6882_vm5, %v6854_v59  ;;  %v6117_v54 = vpop.permute.xlu1 %6116  ;;  %v8258_v15 = vpop.f32.mrf.mxu1 }
 0x6f2   : > { %6718 = vrot.lane.b32.xlu0 %v6579_v52, %s8482_s8  ;;  %6230 = vst.msk [vmem:[#allocation3 + $0xf8] sm:$0xff] %vm6198_vm9, %v6117_v54  ;;  %v7344_v21 = vmul.f32 %v8258_v15, %v12984_v48  ;;  %v6294_v54 = vld [vmem:[#allocation2 + $0x1b0] sm:$0xff] }
 0x6f3   : > { %5853 = vrot.lane.b32.xlu1 %v6577_v13, %s8479_s16  ;;  %v7113_v60 = vpop.f32.mrf.mxu1  ;;  %v7544_v13 = vrot.slane %v7445_v55, 1 }
 0x6f4   : > { %v6693_v12 = vpop.permute.xlu0 %6692  ;;  %v7343_v11 = vmul.f32 %v12984_v48, %v7113_v60  ;;  %v7399_v1 = vadd.f32 %v12996_v20, %v7344_v21 }
 0x6f5   : > { %6807 = vst.msk [vmem:[#allocation3 + $0xf0] sm:$0xff] %vm6776_vm6, %v6693_v12  ;;  %v6406_v14 = vpop.permute.xlu1 %6405  ;;  %v7545_v33 = vsel %vm7538_vm4, %v13025_v43, %v7544_v13 }
 0x6f6   : > { %6142 = vrot.lane.b32.xlu0 %v6002_v50, %s8480_s27  ;;  %6519 = vst.msk [vmem:[#allocation3 + $0xf8] sm:$0xff] %vm6487_vm3, %v6406_v14  ;;  %v13006_v9 = vadd.f32 %v12996_v20, %v7343_v11  ;;  %v7447_v62 = vmax.f32 %v7399_v1, 0.0  ;;  %v13049_v59 = vmax.f32 %v7444_v22, %v7545_v33 }
 0x6f7   : > { %5855 = vrot.lane.b32.xlu1 %v6578_v46, %s8479_s16 }
 0x6f8   : > { %v6695_v61 = vpop.permute.xlu0 %6694  ;;  %v7446_v56 = vmax.f32 %v13006_v9, 0.0  ;;  %v7548_v51 = vrot.slane %v7447_v62, 1 }
 0x6f9   : > { %6808 = vst.msk [vmem:[#allocation3 + $0xf8] sm:$0xff] %vm6776_vm6, %v6695_v61  ;;  %v5830_v27 = vpop.permute.xlu1 %5829 }
 0x6fa   : > { %6431 = vrot.lane.b32.xlu0 %v6291_v47, %s8481_s11  ;;  %5942 = vst.msk [vmem:[#allocation3 + $0x100] sm:$0xff] %vm5909_vm12, %v5830_v27  ;;  %v13030_v16 = vrot.slane %v7446_v56, 1  ;;  %v6583_v47 = vld [vmem:[#allocation2 + $0x1b1] sm:$0xff] }
 0x6fb   : > { %6144 = vrot.lane.b32.xlu1 %v6003_v40, %s8480_s27 }
 0x6fc   : > { %v6119_v44 = vpop.permute.xlu0 %6118  ;;  %v6855_v58 = vld [vmem:[#allocation3 + $0xf0] sm:$0xff]  ;;  %v7547_v38 = vsel %vm7538_vm4, %v7544_v13, %v13030_v16  ;;  %v7549_v36 = vsel %vm7538_vm4, %v13030_v16, %v7548_v51 }
 0x6fd   : > { %6231 = vst.msk [vmem:[#allocation3 + $0x100] sm:$0xff] %vm6198_vm9, %v6119_v44  ;;  %8295 = vmatprep.mubr.msk.f32.mxu1 %vm6882_vm5, %v6855_v58  ;;  %v5832_v30 = vpop.permute.xlu1 %5831  ;;  %v13051_v42 = vmax.f32 %v7445_v55, %v7547_v38 }
 0x6fe   : > { %6720 = vrot.lane.b32.xlu0 %v6580_v63, %s8482_s8  ;;  %5943 = vst.msk [vmem:[#allocation3 + $0x108] sm:$0xff] %vm5909_vm12, %v5832_v30 }
 0x6ff   : > { %6433 = vrot.lane.b32.xlu1 %v6292_v24, %s8481_s11 }
 0x700   : > { %v6408_v7 = vpop.permute.xlu0 %6407  ;;  %v6856_v10 = vld [vmem:[#allocation3 + $0xf8] sm:$0xff] }
 0x701   : > { %6520 = vst.msk [vmem:[#allocation3 + $0x100] sm:$0xff] %vm6487_vm3, %v6408_v7  ;;  %v8261_v18 = vpop.f32.mrf.mxu1  ;;  %8296 = vmatmul.mubr.msk.f32.gmra.mxu1 %vm6882_vm5, %v6856_v10  ;;  %v6121_v39 = vpop.permute.xlu1 %6120 }
 0x702   : > { %v7346_v0 = vmul.f32 %v8261_v18, %v12984_v48  ;;  %6722 = vrot.lane.b32.xlu0 %v6581_v5, %s8482_s8  ;;  %6232 = vst.msk [vmem:[#allocation3 + $0x108] sm:$0xff] %vm6198_vm9, %v6121_v39  ;;  %v13086_v39 = vmax.f32 %v7446_v56, %v7549_v36 }
 0x703   : > { %v7123_v26 = vpop.f32.mrf.mxu1  ;;  %5857 = vrot.lane.b32.xlu1 %v6579_v52, %s8479_s16 }
 0x704   : > { %v13021_v35 = vadd.f32 %v12996_v20, %v7346_v0  ;;  %v7345_v37 = vmul.f32 %v12984_v48, %v7123_v26  ;;  %v6697_v57 = vpop.permute.xlu0 %6696 }
 0x705   : > { %6809 = vst.msk [vmem:[#allocation3 + $0x100] sm:$0xff] %vm6776_vm6, %v6697_v57  ;;  %v6410_v53 = vpop.permute.xlu1 %6409 }
 0x706   : > { %v7449_v31 = vmax.f32 %v13021_v35, 0.0  ;;  %v7400_v19 = vadd.f32 %v12996_v20, %v7345_v37  ;;  %6146 = vrot.lane.b32.xlu0 %v6004_v4, %s8480_s27  ;;  %6521 = vst.msk [vmem:[#allocation3 + $0x108] sm:$0xff] %vm6487_vm3, %v6410_v53 }
 0x707   : > { %5859 = vrot.lane.b32.xlu1 %v6580_v63, %s8479_s16 }
 0x708   : > { %v7448_v3 = vmax.f32 %v7400_v19, 0.0  ;;  %v6699_v49 = vpop.permute.xlu0 %6698  ;;  %v7552_v34 = vrot.slane %v7449_v31, 1 }
 0x709   : > { %6810 = vst.msk [vmem:[#allocation3 + $0x108] sm:$0xff] %vm6776_vm6, %v6699_v49  ;;  %v5834_v45 = vpop.permute.xlu1 %5833 }
 0x70a   : > { %v7550_v2 = vrot.slane %v7448_v3, 1  ;;  %6435 = vrot.lane.b32.xlu0 %v6293_v41, %s8481_s11  ;;  %5944 = vst.msk [vmem:[#allocation3 + $0x110] sm:$0xff] %vm5909_vm12, %v5834_v45 }
 0x70b   : > { %6148 = vrot.lane.b32.xlu1 %v6005_v8, %s8480_s27 }
 0x70c   : > { %v7551_v46 = vsel %vm7538_vm4, %v7548_v51, %v7550_v2  ;;  %v7553_v17 = vsel %vm7538_vm4, %v7550_v2, %v7552_v34  ;;  %v6123_v32 = vpop.permute.xlu0 %6122  ;;  %v6857_v25 = vld [vmem:[#allocation3 + $0x100] sm:$0xff] }
 0x70d   : > { %v13053_v52 = vmax.f32 %v7448_v3, %v7553_v17  ;;  %6233 = vst.msk [vmem:[#allocation3 + $0x110] sm:$0xff] %vm6198_vm9, %v6123_v32  ;;  %8298 = vmatprep.mubr.msk.f32.mxu1 %vm6882_vm5, %v6857_v25  ;;  %v7689_v15 = vmax.f32 %v7447_v62, %v7551_v46  ;;  %v5836_v12 = vpop.permute.xlu1 %5835 }
 0x70e   : > { %6724 = vrot.lane.b32.xlu0 %v6582_v29, %s8482_s8  ;;  %5945 = vst.msk [vmem:[#allocation3 + $0x118] sm:$0xff] %vm5909_vm12, %v5836_v12 }
 0x70f   : > { %v7735_v50 = vmax.f32 %v13051_v42, %v13053_v52  ;;  %v7734_v14 = vmax.f32 %v13049_v59, %v7689_v15  ;;  %6437 = vrot.lane.b32.xlu1 %v6294_v54, %s8481_s11 }
 0x710   : > { %v6412_v60 = vpop.permute.xlu0 %6411  ;;  %v6858_v61 = vld [vmem:[#allocation3 + $0x108] sm:$0xff] }
 0x711   : > { %7783 = vst.msk [vmem:[#allocation2 + $0x18] sm:$0xff] %vm14070_vm2, %v7735_v50  ;;  %v8264_v23 = vpop.f32.mrf.mxu1  ;;  %8299 = vmatmul.mubr.msk.f32.gmra.mxu1 %vm6882_vm5, %v6858_v61  ;;  %v6125_v27 = vpop.permute.xlu1 %6124  ;;  %vm14080_vm2 = vmmov %vm14072_vm0 }
 0x712   : > { %6522 = vst.msk [vmem:[#allocation3 + $0x110] sm:$0xff] %vm6487_vm3, %v6412_v60  ;;  %v7348_v11 = vmul.f32 %v8264_v23, %v12984_v48 }
 0x713   : > { %7782 = vst.msk [vmem:[#allocation2 + $0x10] sm:$0xff] %vm14071_vm14, %v7734_v14  ;;  %v7133_v28 = vpop.f32.mrf.mxu1  ;;  %6726 = vrot.lane.b32.xlu1 %v6583_v47, %s8482_s8  ;;  %vm14081_vm14 = vmmov %vm14072_vm0 }
 0x714   : > { %6234 = vst.msk [vmem:[#allocation3 + $0x118] sm:$0xff] %vm6198_vm9, %v6125_v27  ;;  %v13070_v40 = vadd.f32 %v12996_v20, %v7348_v11  ;;  %v7347_v44 = vmul.f32 %v12984_v48, %v7133_v28  ;;  %v6701_v58 = vpop.permute.xlu0 %6700 }
 0x715   : > { %6811 = vst.msk [vmem:[#allocation3 + $0x110] sm:$0xff] %vm6776_vm6, %v6701_v58  ;;  %v6414_v24 = vpop.permute.xlu1 %6413 }
 0x716   : > { %v7451_v6 = vmax.f32 %v13070_v40, 0.0  ;;  %v7402_v63 = vadd.f32 %v12996_v20, %v7347_v44  ;;  %6523 = vst.msk [vmem:[#allocation3 + $0x118] sm:$0xff] %vm6487_vm3, %v6414_v24 }
 0x718   : > { %v7450_v21 = vmax.f32 %v7402_v63, 0.0  ;;  %v6703_v30 = vpop.permute.xlu0 %6702  ;;  %v7556_v5 = vrot.slane %v7451_v6, 1 }
 0x719   : > { %6812 = vst.msk [vmem:[#allocation3 + $0x118] sm:$0xff] %vm6776_vm6, %v6703_v30  ;;  %v5838_v10 = vpop.permute.xlu1 %5837 }
 0x71a   : > { %v7554_v7 = vrot.slane %v7450_v21, 1  ;;  %5946 = vst.msk [vmem:[#allocation3 + $0x120] sm:$0xff] %vm5909_vm12, %v5838_v10 }
 0x71c   : > { %v7555_v22 = vsel %vm7538_vm4, %v7552_v34, %v7554_v7  ;;  %v7557_v18 = vsel %vm7538_vm4, %v7554_v7, %v7556_v5  ;;  %v6127_v1 = vpop.permute.xlu0 %6126  ;;  %v6859_v0 = vld [vmem:[#allocation3 + $0x110] sm:$0xff] }
 0x71d   : > { %v13088_v55 = vmax.f32 %v7450_v21, %v7557_v18  ;;  %6235 = vst.msk [vmem:[#allocation3 + $0x120] sm:$0xff] %vm6198_vm9, %v6127_v1  ;;  %8301 = vmatprep.mubr.msk.f32.mxu1 %vm6882_vm5, %v6859_v0  ;;  %v7691_v26 = vmax.f32 %v7449_v31, %v7555_v22  ;;  %v5840_v4 = vpop.permute.xlu1 %5839 }
 0x71e   : > { %5947 = vst.msk [vmem:[#allocation3 + $0x128] sm:$0xff] %vm5909_vm12, %v5840_v4 }
 0x71f   : > { %v7737_v37 = vmax.f32 %v7689_v15, %v13088_v55  ;;  %v7736_v57 = vmax.f32 %v13086_v39, %v7691_v26 }
 0x720   : > { %v6416_v62 = vpop.permute.xlu0 %6415  ;;  %v6860_v9 = vld [vmem:[#allocation3 + $0x118] sm:$0xff] }
 0x721   : > { %7785 = vst.msk [vmem:[#allocation2 + $0x28] sm:$0xff] %vm14072_vm0, %v7737_v37  ;;  %v8267_v56 = vpop.f32.mrf.mxu1  ;;  %8302 = vmatmul.mubr.msk.f32.gmra.mxu1 %vm6882_vm5, %v6860_v9  ;;  %v6129_v16 = vpop.permute.xlu1 %6128 }
 0x722   : > { %6524 = vst.msk [vmem:[#allocation3 + $0x120] sm:$0xff] %vm6487_vm3, %v6416_v62  ;;  %v7350_v35 = vmul.f32 %v8267_v56, %v12984_v48 }
 0x723   : > { %7784 = vst.msk [vmem:[#allocation2 + $0x20] sm:$0xff] %vm14073_vm7, %v7736_v57  ;;  %v7143_v31 = vpop.f32.mrf.mxu1  ;;  %vm14082_vm7 = vmmov %vm14072_vm0 }
 0x724   : > { %6236 = vst.msk [vmem:[#allocation3 + $0x128] sm:$0xff] %vm6198_vm9, %v6129_v16  ;;  %v7405_v19 = vadd.f32 %v12996_v20, %v7350_v35  ;;  %v7349_v53 = vmul.f32 %v12984_v48, %v7143_v31  ;;  %v6705_v13 = vpop.permute.xlu0 %6704 }
 0x725   : > { %6813 = vst.msk [vmem:[#allocation3 + $0x120] sm:$0xff] %vm6776_vm6, %v6705_v13  ;;  %v6418_v49 = vpop.permute.xlu1 %6417 }
 0x726   : > { %v7453_v41 = vmax.f32 %v7405_v19, 0.0  ;;  %v7404_v3 = vadd.f32 %v12996_v20, %v7349_v53  ;;  %6525 = vst.msk [vmem:[#allocation3 + $0x128] sm:$0xff] %vm6487_vm3, %v6418_v49 }
 0x728   : > { %v7452_v33 = vmax.f32 %v7404_v3, 0.0  ;;  %v6707_v8 = vpop.permute.xlu0 %6706  ;;  %v7560_v51 = vrot.slane %v7453_v41, 1 }
 0x729   : > { %6814 = vst.msk [vmem:[#allocation3 + $0x128] sm:$0xff] %vm6776_vm6, %v6707_v8  ;;  %v5842_v34 = vpop.permute.xlu1 %5841 }
 0x72a   : > { %v7558_v38 = vrot.slane %v7452_v33, 1  ;;  %5948 = vst.msk [vmem:[#allocation3 + $0x130] sm:$0xff] %vm5909_vm12, %v5842_v34 }
 0x72c   : > { %v7559_v2 = vsel %vm7538_vm4, %v7556_v5, %v7558_v38  ;;  %v7561_v45 = vsel %vm7538_vm4, %v7558_v38, %v7560_v51  ;;  %v6131_v29 = vpop.permute.xlu0 %6130  ;;  %v6861_v46 = vld [vmem:[#allocation3 + $0x120] sm:$0xff] }
 0x72d   : > { %v13112_v17 = vmax.f32 %v7452_v33, %v7561_v45  ;;  %6237 = vst.msk [vmem:[#allocation3 + $0x130] sm:$0xff] %vm6198_vm9, %v6131_v29  ;;  %8304 = vmatprep.mubr.msk.f32.mxu1 %vm6882_vm5, %v6861_v46  ;;  %v7693_v32 = vmax.f32 %v7451_v6, %v7559_v2  ;;  %v5844_v25 = vpop.permute.xlu1 %5843 }
 0x72e   : > { %5949 = vst.msk [vmem:[#allocation3 + $0x138] sm:$0xff] %vm5909_vm12, %v5844_v25 }
 0x72f   : > { %v7739_v54 = vmax.f32 %v7691_v26, %v13112_v17  ;;  %v7738_v15 = vmax.f32 %v13053_v52, %v7693_v32 }
 0x730   : > { %v6420_v12 = vpop.permute.xlu0 %6419  ;;  %v6862_v50 = vld [vmem:[#allocation3 + $0x128] sm:$0xff] }
 0x731   : > { %7787 = vst.msk [vmem:[#allocation2 + $0x38] sm:$0xff] %vm14074_vm15, %v7739_v54  ;;  %v8270_v14 = vpop.f32.mrf.mxu1  ;;  %8305 = vmatmul.mubr.msk.f32.gmra.mxu1 %vm6882_vm5, %v6862_v50  ;;  %v6133_v61 = vpop.permute.xlu1 %6132  ;;  %vm14084_vm15 = vmmov %vm14072_vm0 }
 0x732   : > { %6526 = vst.msk [vmem:[#allocation3 + $0x130] sm:$0xff] %vm6487_vm3, %v6420_v12  ;;  %v7352_v60 = vmul.f32 %v8270_v14, %v12984_v48 }
 0x733   : > { %7786 = vst.msk [vmem:[#allocation2 + $0x30] sm:$0xff] %vm14075_vm8, %v7738_v15  ;;  %v7153_v23 = vpop.f32.mrf.mxu1  ;;  %vm14089_vm8 = vmmov %vm14072_vm0 }
 0x734   : > { %6238 = vst.msk [vmem:[#allocation3 + $0x138] sm:$0xff] %vm6198_vm9, %v6133_v61  ;;  %v7407_v47 = vadd.f32 %v12996_v20, %v7352_v60  ;;  %v7351_v52 = vmul.f32 %v12984_v48, %v7153_v23  ;;  %v6422_v11 = vpop.permute.xlu0 %6421 }
 0x735   : > { %6527 = vst.msk [vmem:[#allocation3 + $0x138] sm:$0xff] %vm6487_vm3, %v6422_v11  ;;  %v6055_v40 = vpop.permute.xlu1 %6054 }
 0x736   : > { %v7455_v27 = vmax.f32 %v7407_v47, 0.0  ;;  %v7406_v28 = vadd.f32 %v12996_v20, %v7351_v52  ;;  %6199 = vst.msk [vmem:[#allocation3] sm:$0xff] %vm6198_vm9, %v6055_v40 }
 0x738   : > { %v7454_v44 = vmax.f32 %v7406_v28, 0.0  ;;  %v5846_v58 = vpop.permute.xlu0 %5845  ;;  %v7564_v6 = vrot.slane %v7455_v27, 1 }
 0x739   : > { %5950 = vst.msk [vmem:[#allocation3 + $0x140] sm:$0xff] %vm5909_vm12, %v5846_v58  ;;  %v6709_v24 = vpop.permute.xlu1 %6708 }
 0x73a   : > { %v7562_v63 = vrot.slane %v7454_v44, 1  ;;  %6815 = vst.msk [vmem:[#allocation3 + $0x130] sm:$0xff] %vm6776_vm6, %v6709_v24 }
 0x73c   : > { %v7563_v21 = vsel %vm7538_vm4, %v7560_v51, %v7562_v63  ;;  %v7565_v30 = vsel %vm7538_vm4, %v7562_v63, %v7564_v6  ;;  %v6344_v36 = vpop.permute.xlu0 %6343 }
 0x73d   : > { %v13134_v5 = vmax.f32 %v7454_v44, %v7565_v30  ;;  %6488 = vst.msk [vmem:[#allocation3] sm:$0xff] %vm6487_vm3, %v6344_v36  ;;  %v7695_v7 = vmax.f32 %v7453_v41, %v7563_v21  ;;  %v6057_v10 = vpop.permute.xlu1 %6056 }
 0x73e   : > { %6200 = vst.msk [vmem:[#allocation3 + $0x8] sm:$0xff] %vm6198_vm9, %v6057_v10 }
 0x73f   : > { %v7741_v22 = vmax.f32 %v7693_v32, %v13134_v5  ;;  %v7740_v18 = vmax.f32 %v13088_v55, %v7695_v7 }
 0x740   : > { %v5848_v1 = vpop.permute.xlu0 %5847 }
 0x741   : > { %7789 = vst.msk [vmem:[#allocation2 + $0x48] sm:$0xff] %vm14076_vm10, %v7741_v22  ;;  %v8273_v0 = vpop.f32.mrf.mxu1  ;;  %v6711_v4 = vpop.permute.xlu1 %6710  ;;  %v6863_v37 = vld [vmem:[#allocation3 + $0x130] sm:$0xff]  ;;  %vm14090_vm10 = vmmov %vm14072_vm0 }
 0x742   : > { %5951 = vst.msk [vmem:[#allocation3 + $0x148] sm:$0xff] %vm5909_vm12, %v5848_v1  ;;  %v7354_v26 = vmul.f32 %v8273_v0, %v12984_v48  ;;  %8307 = vmatprep.mubr.msk.f32.mxu1 %vm6882_vm5, %v6863_v37 }
 0x743   : > { %7788 = vst.msk [vmem:[#allocation2 + $0x40] sm:$0xff] %vm14077_vm13, %v7740_v18  ;;  %v7163_v57 = vpop.f32.mrf.mxu1  ;;  %vm14091_vm13 = vmmov %vm14072_vm0 }
 0x744   : > { %6816 = vst.msk [vmem:[#allocation3 + $0x138] sm:$0xff] %vm6776_vm6, %v6711_v4  ;;  %v13147_v62 = vadd.f32 %v12996_v20, %v7354_v26  ;;  %v7353_v55 = vmul.f32 %v12984_v48, %v7163_v57  ;;  %v6346_v9 = vpop.permute.xlu0 %6345 }
 0x745   : > { %6489 = vst.msk [vmem:[#allocation3 + $0x8] sm:$0xff] %vm6487_vm3, %v6346_v9  ;;  %v6135_v16 = vpop.permute.xlu1 %6134 }
 0x746   : > { %v7457_v56 = vmax.f32 %v13147_v62, 0.0  ;;  %v7408_v35 = vadd.f32 %v12996_v20, %v7353_v55  ;;  %6239 = vst.msk [vmem:[#allocation3 + $0x140] sm:$0xff] %vm6198_vm9, %v6135_v16 }
 0x748   : > { %v7456_v31 = vmax.f32 %v7408_v35, 0.0  ;;  %v6137_v19 = vpop.permute.xlu0 %6136  ;;  %v7568_v53 = vrot.slane %v7457_v56, 1 }
 0x749   : > { %6240 = vst.msk [vmem:[#allocation3 + $0x148] sm:$0xff] %vm6198_vm9, %v6137_v19  ;;  %v6633_v41 = vpop.permute.xlu1 %6632 }
 0x74a   : > { %v7566_v13 = vrot.slane %v7456_v31, 1  ;;  %6777 = vst.msk [vmem:[#allocation3] sm:$0xff] %vm6776_vm6, %v6633_v41 }
 0x74b   : > { %v6864_v3 = vld [vmem:[#allocation3 + $0x138] sm:$0xff] }
 0x74c   : > { %8308 = vmatmul.mubr.msk.f32.gmra.mxu1 %vm6882_vm5, %v6864_v3  ;;  %v7567_v49 = vsel %vm7538_vm4, %v7564_v6, %v7566_v13  ;;  %v7569_v33 = vsel %vm7538_vm4, %v7566_v13, %v7568_v53  ;;  %v6635_v8 = vpop.permute.xlu0 %6634 }
 0x74d   : > { %v13159_v51 = vmax.f32 %v7456_v31, %v7569_v33  ;;  %6778 = vst.msk [vmem:[#allocation3 + $0x8] sm:$0xff] %vm6776_vm6, %v6635_v8  ;;  %v7697_v38 = vmax.f32 %v7455_v27, %v7567_v49  ;;  %v6424_v34 = vpop.permute.xlu1 %6423 }
 0x74e   : > { %6528 = vst.msk [vmem:[#allocation3 + $0x140] sm:$0xff] %vm6487_vm3, %v6424_v34 }
 0x74f   : > { %v7743_v2 = vmax.f32 %v7695_v7, %v13159_v51  ;;  %v7742_v45 = vmax.f32 %v13112_v17, %v7697_v38 }
 0x750   : > { %v6713_v29 = vpop.permute.xlu0 %6712 }
 0x751   : > { %7791 = vst.msk [vmem:[#allocation2 + $0x58] sm:$0xff] %vm14078_vm1, %v7743_v2  ;;  %v8276_v46 = vpop.f32.mrf.mxu1  ;;  %v6426_v25 = vpop.permute.xlu1 %6425  ;;  %v6825_v54 = vld [vmem:[#allocation3] sm:$0xff]  ;;  %vm14092_vm1 = vmmov %vm14072_vm0 }
 0x752   : > { %6817 = vst.msk [vmem:[#allocation3 + $0x140] sm:$0xff] %vm6776_vm6, %v6713_v29  ;;  %v7356_v32 = vmul.f32 %v8276_v46, %v12984_v48  ;;  %8250 = vmatprep.mubr.msk.f32.mxu0 %vm6882_vm5, %v6825_v54 }
 0x753   : > { %7790 = vst.msk [vmem:[#allocation2 + $0x50] sm:$0xff] %vm14079_vm11, %v7742_v45  ;;  %v7173_v15 = vpop.f32.mrf.mxu1  ;;  %vm14093_vm11 = vmmov %vm14072_vm0 }
 0x754   : > { %6529 = vst.msk [vmem:[#allocation3 + $0x148] sm:$0xff] %vm6487_vm3, %v6426_v25  ;;  %v13172_v12 = vadd.f32 %v12996_v20, %v7356_v32  ;;  %v7355_v17 = vmul.f32 %v12984_v48, %v7173_v15  ;;  %v6715_v50 = vpop.permute.xlu0 %6714  ;;  %v6826_v14 = vld [vmem:[#allocation3 + $0x8] sm:$0xff] }
 0x755   : > { %6818 = vst.msk [vmem:[#allocation3 + $0x148] sm:$0xff] %vm6776_vm6, %v6715_v50  ;;  %8251 = vmatmul.mubr.msk.f32.vlgmr.msra.gmra.mxu0 %vm6882_vm5, %v6826_v14  ;;  %v5850_v23 = vpop.permute.xlu1 %5849 }
 0x756   : > { %v7459_v60 = vmax.f32 %v13172_v12, 0.0  ;;  %v7410_v61 = vadd.f32 %v12996_v20, %v7355_v17  ;;  %5952 = vst.msk [vmem:[#allocation3 + $0x150] sm:$0xff] %vm5909_vm12, %v5850_v23 }
 0x758   : > { %v7458_v47 = vmax.f32 %v7410_v61, 0.0  ;;  %v6139_v52 = vpop.permute.xlu0 %6138  ;;  %v7572_v27 = vrot.slane %v7459_v60, 1 }
 0x759   : > { %v6865_v11 = vld [vmem:[#allocation3 + $0x140] sm:$0xff]  ;;  %6241 = vst.msk [vmem:[#allocation3 + $0x150] sm:$0xff] %vm6198_vm9, %v6139_v52  ;;  %v5852_v40 = vpop.permute.xlu1 %5851 }
 0x75a   : > { %8310 = vmatprep.mubr.msk.f32.mxu1 %vm6882_vm5, %v6865_v11  ;;  %v7570_v28 = vrot.slane %v7458_v47, 1  ;;  %5953 = vst.msk [vmem:[#allocation3 + $0x158] sm:$0xff] %vm5909_vm12, %v5852_v40 }
 0x75c   : > { %v7571_v44 = vsel %vm7538_vm4, %v7568_v53, %v7570_v28  ;;  %v7573_v58 = vsel %vm7538_vm4, %v7570_v28, %v7572_v27  ;;  %v6428_v6 = vpop.permute.xlu0 %6427  ;;  %v6866_v63 = vld [vmem:[#allocation3 + $0x148] sm:$0xff] }
 0x75d   : > { %v13185_v24 = vmax.f32 %v7458_v47, %v7573_v58  ;;  %6530 = vst.msk [vmem:[#allocation3 + $0x150] sm:$0xff] %vm6487_vm3, %v6428_v6  ;;  %8311 = vmatmul.mubr.msk.f32.gmra.mxu1 %vm6882_vm5, %v6866_v63  ;;  %v7699_v21 = vmax.f32 %v7457_v56, %v7571_v44  ;;  %v6141_v30 = vpop.permute.xlu1 %6140 }
 0x75e   : > { %6242 = vst.msk [vmem:[#allocation3 + $0x158] sm:$0xff] %vm6198_vm9, %v6141_v30 }
 0x75f   : > { %v7745_v36 = vmax.f32 %v7697_v38, %v13185_v24  ;;  %v7744_v7 = vmax.f32 %v13134_v5, %v7699_v21 }
 0x760   : > { %v6717_v10 = vpop.permute.xlu0 %6716 }
 0x761   : > { %7793 = vst.msk [vmem:[#allocation2 + $0x68] sm:$0xff] %vm14080_vm2, %v7745_v36  ;;  %v8279_v22 = vpop.f32.mrf.mxu1  ;;  %v6430_v1 = vpop.permute.xlu1 %6429  ;;  %vm14094_vm2 = vmmov %vm14072_vm0 }
 0x762   : > { %6819 = vst.msk [vmem:[#allocation3 + $0x150] sm:$0xff] %vm6776_vm6, %v6717_v10  ;;  %v7358_v18 = vmul.f32 %v8279_v22, %v12984_v48 }
 0x763   : > { %7792 = vst.msk [vmem:[#allocation2 + $0x60] sm:$0xff] %vm14081_vm14, %v7744_v7  ;;  %v7183_v0 = vpop.f32.mrf.mxu1  ;;  %vm14095_vm14 = vmmov %vm14072_vm0 }
 0x764   : > { %6531 = vst.msk [vmem:[#allocation3 + $0x158] sm:$0xff] %vm6487_vm3, %v6430_v1  ;;  %v13198_v26 = vadd.f32 %v12996_v20, %v7358_v18  ;;  %v7357_v4 = vmul.f32 %v12984_v48, %v7183_v0  ;;  %v6719_v5 = vpop.permute.xlu0 %6718 }
 0x765   : > { %6820 = vst.msk [vmem:[#allocation3 + $0x158] sm:$0xff] %vm6776_vm6, %v6719_v5  ;;  %v5854_v62 = vpop.permute.xlu1 %5853 }
 0x766   : > { %v7461_v37 = vmax.f32 %v13198_v26, 0.0  ;;  %v7412_v57 = vadd.f32 %v12996_v20, %v7357_v4  ;;  %5954 = vst.msk [vmem:[#allocation3 + $0x160] sm:$0xff] %vm5909_vm12, %v5854_v62 }
 0x768   : > { %v7460_v55 = vmax.f32 %v7412_v57, 0.0  ;;  %v6143_v9 = vpop.permute.xlu0 %6142  ;;  %v7576_v35 = vrot.slane %v7461_v37, 1 }
 0x769   : > { %v6867_v56 = vld [vmem:[#allocation3 + $0x150] sm:$0xff]  ;;  %6243 = vst.msk [vmem:[#allocation3 + $0x160] sm:$0xff] %vm6198_vm9, %v6143_v9  ;;  %v5856_v31 = vpop.permute.xlu1 %5855 }
 0x76a   : > { %8313 = vmatprep.mubr.msk.f32.mxu1 %vm6882_vm5, %v6867_v56  ;;  %v7574_v16 = vrot.slane %v7460_v55, 1  ;;  %5955 = vst.msk [vmem:[#allocation3 + $0x168] sm:$0xff] %vm5909_vm12, %v5856_v31 }
 0x76c   : > { %v7575_v19 = vsel %vm7538_vm4, %v7572_v27, %v7574_v16  ;;  %v7577_v53 = vsel %vm7538_vm4, %v7574_v16, %v7576_v35  ;;  %v6432_v13 = vpop.permute.xlu0 %6431  ;;  %v6868_v41 = vld [vmem:[#allocation3 + $0x158] sm:$0xff] }
 0x76d   : > { %v13210_v3 = vmax.f32 %v7460_v55, %v7577_v53  ;;  %6532 = vst.msk [vmem:[#allocation3 + $0x160] sm:$0xff] %vm6487_vm3, %v6432_v13  ;;  %8314 = vmatmul.mubr.msk.f32.gmra.mxu1 %vm6882_vm5, %v6868_v41  ;;  %v7701_v49 = vmax.f32 %v7459_v60, %v7575_v19  ;;  %v6145_v33 = vpop.permute.xlu1 %6144 }
 0x76e   : > { %6244 = vst.msk [vmem:[#allocation3 + $0x168] sm:$0xff] %vm6198_vm9, %v6145_v33 }
 0x76f   : > { %v7747_v8 = vmax.f32 %v7699_v21, %v13210_v3  ;;  %v7746_v38 = vmax.f32 %v13159_v51, %v7701_v49 }
 0x770   : > { %v6721_v34 = vpop.permute.xlu0 %6720 }
 0x771   : > { %7795 = vst.msk [vmem:[#allocation2 + $0x78] sm:$0xff] %vm14072_vm0, %v7747_v8  ;;  %v8282_v2 = vpop.f32.mrf.mxu1  ;;  %v6434_v29 = vpop.permute.xlu1 %6433 }
 0x772   : > { %6821 = vst.msk [vmem:[#allocation3 + $0x160] sm:$0xff] %vm6776_vm6, %v6721_v34  ;;  %v7360_v45 = vmul.f32 %v8282_v2, %v12984_v48 }
 0x773   : > { %7794 = vst.msk [vmem:[#allocation2 + $0x70] sm:$0xff] %vm14082_vm7, %v7746_v38  ;;  %v7193_v46 = vpop.f32.mrf.mxu1  ;;  %vm14096_vm7 = vmmov %vm14072_vm0 }
 0x774   : > { %6533 = vst.msk [vmem:[#allocation3 + $0x168] sm:$0xff] %vm6487_vm3, %v6434_v29  ;;  %v7415_v32 = vadd.f32 %v12996_v20, %v7360_v45  ;;  %v7359_v25 = vmul.f32 %v12984_v48, %v7193_v46  ;;  %v6723_v54 = vpop.permute.xlu0 %6722 }
 0x775   : > { %6822 = vst.msk [vmem:[#allocation3 + $0x168] sm:$0xff] %vm6776_vm6, %v6723_v54  ;;  %v5858_v12 = vpop.permute.xlu1 %5857 }
 0x776   : > { %v7463_v51 = vmax.f32 %v7415_v32, 0.0  ;;  %v7414_v15 = vadd.f32 %v12996_v20, %v7359_v25  ;;  %5956 = vst.msk [vmem:[#allocation3 + $0x170] sm:$0xff] %vm5909_vm12, %v5858_v12 }
 0x778   : > { %v7462_v17 = vmax.f32 %v7414_v15, 0.0  ;;  %v6147_v14 = vpop.permute.xlu0 %6146  ;;  %v7580_v60 = vrot.slane %v7463_v51, 1 }
 0x779   : > { %v6869_v50 = vld [vmem:[#allocation3 + $0x160] sm:$0xff]  ;;  %6245 = vst.msk [vmem:[#allocation3 + $0x170] sm:$0xff] %vm6198_vm9, %v6147_v14  ;;  %v5860_v23 = vpop.permute.xlu1 %5859 }
 0x77a   : > { %8316 = vmatprep.mubr.msk.f32.mxu1 %vm6882_vm5, %v6869_v50  ;;  %v7578_v61 = vrot.slane %v7462_v17, 1  ;;  %5957 = vst.msk [vmem:[#allocation3 + $0x178] sm:$0xff] %vm5909_vm12, %v5860_v23  ;;  %vm14083_vm12 = vmmov %vm14072_vm0 }
 0x77c   : > { %v7579_v47 = vsel %vm7538_vm4, %v7576_v35, %v7578_v61  ;;  %v7581_v52 = vsel %vm7538_vm4, %v7578_v61, %v7580_v60  ;;  %v6870_v11 = vld [vmem:[#allocation3 + $0x168] sm:$0xff]  ;;  %v6436_v27 = vpop.permute.xlu0 %6435 }
 0x77d   : > { %v7704_v28 = vmax.f32 %v7462_v17, %v7581_v52  ;;  %8317 = vmatmul.mubr.msk.f32.gmra.mxu1 %vm6882_vm5, %v6870_v11  ;;  %6534 = vst.msk [vmem:[#allocation3 + $0x170] sm:$0xff] %vm6487_vm3, %v6436_v27  ;;  %v7703_v40 = vmax.f32 %v7461_v37, %v7579_v47  ;;  %v6149_v44 = vpop.permute.xlu1 %6148 }
 0x77e   : > { %6246 = vst.msk [vmem:[#allocation3 + $0x178] sm:$0xff] %vm6198_vm9, %v6149_v44  ;;  %vm14085_vm9 = vmmov %vm14072_vm0 }
 0x77f   : > { %v7749_v58 = vmax.f32 %v7701_v49, %v7704_v28  ;;  %v7748_v6 = vmax.f32 %v13185_v24, %v7703_v40 }
 0x780   : > { %v6725_v63 = vpop.permute.xlu0 %6724 }
 0x781   : > { %7797 = vst.msk [vmem:[#allocation2 + $0x88] sm:$0xff] %vm14083_vm12, %v7749_v58  ;;  %v8285_v21 = vpop.f32.mrf.mxu1  ;;  %v6438_v36 = vpop.permute.xlu1 %6437  ;;  %vm14097_vm12 = vmmov %vm14072_vm0 }
 0x782   : > { %7796 = vst.msk [vmem:[#allocation2 + $0x80] sm:$0xff] %vm14084_vm15, %v7748_v6  ;;  %v7362_v30 = vmul.f32 %v8285_v21, %v12984_v48  ;;  %vm14098_vm15 = vmmov %vm14072_vm0 }
 0x783   : > { %6823 = vst.msk [vmem:[#allocation3 + $0x170] sm:$0xff] %vm6776_vm6, %v6725_v63  ;;  %v7203_v7 = vpop.f32.mrf.mxu1 }
 0x784   : > { %6535 = vst.msk [vmem:[#allocation3 + $0x178] sm:$0xff] %vm6487_vm3, %v6438_v36  ;;  %v7417_v10 = vadd.f32 %v12996_v20, %v7362_v30  ;;  %v7361_v22 = vmul.f32 %v12984_v48, %v7203_v7  ;;  %vm14086_vm3 = vmmov %vm14072_vm0 }
 0x785   : > { %v6727_v1 = vpop.permute.xlu1 %6726 }
 0x786   : > { %v7465_v18 = vmax.f32 %v7417_v10, 0.0  ;;  %v7416_v24 = vadd.f32 %v12996_v20, %v7361_v22  ;;  %6824 = vst.msk [vmem:[#allocation3 + $0x178] sm:$0xff] %vm6776_vm6, %v6727_v1  ;;  %vm14087_vm6 = vmmov %vm14072_vm0 }
 0x788   : > { %v7464_v0 = vmax.f32 %v7416_v24, 0.0  ;;  %v7584_v4 = vrot.slane %v7465_v18, 1 }
 0x78a   : > { %v6871_v26 = vld [vmem:[#allocation3 + $0x170] sm:$0xff]  ;;  %v7582_v5 = vrot.slane %v7464_v0, 1 }
 0x78b   : > { %8319 = vmatprep.mubr.msk.f32.mxu1 %vm6882_vm5, %v6871_v26 }
 0x78c   : > { %v7583_v37 = vsel %vm7538_vm4, %v7580_v60, %v7582_v5  ;;  %v7585_v57 = vsel %vm7538_vm4, %v7582_v5, %v7584_v4 }
 0x78d   : > { %v7706_v62 = vmax.f32 %v7464_v0, %v7585_v57  ;;  %v7705_v55 = vmax.f32 %v7463_v51, %v7583_v37  ;;  %v6872_v9 = vld [vmem:[#allocation3 + $0x178] sm:$0xff] }
 0x78e   : > { %8320 = vmatmul.mubr.msk.f32.gmra.mxu1 %vm6882_vm5, %v6872_v9  ;;  %vm14088_vm5 = vmmov %vm14072_vm0 }
 0x78f   : > { %v7751_v56 = vmax.f32 %v7703_v40, %v7706_v62  ;;  %v7750_v35 = vmax.f32 %v13210_v3, %v7705_v55 }
 0x791   : > { %7799 = vst.msk [vmem:[#allocation2 + $0x98] sm:$0xff] %vm14085_vm9, %v7751_v56  ;;  %v8288_v16 = vpop.f32.mrf.mxu1  ;;  %vm14099_vm9 = vmmov %vm14072_vm0 }
 0x792   : > { %7798 = vst.msk [vmem:[#allocation2 + $0x90] sm:$0xff] %vm14086_vm3, %v7750_v35  ;;  %v7364_v31 = vmul.f32 %v8288_v16, %v12984_v48  ;;  %vm14100_vm3 = vmmov %vm14072_vm0 }
 0x793   : > { %v7213_v19 = vpop.f32.mrf.mxu1 }
 0x794   : > { %v7419_v53 = vadd.f32 %v12996_v20, %v7364_v31  ;;  %v7363_v13 = vmul.f32 %v12984_v48, %v7213_v19 }
 0x796   : > { %v7467_v41 = vmax.f32 %v7419_v53, 0.0  ;;  %v7418_v49 = vadd.f32 %v12996_v20, %v7363_v13 }
 0x798   : > { %v7466_v33 = vmax.f32 %v7418_v49, 0.0  ;;  %v7588_v8 = vrot.slane %v7467_v41, 1 }
 0x79a   : > { %v7586_v38 = vrot.slane %v7466_v33, 1 }
 0x79c   : > { %v7587_v3 = vsel %vm7538_vm4, %v7584_v4, %v7586_v38  ;;  %v7589_v34 = vsel %vm7538_vm4, %v7586_v38, %v7588_v8 }
 0x79d   : > { %v7708_v2 = vmax.f32 %v7466_v33, %v7589_v34  ;;  %v7707_v45 = vmax.f32 %v7465_v18, %v7587_v3 }
 0x79f   : > { %v7753_v29 = vmax.f32 %v7705_v55, %v7708_v2  ;;  %v7752_v46 = vmax.f32 %v7704_v28, %v7707_v45 }
 0x7a1   : > { %7801 = vst.msk [vmem:[#allocation2 + $0xa8] sm:$0xff] %vm14087_vm6, %v7753_v29  ;;  %v8291_v32 = vpop.f32.mrf.mxu1  ;;  %vm14101_vm6 = vmmov %vm14072_vm0 }
 0x7a2   : > { %7800 = vst.msk [vmem:[#allocation2 + $0xa0] sm:$0xff] %vm14088_vm5, %v7752_v46  ;;  %v7366_v25 = vmul.f32 %v8291_v32, %v12984_v48  ;;  %vm14102_vm5 = vmmov %vm14072_vm0 }
 0x7a3   : > { %v7223_v54 = vpop.f32.mrf.mxu1 }
 0x7a4   : > { %v7421_v51 = vadd.f32 %v12996_v20, %v7366_v25  ;;  %v7365_v15 = vmul.f32 %v12984_v48, %v7223_v54 }
 0x7a6   : > { %v7469_v12 = vmax.f32 %v7421_v51, 0.0  ;;  %v7420_v17 = vadd.f32 %v12996_v20, %v7365_v15 }
 0x7a8   : > { %v7468_v50 = vmax.f32 %v7420_v17, 0.0  ;;  %v7592_v14 = vrot.slane %v7469_v12, 1 }
 0x7aa   : > { %v7590_v60 = vrot.slane %v7468_v50, 1 }
 0x7ac   : > { %v7591_v61 = vsel %vm7538_vm4, %v7588_v8, %v7590_v60  ;;  %v7593_v23 = vsel %vm7538_vm4, %v7590_v60, %v7592_v14 }
 0x7ad   : > { %v7710_v47 = vmax.f32 %v7468_v50, %v7593_v23  ;;  %v7709_v52 = vmax.f32 %v7467_v41, %v7591_v61 }
 0x7af   : > { %v7755_v11 = vmax.f32 %v7707_v45, %v7710_v47  ;;  %v7754_v27 = vmax.f32 %v7706_v62, %v7709_v52 }
 0x7b1   : > { %7803 = vst.msk [vmem:[#allocation2 + $0xb8] sm:$0xff] %vm14089_vm8, %v7755_v11  ;;  %v8294_v28 = vpop.f32.mrf.mxu1  ;;  %vm14103_vm8 = vmmov %vm14072_vm0 }
 0x7b2   : > { %7802 = vst.msk [vmem:[#allocation2 + $0xb0] sm:$0xff] %vm14090_vm10, %v7754_v27  ;;  %v7368_v40 = vmul.f32 %v8294_v28, %v12984_v48  ;;  %vm14104_vm10 = vmmov %vm14072_vm0 }
 0x7b3   : > { %v7233_v44 = vpop.f32.mrf.mxu1 }
 0x7b4   : > { %v7423_v58 = vadd.f32 %v12996_v20, %v7368_v40  ;;  %v7367_v6 = vmul.f32 %v12984_v48, %v7233_v44 }
 0x7b6   : > { %v7471_v63 = vmax.f32 %v7423_v58, 0.0  ;;  %v7422_v21 = vadd.f32 %v12996_v20, %v7367_v6 }
 0x7b8   : > { %v7470_v30 = vmax.f32 %v7422_v21, 0.0  ;;  %v7596_v36 = vrot.slane %v7471_v63, 1 }
 0x7ba   : > { %v7594_v7 = vrot.slane %v7470_v30, 1 }
 0x7bc   : > { %v7595_v10 = vsel %vm7538_vm4, %v7592_v14, %v7594_v7  ;;  %v7597_v22 = vsel %vm7538_vm4, %v7594_v7, %v7596_v36 }
 0x7bd   : > { %v7712_v18 = vmax.f32 %v7470_v30, %v7597_v22  ;;  %v7711_v24 = vmax.f32 %v7469_v12, %v7595_v10 }
 0x7bf   : > { %v7757_v1 = vmax.f32 %v7709_v52, %v7712_v18  ;;  %v7756_v0 = vmax.f32 %v7708_v2, %v7711_v24 }
 0x7c1   : > { %7805 = vst.msk [vmem:[#allocation2 + $0xc8] sm:$0xff] %vm14091_vm13, %v7757_v1  ;;  %v8297_v26 = vpop.f32.mrf.mxu1  ;;  %vm14105_vm13 = vmmov %vm14072_vm0 }
 0x7c2   : > { %7804 = vst.msk [vmem:[#allocation2 + $0xc0] sm:$0xff] %vm14092_vm1, %v7756_v0  ;;  %v7370_v4 = vmul.f32 %v8297_v26, %v12984_v48  ;;  %vm14106_vm1 = vmmov %vm14072_vm0 }
 0x7c3   : > { %v7243_v5 = vpop.f32.mrf.mxu1 }
 0x7c4   : > { %v7425_v37 = vadd.f32 %v12996_v20, %v7370_v4  ;;  %v7369_v57 = vmul.f32 %v12984_v48, %v7243_v5 }
 0x7c6   : > { %v7473_v62 = vmax.f32 %v7425_v37, 0.0  ;;  %v7424_v55 = vadd.f32 %v12996_v20, %v7369_v57 }
 0x7c8   : > { %v7472_v9 = vmax.f32 %v7424_v55, 0.0  ;;  %v7600_v56 = vrot.slane %v7473_v62, 1  ;;  %v13314_v55 = vld [vmem:[%s13407_s5] ss:$0 sm:$0xff] }
 0x7ca   : > { %v7598_v35 = vrot.slane %v7472_v9, 1 }
 0x7cc   : > { %v7599_v16 = vsel %vm7538_vm4, %v7596_v36, %v7598_v35  ;;  %v7601_v31 = vsel %vm7538_vm4, %v7598_v35, %v7600_v56 }
 0x7cd   : > { %v7714_v19 = vmax.f32 %v7472_v9, %v7601_v31  ;;  %v7713_v53 = vmax.f32 %v7471_v63, %v7599_v16 }
 0x7cf   : > { %v7759_v13 = vmax.f32 %v7711_v24, %v7714_v19  ;;  %v7758_v41 = vmax.f32 %v7710_v47, %v7713_v53 }
 0x7d1   : > { %7807 = vst.msk [vmem:[#allocation2 + $0xd8] sm:$0xff] %vm14093_vm11, %v7759_v13  ;;  %v8300_v49 = vpop.f32.mrf.mxu1  ;;  %vm14107_vm11 = vmmov %vm14072_vm0 }
 0x7d2   : > { %7806 = vst.msk [vmem:[#allocation2 + $0xd0] sm:$0xff] %vm14094_vm2, %v7758_v41  ;;  %v7372_v33 = vmul.f32 %v8300_v49, %v12984_v48  ;;  %vm14108_vm2 = vmmov %vm14072_vm0 }
 0x7d3   : > { %v7253_v8 = vpop.f32.mrf.mxu1 }
 0x7d4   : > { %v7427_v38 = vadd.f32 %v12996_v20, %v7372_v33  ;;  %v7371_v3 = vmul.f32 %v12984_v48, %v7253_v8 }
 0x7d6   : > { %v7475_v34 = vmax.f32 %v7427_v38, 0.0  ;;  %v7426_v2 = vadd.f32 %v12996_v20, %v7371_v3 }
 0x7d8   : > { %v7474_v45 = vmax.f32 %v7426_v2, 0.0  ;;  %v7604_v29 = vrot.slane %v7475_v34, 1 }
 0x7da   : > { %v7602_v46 = vrot.slane %v7474_v45, 1 }
 0x7dc   : > { %v7603_v32 = vsel %vm7538_vm4, %v7600_v56, %v7602_v46  ;;  %v7605_v25 = vsel %vm7538_vm4, %v7602_v46, %v7604_v29 }
 0x7dd   : > { %v7716_v54 = vmax.f32 %v7474_v45, %v7605_v25  ;;  %v7715_v51 = vmax.f32 %v7473_v62, %v7603_v32 }
 0x7df   : > { %v7761_v15 = vmax.f32 %v7713_v53, %v7716_v54  ;;  %v7760_v12 = vmax.f32 %v7712_v18, %v7715_v51 }
 0x7e1   : > { %7809 = vst.msk [vmem:[#allocation2 + $0xe8] sm:$0xff] %vm14095_vm14, %v7761_v15  ;;  %v8303_v17 = vpop.f32.mrf.mxu1  ;;  %vm14109_vm14 = vmmov %vm14072_vm0 }
 0x7e2   : > { %7808 = vst.msk [vmem:[#allocation2 + $0xe0] sm:$0xff] %vm14072_vm0, %v7760_v12  ;;  %v7374_v50 = vmul.f32 %v8303_v17, %v12984_v48 }
 0x7e3   : > { %v7263_v14 = vpop.f32.mrf.mxu1 }
 0x7e4   : > { %v7429_v60 = vadd.f32 %v12996_v20, %v7374_v50  ;;  %v7373_v61 = vmul.f32 %v12984_v48, %v7263_v14 }
 0x7e6   : > { %v7477_v23 = vmax.f32 %v7429_v60, 0.0  ;;  %v7428_v47 = vadd.f32 %v12996_v20, %v7373_v61 }
 0x7e8   : > { %v7476_v52 = vmax.f32 %v7428_v47, 0.0  ;;  %v7608_v11 = vrot.slane %v7477_v23, 1 }
 0x7ea   : > { %v7606_v27 = vrot.slane %v7476_v52, 1 }
 0x7ec   : > { %v7607_v28 = vsel %vm7538_vm4, %v7604_v29, %v7606_v27  ;;  %v7609_v40 = vsel %vm7538_vm4, %v7606_v27, %v7608_v11 }
 0x7ed   : > { %v7718_v44 = vmax.f32 %v7476_v52, %v7609_v40  ;;  %v7717_v58 = vmax.f32 %v7475_v34, %v7607_v28 }
 0x7ef   : > { %v7763_v6 = vmax.f32 %v7715_v51, %v7718_v44  ;;  %v7762_v63 = vmax.f32 %v7714_v19, %v7717_v58  ;;  %v13322_v19 = vld [vmem:[%s13408_s6] ss:$0 sm:$0xff] }
 0x7f1   : > { %7811 = vst.msk [vmem:[#allocation2 + $0xf8] sm:$0xff] %vm14096_vm7, %v7763_v6  ;;  %v8306_v21 = vpop.f32.mrf.mxu1  ;;  %vm14110_vm7 = vmmov %vm14072_vm0 }
 0x7f2   : > { %7810 = vst.msk [vmem:[#allocation2 + $0xf0] sm:$0xff] %vm14097_vm12, %v7762_v63  ;;  %v7376_v30 = vmul.f32 %v8306_v21, %v12984_v48  ;;  %vm14111_vm12 = vmmov %vm14072_vm0 }
 0x7f3   : > { %v7273_v36 = vpop.f32.mrf.mxu1 }
 0x7f4   : > { %v7431_v7 = vadd.f32 %v12996_v20, %v7376_v30  ;;  %v7375_v10 = vmul.f32 %v12984_v48, %v7273_v36 }
 0x7f6   : > { %v7479_v22 = vmax.f32 %v7431_v7, 0.0  ;;  %v7430_v18 = vadd.f32 %v12996_v20, %v7375_v10 }
 0x7f8   : > { %v7478_v24 = vmax.f32 %v7430_v18, 0.0  ;;  %v7612_v1 = vrot.slane %v7479_v22, 1 }
 0x7fa   : > { %v7610_v0 = vrot.slane %v7478_v24, 1 }
 0x7fc   : > { %v7611_v26 = vsel %vm7538_vm4, %v7608_v11, %v7610_v0  ;;  %v7613_v4 = vsel %vm7538_vm4, %v7610_v0, %v7612_v1  ;;  %v7830_v0 = vld [vmem:[#allocation2 + $0x30] ss:$2 sm:$0xff] }
 0x7fd   : > { %v13306_v5 = vmax.f32 %v7478_v24, %v7613_v4  ;;  %v7719_v37 = vmax.f32 %v7477_v23, %v7611_v26 }
 0x7ff   : > { %v7765_v57 = vmax.f32 %v7717_v58, %v13306_v5  ;;  %v7764_v62 = vmax.f32 %v7716_v54, %v7719_v37 }
 0x801   : > { %7813 = vst.msk [vmem:[#allocation2 + $0x108] sm:$0xff] %vm14098_vm15, %v7765_v57  ;;  %vm14112_vm15 = vmmov %vm14072_vm0 }
 0x802   : > { %7812 = vst.msk [vmem:[#allocation2 + $0x100] sm:$0xff] %vm14099_vm9, %v7764_v62  ;;  %vm14114_vm9 = vmmov %vm14072_vm0 }
 0x80c   : > { %v8309_v48 = vpop.f32.mrf.mxu1 }
 0x80d   : > { %v7378_v9 = vmul.f32 %v13314_v55, %v8309_v48 }
 0x80e   : > { %v7283_v56 = vpop.f32.mrf.mxu1 }
 0x80f   : > { %v7433_v35 = vadd.f32 %v12996_v20, %v7378_v9  ;;  %v7377_v16 = vmul.f32 %v13314_v55, %v7283_v56  ;;  %v7834_v56 = vld [vmem:[#allocation2 + $0x90] ss:$2 sm:$0xff] }
 0x811   : > { %v7481_v31 = vmax.f32 %v7433_v35, 0.0  ;;  %v7432_v53 = vadd.f32 %v13322_v19, %v7377_v16 }
 0x813   : > { %v7480_v13 = vmax.f32 %v7432_v53, 0.0  ;;  %v7616_v41 = vrot.slane %v7481_v31, 1 }
 0x815   : > { %v7614_v49 = vrot.slane %v7480_v13, 1  ;;  %v8252_v33 = vpop.f32.mrf.mxu0 }
 0x816   : > { %v7340_v20 = vmul.f32 %v13314_v55, %v8252_v33 }
 0x817   : > { %v7615_v8 = vsel %vm7538_vm4, %v7612_v1, %v7614_v49  ;;  %v7617_v38 = vsel %vm7538_vm4, %v7614_v49, %v7616_v41  ;;  %v7093_v34 = vpop.f32.mrf.mxu0 }
 0x818   : > { %v13328_v3 = vmax.f32 %v7480_v13, %v7617_v38  ;;  %v7721_v2 = vmax.f32 %v7479_v22, %v7615_v8  ;;  %v7395_v45 = vadd.f32 %v13322_v19, %v7340_v20  ;;  %v7339_v29 = vmul.f32 %v13314_v55, %v7093_v34  ;;  %v7836_v13 = vld [vmem:[#allocation2 + $0xc0] ss:$2 sm:$0xff]  ;;  %v7838_v20 = vld [vmem:[#allocation2 + $0xf0] ss:$2 sm:$0xff] }
 0x81a   : > { %v7767_v46 = vmax.f32 %v7719_v37, %v13328_v3  ;;  %v7766_v32 = vmax.f32 %v7718_v44, %v7721_v2  ;;  %v7443_v25 = vmax.f32 %v7395_v45, 0.0  ;;  %v7394_v54 = vadd.f32 %v13322_v19, %v7339_v29  ;;  %v7832_v37 = vld [vmem:[#allocation2 + $0x60] ss:$2 sm:$0xff] }
 0x81c   : > { %7815 = vst.msk [vmem:[#allocation2 + $0x118] sm:$0xff] %vm14100_vm3, %v7767_v46  ;;  %v7540_v51 = vrot.slane %v7443_v25, 1  ;;  %v7442_v15 = vmax.f32 %v7394_v54, 0.0  ;;  %vm7875_vm3 = vcmask 523264  }
 0x81d   : > { %7814 = vst.msk [vmem:[#allocation2 + $0x110] sm:$0xff] %vm14101_vm6, %v7766_v32  ;;  %v8312_v12 = vpop.f32.mrf.mxu1 }
 0x81e   : > { %v7543_v17 = vsel %vm7538_vm4, %v7540_v51, %v13025_v43  ;;  %v13338_v50 = vrot.slane %v7442_v15, 1  ;;  %v7380_v14 = vmul.f32 %v13314_v55, %v8312_v12 }
 0x81f   : > { %v13341_v60 = vmax.f32 %v7443_v25, %v7543_v17  ;;  %v7293_v61 = vpop.f32.mrf.mxu1 }
 0x820   : > { %v7541_v23 = vsel %vm7538_vm4, %v13338_v50, %v7540_v51  ;;  %v7435_v47 = vadd.f32 %v13322_v19, %v7380_v14  ;;  %v7379_v52 = vmul.f32 %v13314_v55, %v7293_v61 }
 0x821   : > { %v7733_v11 = vmax.f32 %v13341_v60, %v13086_v39  ;;  %v13349_v27 = vmax.f32 %v7442_v15, %v7541_v23 }
 0x822   : > { %v7483_v43 = vmax.f32 %v7435_v47, 0.0  ;;  %v7434_v28 = vadd.f32 %v13322_v19, %v7379_v52 }
 0x823   : > { %7781 = vst.msk [vmem:[#allocation2 + $0x8] sm:$0xff] %vm14102_vm5, %v7733_v11  ;;  %v7732_v40 = vmax.f32 %v13349_v27, %v13051_v42 }
 0x824   : > { %v7482_v44 = vmax.f32 %v7434_v28, 0.0  ;;  %v7620_v58 = vrot.slane %v7483_v43, 1 }
 0x825   : > { %7780 = vst.msk [vmem:[#allocation2] sm:$0xff] %vm14103_vm8, %v7732_v40 }
 0x826   : > { %v7618_v6 = vrot.slane %v7482_v44, 1 }
 0x828   : > { %v7619_v63 = vsel %vm7538_vm4, %v7616_v41, %v7618_v6  ;;  %v7621_v21 = vsel %vm7538_vm4, %v7618_v6, %v7620_v58 }
 0x829   : > { %v7724_v39 = vmax.f32 %v7482_v44, %v7621_v21  ;;  %v7723_v30 = vmax.f32 %v7481_v31, %v7619_v63 }
 0x82b   : > { %v7769_v36 = vmax.f32 %v7721_v2, %v7724_v39  ;;  %v7768_v7 = vmax.f32 %v13306_v5, %v7723_v30 }
 0x82c   : > { %v7828_v10 = vld [vmem:[#allocation2] ss:$2 sm:$0xff] }
 0x82d   : > { %7817 = vst.msk [vmem:[#allocation2 + $0x128] sm:$0xff] %vm14104_vm10, %v7769_v36  ;;  %7843 = vxpose.xlu0.b32.start [1/8] (short) (narrow) %v7828_v10, 8  ;;  %v8315_v22 = vpop.f32.mrf.mxu1 }
 0x82e   : > { %7816 = vst.msk [vmem:[#allocation2 + $0x120] sm:$0xff] %vm14105_vm13, %v7768_v7  ;;  %v7382_v42 = vmul.f32 %v13314_v55, %v8315_v22 }
 0x82f   : > { %v7303_v18 = vpop.f32.mrf.mxu1 }
 0x830   : > { %v7437_v24 = vadd.f32 %v13322_v19, %v7382_v42  ;;  %v7381_v1 = vmul.f32 %v13314_v55, %v7303_v18 }
 0x831   : > { %7844 = vxpose.xlu0.b32.cont [2/8] (short) (narrow) %v7830_v0, 8 }
 0x832   : > { %v7485_v26 = vmax.f32 %v7437_v24, 0.0  ;;  %v7436_v4 = vadd.f32 %v13322_v19, %v7381_v1 }
 0x834   : > { %v7484_v5 = vmax.f32 %v7436_v4, 0.0  ;;  %v7624_v57 = vrot.slane %v7485_v26, 1 }
 0x835   : > { %7845 = vxpose.xlu0.b32.cont [3/8] (short) (narrow) %v7832_v37, 8  ;;  %v7840_v29 = vld [vmem:[#allocation2 + $0x120] ss:$2 sm:$0xff] }
 0x836   : > { %v7622_v62 = vrot.slane %v7484_v5, 1 }
 0x838   : > { %v7623_v48 = vsel %vm7538_vm4, %v7620_v58, %v7622_v62  ;;  %v7625_v9 = vsel %vm7538_vm4, %v7622_v62, %v7624_v57 }
 0x839   : > { %v7726_v35 = vmax.f32 %v7484_v5, %v7625_v9  ;;  %7846 = vxpose.xlu0.b32.cont [4/8] (short) (narrow) %v7834_v56, 8  ;;  %v7725_v16 = vmax.f32 %v7483_v43, %v7623_v48 }
 0x83b   : > { %v7771_v31 = vmax.f32 %v7723_v30, %v7726_v35  ;;  %v7770_v53 = vmax.f32 %v13328_v3, %v7725_v16 }
 0x83d   : > { %7819 = vst.msk [vmem:[#allocation2 + $0x138] sm:$0xff] %vm14106_vm1, %v7771_v31  ;;  %7847 = vxpose.xlu0.b32.cont [5/8] (short) (narrow) %v7836_v13, 8  ;;  %v8318_v41 = vpop.f32.mrf.mxu1 }
 0x83e   : > { %7818 = vst.msk [vmem:[#allocation2 + $0x130] sm:$0xff] %vm14107_vm11, %v7770_v53  ;;  %v7384_v49 = vmul.f32 %v13314_v55, %v8318_v41 }
 0x83f   : > { %v7313_v33 = vpop.f32.mrf.mxu1 }
 0x840   : > { %v7439_v8 = vadd.f32 %v13322_v19, %v7384_v49  ;;  %v7383_v38 = vmul.f32 %v13314_v55, %v7313_v33 }
 0x841   : > { %7848 = vxpose.xlu0.b32.cont [6/8] (short) (narrow) %v7838_v20, 8 }
 0x842   : > { %v7487_v34 = vmax.f32 %v7439_v8, 0.0  ;;  %v7438_v2 = vadd.f32 %v13322_v19, %v7383_v38 }
 0x844   : > { %v7628_v3 = vrot.slane %v7487_v34, 1  ;;  %v7486_v45 = vmax.f32 %v7438_v2, 0.0 }
 0x845   : > { %7849 = vxpose.xlu0.b32.cont [7/8] (short) (narrow) %v7840_v29, 8 }
 0x846   : > { %v7626_v46 = vrot.slane %v7486_v45, 1 }
 0x848   : > { %v7627_v32 = vsel %vm7538_vm4, %v7624_v57, %v7626_v46  ;;  %v7629_v25 = vsel %vm7538_vm4, %v7626_v46, %v7628_v3 }
 0x849   : > { %v7728_v54 = vmax.f32 %v7486_v45, %v7629_v25  ;;  %v7727_v51 = vmax.f32 %v7485_v26, %v7627_v32 }
 0x84b   : > { %v7773_v15 = vmax.f32 %v7725_v16, %v7728_v54  ;;  %v7772_v12 = vmax.f32 %v7724_v39, %v7727_v51 }
 0x84d   : > { %7821 = vst.msk [vmem:[#allocation2 + $0x148] sm:$0xff] %vm14108_vm2, %v7773_v15 }
 0x84e   : > { %7820 = vst.msk [vmem:[#allocation2 + $0x140] sm:$0xff] %vm14109_vm14, %v7772_v12  ;;  %v8321_v17 = vpop.f32.mrf.mxu1 }
 0x84f   : > { %v7386_v14 = vmul.f32 %v13314_v55, %v8321_v17 }
 0x850   : > { %v7323_v61 = vpop.f32.mrf.mxu1 }
 0x851   : > { %v7441_v23 = vadd.f32 %v13322_v19, %v7386_v14  ;;  %v7385_v47 = vmul.f32 %v13314_v55, %v7323_v61 }
 0x853   : > { %v7489_v52 = vmax.f32 %v7441_v23, 0.0  ;;  %v7440_v11 = vadd.f32 %v13322_v19, %v7385_v47 }
 0x855   : > { %v7632_v43 = vrot.slane %v7489_v52, 1  ;;  %v7488_v28 = vmax.f32 %v7440_v11, 0.0 }
 0x857   : > { %v7683_v40 = vsel %vm7538_vm4, %v7632_v43, %v13338_v50  ;;  %v7630_v44 = vrot.slane %v7488_v28, 1 }
 0x858   : > { %v7731_v58 = vmax.f32 %v7489_v52, %v7683_v40 }
 0x859   : > { %v7631_v6 = vsel %vm7538_vm4, %v7628_v3, %v7630_v44  ;;  %v7633_v63 = vsel %vm7538_vm4, %v7630_v44, %v7632_v43  ;;  %vm14113_vm4 = vmmov %vm14072_vm0 }
 0x85a   : > { %v7776_v21 = vmax.f32 %v7728_v54, %v7731_v58  ;;  %v7779_v39 = vmax.f32 %v7731_v58, %v13049_v59  ;;  %v7729_v30 = vmax.f32 %v7487_v34, %v7631_v6  ;;  %v7730_v55 = vmax.f32 %v7488_v28, %v7633_v63 }
 0x85c   : > { %7824 = vst.msk [vmem:[#allocation2 + $0x160] sm:$0xff] %vm14072_vm0, %v7776_v21  ;;  %v7774_v19 = vmax.f32 %v7726_v35, %v7729_v30  ;;  %v7775_v36 = vmax.f32 %v7727_v51, %v7730_v55  ;;  %v7777_v50 = vmax.f32 %v7729_v30, %v13349_v27  ;;  %v7778_v7 = vmax.f32 %v7730_v55, %v13341_v60 }
 0x85d   : > { %7827 = vst.msk [vmem:[#allocation2 + $0x178] sm:$0xff] %vm14110_vm7, %v7779_v39 }
 0x85e   : > { %7825 = vst.msk [vmem:[#allocation2 + $0x168] sm:$0xff] %vm14111_vm12, %v7777_v50 }
 0x85f   : > { %7826 = vst.msk [vmem:[#allocation2 + $0x170] sm:$0xff] %vm14112_vm15, %v7778_v7 }
 0x860   : > { %7822 = vst.msk [vmem:[#allocation2 + $0x150] sm:$0xff] %vm14113_vm4, %v7774_v19 }
 0x861   : > { %7823 = vst.msk [vmem:[#allocation2 + $0x158] sm:$0xff] %vm14114_vm9, %v7775_v36 }
 0x868   : > { %v7842_v59 = vld [vmem:[#allocation2 + $0x150] ss:$2 sm:$0xff] }
 0x869   : > { %7850 = vxpose.xlu0.b32.end [8/8] (short) (narrow) %v7842_v59, 8 }
 0x8c9   : > { %v7859_v10 = vpop.trf.xlu0 }
 0x8ca   : > { %7876 = vst.msk [vmem:[%s276_s26] sm:$0xff] %vm7875_vm3, %v7859_v10 }
 0x8cb PF: > { %s17_s24 = sadd.s32 1, %s8468_s24  }
 0x8cc   : > { %p14_p4 = scmp.ge.s32.totalorder %s17_s24, 4  }
 0x8ce   :  { %16 = sbr.rel (!%p14_p4) target bundleno = 1 (0x1), region = 85 }

</bundles_post_ra>
